<compile_context>
chip_gen: v7x
topology: tpu7x:2x2x1
jax: 0.10.0
libtpu: 0.0.40
codegen_flags: <defaults>
</compile_context>

<pallas_src>
import functools

import jax
import jax.numpy as jnp
from jax import lax
from jax.experimental import pallas as pl
from jax.experimental.pallas import tpu as pltpu

VTH = 1.0  # spiking threshold


def _round_up(x, m):
    return ((x + m - 1) // m) * m


def _pick_batch_tile(B, target=256):
    """MXU-row-sized batch tile that keeps >= 2 grid steps when possible.

    target=256 matches the v6e/v7x MXU (2x256^2); it is also fine on v5e
    (two 128-row passes).  The batch is padded up to a multiple of the tile
    by the wrapper, never shrunk to tiny divisors of B.
    """
    Bp = _round_up(max(int(B), 1), 8)
    half = _round_up(pl.cdiv(Bp, 2), 8)   # aim for >= 2 grid steps (v7x megacore)
    tb = min(target, half)
    if tb >= 16:
        tb = _round_up(tb, 16)            # enables the 2-chain latency-hiding split
    return tb


def _snn_spide_kernel(u_ref, wx_ref, ws_ref, o_ref, *, time_step, n_chains,
                      unroll):
    wx = wx_ref[...]
    ws = ws_ref[...]
    tb = o_ref.shape[0]
    sub = tb // n_chains

    def init(c):
        # Constant input current, computed once per batch sub-tile.
        u1 = jnp.dot(u_ref[pl.ds(c * sub, sub), :], wx,
                     preferred_element_type=jnp.float32)
        s = (u1 >= VTH).astype(jnp.float32)
        return (u1, u1, s, s)   # (u1, v, s, r)

    state = tuple(init(c) for c in range(n_chains))

    def body(_, chains):
        # Issue every chain's feedback matmul before any VPU update so the
        # scheduler can overlap chain A's MXU pass with chain B's membrane /
        # spike update: batch rows are independent, so this is a legal 2-deep
        # software pipeline across the otherwise strictly serial time chain.
        fbs = tuple(
            jnp.dot(s.astype(ws.dtype), ws, preferred_element_type=jnp.float32)
            for (_, _, s, _) in chains)
        nxt = []
        for (u1, v, s, r), fb in zip(chains, fbs):
            v = v - VTH * s + fb + u1            # IF dynamics, soft reset
            s = (v >= VTH).astype(jnp.float32)
            nxt.append((u1, v, s, r + s))
        return tuple(nxt)

    state = lax.fori_loop(0, time_step - 1, body, state, unroll=unroll)

    # 'last' output type: average firing rate over the window.
    inv_t = 1.0 / float(time_step)
    for c in range(n_chains):
        r = state[c][3]
        o_ref[pl.ds(c * sub, sub), :] = (r * inv_t).astype(o_ref.dtype)


def snn_spide_forward(u, wx, ws, *, time_step=30, batch_tile=None,
                      feedback_dtype=jnp.bfloat16, n_chains=None, unroll=None):
    """Pallas implementation of SNNSPIDEModule.forward (eval / no_grad path,
    input_type='constant', output_type='last').

    u  : (B, d_in)  constant input
    wx : (d_in, H)  input weights
    ws : (H, H)     recurrent (feedback) weights
    returns (B, H) float32 average firing rate after `time_step` steps.

    feedback_dtype=jnp.float32 reproduces the torch module's f32 arithmetic
    exactly; the default bf16 is the MXU fast path (lossless LHS cast of the
    {0,1} spikes, f32 accumulation, half the resident Ws bytes).
    """
    B, d_in = u.shape
    H = wx.shape[1]
    assert ws.shape == (H, H)

    if batch_tile is None:
        tb = _pick_batch_tile(B)
    else:
        tb = max(8, _round_up(int(batch_tile), 8))
    Bp = _round_up(B, tb)           # pad the batch instead of shrinking the tile
    grid = Bp // tb

    if n_chains is None:
        n_chains = 2 if tb % 16 == 0 else 1
    assert tb % (8 * n_chains) == 0, "sub-tile must stay sublane aligned"

    if unroll is None:
        # Full unroll only while the loop carriers are small; larger tiles get
        # a moderate unroll to avoid vreg-pressure-driven spills (sweep this).
        unroll = True if tb * H <= 32 * 1024 else 4

    ws_cast = ws.astype(feedback_dtype)
    ws_bytes = jnp.dtype(feedback_dtype).itemsize

    u_in = u if Bp == B else jnp.pad(u, ((0, Bp - B), (0, 0)))

    # Explicit VMEM budget: double-buffered u/out tiles, single-buffered
    # weights, plus the live loop state (u1/v/s/r + matmul transient).
    need = (2 * tb * d_in * 4 + 2 * tb * H * 4
            + d_in * H * 4 + H * H * ws_bytes
            + 6 * tb * H * 4 + (4 << 20))
    try:
        cap = int(pltpu.get_tpu_info().vmem_capacity_bytes)
    except Exception:
        cap = 64 << 20              # v7x per-TC VMEM (most conservative)
    vmem_limit = int(min(max(2 * need, 32 << 20), cap - (2 << 20)))

    flops = 2 * Bp * H * (d_in + (time_step - 1) * H)
    bytes_accessed = (Bp * d_in * 4 + d_in * H * 4 + H * H * ws_bytes
                      + Bp * H * 4)
    cost = pl.CostEstimate(flops=int(flops), transcendentals=0,
                           bytes_accessed=int(bytes_accessed))

    kernel = functools.partial(_snn_spide_kernel, time_step=time_step,
                               n_chains=n_chains, unroll=unroll)

    def build(single_buffer_weights):
        # Weights have a constant block index -> DMA'd once, VMEM-resident
        # across all batch tiles; Buffered(1) drops the useless second buffer.
        w_kw = {"pipeline_mode": pl.Buffered(1)} if single_buffer_weights else {}
        return pl.pallas_call(
            kernel,
            out_shape=jax.ShapeDtypeStruct((Bp, H), jnp.float32),
            grid=(grid,),
            in_specs=[
                pl.BlockSpec((tb, d_in), lambda i: (i, 0)),
                pl.BlockSpec((d_in, H), lambda i: (0, 0), **w_kw),
                pl.BlockSpec((H, H), lambda i: (0, 0), **w_kw),
            ],
            out_specs=pl.BlockSpec((tb, H), lambda i: (i, 0)),
            compiler_params=pltpu.CompilerParams(
                dimension_semantics=("parallel",),
                vmem_limit_bytes=vmem_limit),
            cost_estimate=cost,
        )

    try:
        out = build(True)(u_in, wx, ws_cast)
    except Exception:
        # Fallback if this jaxlib rejects single-buffered BlockSpecs: default
        # double-buffered weights (identical results, slightly more VMEM).
        out = build(False)(u_in, wx, ws_cast)

    return out if Bp == B else out[:B]


def _reference(u, wx, ws, time_step, feedback_dtype=jnp.float32):
    """Pure-JAX reference (HIGHEST-precision matmuls) of the same dynamics."""
    prec = lax.Precision.HIGHEST
    ws_c = ws.astype(feedback_dtype)
    u1 = jnp.dot(u, wx, preferred_element_type=jnp.float32, precision=prec)
    v = u1
    s = (v >= VTH).astype(jnp.float32)
    r = s
    for _ in range(time_step - 1):
        fb = jnp.dot(s.astype(feedback_dtype), ws_c,
                     preferred_element_type=jnp.float32, precision=prec)
        v = v - VTH * s + fb + u1
        s = (v >= VTH).astype(jnp.float32)
        r = r + s
    return r * (1.0 / float(time_step))


if __name__ == "__main__":
    key = jax.random.PRNGKey(0)
    k_u, k_wx, k_ws = jax.random.split(key, 3)

    # B=60 exercises batch padding (-> 64), the 2-step "parallel" grid and the
    # in-kernel 2-chain split (tile 32, two 16-row chains).
    B, D_IN, HIDDEN = 60, 32, 128
    TIME_STEP = 30   # module default kwargs.get('time_step', 30)

    u = jax.random.normal(k_u, (B, D_IN), dtype=jnp.float32)
    # Deterministic synthetic parameters (scaled so a healthy fraction spikes).
    wx = jax.random.normal(k_wx, (D_IN, HIDDEN), dtype=jnp.float32) * 0.3
    ws = jax.random.normal(k_ws, (HIDDEN, HIDDEN), dtype=jnp.float32) * 0.05

    out_bf16 = jax.block_until_ready(
        snn_spide_forward(u, wx, ws, time_step=TIME_STEP))
    out_f32 = jax.block_until_ready(
        snn_spide_forward(u, wx, ws, time_step=TIME_STEP,
                          feedback_dtype=jnp.float32))

    ref_f32 = _reference(u, wx, ws, TIME_STEP, feedback_dtype=jnp.float32)
    ref_bf16 = _reference(u, wx, ws, TIME_STEP, feedback_dtype=jnp.bfloat16)

    assert out_bf16.shape == (B, HIDDEN) and out_f32.shape == (B, HIDDEN)

    # Structural sanity: firing rates are (integer spike count) / T in [0, 1].
    for o in (out_bf16, out_f32):
        assert bool(jnp.all((o >= -1e-6) & (o <= 1.0 + 1e-6)))
        counts = o * TIME_STEP
        assert bool(jnp.all(jnp.abs(counts - jnp.round(counts)) < 1e-3))

    def spike_count_stats(a, b):
        d = jnp.abs(a - b) * TIME_STEP        # difference in spike counts
        return float(jnp.mean(d >= 0.5)), float(jnp.mean(d))

    # Matched-dtype checks: only rare near-threshold numeric ties (hard
    # `v >= vth` comparison) may flip a few spikes.
    frac, mean = spike_count_stats(out_f32, ref_f32)
    assert frac <= 0.10 and mean <= 0.5, ("f32 mismatch", frac, mean)
    frac, mean = spike_count_stats(out_bf16, ref_bf16)
    assert frac <= 0.10 and mean <= 0.5, ("bf16 mismatch", frac, mean)

    # bf16-feedback fast path vs. true f32 semantics: bounded spike-rate drift
    # (weight rounding can flip spikes near vth; counts span 0..30, so a real
    # bug would blow far past these bounds).
    frac, mean = spike_count_stats(out_bf16, ref_f32)
    assert frac <= 0.5 and mean <= 3.0, ("bf16 drift too large", frac, mean)

    # TODO(synk): the training-time `Backward` implicit-differentiation path
    # (snn_backward over time_step_back) is autograd machinery, not a forward
    # op, and is intentionally not translated; likewise the non-'constant'
    # input_type permute path and leaky-LIF variants (module defaults used).
    print("KERNEL_OK")
</pallas_src>

<mosaic_0001>
module attributes {stable_mosaic.version = 11 : i64} {
  func.func @_snn_spide_kernel(%arg0: i32, %arg1: memref<32x32xf32, #tpu.memory_space<vmem>>, %arg2: memref<32x128xf32, #tpu.memory_space<vmem>>, %arg3: memref<128x128xbf16, #tpu.memory_space<vmem>>, %arg4: memref<32x128xf32, #tpu.memory_space<vmem>>) attributes {dimension_semantics = [#tpu.dimension_semantics<parallel>], iteration_bounds = array<i64: 2>, scalar_prefetch = 0 : i64, scratch_operands = 0 : i64, tpu.core_type = #tpu.core_type<tc>, window_params = [{transform_indices = @transform_0, window_bounds = array<i64: 32, 32>}, {pipeline_mode = #tpu.pipeline_mode<synchronous>, transform_indices = @transform_1, window_bounds = array<i64: 32, 128>}, {pipeline_mode = #tpu.pipeline_mode<synchronous>, transform_indices = @transform_2, window_bounds = array<i64: 128, 128>}, {transform_indices = @transform_3, window_bounds = array<i64: 32, 128>}]} {
    %c0 = arith.constant 0 : index
    %c0_0 = arith.constant 0 : index
    %0 = vector.load %arg2[%c0, %c0_0] : memref<32x128xf32, #tpu.memory_space<vmem>>, vector<32x128xf32>
    %c0_1 = arith.constant 0 : index
    %c0_2 = arith.constant 0 : index
    %1 = vector.load %arg3[%c0_1, %c0_2] : memref<128x128xbf16, #tpu.memory_space<vmem>>, vector<128x128xbf16>
    %c0_3 = arith.constant 0 : index
    %c0_4 = arith.constant 0 : index
    %2 = vector.load %arg1[%c0_3, %c0_4] : memref<32x32xf32, #tpu.memory_space<vmem>>, vector<16x32xf32>
    %cst = arith.constant dense<0.000000e+00> : vector<16x128xf32>
    %3 = tpu.matmul %2, %0, %cst {dimension_numbers = #tpu.dot_dimension_numbers<[1], [0], [0], [1], [0, 0, 1, 1], [], []>} : vector<16x32xf32>, vector<32x128xf32>, vector<16x128xf32> -> vector<16x128xf32>
    %cst_5 = arith.constant 1.000000e+00 : f32
    %4 = vector.broadcast %cst_5 : f32 to vector<16x128xf32>
    %5 = arith.cmpf oge, %3, %4 : vector<16x128xf32>
    %6 = arith.extui %5 : vector<16x128xi1> to vector<16x128xi32>
    %7 = arith.sitofp %6 : vector<16x128xi32> to vector<16x128xf32>
    %c16 = arith.constant 16 : index
    %c0_6 = arith.constant 0 : index
    %8 = vector.load %arg1[%c16, %c0_6] : memref<32x32xf32, #tpu.memory_space<vmem>>, vector<16x32xf32>
    %cst_7 = arith.constant dense<0.000000e+00> : vector<16x128xf32>
    %9 = tpu.matmul %8, %0, %cst_7 {dimension_numbers = #tpu.dot_dimension_numbers<[1], [0], [0], [1], [0, 0, 1, 1], [], []>} : vector<16x32xf32>, vector<32x128xf32>, vector<16x128xf32> -> vector<16x128xf32>
    %cst_8 = arith.constant 1.000000e+00 : f32
    %10 = vector.broadcast %cst_8 : f32 to vector<16x128xf32>
    %11 = arith.cmpf oge, %9, %10 : vector<16x128xf32>
    %12 = arith.extui %11 : vector<16x128xi1> to vector<16x128xi32>
    %13 = arith.sitofp %12 : vector<16x128xi32> to vector<16x128xf32>
    %c0_i32 = arith.constant 0 : i32
    %14 = arith.truncf %7 : vector<16x128xf32> to vector<16x128xbf16>
    %cst_9 = arith.constant dense<0.000000e+00> : vector<16x128xf32>
    %15 = tpu.matmul %14, %1, %cst_9 {dimension_numbers = #tpu.dot_dimension_numbers<[1], [0], [0], [1], [0, 0, 1, 1], [], []>} : vector<16x128xbf16>, vector<128x128xbf16>, vector<16x128xf32> -> vector<16x128xf32>
    %16 = arith.truncf %13 : vector<16x128xf32> to vector<16x128xbf16>
    %cst_10 = arith.constant dense<0.000000e+00> : vector<16x128xf32>
    %17 = tpu.matmul %16, %1, %cst_10 {dimension_numbers = #tpu.dot_dimension_numbers<[1], [0], [0], [1], [0, 0, 1, 1], [], []>} : vector<16x128xbf16>, vector<128x128xbf16>, vector<16x128xf32> -> vector<16x128xf32>
    %cst_11 = arith.constant 1.000000e+00 : f32
    %18 = vector.broadcast %cst_11 : f32 to vector<16x128xf32>
    %19 = arith.mulf %18, %7 : vector<16x128xf32>
    %20 = arith.subf %3, %19 : vector<16x128xf32>
    %21 = arith.addf %20, %15 : vector<16x128xf32>
    %22 = arith.addf %21, %3 : vector<16x128xf32>
    %cst_12 = arith.constant 1.000000e+00 : f32
    %23 = vector.broadcast %cst_12 : f32 to vector<16x128xf32>
    %24 = arith.cmpf oge, %22, %23 : vector<16x128xf32>
    %25 = arith.extui %24 : vector<16x128xi1> to vector<16x128xi32>
    %26 = arith.sitofp %25 : vector<16x128xi32> to vector<16x128xf32>
    %27 = arith.addf %7, %26 : vector<16x128xf32>
    %cst_13 = arith.constant 1.000000e+00 : f32
    %28 = vector.broadcast %cst_13 : f32 to vector<16x128xf32>
    %29 = arith.mulf %28, %13 : vector<16x128xf32>
    %30 = arith.subf %9, %29 : vector<16x128xf32>
    %31 = arith.addf %30, %17 : vector<16x128xf32>
    %32 = arith.addf %31, %9 : vector<16x128xf32>
    %cst_14 = arith.constant 1.000000e+00 : f32
    %33 = vector.broadcast %cst_14 : f32 to vector<16x128xf32>
    %34 = arith.cmpf oge, %32, %33 : vector<16x128xf32>
    %35 = arith.extui %34 : vector<16x128xi1> to vector<16x128xi32>
    %36 = arith.sitofp %35 : vector<16x128xi32> to vector<16x128xf32>
    %37 = arith.addf %13, %36 : vector<16x128xf32>
    %c1_i32 = arith.constant 1 : i32
    %38 = arith.truncf %26 : vector<16x128xf32> to vector<16x128xbf16>
    %cst_15 = arith.constant dense<0.000000e+00> : vector<16x128xf32>
    %39 = tpu.matmul %38, %1, %cst_15 {dimension_numbers = #tpu.dot_dimension_numbers<[1], [0], [0], [1], [0, 0, 1, 1], [], []>} : vector<16x128xbf16>, vector<128x128xbf16>, vector<16x128xf32> -> vector<16x128xf32>
    %40 = arith.truncf %36 : vector<16x128xf32> to vector<16x128xbf16>
    %cst_16 = arith.constant dense<0.000000e+00> : vector<16x128xf32>
    %41 = tpu.matmul %40, %1, %cst_16 {dimension_numbers = #tpu.dot_dimension_numbers<[1], [0], [0], [1], [0, 0, 1, 1], [], []>} : vector<16x128xbf16>, vector<128x128xbf16>, vector<16x128xf32> -> vector<16x128xf32>
    %cst_17 = arith.constant 1.000000e+00 : f32
    %42 = vector.broadcast %cst_17 : f32 to vector<16x128xf32>
    %43 = arith.mulf %42, %26 : vector<16x128xf32>
    %44 = arith.subf %22, %43 : vector<16x128xf32>
    %45 = arith.addf %44, %39 : vector<16x128xf32>
    %46 = arith.addf %45, %3 : vector<16x128xf32>
    %cst_18 = arith.constant 1.000000e+00 : f32
    %47 = vector.broadcast %cst_18 : f32 to vector<16x128xf32>
    %48 = arith.cmpf oge, %46, %47 : vector<16x128xf32>
    %49 = arith.extui %48 : vector<16x128xi1> to vector<16x128xi32>
    %50 = arith.sitofp %49 : vector<16x128xi32> to vector<16x128xf32>
    %51 = arith.addf %27, %50 : vector<16x128xf32>
    %cst_19 = arith.constant 1.000000e+00 : f32
    %52 = vector.broadcast %cst_19 : f32 to vector<16x128xf32>
    %53 = arith.mulf %52, %36 : vector<16x128xf32>
    %54 = arith.subf %32, %53 : vector<16x128xf32>
    %55 = arith.addf %54, %41 : vector<16x128xf32>
    %56 = arith.addf %55, %9 : vector<16x128xf32>
    %cst_20 = arith.constant 1.000000e+00 : f32
    %57 = vector.broadcast %cst_20 : f32 to vector<16x128xf32>
    %58 = arith.cmpf oge, %56, %57 : vector<16x128xf32>
    %59 = arith.extui %58 : vector<16x128xi1> to vector<16x128xi32>
    %60 = arith.sitofp %59 : vector<16x128xi32> to vector<16x128xf32>
    %61 = arith.addf %37, %60 : vector<16x128xf32>
    %c2_i32 = arith.constant 2 : i32
    %62 = arith.truncf %50 : vector<16x128xf32> to vector<16x128xbf16>
    %cst_21 = arith.constant dense<0.000000e+00> : vector<16x128xf32>
    %63 = tpu.matmul %62, %1, %cst_21 {dimension_numbers = #tpu.dot_dimension_numbers<[1], [0], [0], [1], [0, 0, 1, 1], [], []>} : vector<16x128xbf16>, vector<128x128xbf16>, vector<16x128xf32> -> vector<16x128xf32>
    %64 = arith.truncf %60 : vector<16x128xf32> to vector<16x128xbf16>
    %cst_22 = arith.constant dense<0.000000e+00> : vector<16x128xf32>
    %65 = tpu.matmul %64, %1, %cst_22 {dimension_numbers = #tpu.dot_dimension_numbers<[1], [0], [0], [1], [0, 0, 1, 1], [], []>} : vector<16x128xbf16>, vector<128x128xbf16>, vector<16x128xf32> -> vector<16x128xf32>
    %cst_23 = arith.constant 1.000000e+00 : f32
    %66 = vector.broadcast %cst_23 : f32 to vector<16x128xf32>
    %67 = arith.mulf %66, %50 : vector<16x128xf32>
    %68 = arith.subf %46, %67 : vector<16x128xf32>
    %69 = arith.addf %68, %63 : vector<16x128xf32>
    %70 = arith.addf %69, %3 : vector<16x128xf32>
    %cst_24 = arith.constant 1.000000e+00 : f32
    %71 = vector.broadcast %cst_24 : f32 to vector<16x128xf32>
    %72 = arith.cmpf oge, %70, %71 : vector<16x128xf32>
    %73 = arith.extui %72 : vector<16x128xi1> to vector<16x128xi32>
    %74 = arith.sitofp %73 : vector<16x128xi32> to vector<16x128xf32>
    %75 = arith.addf %51, %74 : vector<16x128xf32>
    %cst_25 = arith.constant 1.000000e+00 : f32
    %76 = vector.broadcast %cst_25 : f32 to vector<16x128xf32>
    %77 = arith.mulf %76, %60 : vector<16x128xf32>
    %78 = arith.subf %56, %77 : vector<16x128xf32>
    %79 = arith.addf %78, %65 : vector<16x128xf32>
    %80 = arith.addf %79, %9 : vector<16x128xf32>
    %cst_26 = arith.constant 1.000000e+00 : f32
    %81 = vector.broadcast %cst_26 : f32 to vector<16x128xf32>
    %82 = arith.cmpf oge, %80, %81 : vector<16x128xf32>
    %83 = arith.extui %82 : vector<16x128xi1> to vector<16x128xi32>
    %84 = arith.sitofp %83 : vector<16x128xi32> to vector<16x128xf32>
    %85 = arith.addf %61, %84 : vector<16x128xf32>
    %c3_i32 = arith.constant 3 : i32
    %86 = arith.truncf %74 : vector<16x128xf32> to vector<16x128xbf16>
    %cst_27 = arith.constant dense<0.000000e+00> : vector<16x128xf32>
    %87 = tpu.matmul %86, %1, %cst_27 {dimension_numbers = #tpu.dot_dimension_numbers<[1], [0], [0], [1], [0, 0, 1, 1], [], []>} : vector<16x128xbf16>, vector<128x128xbf16>, vector<16x128xf32> -> vector<16x128xf32>
    %88 = arith.truncf %84 : vector<16x128xf32> to vector<16x128xbf16>
    %cst_28 = arith.constant dense<0.000000e+00> : vector<16x128xf32>
    %89 = tpu.matmul %88, %1, %cst_28 {dimension_numbers = #tpu.dot_dimension_numbers<[1], [0], [0], [1], [0, 0, 1, 1], [], []>} : vector<16x128xbf16>, vector<128x128xbf16>, vector<16x128xf32> -> vector<16x128xf32>
    %cst_29 = arith.constant 1.000000e+00 : f32
    %90 = vector.broadcast %cst_29 : f32 to vector<16x128xf32>
    %91 = arith.mulf %90, %74 : vector<16x128xf32>
    %92 = arith.subf %70, %91 : vector<16x128xf32>
    %93 = arith.addf %92, %87 : vector<16x128xf32>
    %94 = arith.addf %93, %3 : vector<16x128xf32>
    %cst_30 = arith.constant 1.000000e+00 : f32
    %95 = vector.broadcast %cst_30 : f32 to vector<16x128xf32>
    %96 = arith.cmpf oge, %94, %95 : vector<16x128xf32>
    %97 = arith.extui %96 : vector<16x128xi1> to vector<16x128xi32>
    %98 = arith.sitofp %97 : vector<16x128xi32> to vector<16x128xf32>
    %99 = arith.addf %75, %98 : vector<16x128xf32>
    %cst_31 = arith.constant 1.000000e+00 : f32
    %100 = vector.broadcast %cst_31 : f32 to vector<16x128xf32>
    %101 = arith.mulf %100, %84 : vector<16x128xf32>
    %102 = arith.subf %80, %101 : vector<16x128xf32>
    %103 = arith.addf %102, %89 : vector<16x128xf32>
    %104 = arith.addf %103, %9 : vector<16x128xf32>
    %cst_32 = arith.constant 1.000000e+00 : f32
    %105 = vector.broadcast %cst_32 : f32 to vector<16x128xf32>
    %106 = arith.cmpf oge, %104, %105 : vector<16x128xf32>
    %107 = arith.extui %106 : vector<16x128xi1> to vector<16x128xi32>
    %108 = arith.sitofp %107 : vector<16x128xi32> to vector<16x128xf32>
    %109 = arith.addf %85, %108 : vector<16x128xf32>
    %c4_i32 = arith.constant 4 : i32
    %110 = arith.truncf %98 : vector<16x128xf32> to vector<16x128xbf16>
    %cst_33 = arith.constant dense<0.000000e+00> : vector<16x128xf32>
    %111 = tpu.matmul %110, %1, %cst_33 {dimension_numbers = #tpu.dot_dimension_numbers<[1], [0], [0], [1], [0, 0, 1, 1], [], []>} : vector<16x128xbf16>, vector<128x128xbf16>, vector<16x128xf32> -> vector<16x128xf32>
    %112 = arith.truncf %108 : vector<16x128xf32> to vector<16x128xbf16>
    %cst_34 = arith.constant dense<0.000000e+00> : vector<16x128xf32>
    %113 = tpu.matmul %112, %1, %cst_34 {dimension_numbers = #tpu.dot_dimension_numbers<[1], [0], [0], [1], [0, 0, 1, 1], [], []>} : vector<16x128xbf16>, vector<128x128xbf16>, vector<16x128xf32> -> vector<16x128xf32>
    %cst_35 = arith.constant 1.000000e+00 : f32
    %114 = vector.broadcast %cst_35 : f32 to vector<16x128xf32>
    %115 = arith.mulf %114, %98 : vector<16x128xf32>
    %116 = arith.subf %94, %115 : vector<16x128xf32>
    %117 = arith.addf %116, %111 : vector<16x128xf32>
    %118 = arith.addf %117, %3 : vector<16x128xf32>
    %cst_36 = arith.constant 1.000000e+00 : f32
    %119 = vector.broadcast %cst_36 : f32 to vector<16x128xf32>
    %120 = arith.cmpf oge, %118, %119 : vector<16x128xf32>
    %121 = arith.extui %120 : vector<16x128xi1> to vector<16x128xi32>
    %122 = arith.sitofp %121 : vector<16x128xi32> to vector<16x128xf32>
    %123 = arith.addf %99, %122 : vector<16x128xf32>
    %cst_37 = arith.constant 1.000000e+00 : f32
    %124 = vector.broadcast %cst_37 : f32 to vector<16x128xf32>
    %125 = arith.mulf %124, %108 : vector<16x128xf32>
    %126 = arith.subf %104, %125 : vector<16x128xf32>
    %127 = arith.addf %126, %113 : vector<16x128xf32>
    %128 = arith.addf %127, %9 : vector<16x128xf32>
    %cst_38 = arith.constant 1.000000e+00 : f32
    %129 = vector.broadcast %cst_38 : f32 to vector<16x128xf32>
    %130 = arith.cmpf oge, %128, %129 : vector<16x128xf32>
    %131 = arith.extui %130 : vector<16x128xi1> to vector<16x128xi32>
    %132 = arith.sitofp %131 : vector<16x128xi32> to vector<16x128xf32>
    %133 = arith.addf %109, %132 : vector<16x128xf32>
    %c5_i32 = arith.constant 5 : i32
    %134 = arith.truncf %122 : vector<16x128xf32> to vector<16x128xbf16>
    %cst_39 = arith.constant dense<0.000000e+00> : vector<16x128xf32>
    %135 = tpu.matmul %134, %1, %cst_39 {dimension_numbers = #tpu.dot_dimension_numbers<[1], [0], [0], [1], [0, 0, 1, 1], [], []>} : vector<16x128xbf16>, vector<128x128xbf16>, vector<16x128xf32> -> vector<16x128xf32>
    %136 = arith.truncf %132 : vector<16x128xf32> to vector<16x128xbf16>
    %cst_40 = arith.constant dense<0.000000e+00> : vector<16x128xf32>
    %137 = tpu.matmul %136, %1, %cst_40 {dimension_numbers = #tpu.dot_dimension_numbers<[1], [0], [0], [1], [0, 0, 1, 1], [], []>} : vector<16x128xbf16>, vector<128x128xbf16>, vector<16x128xf32> -> vector<16x128xf32>
    %cst_41 = arith.constant 1.000000e+00 : f32
    %138 = vector.broadcast %cst_41 : f32 to vector<16x128xf32>
    %139 = arith.mulf %138, %122 : vector<16x128xf32>
    %140 = arith.subf %118, %139 : vector<16x128xf32>
    %141 = arith.addf %140, %135 : vector<16x128xf32>
    %142 = arith.addf %141, %3 : vector<16x128xf32>
    %cst_42 = arith.constant 1.000000e+00 : f32
    %143 = vector.broadcast %cst_42 : f32 to vector<16x128xf32>
    %144 = arith.cmpf oge, %142, %143 : vector<16x128xf32>
    %145 = arith.extui %144 : vector<16x128xi1> to vector<16x128xi32>
    %146 = arith.sitofp %145 : vector<16x128xi32> to vector<16x128xf32>
    %147 = arith.addf %123, %146 : vector<16x128xf32>
    %cst_43 = arith.constant 1.000000e+00 : f32
    %148 = vector.broadcast %cst_43 : f32 to vector<16x128xf32>
    %149 = arith.mulf %148, %132 : vector<16x128xf32>
    %150 = arith.subf %128, %149 : vector<16x128xf32>
    %151 = arith.addf %150, %137 : vector<16x128xf32>
    %152 = arith.addf %151, %9 : vector<16x128xf32>
    %cst_44 = arith.constant 1.000000e+00 : f32
    %153 = vector.broadcast %cst_44 : f32 to vector<16x128xf32>
    %154 = arith.cmpf oge, %152, %153 : vector<16x128xf32>
    %155 = arith.extui %154 : vector<16x128xi1> to vector<16x128xi32>
    %156 = arith.sitofp %155 : vector<16x128xi32> to vector<16x128xf32>
    %157 = arith.addf %133, %156 : vector<16x128xf32>
    %c6_i32 = arith.constant 6 : i32
    %158 = arith.truncf %146 : vector<16x128xf32> to vector<16x128xbf16>
    %cst_45 = arith.constant dense<0.000000e+00> : vector<16x128xf32>
    %159 = tpu.matmul %158, %1, %cst_45 {dimension_numbers = #tpu.dot_dimension_numbers<[1], [0], [0], [1], [0, 0, 1, 1], [], []>} : vector<16x128xbf16>, vector<128x128xbf16>, vector<16x128xf32> -> vector<16x128xf32>
    %160 = arith.truncf %156 : vector<16x128xf32> to vector<16x128xbf16>
    %cst_46 = arith.constant dense<0.000000e+00> : vector<16x128xf32>
    %161 = tpu.matmul %160, %1, %cst_46 {dimension_numbers = #tpu.dot_dimension_numbers<[1], [0], [0], [1], [0, 0, 1, 1], [], []>} : vector<16x128xbf16>, vector<128x128xbf16>, vector<16x128xf32> -> vector<16x128xf32>
    %cst_47 = arith.constant 1.000000e+00 : f32
    %162 = vector.broadcast %cst_47 : f32 to vector<16x128xf32>
    %163 = arith.mulf %162, %146 : vector<16x128xf32>
    %164 = arith.subf %142, %163 : vector<16x128xf32>
    %165 = arith.addf %164, %159 : vector<16x128xf32>
    %166 = arith.addf %165, %3 : vector<16x128xf32>
    %cst_48 = arith.constant 1.000000e+00 : f32
    %167 = vector.broadcast %cst_48 : f32 to vector<16x128xf32>
    %168 = arith.cmpf oge, %166, %167 : vector<16x128xf32>
    %169 = arith.extui %168 : vector<16x128xi1> to vector<16x128xi32>
    %170 = arith.sitofp %169 : vector<16x128xi32> to vector<16x128xf32>
    %171 = arith.addf %147, %170 : vector<16x128xf32>
    %cst_49 = arith.constant 1.000000e+00 : f32
    %172 = vector.broadcast %cst_49 : f32 to vector<16x128xf32>
    %173 = arith.mulf %172, %156 : vector<16x128xf32>
    %174 = arith.subf %152, %173 : vector<16x128xf32>
    %175 = arith.addf %174, %161 : vector<16x128xf32>
    %176 = arith.addf %175, %9 : vector<16x128xf32>
    %cst_50 = arith.constant 1.000000e+00 : f32
    %177 = vector.broadcast %cst_50 : f32 to vector<16x128xf32>
    %178 = arith.cmpf oge, %176, %177 : vector<16x128xf32>
    %179 = arith.extui %178 : vector<16x128xi1> to vector<16x128xi32>
    %180 = arith.sitofp %179 : vector<16x128xi32> to vector<16x128xf32>
    %181 = arith.addf %157, %180 : vector<16x128xf32>
    %c7_i32 = arith.constant 7 : i32
    %182 = arith.truncf %170 : vector<16x128xf32> to vector<16x128xbf16>
    %cst_51 = arith.constant dense<0.000000e+00> : vector<16x128xf32>
    %183 = tpu.matmul %182, %1, %cst_51 {dimension_numbers = #tpu.dot_dimension_numbers<[1], [0], [0], [1], [0, 0, 1, 1], [], []>} : vector<16x128xbf16>, vector<128x128xbf16>, vector<16x128xf32> -> vector<16x128xf32>
    %184 = arith.truncf %180 : vector<16x128xf32> to vector<16x128xbf16>
    %cst_52 = arith.constant dense<0.000000e+00> : vector<16x128xf32>
    %185 = tpu.matmul %184, %1, %cst_52 {dimension_numbers = #tpu.dot_dimension_numbers<[1], [0], [0], [1], [0, 0, 1, 1], [], []>} : vector<16x128xbf16>, vector<128x128xbf16>, vector<16x128xf32> -> vector<16x128xf32>
    %cst_53 = arith.constant 1.000000e+00 : f32
    %186 = vector.broadcast %cst_53 : f32 to vector<16x128xf32>
    %187 = arith.mulf %186, %170 : vector<16x128xf32>
    %188 = arith.subf %166, %187 : vector<16x128xf32>
    %189 = arith.addf %188, %183 : vector<16x128xf32>
    %190 = arith.addf %189, %3 : vector<16x128xf32>
    %cst_54 = arith.constant 1.000000e+00 : f32
    %191 = vector.broadcast %cst_54 : f32 to vector<16x128xf32>
    %192 = arith.cmpf oge, %190, %191 : vector<16x128xf32>
    %193 = arith.extui %192 : vector<16x128xi1> to vector<16x128xi32>
    %194 = arith.sitofp %193 : vector<16x128xi32> to vector<16x128xf32>
    %195 = arith.addf %171, %194 : vector<16x128xf32>
    %cst_55 = arith.constant 1.000000e+00 : f32
    %196 = vector.broadcast %cst_55 : f32 to vector<16x128xf32>
    %197 = arith.mulf %196, %180 : vector<16x128xf32>
    %198 = arith.subf %176, %197 : vector<16x128xf32>
    %199 = arith.addf %198, %185 : vector<16x128xf32>
    %200 = arith.addf %199, %9 : vector<16x128xf32>
    %cst_56 = arith.constant 1.000000e+00 : f32
    %201 = vector.broadcast %cst_56 : f32 to vector<16x128xf32>
    %202 = arith.cmpf oge, %200, %201 : vector<16x128xf32>
    %203 = arith.extui %202 : vector<16x128xi1> to vector<16x128xi32>
    %204 = arith.sitofp %203 : vector<16x128xi32> to vector<16x128xf32>
    %205 = arith.addf %181, %204 : vector<16x128xf32>
    %c8_i32 = arith.constant 8 : i32
    %206 = arith.truncf %194 : vector<16x128xf32> to vector<16x128xbf16>
    %cst_57 = arith.constant dense<0.000000e+00> : vector<16x128xf32>
    %207 = tpu.matmul %206, %1, %cst_57 {dimension_numbers = #tpu.dot_dimension_numbers<[1], [0], [0], [1], [0, 0, 1, 1], [], []>} : vector<16x128xbf16>, vector<128x128xbf16>, vector<16x128xf32> -> vector<16x128xf32>
    %208 = arith.truncf %204 : vector<16x128xf32> to vector<16x128xbf16>
    %cst_58 = arith.constant dense<0.000000e+00> : vector<16x128xf32>
    %209 = tpu.matmul %208, %1, %cst_58 {dimension_numbers = #tpu.dot_dimension_numbers<[1], [0], [0], [1], [0, 0, 1, 1], [], []>} : vector<16x128xbf16>, vector<128x128xbf16>, vector<16x128xf32> -> vector<16x128xf32>
    %cst_59 = arith.constant 1.000000e+00 : f32
    %210 = vector.broadcast %cst_59 : f32 to vector<16x128xf32>
    %211 = arith.mulf %210, %194 : vector<16x128xf32>
    %212 = arith.subf %190, %211 : vector<16x128xf32>
    %213 = arith.addf %212, %207 : vector<16x128xf32>
    %214 = arith.addf %213, %3 : vector<16x128xf32>
    %cst_60 = arith.constant 1.000000e+00 : f32
    %215 = vector.broadcast %cst_60 : f32 to vector<16x128xf32>
    %216 = arith.cmpf oge, %214, %215 : vector<16x128xf32>
    %217 = arith.extui %216 : vector<16x128xi1> to vector<16x128xi32>
    %218 = arith.sitofp %217 : vector<16x128xi32> to vector<16x128xf32>
    %219 = arith.addf %195, %218 : vector<16x128xf32>
    %cst_61 = arith.constant 1.000000e+00 : f32
    %220 = vector.broadcast %cst_61 : f32 to vector<16x128xf32>
    %221 = arith.mulf %220, %204 : vector<16x128xf32>
    %222 = arith.subf %200, %221 : vector<16x128xf32>
    %223 = arith.addf %222, %209 : vector<16x128xf32>
    %224 = arith.addf %223, %9 : vector<16x128xf32>
    %cst_62 = arith.constant 1.000000e+00 : f32
    %225 = vector.broadcast %cst_62 : f32 to vector<16x128xf32>
    %226 = arith.cmpf oge, %224, %225 : vector<16x128xf32>
    %227 = arith.extui %226 : vector<16x128xi1> to vector<16x128xi32>
    %228 = arith.sitofp %227 : vector<16x128xi32> to vector<16x128xf32>
    %229 = arith.addf %205, %228 : vector<16x128xf32>
    %c9_i32 = arith.constant 9 : i32
    %230 = arith.truncf %218 : vector<16x128xf32> to vector<16x128xbf16>
    %cst_63 = arith.constant dense<0.000000e+00> : vector<16x128xf32>
    %231 = tpu.matmul %230, %1, %cst_63 {dimension_numbers = #tpu.dot_dimension_numbers<[1], [0], [0], [1], [0, 0, 1, 1], [], []>} : vector<16x128xbf16>, vector<128x128xbf16>, vector<16x128xf32> -> vector<16x128xf32>
    %232 = arith.truncf %228 : vector<16x128xf32> to vector<16x128xbf16>
    %cst_64 = arith.constant dense<0.000000e+00> : vector<16x128xf32>
    %233 = tpu.matmul %232, %1, %cst_64 {dimension_numbers = #tpu.dot_dimension_numbers<[1], [0], [0], [1], [0, 0, 1, 1], [], []>} : vector<16x128xbf16>, vector<128x128xbf16>, vector<16x128xf32> -> vector<16x128xf32>
    %cst_65 = arith.constant 1.000000e+00 : f32
    %234 = vector.broadcast %cst_65 : f32 to vector<16x128xf32>
    %235 = arith.mulf %234, %218 : vector<16x128xf32>
    %236 = arith.subf %214, %235 : vector<16x128xf32>
    %237 = arith.addf %236, %231 : vector<16x128xf32>
    %238 = arith.addf %237, %3 : vector<16x128xf32>
    %cst_66 = arith.constant 1.000000e+00 : f32
    %239 = vector.broadcast %cst_66 : f32 to vector<16x128xf32>
    %240 = arith.cmpf oge, %238, %239 : vector<16x128xf32>
    %241 = arith.extui %240 : vector<16x128xi1> to vector<16x128xi32>
    %242 = arith.sitofp %241 : vector<16x128xi32> to vector<16x128xf32>
    %243 = arith.addf %219, %242 : vector<16x128xf32>
    %cst_67 = arith.constant 1.000000e+00 : f32
    %244 = vector.broadcast %cst_67 : f32 to vector<16x128xf32>
    %245 = arith.mulf %244, %228 : vector<16x128xf32>
    %246 = arith.subf %224, %245 : vector<16x128xf32>
    %247 = arith.addf %246, %233 : vector<16x128xf32>
    %248 = arith.addf %247, %9 : vector<16x128xf32>
    %cst_68 = arith.constant 1.000000e+00 : f32
    %249 = vector.broadcast %cst_68 : f32 to vector<16x128xf32>
    %250 = arith.cmpf oge, %248, %249 : vector<16x128xf32>
    %251 = arith.extui %250 : vector<16x128xi1> to vector<16x128xi32>
    %252 = arith.sitofp %251 : vector<16x128xi32> to vector<16x128xf32>
    %253 = arith.addf %229, %252 : vector<16x128xf32>
    %c10_i32 = arith.constant 10 : i32
    %254 = arith.truncf %242 : vector<16x128xf32> to vector<16x128xbf16>
    %cst_69 = arith.constant dense<0.000000e+00> : vector<16x128xf32>
    %255 = tpu.matmul %254, %1, %cst_69 {dimension_numbers = #tpu.dot_dimension_numbers<[1], [0], [0], [1], [0, 0, 1, 1], [], []>} : vector<16x128xbf16>, vector<128x128xbf16>, vector<16x128xf32> -> vector<16x128xf32>
    %256 = arith.truncf %252 : vector<16x128xf32> to vector<16x128xbf16>
    %cst_70 = arith.constant dense<0.000000e+00> : vector<16x128xf32>
    %257 = tpu.matmul %256, %1, %cst_70 {dimension_numbers = #tpu.dot_dimension_numbers<[1], [0], [0], [1], [0, 0, 1, 1], [], []>} : vector<16x128xbf16>, vector<128x128xbf16>, vector<16x128xf32> -> vector<16x128xf32>
    %cst_71 = arith.constant 1.000000e+00 : f32
    %258 = vector.broadcast %cst_71 : f32 to vector<16x128xf32>
    %259 = arith.mulf %258, %242 : vector<16x128xf32>
    %260 = arith.subf %238, %259 : vector<16x128xf32>
    %261 = arith.addf %260, %255 : vector<16x128xf32>
    %262 = arith.addf %261, %3 : vector<16x128xf32>
    %cst_72 = arith.constant 1.000000e+00 : f32
    %263 = vector.broadcast %cst_72 : f32 to vector<16x128xf32>
    %264 = arith.cmpf oge, %262, %263 : vector<16x128xf32>
    %265 = arith.extui %264 : vector<16x128xi1> to vector<16x128xi32>
    %266 = arith.sitofp %265 : vector<16x128xi32> to vector<16x128xf32>
    %267 = arith.addf %243, %266 : vector<16x128xf32>
    %cst_73 = arith.constant 1.000000e+00 : f32
    %268 = vector.broadcast %cst_73 : f32 to vector<16x128xf32>
    %269 = arith.mulf %268, %252 : vector<16x128xf32>
    %270 = arith.subf %248, %269 : vector<16x128xf32>
    %271 = arith.addf %270, %257 : vector<16x128xf32>
    %272 = arith.addf %271, %9 : vector<16x128xf32>
    %cst_74 = arith.constant 1.000000e+00 : f32
    %273 = vector.broadcast %cst_74 : f32 to vector<16x128xf32>
    %274 = arith.cmpf oge, %272, %273 : vector<16x128xf32>
    %275 = arith.extui %274 : vector<16x128xi1> to vector<16x128xi32>
    %276 = arith.sitofp %275 : vector<16x128xi32> to vector<16x128xf32>
    %277 = arith.addf %253, %276 : vector<16x128xf32>
    %c11_i32 = arith.constant 11 : i32
    %278 = arith.truncf %266 : vector<16x128xf32> to vector<16x128xbf16>
    %cst_75 = arith.constant dense<0.000000e+00> : vector<16x128xf32>
    %279 = tpu.matmul %278, %1, %cst_75 {dimension_numbers = #tpu.dot_dimension_numbers<[1], [0], [0], [1], [0, 0, 1, 1], [], []>} : vector<16x128xbf16>, vector<128x128xbf16>, vector<16x128xf32> -> vector<16x128xf32>
    %280 = arith.truncf %276 : vector<16x128xf32> to vector<16x128xbf16>
    %cst_76 = arith.constant dense<0.000000e+00> : vector<16x128xf32>
    %281 = tpu.matmul %280, %1, %cst_76 {dimension_numbers = #tpu.dot_dimension_numbers<[1], [0], [0], [1], [0, 0, 1, 1], [], []>} : vector<16x128xbf16>, vector<128x128xbf16>, vector<16x128xf32> -> vector<16x128xf32>
    %cst_77 = arith.constant 1.000000e+00 : f32
    %282 = vector.broadcast %cst_77 : f32 to vector<16x128xf32>
    %283 = arith.mulf %282, %266 : vector<16x128xf32>
    %284 = arith.subf %262, %283 : vector<16x128xf32>
    %285 = arith.addf %284, %279 : vector<16x128xf32>
    %286 = arith.addf %285, %3 : vector<16x128xf32>
    %cst_78 = arith.constant 1.000000e+00 : f32
    %287 = vector.broadcast %cst_78 : f32 to vector<16x128xf32>
    %288 = arith.cmpf oge, %286, %287 : vector<16x128xf32>
    %289 = arith.extui %288 : vector<16x128xi1> to vector<16x128xi32>
    %290 = arith.sitofp %289 : vector<16x128xi32> to vector<16x128xf32>
    %291 = arith.addf %267, %290 : vector<16x128xf32>
    %cst_79 = arith.constant 1.000000e+00 : f32
    %292 = vector.broadcast %cst_79 : f32 to vector<16x128xf32>
    %293 = arith.mulf %292, %276 : vector<16x128xf32>
    %294 = arith.subf %272, %293 : vector<16x128xf32>
    %295 = arith.addf %294, %281 : vector<16x128xf32>
    %296 = arith.addf %295, %9 : vector<16x128xf32>
    %cst_80 = arith.constant 1.000000e+00 : f32
    %297 = vector.broadcast %cst_80 : f32 to vector<16x128xf32>
    %298 = arith.cmpf oge, %296, %297 : vector<16x128xf32>
    %299 = arith.extui %298 : vector<16x128xi1> to vector<16x128xi32>
    %300 = arith.sitofp %299 : vector<16x128xi32> to vector<16x128xf32>
    %301 = arith.addf %277, %300 : vector<16x128xf32>
    %c12_i32 = arith.constant 12 : i32
    %302 = arith.truncf %290 : vector<16x128xf32> to vector<16x128xbf16>
    %cst_81 = arith.constant dense<0.000000e+00> : vector<16x128xf32>
    %303 = tpu.matmul %302, %1, %cst_81 {dimension_numbers = #tpu.dot_dimension_numbers<[1], [0], [0], [1], [0, 0, 1, 1], [], []>} : vector<16x128xbf16>, vector<128x128xbf16>, vector<16x128xf32> -> vector<16x128xf32>
    %304 = arith.truncf %300 : vector<16x128xf32> to vector<16x128xbf16>
    %cst_82 = arith.constant dense<0.000000e+00> : vector<16x128xf32>
    %305 = tpu.matmul %304, %1, %cst_82 {dimension_numbers = #tpu.dot_dimension_numbers<[1], [0], [0], [1], [0, 0, 1, 1], [], []>} : vector<16x128xbf16>, vector<128x128xbf16>, vector<16x128xf32> -> vector<16x128xf32>
    %cst_83 = arith.constant 1.000000e+00 : f32
    %306 = vector.broadcast %cst_83 : f32 to vector<16x128xf32>
    %307 = arith.mulf %306, %290 : vector<16x128xf32>
    %308 = arith.subf %286, %307 : vector<16x128xf32>
    %309 = arith.addf %308, %303 : vector<16x128xf32>
    %310 = arith.addf %309, %3 : vector<16x128xf32>
    %cst_84 = arith.constant 1.000000e+00 : f32
    %311 = vector.broadcast %cst_84 : f32 to vector<16x128xf32>
    %312 = arith.cmpf oge, %310, %311 : vector<16x128xf32>
    %313 = arith.extui %312 : vector<16x128xi1> to vector<16x128xi32>
    %314 = arith.sitofp %313 : vector<16x128xi32> to vector<16x128xf32>
    %315 = arith.addf %291, %314 : vector<16x128xf32>
    %cst_85 = arith.constant 1.000000e+00 : f32
    %316 = vector.broadcast %cst_85 : f32 to vector<16x128xf32>
    %317 = arith.mulf %316, %300 : vector<16x128xf32>
    %318 = arith.subf %296, %317 : vector<16x128xf32>
    %319 = arith.addf %318, %305 : vector<16x128xf32>
    %320 = arith.addf %319, %9 : vector<16x128xf32>
    %cst_86 = arith.constant 1.000000e+00 : f32
    %321 = vector.broadcast %cst_86 : f32 to vector<16x128xf32>
    %322 = arith.cmpf oge, %320, %321 : vector<16x128xf32>
    %323 = arith.extui %322 : vector<16x128xi1> to vector<16x128xi32>
    %324 = arith.sitofp %323 : vector<16x128xi32> to vector<16x128xf32>
    %325 = arith.addf %301, %324 : vector<16x128xf32>
    %c13_i32 = arith.constant 13 : i32
    %326 = arith.truncf %314 : vector<16x128xf32> to vector<16x128xbf16>
    %cst_87 = arith.constant dense<0.000000e+00> : vector<16x128xf32>
    %327 = tpu.matmul %326, %1, %cst_87 {dimension_numbers = #tpu.dot_dimension_numbers<[1], [0], [0], [1], [0, 0, 1, 1], [], []>} : vector<16x128xbf16>, vector<128x128xbf16>, vector<16x128xf32> -> vector<16x128xf32>
    %328 = arith.truncf %324 : vector<16x128xf32> to vector<16x128xbf16>
    %cst_88 = arith.constant dense<0.000000e+00> : vector<16x128xf32>
    %329 = tpu.matmul %328, %1, %cst_88 {dimension_numbers = #tpu.dot_dimension_numbers<[1], [0], [0], [1], [0, 0, 1, 1], [], []>} : vector<16x128xbf16>, vector<128x128xbf16>, vector<16x128xf32> -> vector<16x128xf32>
    %cst_89 = arith.constant 1.000000e+00 : f32
    %330 = vector.broadcast %cst_89 : f32 to vector<16x128xf32>
    %331 = arith.mulf %330, %314 : vector<16x128xf32>
    %332 = arith.subf %310, %331 : vector<16x128xf32>
    %333 = arith.addf %332, %327 : vector<16x128xf32>
    %334 = arith.addf %333, %3 : vector<16x128xf32>
    %cst_90 = arith.constant 1.000000e+00 : f32
    %335 = vector.broadcast %cst_90 : f32 to vector<16x128xf32>
    %336 = arith.cmpf oge, %334, %335 : vector<16x128xf32>
    %337 = arith.extui %336 : vector<16x128xi1> to vector<16x128xi32>
    %338 = arith.sitofp %337 : vector<16x128xi32> to vector<16x128xf32>
    %339 = arith.addf %315, %338 : vector<16x128xf32>
    %cst_91 = arith.constant 1.000000e+00 : f32
    %340 = vector.broadcast %cst_91 : f32 to vector<16x128xf32>
    %341 = arith.mulf %340, %324 : vector<16x128xf32>
    %342 = arith.subf %320, %341 : vector<16x128xf32>
    %343 = arith.addf %342, %329 : vector<16x128xf32>
    %344 = arith.addf %343, %9 : vector<16x128xf32>
    %cst_92 = arith.constant 1.000000e+00 : f32
    %345 = vector.broadcast %cst_92 : f32 to vector<16x128xf32>
    %346 = arith.cmpf oge, %344, %345 : vector<16x128xf32>
    %347 = arith.extui %346 : vector<16x128xi1> to vector<16x128xi32>
    %348 = arith.sitofp %347 : vector<16x128xi32> to vector<16x128xf32>
    %349 = arith.addf %325, %348 : vector<16x128xf32>
    %c14_i32 = arith.constant 14 : i32
    %350 = arith.truncf %338 : vector<16x128xf32> to vector<16x128xbf16>
    %cst_93 = arith.constant dense<0.000000e+00> : vector<16x128xf32>
    %351 = tpu.matmul %350, %1, %cst_93 {dimension_numbers = #tpu.dot_dimension_numbers<[1], [0], [0], [1], [0, 0, 1, 1], [], []>} : vector<16x128xbf16>, vector<128x128xbf16>, vector<16x128xf32> -> vector<16x128xf32>
    %352 = arith.truncf %348 : vector<16x128xf32> to vector<16x128xbf16>
    %cst_94 = arith.constant dense<0.000000e+00> : vector<16x128xf32>
    %353 = tpu.matmul %352, %1, %cst_94 {dimension_numbers = #tpu.dot_dimension_numbers<[1], [0], [0], [1], [0, 0, 1, 1], [], []>} : vector<16x128xbf16>, vector<128x128xbf16>, vector<16x128xf32> -> vector<16x128xf32>
    %cst_95 = arith.constant 1.000000e+00 : f32
    %354 = vector.broadcast %cst_95 : f32 to vector<16x128xf32>
    %355 = arith.mulf %354, %338 : vector<16x128xf32>
    %356 = arith.subf %334, %355 : vector<16x128xf32>
    %357 = arith.addf %356, %351 : vector<16x128xf32>
    %358 = arith.addf %357, %3 : vector<16x128xf32>
    %cst_96 = arith.constant 1.000000e+00 : f32
    %359 = vector.broadcast %cst_96 : f32 to vector<16x128xf32>
    %360 = arith.cmpf oge, %358, %359 : vector<16x128xf32>
    %361 = arith.extui %360 : vector<16x128xi1> to vector<16x128xi32>
    %362 = arith.sitofp %361 : vector<16x128xi32> to vector<16x128xf32>
    %363 = arith.addf %339, %362 : vector<16x128xf32>
    %cst_97 = arith.constant 1.000000e+00 : f32
    %364 = vector.broadcast %cst_97 : f32 to vector<16x128xf32>
    %365 = arith.mulf %364, %348 : vector<16x128xf32>
    %366 = arith.subf %344, %365 : vector<16x128xf32>
    %367 = arith.addf %366, %353 : vector<16x128xf32>
    %368 = arith.addf %367, %9 : vector<16x128xf32>
    %cst_98 = arith.constant 1.000000e+00 : f32
    %369 = vector.broadcast %cst_98 : f32 to vector<16x128xf32>
    %370 = arith.cmpf oge, %368, %369 : vector<16x128xf32>
    %371 = arith.extui %370 : vector<16x128xi1> to vector<16x128xi32>
    %372 = arith.sitofp %371 : vector<16x128xi32> to vector<16x128xf32>
    %373 = arith.addf %349, %372 : vector<16x128xf32>
    %c15_i32 = arith.constant 15 : i32
    %374 = arith.truncf %362 : vector<16x128xf32> to vector<16x128xbf16>
    %cst_99 = arith.constant dense<0.000000e+00> : vector<16x128xf32>
    %375 = tpu.matmul %374, %1, %cst_99 {dimension_numbers = #tpu.dot_dimension_numbers<[1], [0], [0], [1], [0, 0, 1, 1], [], []>} : vector<16x128xbf16>, vector<128x128xbf16>, vector<16x128xf32> -> vector<16x128xf32>
    %376 = arith.truncf %372 : vector<16x128xf32> to vector<16x128xbf16>
    %cst_100 = arith.constant dense<0.000000e+00> : vector<16x128xf32>
    %377 = tpu.matmul %376, %1, %cst_100 {dimension_numbers = #tpu.dot_dimension_numbers<[1], [0], [0], [1], [0, 0, 1, 1], [], []>} : vector<16x128xbf16>, vector<128x128xbf16>, vector<16x128xf32> -> vector<16x128xf32>
    %cst_101 = arith.constant 1.000000e+00 : f32
    %378 = vector.broadcast %cst_101 : f32 to vector<16x128xf32>
    %379 = arith.mulf %378, %362 : vector<16x128xf32>
    %380 = arith.subf %358, %379 : vector<16x128xf32>
    %381 = arith.addf %380, %375 : vector<16x128xf32>
    %382 = arith.addf %381, %3 : vector<16x128xf32>
    %cst_102 = arith.constant 1.000000e+00 : f32
    %383 = vector.broadcast %cst_102 : f32 to vector<16x128xf32>
    %384 = arith.cmpf oge, %382, %383 : vector<16x128xf32>
    %385 = arith.extui %384 : vector<16x128xi1> to vector<16x128xi32>
    %386 = arith.sitofp %385 : vector<16x128xi32> to vector<16x128xf32>
    %387 = arith.addf %363, %386 : vector<16x128xf32>
    %cst_103 = arith.constant 1.000000e+00 : f32
    %388 = vector.broadcast %cst_103 : f32 to vector<16x128xf32>
    %389 = arith.mulf %388, %372 : vector<16x128xf32>
    %390 = arith.subf %368, %389 : vector<16x128xf32>
    %391 = arith.addf %390, %377 : vector<16x128xf32>
    %392 = arith.addf %391, %9 : vector<16x128xf32>
    %cst_104 = arith.constant 1.000000e+00 : f32
    %393 = vector.broadcast %cst_104 : f32 to vector<16x128xf32>
    %394 = arith.cmpf oge, %392, %393 : vector<16x128xf32>
    %395 = arith.extui %394 : vector<16x128xi1> to vector<16x128xi32>
    %396 = arith.sitofp %395 : vector<16x128xi32> to vector<16x128xf32>
    %397 = arith.addf %373, %396 : vector<16x128xf32>
    %c16_i32 = arith.constant 16 : i32
    %398 = arith.truncf %386 : vector<16x128xf32> to vector<16x128xbf16>
    %cst_105 = arith.constant dense<0.000000e+00> : vector<16x128xf32>
    %399 = tpu.matmul %398, %1, %cst_105 {dimension_numbers = #tpu.dot_dimension_numbers<[1], [0], [0], [1], [0, 0, 1, 1], [], []>} : vector<16x128xbf16>, vector<128x128xbf16>, vector<16x128xf32> -> vector<16x128xf32>
    %400 = arith.truncf %396 : vector<16x128xf32> to vector<16x128xbf16>
    %cst_106 = arith.constant dense<0.000000e+00> : vector<16x128xf32>
    %401 = tpu.matmul %400, %1, %cst_106 {dimension_numbers = #tpu.dot_dimension_numbers<[1], [0], [0], [1], [0, 0, 1, 1], [], []>} : vector<16x128xbf16>, vector<128x128xbf16>, vector<16x128xf32> -> vector<16x128xf32>
    %cst_107 = arith.constant 1.000000e+00 : f32
    %402 = vector.broadcast %cst_107 : f32 to vector<16x128xf32>
    %403 = arith.mulf %402, %386 : vector<16x128xf32>
    %404 = arith.subf %382, %403 : vector<16x128xf32>
    %405 = arith.addf %404, %399 : vector<16x128xf32>
    %406 = arith.addf %405, %3 : vector<16x128xf32>
    %cst_108 = arith.constant 1.000000e+00 : f32
    %407 = vector.broadcast %cst_108 : f32 to vector<16x128xf32>
    %408 = arith.cmpf oge, %406, %407 : vector<16x128xf32>
    %409 = arith.extui %408 : vector<16x128xi1> to vector<16x128xi32>
    %410 = arith.sitofp %409 : vector<16x128xi32> to vector<16x128xf32>
    %411 = arith.addf %387, %410 : vector<16x128xf32>
    %cst_109 = arith.constant 1.000000e+00 : f32
    %412 = vector.broadcast %cst_109 : f32 to vector<16x128xf32>
    %413 = arith.mulf %412, %396 : vector<16x128xf32>
    %414 = arith.subf %392, %413 : vector<16x128xf32>
    %415 = arith.addf %414, %401 : vector<16x128xf32>
    %416 = arith.addf %415, %9 : vector<16x128xf32>
    %cst_110 = arith.constant 1.000000e+00 : f32
    %417 = vector.broadcast %cst_110 : f32 to vector<16x128xf32>
    %418 = arith.cmpf oge, %416, %417 : vector<16x128xf32>
    %419 = arith.extui %418 : vector<16x128xi1> to vector<16x128xi32>
    %420 = arith.sitofp %419 : vector<16x128xi32> to vector<16x128xf32>
    %421 = arith.addf %397, %420 : vector<16x128xf32>
    %c17_i32 = arith.constant 17 : i32
    %422 = arith.truncf %410 : vector<16x128xf32> to vector<16x128xbf16>
    %cst_111 = arith.constant dense<0.000000e+00> : vector<16x128xf32>
    %423 = tpu.matmul %422, %1, %cst_111 {dimension_numbers = #tpu.dot_dimension_numbers<[1], [0], [0], [1], [0, 0, 1, 1], [], []>} : vector<16x128xbf16>, vector<128x128xbf16>, vector<16x128xf32> -> vector<16x128xf32>
    %424 = arith.truncf %420 : vector<16x128xf32> to vector<16x128xbf16>
    %cst_112 = arith.constant dense<0.000000e+00> : vector<16x128xf32>
    %425 = tpu.matmul %424, %1, %cst_112 {dimension_numbers = #tpu.dot_dimension_numbers<[1], [0], [0], [1], [0, 0, 1, 1], [], []>} : vector<16x128xbf16>, vector<128x128xbf16>, vector<16x128xf32> -> vector<16x128xf32>
    %cst_113 = arith.constant 1.000000e+00 : f32
    %426 = vector.broadcast %cst_113 : f32 to vector<16x128xf32>
    %427 = arith.mulf %426, %410 : vector<16x128xf32>
    %428 = arith.subf %406, %427 : vector<16x128xf32>
    %429 = arith.addf %428, %423 : vector<16x128xf32>
    %430 = arith.addf %429, %3 : vector<16x128xf32>
    %cst_114 = arith.constant 1.000000e+00 : f32
    %431 = vector.broadcast %cst_114 : f32 to vector<16x128xf32>
    %432 = arith.cmpf oge, %430, %431 : vector<16x128xf32>
    %433 = arith.extui %432 : vector<16x128xi1> to vector<16x128xi32>
    %434 = arith.sitofp %433 : vector<16x128xi32> to vector<16x128xf32>
    %435 = arith.addf %411, %434 : vector<16x128xf32>
    %cst_115 = arith.constant 1.000000e+00 : f32
    %436 = vector.broadcast %cst_115 : f32 to vector<16x128xf32>
    %437 = arith.mulf %436, %420 : vector<16x128xf32>
    %438 = arith.subf %416, %437 : vector<16x128xf32>
    %439 = arith.addf %438, %425 : vector<16x128xf32>
    %440 = arith.addf %439, %9 : vector<16x128xf32>
    %cst_116 = arith.constant 1.000000e+00 : f32
    %441 = vector.broadcast %cst_116 : f32 to vector<16x128xf32>
    %442 = arith.cmpf oge, %440, %441 : vector<16x128xf32>
    %443 = arith.extui %442 : vector<16x128xi1> to vector<16x128xi32>
    %444 = arith.sitofp %443 : vector<16x128xi32> to vector<16x128xf32>
    %445 = arith.addf %421, %444 : vector<16x128xf32>
    %c18_i32 = arith.constant 18 : i32
    %446 = arith.truncf %434 : vector<16x128xf32> to vector<16x128xbf16>
    %cst_117 = arith.constant dense<0.000000e+00> : vector<16x128xf32>
    %447 = tpu.matmul %446, %1, %cst_117 {dimension_numbers = #tpu.dot_dimension_numbers<[1], [0], [0], [1], [0, 0, 1, 1], [], []>} : vector<16x128xbf16>, vector<128x128xbf16>, vector<16x128xf32> -> vector<16x128xf32>
    %448 = arith.truncf %444 : vector<16x128xf32> to vector<16x128xbf16>
    %cst_118 = arith.constant dense<0.000000e+00> : vector<16x128xf32>
    %449 = tpu.matmul %448, %1, %cst_118 {dimension_numbers = #tpu.dot_dimension_numbers<[1], [0], [0], [1], [0, 0, 1, 1], [], []>} : vector<16x128xbf16>, vector<128x128xbf16>, vector<16x128xf32> -> vector<16x128xf32>
    %cst_119 = arith.constant 1.000000e+00 : f32
    %450 = vector.broadcast %cst_119 : f32 to vector<16x128xf32>
    %451 = arith.mulf %450, %434 : vector<16x128xf32>
    %452 = arith.subf %430, %451 : vector<16x128xf32>
    %453 = arith.addf %452, %447 : vector<16x128xf32>
    %454 = arith.addf %453, %3 : vector<16x128xf32>
    %cst_120 = arith.constant 1.000000e+00 : f32
    %455 = vector.broadcast %cst_120 : f32 to vector<16x128xf32>
    %456 = arith.cmpf oge, %454, %455 : vector<16x128xf32>
    %457 = arith.extui %456 : vector<16x128xi1> to vector<16x128xi32>
    %458 = arith.sitofp %457 : vector<16x128xi32> to vector<16x128xf32>
    %459 = arith.addf %435, %458 : vector<16x128xf32>
    %cst_121 = arith.constant 1.000000e+00 : f32
    %460 = vector.broadcast %cst_121 : f32 to vector<16x128xf32>
    %461 = arith.mulf %460, %444 : vector<16x128xf32>
    %462 = arith.subf %440, %461 : vector<16x128xf32>
    %463 = arith.addf %462, %449 : vector<16x128xf32>
    %464 = arith.addf %463, %9 : vector<16x128xf32>
    %cst_122 = arith.constant 1.000000e+00 : f32
    %465 = vector.broadcast %cst_122 : f32 to vector<16x128xf32>
    %466 = arith.cmpf oge, %464, %465 : vector<16x128xf32>
    %467 = arith.extui %466 : vector<16x128xi1> to vector<16x128xi32>
    %468 = arith.sitofp %467 : vector<16x128xi32> to vector<16x128xf32>
    %469 = arith.addf %445, %468 : vector<16x128xf32>
    %c19_i32 = arith.constant 19 : i32
    %470 = arith.truncf %458 : vector<16x128xf32> to vector<16x128xbf16>
    %cst_123 = arith.constant dense<0.000000e+00> : vector<16x128xf32>
    %471 = tpu.matmul %470, %1, %cst_123 {dimension_numbers = #tpu.dot_dimension_numbers<[1], [0], [0], [1], [0, 0, 1, 1], [], []>} : vector<16x128xbf16>, vector<128x128xbf16>, vector<16x128xf32> -> vector<16x128xf32>
    %472 = arith.truncf %468 : vector<16x128xf32> to vector<16x128xbf16>
    %cst_124 = arith.constant dense<0.000000e+00> : vector<16x128xf32>
    %473 = tpu.matmul %472, %1, %cst_124 {dimension_numbers = #tpu.dot_dimension_numbers<[1], [0], [0], [1], [0, 0, 1, 1], [], []>} : vector<16x128xbf16>, vector<128x128xbf16>, vector<16x128xf32> -> vector<16x128xf32>
    %cst_125 = arith.constant 1.000000e+00 : f32
    %474 = vector.broadcast %cst_125 : f32 to vector<16x128xf32>
    %475 = arith.mulf %474, %458 : vector<16x128xf32>
    %476 = arith.subf %454, %475 : vector<16x128xf32>
    %477 = arith.addf %476, %471 : vector<16x128xf32>
    %478 = arith.addf %477, %3 : vector<16x128xf32>
    %cst_126 = arith.constant 1.000000e+00 : f32
    %479 = vector.broadcast %cst_126 : f32 to vector<16x128xf32>
    %480 = arith.cmpf oge, %478, %479 : vector<16x128xf32>
    %481 = arith.extui %480 : vector<16x128xi1> to vector<16x128xi32>
    %482 = arith.sitofp %481 : vector<16x128xi32> to vector<16x128xf32>
    %483 = arith.addf %459, %482 : vector<16x128xf32>
    %cst_127 = arith.constant 1.000000e+00 : f32
    %484 = vector.broadcast %cst_127 : f32 to vector<16x128xf32>
    %485 = arith.mulf %484, %468 : vector<16x128xf32>
    %486 = arith.subf %464, %485 : vector<16x128xf32>
    %487 = arith.addf %486, %473 : vector<16x128xf32>
    %488 = arith.addf %487, %9 : vector<16x128xf32>
    %cst_128 = arith.constant 1.000000e+00 : f32
    %489 = vector.broadcast %cst_128 : f32 to vector<16x128xf32>
    %490 = arith.cmpf oge, %488, %489 : vector<16x128xf32>
    %491 = arith.extui %490 : vector<16x128xi1> to vector<16x128xi32>
    %492 = arith.sitofp %491 : vector<16x128xi32> to vector<16x128xf32>
    %493 = arith.addf %469, %492 : vector<16x128xf32>
    %c20_i32 = arith.constant 20 : i32
    %494 = arith.truncf %482 : vector<16x128xf32> to vector<16x128xbf16>
    %cst_129 = arith.constant dense<0.000000e+00> : vector<16x128xf32>
    %495 = tpu.matmul %494, %1, %cst_129 {dimension_numbers = #tpu.dot_dimension_numbers<[1], [0], [0], [1], [0, 0, 1, 1], [], []>} : vector<16x128xbf16>, vector<128x128xbf16>, vector<16x128xf32> -> vector<16x128xf32>
    %496 = arith.truncf %492 : vector<16x128xf32> to vector<16x128xbf16>
    %cst_130 = arith.constant dense<0.000000e+00> : vector<16x128xf32>
    %497 = tpu.matmul %496, %1, %cst_130 {dimension_numbers = #tpu.dot_dimension_numbers<[1], [0], [0], [1], [0, 0, 1, 1], [], []>} : vector<16x128xbf16>, vector<128x128xbf16>, vector<16x128xf32> -> vector<16x128xf32>
    %cst_131 = arith.constant 1.000000e+00 : f32
    %498 = vector.broadcast %cst_131 : f32 to vector<16x128xf32>
    %499 = arith.mulf %498, %482 : vector<16x128xf32>
    %500 = arith.subf %478, %499 : vector<16x128xf32>
    %501 = arith.addf %500, %495 : vector<16x128xf32>
    %502 = arith.addf %501, %3 : vector<16x128xf32>
    %cst_132 = arith.constant 1.000000e+00 : f32
    %503 = vector.broadcast %cst_132 : f32 to vector<16x128xf32>
    %504 = arith.cmpf oge, %502, %503 : vector<16x128xf32>
    %505 = arith.extui %504 : vector<16x128xi1> to vector<16x128xi32>
    %506 = arith.sitofp %505 : vector<16x128xi32> to vector<16x128xf32>
    %507 = arith.addf %483, %506 : vector<16x128xf32>
    %cst_133 = arith.constant 1.000000e+00 : f32
    %508 = vector.broadcast %cst_133 : f32 to vector<16x128xf32>
    %509 = arith.mulf %508, %492 : vector<16x128xf32>
    %510 = arith.subf %488, %509 : vector<16x128xf32>
    %511 = arith.addf %510, %497 : vector<16x128xf32>
    %512 = arith.addf %511, %9 : vector<16x128xf32>
    %cst_134 = arith.constant 1.000000e+00 : f32
    %513 = vector.broadcast %cst_134 : f32 to vector<16x128xf32>
    %514 = arith.cmpf oge, %512, %513 : vector<16x128xf32>
    %515 = arith.extui %514 : vector<16x128xi1> to vector<16x128xi32>
    %516 = arith.sitofp %515 : vector<16x128xi32> to vector<16x128xf32>
    %517 = arith.addf %493, %516 : vector<16x128xf32>
    %c21_i32 = arith.constant 21 : i32
    %518 = arith.truncf %506 : vector<16x128xf32> to vector<16x128xbf16>
    %cst_135 = arith.constant dense<0.000000e+00> : vector<16x128xf32>
    %519 = tpu.matmul %518, %1, %cst_135 {dimension_numbers = #tpu.dot_dimension_numbers<[1], [0], [0], [1], [0, 0, 1, 1], [], []>} : vector<16x128xbf16>, vector<128x128xbf16>, vector<16x128xf32> -> vector<16x128xf32>
    %520 = arith.truncf %516 : vector<16x128xf32> to vector<16x128xbf16>
    %cst_136 = arith.constant dense<0.000000e+00> : vector<16x128xf32>
    %521 = tpu.matmul %520, %1, %cst_136 {dimension_numbers = #tpu.dot_dimension_numbers<[1], [0], [0], [1], [0, 0, 1, 1], [], []>} : vector<16x128xbf16>, vector<128x128xbf16>, vector<16x128xf32> -> vector<16x128xf32>
    %cst_137 = arith.constant 1.000000e+00 : f32
    %522 = vector.broadcast %cst_137 : f32 to vector<16x128xf32>
    %523 = arith.mulf %522, %506 : vector<16x128xf32>
    %524 = arith.subf %502, %523 : vector<16x128xf32>
    %525 = arith.addf %524, %519 : vector<16x128xf32>
    %526 = arith.addf %525, %3 : vector<16x128xf32>
    %cst_138 = arith.constant 1.000000e+00 : f32
    %527 = vector.broadcast %cst_138 : f32 to vector<16x128xf32>
    %528 = arith.cmpf oge, %526, %527 : vector<16x128xf32>
    %529 = arith.extui %528 : vector<16x128xi1> to vector<16x128xi32>
    %530 = arith.sitofp %529 : vector<16x128xi32> to vector<16x128xf32>
    %531 = arith.addf %507, %530 : vector<16x128xf32>
    %cst_139 = arith.constant 1.000000e+00 : f32
    %532 = vector.broadcast %cst_139 : f32 to vector<16x128xf32>
    %533 = arith.mulf %532, %516 : vector<16x128xf32>
    %534 = arith.subf %512, %533 : vector<16x128xf32>
    %535 = arith.addf %534, %521 : vector<16x128xf32>
    %536 = arith.addf %535, %9 : vector<16x128xf32>
    %cst_140 = arith.constant 1.000000e+00 : f32
    %537 = vector.broadcast %cst_140 : f32 to vector<16x128xf32>
    %538 = arith.cmpf oge, %536, %537 : vector<16x128xf32>
    %539 = arith.extui %538 : vector<16x128xi1> to vector<16x128xi32>
    %540 = arith.sitofp %539 : vector<16x128xi32> to vector<16x128xf32>
    %541 = arith.addf %517, %540 : vector<16x128xf32>
    %c22_i32 = arith.constant 22 : i32
    %542 = arith.truncf %530 : vector<16x128xf32> to vector<16x128xbf16>
    %cst_141 = arith.constant dense<0.000000e+00> : vector<16x128xf32>
    %543 = tpu.matmul %542, %1, %cst_141 {dimension_numbers = #tpu.dot_dimension_numbers<[1], [0], [0], [1], [0, 0, 1, 1], [], []>} : vector<16x128xbf16>, vector<128x128xbf16>, vector<16x128xf32> -> vector<16x128xf32>
    %544 = arith.truncf %540 : vector<16x128xf32> to vector<16x128xbf16>
    %cst_142 = arith.constant dense<0.000000e+00> : vector<16x128xf32>
    %545 = tpu.matmul %544, %1, %cst_142 {dimension_numbers = #tpu.dot_dimension_numbers<[1], [0], [0], [1], [0, 0, 1, 1], [], []>} : vector<16x128xbf16>, vector<128x128xbf16>, vector<16x128xf32> -> vector<16x128xf32>
    %cst_143 = arith.constant 1.000000e+00 : f32
    %546 = vector.broadcast %cst_143 : f32 to vector<16x128xf32>
    %547 = arith.mulf %546, %530 : vector<16x128xf32>
    %548 = arith.subf %526, %547 : vector<16x128xf32>
    %549 = arith.addf %548, %543 : vector<16x128xf32>
    %550 = arith.addf %549, %3 : vector<16x128xf32>
    %cst_144 = arith.constant 1.000000e+00 : f32
    %551 = vector.broadcast %cst_144 : f32 to vector<16x128xf32>
    %552 = arith.cmpf oge, %550, %551 : vector<16x128xf32>
    %553 = arith.extui %552 : vector<16x128xi1> to vector<16x128xi32>
    %554 = arith.sitofp %553 : vector<16x128xi32> to vector<16x128xf32>
    %555 = arith.addf %531, %554 : vector<16x128xf32>
    %cst_145 = arith.constant 1.000000e+00 : f32
    %556 = vector.broadcast %cst_145 : f32 to vector<16x128xf32>
    %557 = arith.mulf %556, %540 : vector<16x128xf32>
    %558 = arith.subf %536, %557 : vector<16x128xf32>
    %559 = arith.addf %558, %545 : vector<16x128xf32>
    %560 = arith.addf %559, %9 : vector<16x128xf32>
    %cst_146 = arith.constant 1.000000e+00 : f32
    %561 = vector.broadcast %cst_146 : f32 to vector<16x128xf32>
    %562 = arith.cmpf oge, %560, %561 : vector<16x128xf32>
    %563 = arith.extui %562 : vector<16x128xi1> to vector<16x128xi32>
    %564 = arith.sitofp %563 : vector<16x128xi32> to vector<16x128xf32>
    %565 = arith.addf %541, %564 : vector<16x128xf32>
    %c23_i32 = arith.constant 23 : i32
    %566 = arith.truncf %554 : vector<16x128xf32> to vector<16x128xbf16>
    %cst_147 = arith.constant dense<0.000000e+00> : vector<16x128xf32>
    %567 = tpu.matmul %566, %1, %cst_147 {dimension_numbers = #tpu.dot_dimension_numbers<[1], [0], [0], [1], [0, 0, 1, 1], [], []>} : vector<16x128xbf16>, vector<128x128xbf16>, vector<16x128xf32> -> vector<16x128xf32>
    %568 = arith.truncf %564 : vector<16x128xf32> to vector<16x128xbf16>
    %cst_148 = arith.constant dense<0.000000e+00> : vector<16x128xf32>
    %569 = tpu.matmul %568, %1, %cst_148 {dimension_numbers = #tpu.dot_dimension_numbers<[1], [0], [0], [1], [0, 0, 1, 1], [], []>} : vector<16x128xbf16>, vector<128x128xbf16>, vector<16x128xf32> -> vector<16x128xf32>
    %cst_149 = arith.constant 1.000000e+00 : f32
    %570 = vector.broadcast %cst_149 : f32 to vector<16x128xf32>
    %571 = arith.mulf %570, %554 : vector<16x128xf32>
    %572 = arith.subf %550, %571 : vector<16x128xf32>
    %573 = arith.addf %572, %567 : vector<16x128xf32>
    %574 = arith.addf %573, %3 : vector<16x128xf32>
    %cst_150 = arith.constant 1.000000e+00 : f32
    %575 = vector.broadcast %cst_150 : f32 to vector<16x128xf32>
    %576 = arith.cmpf oge, %574, %575 : vector<16x128xf32>
    %577 = arith.extui %576 : vector<16x128xi1> to vector<16x128xi32>
    %578 = arith.sitofp %577 : vector<16x128xi32> to vector<16x128xf32>
    %579 = arith.addf %555, %578 : vector<16x128xf32>
    %cst_151 = arith.constant 1.000000e+00 : f32
    %580 = vector.broadcast %cst_151 : f32 to vector<16x128xf32>
    %581 = arith.mulf %580, %564 : vector<16x128xf32>
    %582 = arith.subf %560, %581 : vector<16x128xf32>
    %583 = arith.addf %582, %569 : vector<16x128xf32>
    %584 = arith.addf %583, %9 : vector<16x128xf32>
    %cst_152 = arith.constant 1.000000e+00 : f32
    %585 = vector.broadcast %cst_152 : f32 to vector<16x128xf32>
    %586 = arith.cmpf oge, %584, %585 : vector<16x128xf32>
    %587 = arith.extui %586 : vector<16x128xi1> to vector<16x128xi32>
    %588 = arith.sitofp %587 : vector<16x128xi32> to vector<16x128xf32>
    %589 = arith.addf %565, %588 : vector<16x128xf32>
    %c24_i32 = arith.constant 24 : i32
    %590 = arith.truncf %578 : vector<16x128xf32> to vector<16x128xbf16>
    %cst_153 = arith.constant dense<0.000000e+00> : vector<16x128xf32>
    %591 = tpu.matmul %590, %1, %cst_153 {dimension_numbers = #tpu.dot_dimension_numbers<[1], [0], [0], [1], [0, 0, 1, 1], [], []>} : vector<16x128xbf16>, vector<128x128xbf16>, vector<16x128xf32> -> vector<16x128xf32>
    %592 = arith.truncf %588 : vector<16x128xf32> to vector<16x128xbf16>
    %cst_154 = arith.constant dense<0.000000e+00> : vector<16x128xf32>
    %593 = tpu.matmul %592, %1, %cst_154 {dimension_numbers = #tpu.dot_dimension_numbers<[1], [0], [0], [1], [0, 0, 1, 1], [], []>} : vector<16x128xbf16>, vector<128x128xbf16>, vector<16x128xf32> -> vector<16x128xf32>
    %cst_155 = arith.constant 1.000000e+00 : f32
    %594 = vector.broadcast %cst_155 : f32 to vector<16x128xf32>
    %595 = arith.mulf %594, %578 : vector<16x128xf32>
    %596 = arith.subf %574, %595 : vector<16x128xf32>
    %597 = arith.addf %596, %591 : vector<16x128xf32>
    %598 = arith.addf %597, %3 : vector<16x128xf32>
    %cst_156 = arith.constant 1.000000e+00 : f32
    %599 = vector.broadcast %cst_156 : f32 to vector<16x128xf32>
    %600 = arith.cmpf oge, %598, %599 : vector<16x128xf32>
    %601 = arith.extui %600 : vector<16x128xi1> to vector<16x128xi32>
    %602 = arith.sitofp %601 : vector<16x128xi32> to vector<16x128xf32>
    %603 = arith.addf %579, %602 : vector<16x128xf32>
    %cst_157 = arith.constant 1.000000e+00 : f32
    %604 = vector.broadcast %cst_157 : f32 to vector<16x128xf32>
    %605 = arith.mulf %604, %588 : vector<16x128xf32>
    %606 = arith.subf %584, %605 : vector<16x128xf32>
    %607 = arith.addf %606, %593 : vector<16x128xf32>
    %608 = arith.addf %607, %9 : vector<16x128xf32>
    %cst_158 = arith.constant 1.000000e+00 : f32
    %609 = vector.broadcast %cst_158 : f32 to vector<16x128xf32>
    %610 = arith.cmpf oge, %608, %609 : vector<16x128xf32>
    %611 = arith.extui %610 : vector<16x128xi1> to vector<16x128xi32>
    %612 = arith.sitofp %611 : vector<16x128xi32> to vector<16x128xf32>
    %613 = arith.addf %589, %612 : vector<16x128xf32>
    %c25_i32 = arith.constant 25 : i32
    %614 = arith.truncf %602 : vector<16x128xf32> to vector<16x128xbf16>
    %cst_159 = arith.constant dense<0.000000e+00> : vector<16x128xf32>
    %615 = tpu.matmul %614, %1, %cst_159 {dimension_numbers = #tpu.dot_dimension_numbers<[1], [0], [0], [1], [0, 0, 1, 1], [], []>} : vector<16x128xbf16>, vector<128x128xbf16>, vector<16x128xf32> -> vector<16x128xf32>
    %616 = arith.truncf %612 : vector<16x128xf32> to vector<16x128xbf16>
    %cst_160 = arith.constant dense<0.000000e+00> : vector<16x128xf32>
    %617 = tpu.matmul %616, %1, %cst_160 {dimension_numbers = #tpu.dot_dimension_numbers<[1], [0], [0], [1], [0, 0, 1, 1], [], []>} : vector<16x128xbf16>, vector<128x128xbf16>, vector<16x128xf32> -> vector<16x128xf32>
    %cst_161 = arith.constant 1.000000e+00 : f32
    %618 = vector.broadcast %cst_161 : f32 to vector<16x128xf32>
    %619 = arith.mulf %618, %602 : vector<16x128xf32>
    %620 = arith.subf %598, %619 : vector<16x128xf32>
    %621 = arith.addf %620, %615 : vector<16x128xf32>
    %622 = arith.addf %621, %3 : vector<16x128xf32>
    %cst_162 = arith.constant 1.000000e+00 : f32
    %623 = vector.broadcast %cst_162 : f32 to vector<16x128xf32>
    %624 = arith.cmpf oge, %622, %623 : vector<16x128xf32>
    %625 = arith.extui %624 : vector<16x128xi1> to vector<16x128xi32>
    %626 = arith.sitofp %625 : vector<16x128xi32> to vector<16x128xf32>
    %627 = arith.addf %603, %626 : vector<16x128xf32>
    %cst_163 = arith.constant 1.000000e+00 : f32
    %628 = vector.broadcast %cst_163 : f32 to vector<16x128xf32>
    %629 = arith.mulf %628, %612 : vector<16x128xf32>
    %630 = arith.subf %608, %629 : vector<16x128xf32>
    %631 = arith.addf %630, %617 : vector<16x128xf32>
    %632 = arith.addf %631, %9 : vector<16x128xf32>
    %cst_164 = arith.constant 1.000000e+00 : f32
    %633 = vector.broadcast %cst_164 : f32 to vector<16x128xf32>
    %634 = arith.cmpf oge, %632, %633 : vector<16x128xf32>
    %635 = arith.extui %634 : vector<16x128xi1> to vector<16x128xi32>
    %636 = arith.sitofp %635 : vector<16x128xi32> to vector<16x128xf32>
    %637 = arith.addf %613, %636 : vector<16x128xf32>
    %c26_i32 = arith.constant 26 : i32
    %638 = arith.truncf %626 : vector<16x128xf32> to vector<16x128xbf16>
    %cst_165 = arith.constant dense<0.000000e+00> : vector<16x128xf32>
    %639 = tpu.matmul %638, %1, %cst_165 {dimension_numbers = #tpu.dot_dimension_numbers<[1], [0], [0], [1], [0, 0, 1, 1], [], []>} : vector<16x128xbf16>, vector<128x128xbf16>, vector<16x128xf32> -> vector<16x128xf32>
    %640 = arith.truncf %636 : vector<16x128xf32> to vector<16x128xbf16>
    %cst_166 = arith.constant dense<0.000000e+00> : vector<16x128xf32>
    %641 = tpu.matmul %640, %1, %cst_166 {dimension_numbers = #tpu.dot_dimension_numbers<[1], [0], [0], [1], [0, 0, 1, 1], [], []>} : vector<16x128xbf16>, vector<128x128xbf16>, vector<16x128xf32> -> vector<16x128xf32>
    %cst_167 = arith.constant 1.000000e+00 : f32
    %642 = vector.broadcast %cst_167 : f32 to vector<16x128xf32>
    %643 = arith.mulf %642, %626 : vector<16x128xf32>
    %644 = arith.subf %622, %643 : vector<16x128xf32>
    %645 = arith.addf %644, %639 : vector<16x128xf32>
    %646 = arith.addf %645, %3 : vector<16x128xf32>
    %cst_168 = arith.constant 1.000000e+00 : f32
    %647 = vector.broadcast %cst_168 : f32 to vector<16x128xf32>
    %648 = arith.cmpf oge, %646, %647 : vector<16x128xf32>
    %649 = arith.extui %648 : vector<16x128xi1> to vector<16x128xi32>
    %650 = arith.sitofp %649 : vector<16x128xi32> to vector<16x128xf32>
    %651 = arith.addf %627, %650 : vector<16x128xf32>
    %cst_169 = arith.constant 1.000000e+00 : f32
    %652 = vector.broadcast %cst_169 : f32 to vector<16x128xf32>
    %653 = arith.mulf %652, %636 : vector<16x128xf32>
    %654 = arith.subf %632, %653 : vector<16x128xf32>
    %655 = arith.addf %654, %641 : vector<16x128xf32>
    %656 = arith.addf %655, %9 : vector<16x128xf32>
    %cst_170 = arith.constant 1.000000e+00 : f32
    %657 = vector.broadcast %cst_170 : f32 to vector<16x128xf32>
    %658 = arith.cmpf oge, %656, %657 : vector<16x128xf32>
    %659 = arith.extui %658 : vector<16x128xi1> to vector<16x128xi32>
    %660 = arith.sitofp %659 : vector<16x128xi32> to vector<16x128xf32>
    %661 = arith.addf %637, %660 : vector<16x128xf32>
    %c27_i32 = arith.constant 27 : i32
    %662 = arith.truncf %650 : vector<16x128xf32> to vector<16x128xbf16>
    %cst_171 = arith.constant dense<0.000000e+00> : vector<16x128xf32>
    %663 = tpu.matmul %662, %1, %cst_171 {dimension_numbers = #tpu.dot_dimension_numbers<[1], [0], [0], [1], [0, 0, 1, 1], [], []>} : vector<16x128xbf16>, vector<128x128xbf16>, vector<16x128xf32> -> vector<16x128xf32>
    %664 = arith.truncf %660 : vector<16x128xf32> to vector<16x128xbf16>
    %cst_172 = arith.constant dense<0.000000e+00> : vector<16x128xf32>
    %665 = tpu.matmul %664, %1, %cst_172 {dimension_numbers = #tpu.dot_dimension_numbers<[1], [0], [0], [1], [0, 0, 1, 1], [], []>} : vector<16x128xbf16>, vector<128x128xbf16>, vector<16x128xf32> -> vector<16x128xf32>
    %cst_173 = arith.constant 1.000000e+00 : f32
    %666 = vector.broadcast %cst_173 : f32 to vector<16x128xf32>
    %667 = arith.mulf %666, %650 : vector<16x128xf32>
    %668 = arith.subf %646, %667 : vector<16x128xf32>
    %669 = arith.addf %668, %663 : vector<16x128xf32>
    %670 = arith.addf %669, %3 : vector<16x128xf32>
    %cst_174 = arith.constant 1.000000e+00 : f32
    %671 = vector.broadcast %cst_174 : f32 to vector<16x128xf32>
    %672 = arith.cmpf oge, %670, %671 : vector<16x128xf32>
    %673 = arith.extui %672 : vector<16x128xi1> to vector<16x128xi32>
    %674 = arith.sitofp %673 : vector<16x128xi32> to vector<16x128xf32>
    %675 = arith.addf %651, %674 : vector<16x128xf32>
    %cst_175 = arith.constant 1.000000e+00 : f32
    %676 = vector.broadcast %cst_175 : f32 to vector<16x128xf32>
    %677 = arith.mulf %676, %660 : vector<16x128xf32>
    %678 = arith.subf %656, %677 : vector<16x128xf32>
    %679 = arith.addf %678, %665 : vector<16x128xf32>
    %680 = arith.addf %679, %9 : vector<16x128xf32>
    %cst_176 = arith.constant 1.000000e+00 : f32
    %681 = vector.broadcast %cst_176 : f32 to vector<16x128xf32>
    %682 = arith.cmpf oge, %680, %681 : vector<16x128xf32>
    %683 = arith.extui %682 : vector<16x128xi1> to vector<16x128xi32>
    %684 = arith.sitofp %683 : vector<16x128xi32> to vector<16x128xf32>
    %685 = arith.addf %661, %684 : vector<16x128xf32>
    %c28_i32 = arith.constant 28 : i32
    %686 = arith.truncf %674 : vector<16x128xf32> to vector<16x128xbf16>
    %cst_177 = arith.constant dense<0.000000e+00> : vector<16x128xf32>
    %687 = tpu.matmul %686, %1, %cst_177 {dimension_numbers = #tpu.dot_dimension_numbers<[1], [0], [0], [1], [0, 0, 1, 1], [], []>} : vector<16x128xbf16>, vector<128x128xbf16>, vector<16x128xf32> -> vector<16x128xf32>
    %688 = arith.truncf %684 : vector<16x128xf32> to vector<16x128xbf16>
    %cst_178 = arith.constant dense<0.000000e+00> : vector<16x128xf32>
    %689 = tpu.matmul %688, %1, %cst_178 {dimension_numbers = #tpu.dot_dimension_numbers<[1], [0], [0], [1], [0, 0, 1, 1], [], []>} : vector<16x128xbf16>, vector<128x128xbf16>, vector<16x128xf32> -> vector<16x128xf32>
    %cst_179 = arith.constant 1.000000e+00 : f32
    %690 = vector.broadcast %cst_179 : f32 to vector<16x128xf32>
    %691 = arith.mulf %690, %674 : vector<16x128xf32>
    %692 = arith.subf %670, %691 : vector<16x128xf32>
    %693 = arith.addf %692, %687 : vector<16x128xf32>
    %694 = arith.addf %693, %3 : vector<16x128xf32>
    %cst_180 = arith.constant 1.000000e+00 : f32
    %695 = vector.broadcast %cst_180 : f32 to vector<16x128xf32>
    %696 = arith.cmpf oge, %694, %695 : vector<16x128xf32>
    %697 = arith.extui %696 : vector<16x128xi1> to vector<16x128xi32>
    %698 = arith.sitofp %697 : vector<16x128xi32> to vector<16x128xf32>
    %699 = arith.addf %675, %698 : vector<16x128xf32>
    %cst_181 = arith.constant 1.000000e+00 : f32
    %700 = vector.broadcast %cst_181 : f32 to vector<16x128xf32>
    %701 = arith.mulf %700, %684 : vector<16x128xf32>
    %702 = arith.subf %680, %701 : vector<16x128xf32>
    %703 = arith.addf %702, %689 : vector<16x128xf32>
    %704 = arith.addf %703, %9 : vector<16x128xf32>
    %cst_182 = arith.constant 1.000000e+00 : f32
    %705 = vector.broadcast %cst_182 : f32 to vector<16x128xf32>
    %706 = arith.cmpf oge, %704, %705 : vector<16x128xf32>
    %707 = arith.extui %706 : vector<16x128xi1> to vector<16x128xi32>
    %708 = arith.sitofp %707 : vector<16x128xi32> to vector<16x128xf32>
    %709 = arith.addf %685, %708 : vector<16x128xf32>
    %cst_183 = arith.constant 0.0333333351 : f32
    %710 = vector.broadcast %cst_183 : f32 to vector<16x128xf32>
    %711 = arith.mulf %699, %710 : vector<16x128xf32>
    %c0_184 = arith.constant 0 : index
    %c0_185 = arith.constant 0 : index
    %712 = vector.load %arg4[%c0_184, %c0_185] : memref<32x128xf32, #tpu.memory_space<vmem>>, vector<16x128xf32>
    tpu.vector_store %arg4[%c0_184, %c0_185], %711 {strides = array<i32>} : memref<32x128xf32, #tpu.memory_space<vmem>>, vector<16x128xf32>,
    %cst_186 = arith.constant 0.0333333351 : f32
    %713 = vector.broadcast %cst_186 : f32 to vector<16x128xf32>
    %714 = arith.mulf %709, %713 : vector<16x128xf32>
    %c16_187 = arith.constant 16 : index
    %c0_188 = arith.constant 0 : index
    %715 = vector.load %arg4[%c16_187, %c0_188] : memref<32x128xf32, #tpu.memory_space<vmem>>, vector<16x128xf32>
    tpu.vector_store %arg4[%c16_187, %c0_188], %714 {strides = array<i32>} : memref<32x128xf32, #tpu.memory_space<vmem>>, vector<16x128xf32>,
    return
  }
  func.func @transform_0(%arg0: i32) -> (i32, i32) {
    %c0_i32 = arith.constant 0 : i32
    %c0_i32_0 = arith.constant 0 : i32
    return %arg0, %c0_i32 : i32, i32
  }
  func.func @transform_1(%arg0: i32) -> (i32, i32) {
    %c0_i32 = arith.constant 0 : i32
    %c0_i32_0 = arith.constant 0 : i32
    %c0_i32_1 = arith.constant 0 : i32
    return %c0_i32, %c0_i32_0 : i32, i32
  }
  func.func @transform_2(%arg0: i32) -> (i32, i32) {
    %c0_i32 = arith.constant 0 : i32
    %c0_i32_0 = arith.constant 0 : i32
    %c0_i32_1 = arith.constant 0 : i32
    return %c0_i32, %c0_i32_0 : i32, i32
  }
  func.func @transform_3(%arg0: i32) -> (i32, i32) {
    %c0_i32 = arith.constant 0 : i32
    %c0_i32_0 = arith.constant 0 : i32
    return %arg0, %c0_i32 : i32, i32
  }
}

module attributes {stable_mosaic.version = 11 : i64} {
  func.func @_snn_spide_kernel(%arg0: i32, %arg1: memref<32x32xf32, #tpu.memory_space<vmem>>, %arg2: memref<32x128xf32, #tpu.memory_space<vmem>>, %arg3: memref<128x128xbf16, #tpu.memory_space<vmem>>, %arg4: memref<32x128xf32, #tpu.memory_space<vmem>>) attributes {dimension_semantics = [#tpu.dimension_semantics<parallel>], iteration_bounds = array<i64: 2>, scalar_prefetch = 0 : i64, scratch_operands = 0 : i64, tpu.core_type = #tpu.core_type<tc>, window_params = [{transform_indices = @transform_0, window_bounds = array<i64: 32, 32>}, {pipeline_mode = #tpu.pipeline_mode<synchronous>, transform_indices = @transform_1, window_bounds = array<i64: 32, 128>}, {pipeline_mode = #tpu.pipeline_mode<synchronous>, transform_indices = @transform_2, window_bounds = array<i64: 128, 128>}, {transform_indices = @transform_3, window_bounds = array<i64: 32, 128>}]} {
    %c0 = arith.constant 0 : index
    %c0_0 = arith.constant 0 : index
    %0 = vector.load %arg2[%c0, %c0_0] : memref<32x128xf32, #tpu.memory_space<vmem>>, vector<32x128xf32>
    %c0_1 = arith.constant 0 : index
    %c0_2 = arith.constant 0 : index
    %1 = vector.load %arg3[%c0_1, %c0_2] : memref<128x128xbf16, #tpu.memory_space<vmem>>, vector<128x128xbf16>
    %c0_3 = arith.constant 0 : index
    %c0_4 = arith.constant 0 : index
    %2 = vector.load %arg1[%c0_3, %c0_4] : memref<32x32xf32, #tpu.memory_space<vmem>>, vector<16x32xf32>
    %cst = arith.constant dense<0.000000e+00> : vector<16x128xf32>
    %3 = tpu.matmul %2, %0, %cst {dimension_numbers = #tpu.dot_dimension_numbers<[1], [0], [0], [1], [0, 0, 1, 1], [], []>} : vector<16x32xf32>, vector<32x128xf32>, vector<16x128xf32> -> vector<16x128xf32>
    %cst_5 = arith.constant 1.000000e+00 : f32
    %4 = vector.broadcast %cst_5 : f32 to vector<16x128xf32>
    %5 = arith.cmpf oge, %3, %4 : vector<16x128xf32>
    %6 = arith.extui %5 : vector<16x128xi1> to vector<16x128xi32>
    %7 = arith.sitofp %6 : vector<16x128xi32> to vector<16x128xf32>
    %c16 = arith.constant 16 : index
    %c0_6 = arith.constant 0 : index
    %8 = vector.load %arg1[%c16, %c0_6] : memref<32x32xf32, #tpu.memory_space<vmem>>, vector<16x32xf32>
    %cst_7 = arith.constant dense<0.000000e+00> : vector<16x128xf32>
    %9 = tpu.matmul %8, %0, %cst_7 {dimension_numbers = #tpu.dot_dimension_numbers<[1], [0], [0], [1], [0, 0, 1, 1], [], []>} : vector<16x32xf32>, vector<32x128xf32>, vector<16x128xf32> -> vector<16x128xf32>
    %cst_8 = arith.constant 1.000000e+00 : f32
    %10 = vector.broadcast %cst_8 : f32 to vector<16x128xf32>
    %11 = arith.cmpf oge, %9, %10 : vector<16x128xf32>
    %12 = arith.extui %11 : vector<16x128xi1> to vector<16x128xi32>
    %13 = arith.sitofp %12 : vector<16x128xi32> to vector<16x128xf32>
    %c0_i32 = arith.constant 0 : i32
    %14 = arith.truncf %7 : vector<16x128xf32> to vector<16x128xbf16>
    %cst_9 = arith.constant dense<0.000000e+00> : vector<16x128xf32>
    %15 = tpu.matmul %14, %1, %cst_9 {dimension_numbers = #tpu.dot_dimension_numbers<[1], [0], [0], [1], [0, 0, 1, 1], [], []>} : vector<16x128xbf16>, vector<128x128xbf16>, vector<16x128xf32> -> vector<16x128xf32>
    %16 = arith.truncf %13 : vector<16x128xf32> to vector<16x128xbf16>
    %cst_10 = arith.constant dense<0.000000e+00> : vector<16x128xf32>
    %17 = tpu.matmul %16, %1, %cst_10 {dimension_numbers = #tpu.dot_dimension_numbers<[1], [0], [0], [1], [0, 0, 1, 1], [], []>} : vector<16x128xbf16>, vector<128x128xbf16>, vector<16x128xf32> -> vector<16x128xf32>
    %cst_11 = arith.constant 1.000000e+00 : f32
    %18 = vector.broadcast %cst_11 : f32 to vector<16x128xf32>
    %19 = arith.mulf %18, %7 : vector<16x128xf32>
    %20 = arith.subf %3, %19 : vector<16x128xf32>
    %21 = arith.addf %20, %15 : vector<16x128xf32>
    %22 = arith.addf %21, %3 : vector<16x128xf32>
    %cst_12 = arith.constant 1.000000e+00 : f32
    %23 = vector.broadcast %cst_12 : f32 to vector<16x128xf32>
    %24 = arith.cmpf oge, %22, %23 : vector<16x128xf32>
    %25 = arith.extui %24 : vector<16x128xi1> to vector<16x128xi32>
    %26 = arith.sitofp %25 : vector<16x128xi32> to vector<16x128xf32>
    %27 = arith.addf %7, %26 : vector<16x128xf32>
    %cst_13 = arith.constant 1.000000e+00 : f32
    %28 = vector.broadcast %cst_13 : f32 to vector<16x128xf32>
    %29 = arith.mulf %28, %13 : vector<16x128xf32>
    %30 = arith.subf %9, %29 : vector<16x128xf32>
    %31 = arith.addf %30, %17 : vector<16x128xf32>
    %32 = arith.addf %31, %9 : vector<16x128xf32>
    %cst_14 = arith.constant 1.000000e+00 : f32
    %33 = vector.broadcast %cst_14 : f32 to vector<16x128xf32>
    %34 = arith.cmpf oge, %32, %33 : vector<16x128xf32>
    %35 = arith.extui %34 : vector<16x128xi1> to vector<16x128xi32>
    %36 = arith.sitofp %35 : vector<16x128xi32> to vector<16x128xf32>
    %37 = arith.addf %13, %36 : vector<16x128xf32>
    %c1_i32 = arith.constant 1 : i32
    %38 = arith.truncf %26 : vector<16x128xf32> to vector<16x128xbf16>
    %cst_15 = arith.constant dense<0.000000e+00> : vector<16x128xf32>
    %39 = tpu.matmul %38, %1, %cst_15 {dimension_numbers = #tpu.dot_dimension_numbers<[1], [0], [0], [1], [0, 0, 1, 1], [], []>} : vector<16x128xbf16>, vector<128x128xbf16>, vector<16x128xf32> -> vector<16x128xf32>
    %40 = arith.truncf %36 : vector<16x128xf32> to vector<16x128xbf16>
    %cst_16 = arith.constant dense<0.000000e+00> : vector<16x128xf32>
    %41 = tpu.matmul %40, %1, %cst_16 {dimension_numbers = #tpu.dot_dimension_numbers<[1], [0], [0], [1], [0, 0, 1, 1], [], []>} : vector<16x128xbf16>, vector<128x128xbf16>, vector<16x128xf32> -> vector<16x128xf32>
    %cst_17 = arith.constant 1.000000e+00 : f32
    %42 = vector.broadcast %cst_17 : f32 to vector<16x128xf32>
    %43 = arith.mulf %42, %26 : vector<16x128xf32>
    %44 = arith.subf %22, %43 : vector<16x128xf32>
    %45 = arith.addf %44, %39 : vector<16x128xf32>
    %46 = arith.addf %45, %3 : vector<16x128xf32>
    %cst_18 = arith.constant 1.000000e+00 : f32
    %47 = vector.broadcast %cst_18 : f32 to vector<16x128xf32>
    %48 = arith.cmpf oge, %46, %47 : vector<16x128xf32>
    %49 = arith.extui %48 : vector<16x128xi1> to vector<16x128xi32>
    %50 = arith.sitofp %49 : vector<16x128xi32> to vector<16x128xf32>
    %51 = arith.addf %27, %50 : vector<16x128xf32>
    %cst_19 = arith.constant 1.000000e+00 : f32
    %52 = vector.broadcast %cst_19 : f32 to vector<16x128xf32>
    %53 = arith.mulf %52, %36 : vector<16x128xf32>
    %54 = arith.subf %32, %53 : vector<16x128xf32>
    %55 = arith.addf %54, %41 : vector<16x128xf32>
    %56 = arith.addf %55, %9 : vector<16x128xf32>
    %cst_20 = arith.constant 1.000000e+00 : f32
    %57 = vector.broadcast %cst_20 : f32 to vector<16x128xf32>
    %58 = arith.cmpf oge, %56, %57 : vector<16x128xf32>
    %59 = arith.extui %58 : vector<16x128xi1> to vector<16x128xi32>
    %60 = arith.sitofp %59 : vector<16x128xi32> to vector<16x128xf32>
    %61 = arith.addf %37, %60 : vector<16x128xf32>
    %c2_i32 = arith.constant 2 : i32
    %62 = arith.truncf %50 : vector<16x128xf32> to vector<16x128xbf16>
    %cst_21 = arith.constant dense<0.000000e+00> : vector<16x128xf32>
    %63 = tpu.matmul %62, %1, %cst_21 {dimension_numbers = #tpu.dot_dimension_numbers<[1], [0], [0], [1], [0, 0, 1, 1], [], []>} : vector<16x128xbf16>, vector<128x128xbf16>, vector<16x128xf32> -> vector<16x128xf32>
    %64 = arith.truncf %60 : vector<16x128xf32> to vector<16x128xbf16>
    %cst_22 = arith.constant dense<0.000000e+00> : vector<16x128xf32>
    %65 = tpu.matmul %64, %1, %cst_22 {dimension_numbers = #tpu.dot_dimension_numbers<[1], [0], [0], [1], [0, 0, 1, 1], [], []>} : vector<16x128xbf16>, vector<128x128xbf16>, vector<16x128xf32> -> vector<16x128xf32>
    %cst_23 = arith.constant 1.000000e+00 : f32
    %66 = vector.broadcast %cst_23 : f32 to vector<16x128xf32>
    %67 = arith.mulf %66, %50 : vector<16x128xf32>
    %68 = arith.subf %46, %67 : vector<16x128xf32>
    %69 = arith.addf %68, %63 : vector<16x128xf32>
    %70 = arith.addf %69, %3 : vector<16x128xf32>
    %cst_24 = arith.constant 1.000000e+00 : f32
    %71 = vector.broadcast %cst_24 : f32 to vector<16x128xf32>
    %72 = arith.cmpf oge, %70, %71 : vector<16x128xf32>
    %73 = arith.extui %72 : vector<16x128xi1> to vector<16x128xi32>
    %74 = arith.sitofp %73 : vector<16x128xi32> to vector<16x128xf32>
    %75 = arith.addf %51, %74 : vector<16x128xf32>
    %cst_25 = arith.constant 1.000000e+00 : f32
    %76 = vector.broadcast %cst_25 : f32 to vector<16x128xf32>
    %77 = arith.mulf %76, %60 : vector<16x128xf32>
    %78 = arith.subf %56, %77 : vector<16x128xf32>
    %79 = arith.addf %78, %65 : vector<16x128xf32>
    %80 = arith.addf %79, %9 : vector<16x128xf32>
    %cst_26 = arith.constant 1.000000e+00 : f32
    %81 = vector.broadcast %cst_26 : f32 to vector<16x128xf32>
    %82 = arith.cmpf oge, %80, %81 : vector<16x128xf32>
    %83 = arith.extui %82 : vector<16x128xi1> to vector<16x128xi32>
    %84 = arith.sitofp %83 : vector<16x128xi32> to vector<16x128xf32>
    %85 = arith.addf %61, %84 : vector<16x128xf32>
    %c3_i32 = arith.constant 3 : i32
    %86 = arith.truncf %74 : vector<16x128xf32> to vector<16x128xbf16>
    %cst_27 = arith.constant dense<0.000000e+00> : vector<16x128xf32>
    %87 = tpu.matmul %86, %1, %cst_27 {dimension_numbers = #tpu.dot_dimension_numbers<[1], [0], [0], [1], [0, 0, 1, 1], [], []>} : vector<16x128xbf16>, vector<128x128xbf16>, vector<16x128xf32> -> vector<16x128xf32>
    %88 = arith.truncf %84 : vector<16x128xf32> to vector<16x128xbf16>
    %cst_28 = arith.constant dense<0.000000e+00> : vector<16x128xf32>
    %89 = tpu.matmul %88, %1, %cst_28 {dimension_numbers = #tpu.dot_dimension_numbers<[1], [0], [0], [1], [0, 0, 1, 1], [], []>} : vector<16x128xbf16>, vector<128x128xbf16>, vector<16x128xf32> -> vector<16x128xf32>
    %cst_29 = arith.constant 1.000000e+00 : f32
    %90 = vector.broadcast %cst_29 : f32 to vector<16x128xf32>
    %91 = arith.mulf %90, %74 : vector<16x128xf32>
    %92 = arith.subf %70, %91 : vector<16x128xf32>
    %93 = arith.addf %92, %87 : vector<16x128xf32>
    %94 = arith.addf %93, %3 : vector<16x128xf32>
    %cst_30 = arith.constant 1.000000e+00 : f32
    %95 = vector.broadcast %cst_30 : f32 to vector<16x128xf32>
    %96 = arith.cmpf oge, %94, %95 : vector<16x128xf32>
    %97 = arith.extui %96 : vector<16x128xi1> to vector<16x128xi32>
    %98 = arith.sitofp %97 : vector<16x128xi32> to vector<16x128xf32>
    %99 = arith.addf %75, %98 : vector<16x128xf32>
    %cst_31 = arith.constant 1.000000e+00 : f32
    %100 = vector.broadcast %cst_31 : f32 to vector<16x128xf32>
    %101 = arith.mulf %100, %84 : vector<16x128xf32>
    %102 = arith.subf %80, %101 : vector<16x128xf32>
    %103 = arith.addf %102, %89 : vector<16x128xf32>
    %104 = arith.addf %103, %9 : vector<16x128xf32>
    %cst_32 = arith.constant 1.000000e+00 : f32
    %105 = vector.broadcast %cst_32 : f32 to vector<16x128xf32>
    %106 = arith.cmpf oge, %104, %105 : vector<16x128xf32>
    %107 = arith.extui %106 : vector<16x128xi1> to vector<16x128xi32>
    %108 = arith.sitofp %107 : vector<16x128xi32> to vector<16x128xf32>
    %109 = arith.addf %85, %108 : vector<16x128xf32>
    %c4_i32 = arith.constant 4 : i32
    %110 = arith.truncf %98 : vector<16x128xf32> to vector<16x128xbf16>
    %cst_33 = arith.constant dense<0.000000e+00> : vector<16x128xf32>
    %111 = tpu.matmul %110, %1, %cst_33 {dimension_numbers = #tpu.dot_dimension_numbers<[1], [0], [0], [1], [0, 0, 1, 1], [], []>} : vector<16x128xbf16>, vector<128x128xbf16>, vector<16x128xf32> -> vector<16x128xf32>
    %112 = arith.truncf %108 : vector<16x128xf32> to vector<16x128xbf16>
    %cst_34 = arith.constant dense<0.000000e+00> : vector<16x128xf32>
    %113 = tpu.matmul %112, %1, %cst_34 {dimension_numbers = #tpu.dot_dimension_numbers<[1], [0], [0], [1], [0, 0, 1, 1], [], []>} : vector<16x128xbf16>, vector<128x128xbf16>, vector<16x128xf32> -> vector<16x128xf32>
    %cst_35 = arith.constant 1.000000e+00 : f32
    %114 = vector.broadcast %cst_35 : f32 to vector<16x128xf32>
    %115 = arith.mulf %114, %98 : vector<16x128xf32>
    %116 = arith.subf %94, %115 : vector<16x128xf32>
    %117 = arith.addf %116, %111 : vector<16x128xf32>
    %118 = arith.addf %117, %3 : vector<16x128xf32>
    %cst_36 = arith.constant 1.000000e+00 : f32
    %119 = vector.broadcast %cst_36 : f32 to vector<16x128xf32>
    %120 = arith.cmpf oge, %118, %119 : vector<16x128xf32>
    %121 = arith.extui %120 : vector<16x128xi1> to vector<16x128xi32>
    %122 = arith.sitofp %121 : vector<16x128xi32> to vector<16x128xf32>
    %123 = arith.addf %99, %122 : vector<16x128xf32>
    %cst_37 = arith.constant 1.000000e+00 : f32
    %124 = vector.broadcast %cst_37 : f32 to vector<16x128xf32>
    %125 = arith.mulf %124, %108 : vector<16x128xf32>
    %126 = arith.subf %104, %125 : vector<16x128xf32>
    %127 = arith.addf %126, %113 : vector<16x128xf32>
    %128 = arith.addf %127, %9 : vector<16x128xf32>
    %cst_38 = arith.constant 1.000000e+00 : f32
    %129 = vector.broadcast %cst_38 : f32 to vector<16x128xf32>
    %130 = arith.cmpf oge, %128, %129 : vector<16x128xf32>
    %131 = arith.extui %130 : vector<16x128xi1> to vector<16x128xi32>
    %132 = arith.sitofp %131 : vector<16x128xi32> to vector<16x128xf32>
    %133 = arith.addf %109, %132 : vector<16x128xf32>
    %c5_i32 = arith.constant 5 : i32
    %134 = arith.truncf %122 : vector<16x128xf32> to vector<16x128xbf16>
    %cst_39 = arith.constant dense<0.000000e+00> : vector<16x128xf32>
    %135 = tpu.matmul %134, %1, %cst_39 {dimension_numbers = #tpu.dot_dimension_numbers<[1], [0], [0], [1], [0, 0, 1, 1], [], []>} : vector<16x128xbf16>, vector<128x128xbf16>, vector<16x128xf32> -> vector<16x128xf32>
    %136 = arith.truncf %132 : vector<16x128xf32> to vector<16x128xbf16>
    %cst_40 = arith.constant dense<0.000000e+00> : vector<16x128xf32>
    %137 = tpu.matmul %136, %1, %cst_40 {dimension_numbers = #tpu.dot_dimension_numbers<[1], [0], [0], [1], [0, 0, 1, 1], [], []>} : vector<16x128xbf16>, vector<128x128xbf16>, vector<16x128xf32> -> vector<16x128xf32>
    %cst_41 = arith.constant 1.000000e+00 : f32
    %138 = vector.broadcast %cst_41 : f32 to vector<16x128xf32>
    %139 = arith.mulf %138, %122 : vector<16x128xf32>
    %140 = arith.subf %118, %139 : vector<16x128xf32>
    %141 = arith.addf %140, %135 : vector<16x128xf32>
    %142 = arith.addf %141, %3 : vector<16x128xf32>
    %cst_42 = arith.constant 1.000000e+00 : f32
    %143 = vector.broadcast %cst_42 : f32 to vector<16x128xf32>
    %144 = arith.cmpf oge, %142, %143 : vector<16x128xf32>
    %145 = arith.extui %144 : vector<16x128xi1> to vector<16x128xi32>
    %146 = arith.sitofp %145 : vector<16x128xi32> to vector<16x128xf32>
    %147 = arith.addf %123, %146 : vector<16x128xf32>
    %cst_43 = arith.constant 1.000000e+00 : f32
    %148 = vector.broadcast %cst_43 : f32 to vector<16x128xf32>
    %149 = arith.mulf %148, %132 : vector<16x128xf32>
    %150 = arith.subf %128, %149 : vector<16x128xf32>
    %151 = arith.addf %150, %137 : vector<16x128xf32>
    %152 = arith.addf %151, %9 : vector<16x128xf32>
    %cst_44 = arith.constant 1.000000e+00 : f32
    %153 = vector.broadcast %cst_44 : f32 to vector<16x128xf32>
    %154 = arith.cmpf oge, %152, %153 : vector<16x128xf32>
    %155 = arith.extui %154 : vector<16x128xi1> to vector<16x128xi32>
    %156 = arith.sitofp %155 : vector<16x128xi32> to vector<16x128xf32>
    %157 = arith.addf %133, %156 : vector<16x128xf32>
    %c6_i32 = arith.constant 6 : i32
    %158 = arith.truncf %146 : vector<16x128xf32> to vector<16x128xbf16>
    %cst_45 = arith.constant dense<0.000000e+00> : vector<16x128xf32>
    %159 = tpu.matmul %158, %1, %cst_45 {dimension_numbers = #tpu.dot_dimension_numbers<[1], [0], [0], [1], [0, 0, 1, 1], [], []>} : vector<16x128xbf16>, vector<128x128xbf16>, vector<16x128xf32> -> vector<16x128xf32>
    %160 = arith.truncf %156 : vector<16x128xf32> to vector<16x128xbf16>
    %cst_46 = arith.constant dense<0.000000e+00> : vector<16x128xf32>
    %161 = tpu.matmul %160, %1, %cst_46 {dimension_numbers = #tpu.dot_dimension_numbers<[1], [0], [0], [1], [0, 0, 1, 1], [], []>} : vector<16x128xbf16>, vector<128x128xbf16>, vector<16x128xf32> -> vector<16x128xf32>
    %cst_47 = arith.constant 1.000000e+00 : f32
    %162 = vector.broadcast %cst_47 : f32 to vector<16x128xf32>
    %163 = arith.mulf %162, %146 : vector<16x128xf32>
    %164 = arith.subf %142, %163 : vector<16x128xf32>
    %165 = arith.addf %164, %159 : vector<16x128xf32>
    %166 = arith.addf %165, %3 : vector<16x128xf32>
    %cst_48 = arith.constant 1.000000e+00 : f32
    %167 = vector.broadcast %cst_48 : f32 to vector<16x128xf32>
    %168 = arith.cmpf oge, %166, %167 : vector<16x128xf32>
    %169 = arith.extui %168 : vector<16x128xi1> to vector<16x128xi32>
    %170 = arith.sitofp %169 : vector<16x128xi32> to vector<16x128xf32>
    %171 = arith.addf %147, %170 : vector<16x128xf32>
    %cst_49 = arith.constant 1.000000e+00 : f32
    %172 = vector.broadcast %cst_49 : f32 to vector<16x128xf32>
    %173 = arith.mulf %172, %156 : vector<16x128xf32>
    %174 = arith.subf %152, %173 : vector<16x128xf32>
    %175 = arith.addf %174, %161 : vector<16x128xf32>
    %176 = arith.addf %175, %9 : vector<16x128xf32>
    %cst_50 = arith.constant 1.000000e+00 : f32
    %177 = vector.broadcast %cst_50 : f32 to vector<16x128xf32>
    %178 = arith.cmpf oge, %176, %177 : vector<16x128xf32>
    %179 = arith.extui %178 : vector<16x128xi1> to vector<16x128xi32>
    %180 = arith.sitofp %179 : vector<16x128xi32> to vector<16x128xf32>
    %181 = arith.addf %157, %180 : vector<16x128xf32>
    %c7_i32 = arith.constant 7 : i32
    %182 = arith.truncf %170 : vector<16x128xf32> to vector<16x128xbf16>
    %cst_51 = arith.constant dense<0.000000e+00> : vector<16x128xf32>
    %183 = tpu.matmul %182, %1, %cst_51 {dimension_numbers = #tpu.dot_dimension_numbers<[1], [0], [0], [1], [0, 0, 1, 1], [], []>} : vector<16x128xbf16>, vector<128x128xbf16>, vector<16x128xf32> -> vector<16x128xf32>
    %184 = arith.truncf %180 : vector<16x128xf32> to vector<16x128xbf16>
    %cst_52 = arith.constant dense<0.000000e+00> : vector<16x128xf32>
    %185 = tpu.matmul %184, %1, %cst_52 {dimension_numbers = #tpu.dot_dimension_numbers<[1], [0], [0], [1], [0, 0, 1, 1], [], []>} : vector<16x128xbf16>, vector<128x128xbf16>, vector<16x128xf32> -> vector<16x128xf32>
    %cst_53 = arith.constant 1.000000e+00 : f32
    %186 = vector.broadcast %cst_53 : f32 to vector<16x128xf32>
    %187 = arith.mulf %186, %170 : vector<16x128xf32>
    %188 = arith.subf %166, %187 : vector<16x128xf32>
    %189 = arith.addf %188, %183 : vector<16x128xf32>
    %190 = arith.addf %189, %3 : vector<16x128xf32>
    %cst_54 = arith.constant 1.000000e+00 : f32
    %191 = vector.broadcast %cst_54 : f32 to vector<16x128xf32>
    %192 = arith.cmpf oge, %190, %191 : vector<16x128xf32>
    %193 = arith.extui %192 : vector<16x128xi1> to vector<16x128xi32>
    %194 = arith.sitofp %193 : vector<16x128xi32> to vector<16x128xf32>
    %195 = arith.addf %171, %194 : vector<16x128xf32>
    %cst_55 = arith.constant 1.000000e+00 : f32
    %196 = vector.broadcast %cst_55 : f32 to vector<16x128xf32>
    %197 = arith.mulf %196, %180 : vector<16x128xf32>
    %198 = arith.subf %176, %197 : vector<16x128xf32>
    %199 = arith.addf %198, %185 : vector<16x128xf32>
    %200 = arith.addf %199, %9 : vector<16x128xf32>
    %cst_56 = arith.constant 1.000000e+00 : f32
    %201 = vector.broadcast %cst_56 : f32 to vector<16x128xf32>
    %202 = arith.cmpf oge, %200, %201 : vector<16x128xf32>
    %203 = arith.extui %202 : vector<16x128xi1> to vector<16x128xi32>
    %204 = arith.sitofp %203 : vector<16x128xi32> to vector<16x128xf32>
    %205 = arith.addf %181, %204 : vector<16x128xf32>
    %c8_i32 = arith.constant 8 : i32
    %206 = arith.truncf %194 : vector<16x128xf32> to vector<16x128xbf16>
    %cst_57 = arith.constant dense<0.000000e+00> : vector<16x128xf32>
    %207 = tpu.matmul %206, %1, %cst_57 {dimension_numbers = #tpu.dot_dimension_numbers<[1], [0], [0], [1], [0, 0, 1, 1], [], []>} : vector<16x128xbf16>, vector<128x128xbf16>, vector<16x128xf32> -> vector<16x128xf32>
    %208 = arith.truncf %204 : vector<16x128xf32> to vector<16x128xbf16>
    %cst_58 = arith.constant dense<0.000000e+00> : vector<16x128xf32>
    %209 = tpu.matmul %208, %1, %cst_58 {dimension_numbers = #tpu.dot_dimension_numbers<[1], [0], [0], [1], [0, 0, 1, 1], [], []>} : vector<16x128xbf16>, vector<128x128xbf16>, vector<16x128xf32> -> vector<16x128xf32>
    %cst_59 = arith.constant 1.000000e+00 : f32
    %210 = vector.broadcast %cst_59 : f32 to vector<16x128xf32>
    %211 = arith.mulf %210, %194 : vector<16x128xf32>
    %212 = arith.subf %190, %211 : vector<16x128xf32>
    %213 = arith.addf %212, %207 : vector<16x128xf32>
    %214 = arith.addf %213, %3 : vector<16x128xf32>
    %cst_60 = arith.constant 1.000000e+00 : f32
    %215 = vector.broadcast %cst_60 : f32 to vector<16x128xf32>
    %216 = arith.cmpf oge, %214, %215 : vector<16x128xf32>
    %217 = arith.extui %216 : vector<16x128xi1> to vector<16x128xi32>
    %218 = arith.sitofp %217 : vector<16x128xi32> to vector<16x128xf32>
    %219 = arith.addf %195, %218 : vector<16x128xf32>
    %cst_61 = arith.constant 1.000000e+00 : f32
    %220 = vector.broadcast %cst_61 : f32 to vector<16x128xf32>
    %221 = arith.mulf %220, %204 : vector<16x128xf32>
    %222 = arith.subf %200, %221 : vector<16x128xf32>
    %223 = arith.addf %222, %209 : vector<16x128xf32>
    %224 = arith.addf %223, %9 : vector<16x128xf32>
    %cst_62 = arith.constant 1.000000e+00 : f32
    %225 = vector.broadcast %cst_62 : f32 to vector<16x128xf32>
    %226 = arith.cmpf oge, %224, %225 : vector<16x128xf32>
    %227 = arith.extui %226 : vector<16x128xi1> to vector<16x128xi32>
    %228 = arith.sitofp %227 : vector<16x128xi32> to vector<16x128xf32>
    %229 = arith.addf %205, %228 : vector<16x128xf32>
    %c9_i32 = arith.constant 9 : i32
    %230 = arith.truncf %218 : vector<16x128xf32> to vector<16x128xbf16>
    %cst_63 = arith.constant dense<0.000000e+00> : vector<16x128xf32>
    %231 = tpu.matmul %230, %1, %cst_63 {dimension_numbers = #tpu.dot_dimension_numbers<[1], [0], [0], [1], [0, 0, 1, 1], [], []>} : vector<16x128xbf16>, vector<128x128xbf16>, vector<16x128xf32> -> vector<16x128xf32>
    %232 = arith.truncf %228 : vector<16x128xf32> to vector<16x128xbf16>
    %cst_64 = arith.constant dense<0.000000e+00> : vector<16x128xf32>
    %233 = tpu.matmul %232, %1, %cst_64 {dimension_numbers = #tpu.dot_dimension_numbers<[1], [0], [0], [1], [0, 0, 1, 1], [], []>} : vector<16x128xbf16>, vector<128x128xbf16>, vector<16x128xf32> -> vector<16x128xf32>
    %cst_65 = arith.constant 1.000000e+00 : f32
    %234 = vector.broadcast %cst_65 : f32 to vector<16x128xf32>
    %235 = arith.mulf %234, %218 : vector<16x128xf32>
    %236 = arith.subf %214, %235 : vector<16x128xf32>
    %237 = arith.addf %236, %231 : vector<16x128xf32>
    %238 = arith.addf %237, %3 : vector<16x128xf32>
    %cst_66 = arith.constant 1.000000e+00 : f32
    %239 = vector.broadcast %cst_66 : f32 to vector<16x128xf32>
    %240 = arith.cmpf oge, %238, %239 : vector<16x128xf32>
    %241 = arith.extui %240 : vector<16x128xi1> to vector<16x128xi32>
    %242 = arith.sitofp %241 : vector<16x128xi32> to vector<16x128xf32>
    %243 = arith.addf %219, %242 : vector<16x128xf32>
    %cst_67 = arith.constant 1.000000e+00 : f32
    %244 = vector.broadcast %cst_67 : f32 to vector<16x128xf32>
    %245 = arith.mulf %244, %228 : vector<16x128xf32>
    %246 = arith.subf %224, %245 : vector<16x128xf32>
    %247 = arith.addf %246, %233 : vector<16x128xf32>
    %248 = arith.addf %247, %9 : vector<16x128xf32>
    %cst_68 = arith.constant 1.000000e+00 : f32
    %249 = vector.broadcast %cst_68 : f32 to vector<16x128xf32>
    %250 = arith.cmpf oge, %248, %249 : vector<16x128xf32>
    %251 = arith.extui %250 : vector<16x128xi1> to vector<16x128xi32>
    %252 = arith.sitofp %251 : vector<16x128xi32> to vector<16x128xf32>
    %253 = arith.addf %229, %252 : vector<16x128xf32>
    %c10_i32 = arith.constant 10 : i32
    %254 = arith.truncf %242 : vector<16x128xf32> to vector<16x128xbf16>
    %cst_69 = arith.constant dense<0.000000e+00> : vector<16x128xf32>
    %255 = tpu.matmul %254, %1, %cst_69 {dimension_numbers = #tpu.dot_dimension_numbers<[1], [0], [0], [1], [0, 0, 1, 1], [], []>} : vector<16x128xbf16>, vector<128x128xbf16>, vector<16x128xf32> -> vector<16x128xf32>
    %256 = arith.truncf %252 : vector<16x128xf32> to vector<16x128xbf16>
    %cst_70 = arith.constant dense<0.000000e+00> : vector<16x128xf32>
    %257 = tpu.matmul %256, %1, %cst_70 {dimension_numbers = #tpu.dot_dimension_numbers<[1], [0], [0], [1], [0, 0, 1, 1], [], []>} : vector<16x128xbf16>, vector<128x128xbf16>, vector<16x128xf32> -> vector<16x128xf32>
    %cst_71 = arith.constant 1.000000e+00 : f32
    %258 = vector.broadcast %cst_71 : f32 to vector<16x128xf32>
    %259 = arith.mulf %258, %242 : vector<16x128xf32>
    %260 = arith.subf %238, %259 : vector<16x128xf32>
    %261 = arith.addf %260, %255 : vector<16x128xf32>
    %262 = arith.addf %261, %3 : vector<16x128xf32>
    %cst_72 = arith.constant 1.000000e+00 : f32
    %263 = vector.broadcast %cst_72 : f32 to vector<16x128xf32>
    %264 = arith.cmpf oge, %262, %263 : vector<16x128xf32>
    %265 = arith.extui %264 : vector<16x128xi1> to vector<16x128xi32>
    %266 = arith.sitofp %265 : vector<16x128xi32> to vector<16x128xf32>
    %267 = arith.addf %243, %266 : vector<16x128xf32>
    %cst_73 = arith.constant 1.000000e+00 : f32
    %268 = vector.broadcast %cst_73 : f32 to vector<16x128xf32>
    %269 = arith.mulf %268, %252 : vector<16x128xf32>
    %270 = arith.subf %248, %269 : vector<16x128xf32>
    %271 = arith.addf %270, %257 : vector<16x128xf32>
    %272 = arith.addf %271, %9 : vector<16x128xf32>
    %cst_74 = arith.constant 1.000000e+00 : f32
    %273 = vector.broadcast %cst_74 : f32 to vector<16x128xf32>
    %274 = arith.cmpf oge, %272, %273 : vector<16x128xf32>
    %275 = arith.extui %274 : vector<16x128xi1> to vector<16x128xi32>
    %276 = arith.sitofp %275 : vector<16x128xi32> to vector<16x128xf32>
    %277 = arith.addf %253, %276 : vector<16x128xf32>
    %c11_i32 = arith.constant 11 : i32
    %278 = arith.truncf %266 : vector<16x128xf32> to vector<16x128xbf16>
    %cst_75 = arith.constant dense<0.000000e+00> : vector<16x128xf32>
    %279 = tpu.matmul %278, %1, %cst_75 {dimension_numbers = #tpu.dot_dimension_numbers<[1], [0], [0], [1], [0, 0, 1, 1], [], []>} : vector<16x128xbf16>, vector<128x128xbf16>, vector<16x128xf32> -> vector<16x128xf32>
    %280 = arith.truncf %276 : vector<16x128xf32> to vector<16x128xbf16>
    %cst_76 = arith.constant dense<0.000000e+00> : vector<16x128xf32>
    %281 = tpu.matmul %280, %1, %cst_76 {dimension_numbers = #tpu.dot_dimension_numbers<[1], [0], [0], [1], [0, 0, 1, 1], [], []>} : vector<16x128xbf16>, vector<128x128xbf16>, vector<16x128xf32> -> vector<16x128xf32>
    %cst_77 = arith.constant 1.000000e+00 : f32
    %282 = vector.broadcast %cst_77 : f32 to vector<16x128xf32>
    %283 = arith.mulf %282, %266 : vector<16x128xf32>
    %284 = arith.subf %262, %283 : vector<16x128xf32>
    %285 = arith.addf %284, %279 : vector<16x128xf32>
    %286 = arith.addf %285, %3 : vector<16x128xf32>
    %cst_78 = arith.constant 1.000000e+00 : f32
    %287 = vector.broadcast %cst_78 : f32 to vector<16x128xf32>
    %288 = arith.cmpf oge, %286, %287 : vector<16x128xf32>
    %289 = arith.extui %288 : vector<16x128xi1> to vector<16x128xi32>
    %290 = arith.sitofp %289 : vector<16x128xi32> to vector<16x128xf32>
    %291 = arith.addf %267, %290 : vector<16x128xf32>
    %cst_79 = arith.constant 1.000000e+00 : f32
    %292 = vector.broadcast %cst_79 : f32 to vector<16x128xf32>
    %293 = arith.mulf %292, %276 : vector<16x128xf32>
    %294 = arith.subf %272, %293 : vector<16x128xf32>
    %295 = arith.addf %294, %281 : vector<16x128xf32>
    %296 = arith.addf %295, %9 : vector<16x128xf32>
    %cst_80 = arith.constant 1.000000e+00 : f32
    %297 = vector.broadcast %cst_80 : f32 to vector<16x128xf32>
    %298 = arith.cmpf oge, %296, %297 : vector<16x128xf32>
    %299 = arith.extui %298 : vector<16x128xi1> to vector<16x128xi32>
    %300 = arith.sitofp %299 : vector<16x128xi32> to vector<16x128xf32>
    %301 = arith.addf %277, %300 : vector<16x128xf32>
    %c12_i32 = arith.constant 12 : i32
    %302 = arith.truncf %290 : vector<16x128xf32> to vector<16x128xbf16>
    %cst_81 = arith.constant dense<0.000000e+00> : vector<16x128xf32>
    %303 = tpu.matmul %302, %1, %cst_81 {dimension_numbers = #tpu.dot_dimension_numbers<[1], [0], [0], [1], [0, 0, 1, 1], [], []>} : vector<16x128xbf16>, vector<128x128xbf16>, vector<16x128xf32> -> vector<16x128xf32>
    %304 = arith.truncf %300 : vector<16x128xf32> to vector<16x128xbf16>
    %cst_82 = arith.constant dense<0.000000e+00> : vector<16x128xf32>
    %305 = tpu.matmul %304, %1, %cst_82 {dimension_numbers = #tpu.dot_dimension_numbers<[1], [0], [0], [1], [0, 0, 1, 1], [], []>} : vector<16x128xbf16>, vector<128x128xbf16>, vector<16x128xf32> -> vector<16x128xf32>
    %cst_83 = arith.constant 1.000000e+00 : f32
    %306 = vector.broadcast %cst_83 : f32 to vector<16x128xf32>
    %307 = arith.mulf %306, %290 : vector<16x128xf32>
    %308 = arith.subf %286, %307 : vector<16x128xf32>
    %309 = arith.addf %308, %303 : vector<16x128xf32>
    %310 = arith.addf %309, %3 : vector<16x128xf32>
    %cst_84 = arith.constant 1.000000e+00 : f32
    %311 = vector.broadcast %cst_84 : f32 to vector<16x128xf32>
    %312 = arith.cmpf oge, %310, %311 : vector<16x128xf32>
    %313 = arith.extui %312 : vector<16x128xi1> to vector<16x128xi32>
    %314 = arith.sitofp %313 : vector<16x128xi32> to vector<16x128xf32>
    %315 = arith.addf %291, %314 : vector<16x128xf32>
    %cst_85 = arith.constant 1.000000e+00 : f32
    %316 = vector.broadcast %cst_85 : f32 to vector<16x128xf32>
    %317 = arith.mulf %316, %300 : vector<16x128xf32>
    %318 = arith.subf %296, %317 : vector<16x128xf32>
    %319 = arith.addf %318, %305 : vector<16x128xf32>
    %320 = arith.addf %319, %9 : vector<16x128xf32>
    %cst_86 = arith.constant 1.000000e+00 : f32
    %321 = vector.broadcast %cst_86 : f32 to vector<16x128xf32>
    %322 = arith.cmpf oge, %320, %321 : vector<16x128xf32>
    %323 = arith.extui %322 : vector<16x128xi1> to vector<16x128xi32>
    %324 = arith.sitofp %323 : vector<16x128xi32> to vector<16x128xf32>
    %325 = arith.addf %301, %324 : vector<16x128xf32>
    %c13_i32 = arith.constant 13 : i32
    %326 = arith.truncf %314 : vector<16x128xf32> to vector<16x128xbf16>
    %cst_87 = arith.constant dense<0.000000e+00> : vector<16x128xf32>
    %327 = tpu.matmul %326, %1, %cst_87 {dimension_numbers = #tpu.dot_dimension_numbers<[1], [0], [0], [1], [0, 0, 1, 1], [], []>} : vector<16x128xbf16>, vector<128x128xbf16>, vector<16x128xf32> -> vector<16x128xf32>
    %328 = arith.truncf %324 : vector<16x128xf32> to vector<16x128xbf16>
    %cst_88 = arith.constant dense<0.000000e+00> : vector<16x128xf32>
    %329 = tpu.matmul %328, %1, %cst_88 {dimension_numbers = #tpu.dot_dimension_numbers<[1], [0], [0], [1], [0, 0, 1, 1], [], []>} : vector<16x128xbf16>, vector<128x128xbf16>, vector<16x128xf32> -> vector<16x128xf32>
    %cst_89 = arith.constant 1.000000e+00 : f32
    %330 = vector.broadcast %cst_89 : f32 to vector<16x128xf32>
    %331 = arith.mulf %330, %314 : vector<16x128xf32>
    %332 = arith.subf %310, %331 : vector<16x128xf32>
    %333 = arith.addf %332, %327 : vector<16x128xf32>
    %334 = arith.addf %333, %3 : vector<16x128xf32>
    %cst_90 = arith.constant 1.000000e+00 : f32
    %335 = vector.broadcast %cst_90 : f32 to vector<16x128xf32>
    %336 = arith.cmpf oge, %334, %335 : vector<16x128xf32>
    %337 = arith.extui %336 : vector<16x128xi1> to vector<16x128xi32>
    %338 = arith.sitofp %337 : vector<16x128xi32> to vector<16x128xf32>
    %339 = arith.addf %315, %338 : vector<16x128xf32>
    %cst_91 = arith.constant 1.000000e+00 : f32
    %340 = vector.broadcast %cst_91 : f32 to vector<16x128xf32>
    %341 = arith.mulf %340, %324 : vector<16x128xf32>
    %342 = arith.subf %320, %341 : vector<16x128xf32>
    %343 = arith.addf %342, %329 : vector<16x128xf32>
    %344 = arith.addf %343, %9 : vector<16x128xf32>
    %cst_92 = arith.constant 1.000000e+00 : f32
    %345 = vector.broadcast %cst_92 : f32 to vector<16x128xf32>
    %346 = arith.cmpf oge, %344, %345 : vector<16x128xf32>
    %347 = arith.extui %346 : vector<16x128xi1> to vector<16x128xi32>
    %348 = arith.sitofp %347 : vector<16x128xi32> to vector<16x128xf32>
    %349 = arith.addf %325, %348 : vector<16x128xf32>
    %c14_i32 = arith.constant 14 : i32
    %350 = arith.truncf %338 : vector<16x128xf32> to vector<16x128xbf16>
    %cst_93 = arith.constant dense<0.000000e+00> : vector<16x128xf32>
    %351 = tpu.matmul %350, %1, %cst_93 {dimension_numbers = #tpu.dot_dimension_numbers<[1], [0], [0], [1], [0, 0, 1, 1], [], []>} : vector<16x128xbf16>, vector<128x128xbf16>, vector<16x128xf32> -> vector<16x128xf32>
    %352 = arith.truncf %348 : vector<16x128xf32> to vector<16x128xbf16>
    %cst_94 = arith.constant dense<0.000000e+00> : vector<16x128xf32>
    %353 = tpu.matmul %352, %1, %cst_94 {dimension_numbers = #tpu.dot_dimension_numbers<[1], [0], [0], [1], [0, 0, 1, 1], [], []>} : vector<16x128xbf16>, vector<128x128xbf16>, vector<16x128xf32> -> vector<16x128xf32>
    %cst_95 = arith.constant 1.000000e+00 : f32
    %354 = vector.broadcast %cst_95 : f32 to vector<16x128xf32>
    %355 = arith.mulf %354, %338 : vector<16x128xf32>
    %356 = arith.subf %334, %355 : vector<16x128xf32>
    %357 = arith.addf %356, %351 : vector<16x128xf32>
    %358 = arith.addf %357, %3 : vector<16x128xf32>
    %cst_96 = arith.constant 1.000000e+00 : f32
    %359 = vector.broadcast %cst_96 : f32 to vector<16x128xf32>
    %360 = arith.cmpf oge, %358, %359 : vector<16x128xf32>
    %361 = arith.extui %360 : vector<16x128xi1> to vector<16x128xi32>
    %362 = arith.sitofp %361 : vector<16x128xi32> to vector<16x128xf32>
    %363 = arith.addf %339, %362 : vector<16x128xf32>
    %cst_97 = arith.constant 1.000000e+00 : f32
    %364 = vector.broadcast %cst_97 : f32 to vector<16x128xf32>
    %365 = arith.mulf %364, %348 : vector<16x128xf32>
    %366 = arith.subf %344, %365 : vector<16x128xf32>
    %367 = arith.addf %366, %353 : vector<16x128xf32>
    %368 = arith.addf %367, %9 : vector<16x128xf32>
    %cst_98 = arith.constant 1.000000e+00 : f32
    %369 = vector.broadcast %cst_98 : f32 to vector<16x128xf32>
    %370 = arith.cmpf oge, %368, %369 : vector<16x128xf32>
    %371 = arith.extui %370 : vector<16x128xi1> to vector<16x128xi32>
    %372 = arith.sitofp %371 : vector<16x128xi32> to vector<16x128xf32>
    %373 = arith.addf %349, %372 : vector<16x128xf32>
    %c15_i32 = arith.constant 15 : i32
    %374 = arith.truncf %362 : vector<16x128xf32> to vector<16x128xbf16>
    %cst_99 = arith.constant dense<0.000000e+00> : vector<16x128xf32>
    %375 = tpu.matmul %374, %1, %cst_99 {dimension_numbers = #tpu.dot_dimension_numbers<[1], [0], [0], [1], [0, 0, 1, 1], [], []>} : vector<16x128xbf16>, vector<128x128xbf16>, vector<16x128xf32> -> vector<16x128xf32>
    %376 = arith.truncf %372 : vector<16x128xf32> to vector<16x128xbf16>
    %cst_100 = arith.constant dense<0.000000e+00> : vector<16x128xf32>
    %377 = tpu.matmul %376, %1, %cst_100 {dimension_numbers = #tpu.dot_dimension_numbers<[1], [0], [0], [1], [0, 0, 1, 1], [], []>} : vector<16x128xbf16>, vector<128x128xbf16>, vector<16x128xf32> -> vector<16x128xf32>
    %cst_101 = arith.constant 1.000000e+00 : f32
    %378 = vector.broadcast %cst_101 : f32 to vector<16x128xf32>
    %379 = arith.mulf %378, %362 : vector<16x128xf32>
    %380 = arith.subf %358, %379 : vector<16x128xf32>
    %381 = arith.addf %380, %375 : vector<16x128xf32>
    %382 = arith.addf %381, %3 : vector<16x128xf32>
    %cst_102 = arith.constant 1.000000e+00 : f32
    %383 = vector.broadcast %cst_102 : f32 to vector<16x128xf32>
    %384 = arith.cmpf oge, %382, %383 : vector<16x128xf32>
    %385 = arith.extui %384 : vector<16x128xi1> to vector<16x128xi32>
    %386 = arith.sitofp %385 : vector<16x128xi32> to vector<16x128xf32>
    %387 = arith.addf %363, %386 : vector<16x128xf32>
    %cst_103 = arith.constant 1.000000e+00 : f32
    %388 = vector.broadcast %cst_103 : f32 to vector<16x128xf32>
    %389 = arith.mulf %388, %372 : vector<16x128xf32>
    %390 = arith.subf %368, %389 : vector<16x128xf32>
    %391 = arith.addf %390, %377 : vector<16x128xf32>
    %392 = arith.addf %391, %9 : vector<16x128xf32>
    %cst_104 = arith.constant 1.000000e+00 : f32
    %393 = vector.broadcast %cst_104 : f32 to vector<16x128xf32>
    %394 = arith.cmpf oge, %392, %393 : vector<16x128xf32>
    %395 = arith.extui %394 : vector<16x128xi1> to vector<16x128xi32>
    %396 = arith.sitofp %395 : vector<16x128xi32> to vector<16x128xf32>
    %397 = arith.addf %373, %396 : vector<16x128xf32>
    %c16_i32 = arith.constant 16 : i32
    %398 = arith.truncf %386 : vector<16x128xf32> to vector<16x128xbf16>
    %cst_105 = arith.constant dense<0.000000e+00> : vector<16x128xf32>
    %399 = tpu.matmul %398, %1, %cst_105 {dimension_numbers = #tpu.dot_dimension_numbers<[1], [0], [0], [1], [0, 0, 1, 1], [], []>} : vector<16x128xbf16>, vector<128x128xbf16>, vector<16x128xf32> -> vector<16x128xf32>
    %400 = arith.truncf %396 : vector<16x128xf32> to vector<16x128xbf16>
    %cst_106 = arith.constant dense<0.000000e+00> : vector<16x128xf32>
    %401 = tpu.matmul %400, %1, %cst_106 {dimension_numbers = #tpu.dot_dimension_numbers<[1], [0], [0], [1], [0, 0, 1, 1], [], []>} : vector<16x128xbf16>, vector<128x128xbf16>, vector<16x128xf32> -> vector<16x128xf32>
    %cst_107 = arith.constant 1.000000e+00 : f32
    %402 = vector.broadcast %cst_107 : f32 to vector<16x128xf32>
    %403 = arith.mulf %402, %386 : vector<16x128xf32>
    %404 = arith.subf %382, %403 : vector<16x128xf32>
    %405 = arith.addf %404, %399 : vector<16x128xf32>
    %406 = arith.addf %405, %3 : vector<16x128xf32>
    %cst_108 = arith.constant 1.000000e+00 : f32
    %407 = vector.broadcast %cst_108 : f32 to vector<16x128xf32>
    %408 = arith.cmpf oge, %406, %407 : vector<16x128xf32>
    %409 = arith.extui %408 : vector<16x128xi1> to vector<16x128xi32>
    %410 = arith.sitofp %409 : vector<16x128xi32> to vector<16x128xf32>
    %411 = arith.addf %387, %410 : vector<16x128xf32>
    %cst_109 = arith.constant 1.000000e+00 : f32
    %412 = vector.broadcast %cst_109 : f32 to vector<16x128xf32>
    %413 = arith.mulf %412, %396 : vector<16x128xf32>
    %414 = arith.subf %392, %413 : vector<16x128xf32>
    %415 = arith.addf %414, %401 : vector<16x128xf32>
    %416 = arith.addf %415, %9 : vector<16x128xf32>
    %cst_110 = arith.constant 1.000000e+00 : f32
    %417 = vector.broadcast %cst_110 : f32 to vector<16x128xf32>
    %418 = arith.cmpf oge, %416, %417 : vector<16x128xf32>
    %419 = arith.extui %418 : vector<16x128xi1> to vector<16x128xi32>
    %420 = arith.sitofp %419 : vector<16x128xi32> to vector<16x128xf32>
    %421 = arith.addf %397, %420 : vector<16x128xf32>
    %c17_i32 = arith.constant 17 : i32
    %422 = arith.truncf %410 : vector<16x128xf32> to vector<16x128xbf16>
    %cst_111 = arith.constant dense<0.000000e+00> : vector<16x128xf32>
    %423 = tpu.matmul %422, %1, %cst_111 {dimension_numbers = #tpu.dot_dimension_numbers<[1], [0], [0], [1], [0, 0, 1, 1], [], []>} : vector<16x128xbf16>, vector<128x128xbf16>, vector<16x128xf32> -> vector<16x128xf32>
    %424 = arith.truncf %420 : vector<16x128xf32> to vector<16x128xbf16>
    %cst_112 = arith.constant dense<0.000000e+00> : vector<16x128xf32>
    %425 = tpu.matmul %424, %1, %cst_112 {dimension_numbers = #tpu.dot_dimension_numbers<[1], [0], [0], [1], [0, 0, 1, 1], [], []>} : vector<16x128xbf16>, vector<128x128xbf16>, vector<16x128xf32> -> vector<16x128xf32>
    %cst_113 = arith.constant 1.000000e+00 : f32
    %426 = vector.broadcast %cst_113 : f32 to vector<16x128xf32>
    %427 = arith.mulf %426, %410 : vector<16x128xf32>
    %428 = arith.subf %406, %427 : vector<16x128xf32>
    %429 = arith.addf %428, %423 : vector<16x128xf32>
    %430 = arith.addf %429, %3 : vector<16x128xf32>
    %cst_114 = arith.constant 1.000000e+00 : f32
    %431 = vector.broadcast %cst_114 : f32 to vector<16x128xf32>
    %432 = arith.cmpf oge, %430, %431 : vector<16x128xf32>
    %433 = arith.extui %432 : vector<16x128xi1> to vector<16x128xi32>
    %434 = arith.sitofp %433 : vector<16x128xi32> to vector<16x128xf32>
    %435 = arith.addf %411, %434 : vector<16x128xf32>
    %cst_115 = arith.constant 1.000000e+00 : f32
    %436 = vector.broadcast %cst_115 : f32 to vector<16x128xf32>
    %437 = arith.mulf %436, %420 : vector<16x128xf32>
    %438 = arith.subf %416, %437 : vector<16x128xf32>
    %439 = arith.addf %438, %425 : vector<16x128xf32>
    %440 = arith.addf %439, %9 : vector<16x128xf32>
    %cst_116 = arith.constant 1.000000e+00 : f32
    %441 = vector.broadcast %cst_116 : f32 to vector<16x128xf32>
    %442 = arith.cmpf oge, %440, %441 : vector<16x128xf32>
    %443 = arith.extui %442 : vector<16x128xi1> to vector<16x128xi32>
    %444 = arith.sitofp %443 : vector<16x128xi32> to vector<16x128xf32>
    %445 = arith.addf %421, %444 : vector<16x128xf32>
    %c18_i32 = arith.constant 18 : i32
    %446 = arith.truncf %434 : vector<16x128xf32> to vector<16x128xbf16>
    %cst_117 = arith.constant dense<0.000000e+00> : vector<16x128xf32>
    %447 = tpu.matmul %446, %1, %cst_117 {dimension_numbers = #tpu.dot_dimension_numbers<[1], [0], [0], [1], [0, 0, 1, 1], [], []>} : vector<16x128xbf16>, vector<128x128xbf16>, vector<16x128xf32> -> vector<16x128xf32>
    %448 = arith.truncf %444 : vector<16x128xf32> to vector<16x128xbf16>
    %cst_118 = arith.constant dense<0.000000e+00> : vector<16x128xf32>
    %449 = tpu.matmul %448, %1, %cst_118 {dimension_numbers = #tpu.dot_dimension_numbers<[1], [0], [0], [1], [0, 0, 1, 1], [], []>} : vector<16x128xbf16>, vector<128x128xbf16>, vector<16x128xf32> -> vector<16x128xf32>
    %cst_119 = arith.constant 1.000000e+00 : f32
    %450 = vector.broadcast %cst_119 : f32 to vector<16x128xf32>
    %451 = arith.mulf %450, %434 : vector<16x128xf32>
    %452 = arith.subf %430, %451 : vector<16x128xf32>
    %453 = arith.addf %452, %447 : vector<16x128xf32>
    %454 = arith.addf %453, %3 : vector<16x128xf32>
    %cst_120 = arith.constant 1.000000e+00 : f32
    %455 = vector.broadcast %cst_120 : f32 to vector<16x128xf32>
    %456 = arith.cmpf oge, %454, %455 : vector<16x128xf32>
    %457 = arith.extui %456 : vector<16x128xi1> to vector<16x128xi32>
    %458 = arith.sitofp %457 : vector<16x128xi32> to vector<16x128xf32>
    %459 = arith.addf %435, %458 : vector<16x128xf32>
    %cst_121 = arith.constant 1.000000e+00 : f32
    %460 = vector.broadcast %cst_121 : f32 to vector<16x128xf32>
    %461 = arith.mulf %460, %444 : vector<16x128xf32>
    %462 = arith.subf %440, %461 : vector<16x128xf32>
    %463 = arith.addf %462, %449 : vector<16x128xf32>
    %464 = arith.addf %463, %9 : vector<16x128xf32>
    %cst_122 = arith.constant 1.000000e+00 : f32
    %465 = vector.broadcast %cst_122 : f32 to vector<16x128xf32>
    %466 = arith.cmpf oge, %464, %465 : vector<16x128xf32>
    %467 = arith.extui %466 : vector<16x128xi1> to vector<16x128xi32>
    %468 = arith.sitofp %467 : vector<16x128xi32> to vector<16x128xf32>
    %469 = arith.addf %445, %468 : vector<16x128xf32>
    %c19_i32 = arith.constant 19 : i32
    %470 = arith.truncf %458 : vector<16x128xf32> to vector<16x128xbf16>
    %cst_123 = arith.constant dense<0.000000e+00> : vector<16x128xf32>
    %471 = tpu.matmul %470, %1, %cst_123 {dimension_numbers = #tpu.dot_dimension_numbers<[1], [0], [0], [1], [0, 0, 1, 1], [], []>} : vector<16x128xbf16>, vector<128x128xbf16>, vector<16x128xf32> -> vector<16x128xf32>
    %472 = arith.truncf %468 : vector<16x128xf32> to vector<16x128xbf16>
    %cst_124 = arith.constant dense<0.000000e+00> : vector<16x128xf32>
    %473 = tpu.matmul %472, %1, %cst_124 {dimension_numbers = #tpu.dot_dimension_numbers<[1], [0], [0], [1], [0, 0, 1, 1], [], []>} : vector<16x128xbf16>, vector<128x128xbf16>, vector<16x128xf32> -> vector<16x128xf32>
    %cst_125 = arith.constant 1.000000e+00 : f32
    %474 = vector.broadcast %cst_125 : f32 to vector<16x128xf32>
    %475 = arith.mulf %474, %458 : vector<16x128xf32>
    %476 = arith.subf %454, %475 : vector<16x128xf32>
    %477 = arith.addf %476, %471 : vector<16x128xf32>
    %478 = arith.addf %477, %3 : vector<16x128xf32>
    %cst_126 = arith.constant 1.000000e+00 : f32
    %479 = vector.broadcast %cst_126 : f32 to vector<16x128xf32>
    %480 = arith.cmpf oge, %478, %479 : vector<16x128xf32>
    %481 = arith.extui %480 : vector<16x128xi1> to vector<16x128xi32>
    %482 = arith.sitofp %481 : vector<16x128xi32> to vector<16x128xf32>
    %483 = arith.addf %459, %482 : vector<16x128xf32>
    %cst_127 = arith.constant 1.000000e+00 : f32
    %484 = vector.broadcast %cst_127 : f32 to vector<16x128xf32>
    %485 = arith.mulf %484, %468 : vector<16x128xf32>
    %486 = arith.subf %464, %485 : vector<16x128xf32>
    %487 = arith.addf %486, %473 : vector<16x128xf32>
    %488 = arith.addf %487, %9 : vector<16x128xf32>
    %cst_128 = arith.constant 1.000000e+00 : f32
    %489 = vector.broadcast %cst_128 : f32 to vector<16x128xf32>
    %490 = arith.cmpf oge, %488, %489 : vector<16x128xf32>
    %491 = arith.extui %490 : vector<16x128xi1> to vector<16x128xi32>
    %492 = arith.sitofp %491 : vector<16x128xi32> to vector<16x128xf32>
    %493 = arith.addf %469, %492 : vector<16x128xf32>
    %c20_i32 = arith.constant 20 : i32
    %494 = arith.truncf %482 : vector<16x128xf32> to vector<16x128xbf16>
    %cst_129 = arith.constant dense<0.000000e+00> : vector<16x128xf32>
    %495 = tpu.matmul %494, %1, %cst_129 {dimension_numbers = #tpu.dot_dimension_numbers<[1], [0], [0], [1], [0, 0, 1, 1], [], []>} : vector<16x128xbf16>, vector<128x128xbf16>, vector<16x128xf32> -> vector<16x128xf32>
    %496 = arith.truncf %492 : vector<16x128xf32> to vector<16x128xbf16>
    %cst_130 = arith.constant dense<0.000000e+00> : vector<16x128xf32>
    %497 = tpu.matmul %496, %1, %cst_130 {dimension_numbers = #tpu.dot_dimension_numbers<[1], [0], [0], [1], [0, 0, 1, 1], [], []>} : vector<16x128xbf16>, vector<128x128xbf16>, vector<16x128xf32> -> vector<16x128xf32>
    %cst_131 = arith.constant 1.000000e+00 : f32
    %498 = vector.broadcast %cst_131 : f32 to vector<16x128xf32>
    %499 = arith.mulf %498, %482 : vector<16x128xf32>
    %500 = arith.subf %478, %499 : vector<16x128xf32>
    %501 = arith.addf %500, %495 : vector<16x128xf32>
    %502 = arith.addf %501, %3 : vector<16x128xf32>
    %cst_132 = arith.constant 1.000000e+00 : f32
    %503 = vector.broadcast %cst_132 : f32 to vector<16x128xf32>
    %504 = arith.cmpf oge, %502, %503 : vector<16x128xf32>
    %505 = arith.extui %504 : vector<16x128xi1> to vector<16x128xi32>
    %506 = arith.sitofp %505 : vector<16x128xi32> to vector<16x128xf32>
    %507 = arith.addf %483, %506 : vector<16x128xf32>
    %cst_133 = arith.constant 1.000000e+00 : f32
    %508 = vector.broadcast %cst_133 : f32 to vector<16x128xf32>
    %509 = arith.mulf %508, %492 : vector<16x128xf32>
    %510 = arith.subf %488, %509 : vector<16x128xf32>
    %511 = arith.addf %510, %497 : vector<16x128xf32>
    %512 = arith.addf %511, %9 : vector<16x128xf32>
    %cst_134 = arith.constant 1.000000e+00 : f32
    %513 = vector.broadcast %cst_134 : f32 to vector<16x128xf32>
    %514 = arith.cmpf oge, %512, %513 : vector<16x128xf32>
    %515 = arith.extui %514 : vector<16x128xi1> to vector<16x128xi32>
    %516 = arith.sitofp %515 : vector<16x128xi32> to vector<16x128xf32>
    %517 = arith.addf %493, %516 : vector<16x128xf32>
    %c21_i32 = arith.constant 21 : i32
    %518 = arith.truncf %506 : vector<16x128xf32> to vector<16x128xbf16>
    %cst_135 = arith.constant dense<0.000000e+00> : vector<16x128xf32>
    %519 = tpu.matmul %518, %1, %cst_135 {dimension_numbers = #tpu.dot_dimension_numbers<[1], [0], [0], [1], [0, 0, 1, 1], [], []>} : vector<16x128xbf16>, vector<128x128xbf16>, vector<16x128xf32> -> vector<16x128xf32>
    %520 = arith.truncf %516 : vector<16x128xf32> to vector<16x128xbf16>
    %cst_136 = arith.constant dense<0.000000e+00> : vector<16x128xf32>
    %521 = tpu.matmul %520, %1, %cst_136 {dimension_numbers = #tpu.dot_dimension_numbers<[1], [0], [0], [1], [0, 0, 1, 1], [], []>} : vector<16x128xbf16>, vector<128x128xbf16>, vector<16x128xf32> -> vector<16x128xf32>
    %cst_137 = arith.constant 1.000000e+00 : f32
    %522 = vector.broadcast %cst_137 : f32 to vector<16x128xf32>
    %523 = arith.mulf %522, %506 : vector<16x128xf32>
    %524 = arith.subf %502, %523 : vector<16x128xf32>
    %525 = arith.addf %524, %519 : vector<16x128xf32>
    %526 = arith.addf %525, %3 : vector<16x128xf32>
    %cst_138 = arith.constant 1.000000e+00 : f32
    %527 = vector.broadcast %cst_138 : f32 to vector<16x128xf32>
    %528 = arith.cmpf oge, %526, %527 : vector<16x128xf32>
    %529 = arith.extui %528 : vector<16x128xi1> to vector<16x128xi32>
    %530 = arith.sitofp %529 : vector<16x128xi32> to vector<16x128xf32>
    %531 = arith.addf %507, %530 : vector<16x128xf32>
    %cst_139 = arith.constant 1.000000e+00 : f32
    %532 = vector.broadcast %cst_139 : f32 to vector<16x128xf32>
    %533 = arith.mulf %532, %516 : vector<16x128xf32>
    %534 = arith.subf %512, %533 : vector<16x128xf32>
    %535 = arith.addf %534, %521 : vector<16x128xf32>
    %536 = arith.addf %535, %9 : vector<16x128xf32>
    %cst_140 = arith.constant 1.000000e+00 : f32
    %537 = vector.broadcast %cst_140 : f32 to vector<16x128xf32>
    %538 = arith.cmpf oge, %536, %537 : vector<16x128xf32>
    %539 = arith.extui %538 : vector<16x128xi1> to vector<16x128xi32>
    %540 = arith.sitofp %539 : vector<16x128xi32> to vector<16x128xf32>
    %541 = arith.addf %517, %540 : vector<16x128xf32>
    %c22_i32 = arith.constant 22 : i32
    %542 = arith.truncf %530 : vector<16x128xf32> to vector<16x128xbf16>
    %cst_141 = arith.constant dense<0.000000e+00> : vector<16x128xf32>
    %543 = tpu.matmul %542, %1, %cst_141 {dimension_numbers = #tpu.dot_dimension_numbers<[1], [0], [0], [1], [0, 0, 1, 1], [], []>} : vector<16x128xbf16>, vector<128x128xbf16>, vector<16x128xf32> -> vector<16x128xf32>
    %544 = arith.truncf %540 : vector<16x128xf32> to vector<16x128xbf16>
    %cst_142 = arith.constant dense<0.000000e+00> : vector<16x128xf32>
    %545 = tpu.matmul %544, %1, %cst_142 {dimension_numbers = #tpu.dot_dimension_numbers<[1], [0], [0], [1], [0, 0, 1, 1], [], []>} : vector<16x128xbf16>, vector<128x128xbf16>, vector<16x128xf32> -> vector<16x128xf32>
    %cst_143 = arith.constant 1.000000e+00 : f32
    %546 = vector.broadcast %cst_143 : f32 to vector<16x128xf32>
    %547 = arith.mulf %546, %530 : vector<16x128xf32>
    %548 = arith.subf %526, %547 : vector<16x128xf32>
    %549 = arith.addf %548, %543 : vector<16x128xf32>
    %550 = arith.addf %549, %3 : vector<16x128xf32>
    %cst_144 = arith.constant 1.000000e+00 : f32
    %551 = vector.broadcast %cst_144 : f32 to vector<16x128xf32>
    %552 = arith.cmpf oge, %550, %551 : vector<16x128xf32>
    %553 = arith.extui %552 : vector<16x128xi1> to vector<16x128xi32>
    %554 = arith.sitofp %553 : vector<16x128xi32> to vector<16x128xf32>
    %555 = arith.addf %531, %554 : vector<16x128xf32>
    %cst_145 = arith.constant 1.000000e+00 : f32
    %556 = vector.broadcast %cst_145 : f32 to vector<16x128xf32>
    %557 = arith.mulf %556, %540 : vector<16x128xf32>
    %558 = arith.subf %536, %557 : vector<16x128xf32>
    %559 = arith.addf %558, %545 : vector<16x128xf32>
    %560 = arith.addf %559, %9 : vector<16x128xf32>
    %cst_146 = arith.constant 1.000000e+00 : f32
    %561 = vector.broadcast %cst_146 : f32 to vector<16x128xf32>
    %562 = arith.cmpf oge, %560, %561 : vector<16x128xf32>
    %563 = arith.extui %562 : vector<16x128xi1> to vector<16x128xi32>
    %564 = arith.sitofp %563 : vector<16x128xi32> to vector<16x128xf32>
    %565 = arith.addf %541, %564 : vector<16x128xf32>
    %c23_i32 = arith.constant 23 : i32
    %566 = arith.truncf %554 : vector<16x128xf32> to vector<16x128xbf16>
    %cst_147 = arith.constant dense<0.000000e+00> : vector<16x128xf32>
    %567 = tpu.matmul %566, %1, %cst_147 {dimension_numbers = #tpu.dot_dimension_numbers<[1], [0], [0], [1], [0, 0, 1, 1], [], []>} : vector<16x128xbf16>, vector<128x128xbf16>, vector<16x128xf32> -> vector<16x128xf32>
    %568 = arith.truncf %564 : vector<16x128xf32> to vector<16x128xbf16>
    %cst_148 = arith.constant dense<0.000000e+00> : vector<16x128xf32>
    %569 = tpu.matmul %568, %1, %cst_148 {dimension_numbers = #tpu.dot_dimension_numbers<[1], [0], [0], [1], [0, 0, 1, 1], [], []>} : vector<16x128xbf16>, vector<128x128xbf16>, vector<16x128xf32> -> vector<16x128xf32>
    %cst_149 = arith.constant 1.000000e+00 : f32
    %570 = vector.broadcast %cst_149 : f32 to vector<16x128xf32>
    %571 = arith.mulf %570, %554 : vector<16x128xf32>
    %572 = arith.subf %550, %571 : vector<16x128xf32>
    %573 = arith.addf %572, %567 : vector<16x128xf32>
    %574 = arith.addf %573, %3 : vector<16x128xf32>
    %cst_150 = arith.constant 1.000000e+00 : f32
    %575 = vector.broadcast %cst_150 : f32 to vector<16x128xf32>
    %576 = arith.cmpf oge, %574, %575 : vector<16x128xf32>
    %577 = arith.extui %576 : vector<16x128xi1> to vector<16x128xi32>
    %578 = arith.sitofp %577 : vector<16x128xi32> to vector<16x128xf32>
    %579 = arith.addf %555, %578 : vector<16x128xf32>
    %cst_151 = arith.constant 1.000000e+00 : f32
    %580 = vector.broadcast %cst_151 : f32 to vector<16x128xf32>
    %581 = arith.mulf %580, %564 : vector<16x128xf32>
    %582 = arith.subf %560, %581 : vector<16x128xf32>
    %583 = arith.addf %582, %569 : vector<16x128xf32>
    %584 = arith.addf %583, %9 : vector<16x128xf32>
    %cst_152 = arith.constant 1.000000e+00 : f32
    %585 = vector.broadcast %cst_152 : f32 to vector<16x128xf32>
    %586 = arith.cmpf oge, %584, %585 : vector<16x128xf32>
    %587 = arith.extui %586 : vector<16x128xi1> to vector<16x128xi32>
    %588 = arith.sitofp %587 : vector<16x128xi32> to vector<16x128xf32>
    %589 = arith.addf %565, %588 : vector<16x128xf32>
    %c24_i32 = arith.constant 24 : i32
    %590 = arith.truncf %578 : vector<16x128xf32> to vector<16x128xbf16>
    %cst_153 = arith.constant dense<0.000000e+00> : vector<16x128xf32>
    %591 = tpu.matmul %590, %1, %cst_153 {dimension_numbers = #tpu.dot_dimension_numbers<[1], [0], [0], [1], [0, 0, 1, 1], [], []>} : vector<16x128xbf16>, vector<128x128xbf16>, vector<16x128xf32> -> vector<16x128xf32>
    %592 = arith.truncf %588 : vector<16x128xf32> to vector<16x128xbf16>
    %cst_154 = arith.constant dense<0.000000e+00> : vector<16x128xf32>
    %593 = tpu.matmul %592, %1, %cst_154 {dimension_numbers = #tpu.dot_dimension_numbers<[1], [0], [0], [1], [0, 0, 1, 1], [], []>} : vector<16x128xbf16>, vector<128x128xbf16>, vector<16x128xf32> -> vector<16x128xf32>
    %cst_155 = arith.constant 1.000000e+00 : f32
    %594 = vector.broadcast %cst_155 : f32 to vector<16x128xf32>
    %595 = arith.mulf %594, %578 : vector<16x128xf32>
    %596 = arith.subf %574, %595 : vector<16x128xf32>
    %597 = arith.addf %596, %591 : vector<16x128xf32>
    %598 = arith.addf %597, %3 : vector<16x128xf32>
    %cst_156 = arith.constant 1.000000e+00 : f32
    %599 = vector.broadcast %cst_156 : f32 to vector<16x128xf32>
    %600 = arith.cmpf oge, %598, %599 : vector<16x128xf32>
    %601 = arith.extui %600 : vector<16x128xi1> to vector<16x128xi32>
    %602 = arith.sitofp %601 : vector<16x128xi32> to vector<16x128xf32>
    %603 = arith.addf %579, %602 : vector<16x128xf32>
    %cst_157 = arith.constant 1.000000e+00 : f32
    %604 = vector.broadcast %cst_157 : f32 to vector<16x128xf32>
    %605 = arith.mulf %604, %588 : vector<16x128xf32>
    %606 = arith.subf %584, %605 : vector<16x128xf32>
    %607 = arith.addf %606, %593 : vector<16x128xf32>
    %608 = arith.addf %607, %9 : vector<16x128xf32>
    %cst_158 = arith.constant 1.000000e+00 : f32
    %609 = vector.broadcast %cst_158 : f32 to vector<16x128xf32>
    %610 = arith.cmpf oge, %608, %609 : vector<16x128xf32>
    %611 = arith.extui %610 : vector<16x128xi1> to vector<16x128xi32>
    %612 = arith.sitofp %611 : vector<16x128xi32> to vector<16x128xf32>
    %613 = arith.addf %589, %612 : vector<16x128xf32>
    %c25_i32 = arith.constant 25 : i32
    %614 = arith.truncf %602 : vector<16x128xf32> to vector<16x128xbf16>
    %cst_159 = arith.constant dense<0.000000e+00> : vector<16x128xf32>
    %615 = tpu.matmul %614, %1, %cst_159 {dimension_numbers = #tpu.dot_dimension_numbers<[1], [0], [0], [1], [0, 0, 1, 1], [], []>} : vector<16x128xbf16>, vector<128x128xbf16>, vector<16x128xf32> -> vector<16x128xf32>
    %616 = arith.truncf %612 : vector<16x128xf32> to vector<16x128xbf16>
    %cst_160 = arith.constant dense<0.000000e+00> : vector<16x128xf32>
    %617 = tpu.matmul %616, %1, %cst_160 {dimension_numbers = #tpu.dot_dimension_numbers<[1], [0], [0], [1], [0, 0, 1, 1], [], []>} : vector<16x128xbf16>, vector<128x128xbf16>, vector<16x128xf32> -> vector<16x128xf32>
    %cst_161 = arith.constant 1.000000e+00 : f32
    %618 = vector.broadcast %cst_161 : f32 to vector<16x128xf32>
    %619 = arith.mulf %618, %602 : vector<16x128xf32>
    %620 = arith.subf %598, %619 : vector<16x128xf32>
    %621 = arith.addf %620, %615 : vector<16x128xf32>
    %622 = arith.addf %621, %3 : vector<16x128xf32>
    %cst_162 = arith.constant 1.000000e+00 : f32
    %623 = vector.broadcast %cst_162 : f32 to vector<16x128xf32>
    %624 = arith.cmpf oge, %622, %623 : vector<16x128xf32>
    %625 = arith.extui %624 : vector<16x128xi1> to vector<16x128xi32>
    %626 = arith.sitofp %625 : vector<16x128xi32> to vector<16x128xf32>
    %627 = arith.addf %603, %626 : vector<16x128xf32>
    %cst_163 = arith.constant 1.000000e+00 : f32
    %628 = vector.broadcast %cst_163 : f32 to vector<16x128xf32>
    %629 = arith.mulf %628, %612 : vector<16x128xf32>
    %630 = arith.subf %608, %629 : vector<16x128xf32>
    %631 = arith.addf %630, %617 : vector<16x128xf32>
    %632 = arith.addf %631, %9 : vector<16x128xf32>
    %cst_164 = arith.constant 1.000000e+00 : f32
    %633 = vector.broadcast %cst_164 : f32 to vector<16x128xf32>
    %634 = arith.cmpf oge, %632, %633 : vector<16x128xf32>
    %635 = arith.extui %634 : vector<16x128xi1> to vector<16x128xi32>
    %636 = arith.sitofp %635 : vector<16x128xi32> to vector<16x128xf32>
    %637 = arith.addf %613, %636 : vector<16x128xf32>
    %c26_i32 = arith.constant 26 : i32
    %638 = arith.truncf %626 : vector<16x128xf32> to vector<16x128xbf16>
    %cst_165 = arith.constant dense<0.000000e+00> : vector<16x128xf32>
    %639 = tpu.matmul %638, %1, %cst_165 {dimension_numbers = #tpu.dot_dimension_numbers<[1], [0], [0], [1], [0, 0, 1, 1], [], []>} : vector<16x128xbf16>, vector<128x128xbf16>, vector<16x128xf32> -> vector<16x128xf32>
    %640 = arith.truncf %636 : vector<16x128xf32> to vector<16x128xbf16>
    %cst_166 = arith.constant dense<0.000000e+00> : vector<16x128xf32>
    %641 = tpu.matmul %640, %1, %cst_166 {dimension_numbers = #tpu.dot_dimension_numbers<[1], [0], [0], [1], [0, 0, 1, 1], [], []>} : vector<16x128xbf16>, vector<128x128xbf16>, vector<16x128xf32> -> vector<16x128xf32>
    %cst_167 = arith.constant 1.000000e+00 : f32
    %642 = vector.broadcast %cst_167 : f32 to vector<16x128xf32>
    %643 = arith.mulf %642, %626 : vector<16x128xf32>
    %644 = arith.subf %622, %643 : vector<16x128xf32>
    %645 = arith.addf %644, %639 : vector<16x128xf32>
    %646 = arith.addf %645, %3 : vector<16x128xf32>
    %cst_168 = arith.constant 1.000000e+00 : f32
    %647 = vector.broadcast %cst_168 : f32 to vector<16x128xf32>
    %648 = arith.cmpf oge, %646, %647 : vector<16x128xf32>
    %649 = arith.extui %648 : vector<16x128xi1> to vector<16x128xi32>
    %650 = arith.sitofp %649 : vector<16x128xi32> to vector<16x128xf32>
    %651 = arith.addf %627, %650 : vector<16x128xf32>
    %cst_169 = arith.constant 1.000000e+00 : f32
    %652 = vector.broadcast %cst_169 : f32 to vector<16x128xf32>
    %653 = arith.mulf %652, %636 : vector<16x128xf32>
    %654 = arith.subf %632, %653 : vector<16x128xf32>
    %655 = arith.addf %654, %641 : vector<16x128xf32>
    %656 = arith.addf %655, %9 : vector<16x128xf32>
    %cst_170 = arith.constant 1.000000e+00 : f32
    %657 = vector.broadcast %cst_170 : f32 to vector<16x128xf32>
    %658 = arith.cmpf oge, %656, %657 : vector<16x128xf32>
    %659 = arith.extui %658 : vector<16x128xi1> to vector<16x128xi32>
    %660 = arith.sitofp %659 : vector<16x128xi32> to vector<16x128xf32>
    %661 = arith.addf %637, %660 : vector<16x128xf32>
    %c27_i32 = arith.constant 27 : i32
    %662 = arith.truncf %650 : vector<16x128xf32> to vector<16x128xbf16>
    %cst_171 = arith.constant dense<0.000000e+00> : vector<16x128xf32>
    %663 = tpu.matmul %662, %1, %cst_171 {dimension_numbers = #tpu.dot_dimension_numbers<[1], [0], [0], [1], [0, 0, 1, 1], [], []>} : vector<16x128xbf16>, vector<128x128xbf16>, vector<16x128xf32> -> vector<16x128xf32>
    %664 = arith.truncf %660 : vector<16x128xf32> to vector<16x128xbf16>
    %cst_172 = arith.constant dense<0.000000e+00> : vector<16x128xf32>
    %665 = tpu.matmul %664, %1, %cst_172 {dimension_numbers = #tpu.dot_dimension_numbers<[1], [0], [0], [1], [0, 0, 1, 1], [], []>} : vector<16x128xbf16>, vector<128x128xbf16>, vector<16x128xf32> -> vector<16x128xf32>
    %cst_173 = arith.constant 1.000000e+00 : f32
    %666 = vector.broadcast %cst_173 : f32 to vector<16x128xf32>
    %667 = arith.mulf %666, %650 : vector<16x128xf32>
    %668 = arith.subf %646, %667 : vector<16x128xf32>
    %669 = arith.addf %668, %663 : vector<16x128xf32>
    %670 = arith.addf %669, %3 : vector<16x128xf32>
    %cst_174 = arith.constant 1.000000e+00 : f32
    %671 = vector.broadcast %cst_174 : f32 to vector<16x128xf32>
    %672 = arith.cmpf oge, %670, %671 : vector<16x128xf32>
    %673 = arith.extui %672 : vector<16x128xi1> to vector<16x128xi32>
    %674 = arith.sitofp %673 : vector<16x128xi32> to vector<16x128xf32>
    %675 = arith.addf %651, %674 : vector<16x128xf32>
    %cst_175 = arith.constant 1.000000e+00 : f32
    %676 = vector.broadcast %cst_175 : f32 to vector<16x128xf32>
    %677 = arith.mulf %676, %660 : vector<16x128xf32>
    %678 = arith.subf %656, %677 : vector<16x128xf32>
    %679 = arith.addf %678, %665 : vector<16x128xf32>
    %680 = arith.addf %679, %9 : vector<16x128xf32>
    %cst_176 = arith.constant 1.000000e+00 : f32
    %681 = vector.broadcast %cst_176 : f32 to vector<16x128xf32>
    %682 = arith.cmpf oge, %680, %681 : vector<16x128xf32>
    %683 = arith.extui %682 : vector<16x128xi1> to vector<16x128xi32>
    %684 = arith.sitofp %683 : vector<16x128xi32> to vector<16x128xf32>
    %685 = arith.addf %661, %684 : vector<16x128xf32>
    %c28_i32 = arith.constant 28 : i32
    %686 = arith.truncf %674 : vector<16x128xf32> to vector<16x128xbf16>
    %cst_177 = arith.constant dense<0.000000e+00> : vector<16x128xf32>
    %687 = tpu.matmul %686, %1, %cst_177 {dimension_numbers = #tpu.dot_dimension_numbers<[1], [0], [0], [1], [0, 0, 1, 1], [], []>} : vector<16x128xbf16>, vector<128x128xbf16>, vector<16x128xf32> -> vector<16x128xf32>
    %688 = arith.truncf %684 : vector<16x128xf32> to vector<16x128xbf16>
    %cst_178 = arith.constant dense<0.000000e+00> : vector<16x128xf32>
    %689 = tpu.matmul %688, %1, %cst_178 {dimension_numbers = #tpu.dot_dimension_numbers<[1], [0], [0], [1], [0, 0, 1, 1], [], []>} : vector<16x128xbf16>, vector<128x128xbf16>, vector<16x128xf32> -> vector<16x128xf32>
    %cst_179 = arith.constant 1.000000e+00 : f32
    %690 = vector.broadcast %cst_179 : f32 to vector<16x128xf32>
    %691 = arith.mulf %690, %674 : vector<16x128xf32>
    %692 = arith.subf %670, %691 : vector<16x128xf32>
    %693 = arith.addf %692, %687 : vector<16x128xf32>
    %694 = arith.addf %693, %3 : vector<16x128xf32>
    %cst_180 = arith.constant 1.000000e+00 : f32
    %695 = vector.broadcast %cst_180 : f32 to vector<16x128xf32>
    %696 = arith.cmpf oge, %694, %695 : vector<16x128xf32>
    %697 = arith.extui %696 : vector<16x128xi1> to vector<16x128xi32>
    %698 = arith.sitofp %697 : vector<16x128xi32> to vector<16x128xf32>
    %699 = arith.addf %675, %698 : vector<16x128xf32>
    %cst_181 = arith.constant 1.000000e+00 : f32
    %700 = vector.broadcast %cst_181 : f32 to vector<16x128xf32>
    %701 = arith.mulf %700, %684 : vector<16x128xf32>
    %702 = arith.subf %680, %701 : vector<16x128xf32>
    %703 = arith.addf %702, %689 : vector<16x128xf32>
    %704 = arith.addf %703, %9 : vector<16x128xf32>
    %cst_182 = arith.constant 1.000000e+00 : f32
    %705 = vector.broadcast %cst_182 : f32 to vector<16x128xf32>
    %706 = arith.cmpf oge, %704, %705 : vector<16x128xf32>
    %707 = arith.extui %706 : vector<16x128xi1> to vector<16x128xi32>
    %708 = arith.sitofp %707 : vector<16x128xi32> to vector<16x128xf32>
    %709 = arith.addf %685, %708 : vector<16x128xf32>
    %cst_183 = arith.constant 0.0333333351 : f32
    %710 = vector.broadcast %cst_183 : f32 to vector<16x128xf32>
    %711 = arith.mulf %699, %710 : vector<16x128xf32>
    %c0_184 = arith.constant 0 : index
    %c0_185 = arith.constant 0 : index
    %712 = vector.load %arg4[%c0_184, %c0_185] : memref<32x128xf32, #tpu.memory_space<vmem>>, vector<16x128xf32>
    tpu.vector_store %arg4[%c0_184, %c0_185], %711 {strides = array<i32>} : memref<32x128xf32, #tpu.memory_space<vmem>>, vector<16x128xf32>,
    %cst_186 = arith.constant 0.0333333351 : f32
    %713 = vector.broadcast %cst_186 : f32 to vector<16x128xf32>
    %714 = arith.mulf %709, %713 : vector<16x128xf32>
    %c16_187 = arith.constant 16 : index
    %c0_188 = arith.constant 0 : index
    %715 = vector.load %arg4[%c16_187, %c0_188] : memref<32x128xf32, #tpu.memory_space<vmem>>, vector<16x128xf32>
    tpu.vector_store %arg4[%c16_187, %c0_188], %714 {strides = array<i32>} : memref<32x128xf32, #tpu.memory_space<vmem>>, vector<16x128xf32>,
    return
  }
  func.func @transform_0(%arg0: i32) -> (i32, i32) {
    %c0_i32 = arith.constant 0 : i32
    %c0_i32_0 = arith.constant 0 : i32
    return %arg0, %c0_i32 : i32, i32
  }
  func.func @transform_1(%arg0: i32) -> (i32, i32) {
    %c0_i32 = arith.constant 0 : i32
    %c0_i32_0 = arith.constant 0 : i32
    %c0_i32_1 = arith.constant 0 : i32
    return %c0_i32, %c0_i32_0 : i32, i32
  }
  func.func @transform_2(%arg0: i32) -> (i32, i32) {
    %c0_i32 = arith.constant 0 : i32
    %c0_i32_0 = arith.constant 0 : i32
    %c0_i32_1 = arith.constant 0 : i32
    return %c0_i32, %c0_i32_0 : i32, i32
  }
  func.func @transform_3(%arg0: i32) -> (i32, i32) {
    %c0_i32 = arith.constant 0 : i32
    %c0_i32_0 = arith.constant 0 : i32
    return %arg0, %c0_i32 : i32, i32
  }
}

</mosaic_0001>

<bundles_post_ra>
// kernel: tpu_custom_call.1
= control target key start
LH: loop header
LB: loop body
LE: loop exit
PB: predicated region body
PF: predicated region fallthrough
CT: control target
= control target key end

     0   :  { %8 = vsyncpa [#allocation3], 0  ;;  %s8299_s0 = inlined_call_operand.vmem [shape: f32[64,32], index: 0, kind: input, shape index: {}]   ;;  %s8300_s1 = inlined_call_operand.vmem [shape: f32[32,128], index: 1, kind: input, shape index: {}]   ;;  %s8301_s2 = inlined_call_operand.vmem [shape: bf16[128,128], index: 2, kind: input, shape index: {}]   ;;  %s8302_s3 = inlined_call_operand.hbm [shape: f32[64,128], index: 3, kind: output, shape index: {}]  }
   0x1   :  { %10 = vsyncpa [#allocation3 + $0x1], 0  ;;  %s5911_s12 = smov 0   ;;  %s5913_s13 = smov 0  }
   0x2   :  { %s5915_s14 = smov 0   ;;  %s5917_s15 = smov 0  }
   0x3 LB: > { %s5932_s16 = sadd.s32 4294967295, %s5883_s15   ;;  %s3752_s17 = sadd.s32 4294967294, %s5883_s15   ;;  %s5883_s15 = sphi %s5917_s15, %s8308_s15   ;;  %s5879_s14 = sphi %s5915_s14, %s8307_s14   ;;  %s5875_s13 = sphi %s5913_s13, %s8306_s13   ;;  %s5871_s12 = sphi %s5911_s12, %s8305_s12  }
   0x4   : > { %s5936_s18 = sadd.s32 1, %s5883_s15   ;;  %s91_s19 = sadd.s32 1, %s5879_s14 }
   0x5   : > { %s88_s20 = ssub.s32 %s5883_s15, %s5936_s18  ;;  %p101_p0 = scmp.ne.s32.totalorder %s5879_s14, %s5875_s13 }
   0x6   : > { %p89_p1 = scmp.eq.s32.totalorder %s88_s20, 0  ;;  %p102_p2 = scmp.eq.s32.totalorder %s5932_s16, 1 }
   0x7   : > { %p107_p3 = scmp.ne.s32.totalorder %s5875_s13, %s5871_s12  ;;  %p108_p4 = scmp.eq.s32.totalorder %s3752_s17, 1 }
   0x8   : > { %s5947_s21 = scalar_select %p89_p1, %s5879_s14, %s91_s19  }
   0x9   : > { %p5949_p5 = por %p102_p2, %p101_p0  ;;  %p5953_p6 = por %p108_p4, %p107_p3 }
   0xa   : > { %p3755_p7 = scmp.ge.s32.totalorder %s5883_s15, 1  ;;  %p141_p8 = scmp.lt.s32.totalorder %s5883_s15, 3 }
   0xc   : > { %p142_p9 = pnand %p3755_p7, %p141_p8 }
   0xd   : > { %v173_v0 = vld [vmem:[%s8300_s1] sm:$0xff] (!%p142_p9)  ;;  %v174_v1 = vld [vmem:[%s8300_s1 + $0x8] sm:$0xff] (!%p142_p9)  ;;  %v175_v2 = vld [vmem:[%s8300_s1 + $0x10] sm:$0xff] (!%p142_p9)  ;;  %s3757_s30 = sshll.u32 (!%p142_p9), %s5932_s16, 2  ;;  %vm195_vm0 = vcmask (!%p142_p9), 261120   ;;  %v5885_v11 = vmov (!%p142_p9), 0.0  }
   0xe   : > { %145 = sbr.rel (%p142_p9) target bundleno = 6641 (0x19f1), region = 32  ;;  %v5729_v3 = vpack.c.bf16 (!%p142_p9), %v174_v1, %v173_v0  ;;  %v176_v4 = vld [vmem:[%s8300_s1 + $0x18] sm:$0xff] (!%p142_p9)  ;;  %p166_p10 = scmp.lt.s32.totalorder (!%p142_p9), %s3757_s30, 7  ;;  %v5978_v8 = vld [vmem:[%s8301_s2] sm:$0xff] (!%p142_p9)   ;;  %v5987_v12 = vld [vmem:[%s8301_s2 + $0x8] sm:$0xff] (!%p142_p9)   ;;  %vm5886_vm1 = vmmov (!%p142_p9), 0  }
   0xf   : > { %v5733_v5 = vpack.c.bf16 (!%p142_p9), %v176_v4, %v175_v2  ;;  %v5996_v13 = vld [vmem:[%s8301_s2 + $0x10] sm:$0xff] (!%p142_p9)   ;;  %v6005_v14 = vld [vmem:[%s8301_s2 + $0x18] sm:$0xff] (!%p142_p9)   ;;  %v6014_v15 = vld [vmem:[%s8301_s2 + $0x20] sm:$0xff] (!%p142_p9)   ;;  %v5887_v23 = vmov (!%p142_p9), 1.0|1.0   ;;  %s162_s29 = sand.u32 (!%p142_p9), 1, %s5875_s13  }
  0x10   : > { %5730 = vmatprep.subr.bf16.mxu0 (!%p142_p9), %v5729_v3  ;;  %5738 = vmatprep.subr.bf16.mxu1 (!%p142_p9), %v5729_v3  ;;  %v6023_v16 = vld [vmem:[%s8301_s2 + $0x28] sm:$0xff] (!%p142_p9)   ;;  %v6032_v17 = vld [vmem:[%s8301_s2 + $0x30] sm:$0xff] (!%p142_p9)   ;;  %v6043_v18 = vld [vmem:[%s8301_s2 + $0x38] sm:$0xff] (!%p142_p9)   ;;  %s4012_s4 = sshll.u32 (!%p142_p9), %s5932_s16, 9  ;;  %s8258_s16 = scalar_lea.sflag (!%p142_p9), [#allocation3], %s162_s29 }
  0x11   : > { %5732 = vmatpush3.bf16.msra.mxu0 (!%p142_p9), %v5729_v3  ;;  %5740 = vmatpush3.bf16.msra.mxu1 (!%p142_p9), %v5729_v3  ;;  %s5888_s11 = smov (!%p142_p9), [#allocation2]  }
  0x12   : > { %5734 = vmatprep.subr.bf16.mxu0 (!%p142_p9), %v5733_v5  ;;  %5742 = vmatprep.subr.bf16.mxu1 (!%p142_p9), %v5733_v5  ;;  %s5825_s17 = sshll.u32 (!%p142_p9), %s5888_s11, 4  ;;  %s5826_s17 = int_to_ptr.vmem [resolvable:$false] %s5825_s17 }
  0x13   : > { %s5827_s19 = scalar_lea.vmem (!%p142_p9), %s5826_s17, 1024 }
  0x15   : > { %s8310_s30 = smov (!%p166_p10, %s3757_s30), 7  ;;  %5736 = vmatpush3.bf16.msra.mxu0 %v5733_v5  ;;  %5744 = vmatpush3.bf16.msra.mxu1 %v5733_v5 }
  0x16   : > { %s3758_s6 = sshll.u32 %s8310_s30, 3  ;;  %4569 = vmatprep.subr.bf16.mxu0 %v5885_v11  ;;  %4589 = vmatprep.subr.bf16.mxu1 %v5885_v11  ;;  %s3756_s30 = sshll.u32 %s162_s29, 5 }
  0x17   : > { %s169_s9 = scalar_lea.vmem %s8299_s0, %s3758_s6  ;;  %s164_s5 = scalar_lea.vmem [#allocation2], %s3756_s30 }
  0x18   : > { %v193_v6 = vld [vmem:[%s169_s9] sm:$0xff]  ;;  %v283_v7 = vld [vmem:[%s169_s9 + $0x10] sm:$0xff]  ;;  %v194_v9 = vld [vmem:[%s169_s9 + $0x8] sm:$0xff]  ;;  %s3690_s6 = sshll.u32 %s164_s5, 4  ;;  %s8254_s6 = int_to_ptr.vmem [resolvable:$true] %s3690_s6 }
  0x19   : > { %v284_v10 = vld [vmem:[%s169_s9 + $0x18] sm:$0xff]  ;;  %4555 = vmatprep.mubr.msk.f32.mxu0 %vm195_vm0, %v193_v6  ;;  %4566 = vmatprep.mubr.msk.f32.mxu1 %vm195_vm0, %v283_v7  ;;  %s8252_s9 = scalar_lea.hbm %s8302_s3, %s4012_s4  ;;  %s5821_s10 = scalar_lea.vmem %s8254_s6, 512 }
  0x1a   : > { %4556 = vmatmul.mubr.msk.f32.vlgmr.msra.gmra.mrb[0].mxu0 %vm195_vm0, %v194_v9  ;;  %4567 = vmatmul.mubr.msk.f32.vlgmr.msra.gmra.mrb[0].mxu1 %vm195_vm0, %v284_v10  ;;  %p5822_p11 = scmp.ne.s32.totalorder %s8254_s6, %s5821_s10  ;;  %p5828_p0 = scmp.lt.s32.totalorder %s8254_s6, %s5826_s17 }
  0x1b   : > { %4570 = vmatpush3.bf16.msra.mxu0 %v5978_v8  ;;  %4590 = vmatpush3.bf16.msra.mxu1 %v5978_v8  ;;  %p5829_p1 = scmp.lt.s32.totalorder %s5827_s19, %s5821_s10 }
  0x1c   : > { %4571 = vmatprep.subr.bf16.mxu0 %v5885_v11  ;;  %4591 = vmatprep.subr.bf16.mxu1 %v5885_v11  ;;  %p5823_p12 = pnand %p5822_p11, %p5949_p5 }
  0x1d   : > { %4585 = vmatprep.mubr.msk.bf16.mxu0 %vm5886_vm1, %v5885_v11  ;;  %4605 = vmatprep.mubr.msk.bf16.mxu1 %vm5886_vm1, %v5885_v11  ;;  %p5830_p2 = por %p5829_p1, %p5828_p0 }
  0x1e   : > { %p5824_p13 = pneg %p5823_p12 }
  0x1f   : > { %4572 = vmatpush3.bf16.msra.mxu0 %v5987_v12  ;;  %4592 = vmatpush3.bf16.msra.mxu1 %v5987_v12 }
  0x20   : > { %4573 = vmatprep.subr.bf16.mxu0 %v5885_v11  ;;  %4593 = vmatprep.subr.bf16.mxu1 %v5885_v11  ;;  %p5831_p3 = pnand %p5830_p2, %p5824_p13 }
  0x23   : > { %4574 = vmatpush3.bf16.msra.mxu0 %v5996_v13  ;;  %4594 = vmatpush3.bf16.msra.mxu1 %v5996_v13 }
  0x24   : > { %4575 = vmatprep.subr.bf16.mxu0 %v5885_v11  ;;  %4595 = vmatprep.subr.bf16.mxu1 %v5885_v11 }
  0x27   : > { %4576 = vmatpush3.bf16.msra.mxu0 %v6005_v14  ;;  %4596 = vmatpush3.bf16.msra.mxu1 %v6005_v14 }
  0x28   : > { %4577 = vmatprep.subr.bf16.mxu0 %v5885_v11  ;;  %4597 = vmatprep.subr.bf16.mxu1 %v5885_v11 }
  0x2b   : > { %4578 = vmatpush3.bf16.msra.mxu0 %v6014_v15  ;;  %4598 = vmatpush3.bf16.msra.mxu1 %v6014_v15 }
  0x2c   : > { %4579 = vmatprep.subr.bf16.mxu0 %v5885_v11  ;;  %4599 = vmatprep.subr.bf16.mxu1 %v5885_v11 }
  0x2f   : > { %4580 = vmatpush3.bf16.msra.mxu0 %v6023_v16  ;;  %4600 = vmatpush3.bf16.msra.mxu1 %v6023_v16 }
  0x30   : > { %4581 = vmatprep.subr.bf16.mxu0 %v5885_v11  ;;  %4601 = vmatprep.subr.bf16.mxu1 %v5885_v11 }
  0x33   : > { %4582 = vmatpush3.bf16.msra.mxu0 %v6032_v17  ;;  %4602 = vmatpush3.bf16.msra.mxu1 %v6032_v17 }
  0x34   : > { %4583 = vmatprep.subr.bf16.mxu0 %v5885_v11  ;;  %4603 = vmatprep.subr.bf16.mxu1 %v5885_v11 }
  0x37   : > { %4584 = vmatpush3.bf16.msra.mxu0 %v6043_v18  ;;  %4604 = vmatpush3.bf16.msra.mxu1 %v6043_v18 }
  0x38   : > { %4609 = vmatprep.subr.bf16.mxu0 %v5885_v11  ;;  %4629 = vmatprep.subr.bf16.mxu1 %v5885_v11 }
  0xed   : > { %v6053_v19 = vpop.f32.mrb[0].mxu0  ;;  %v6055_v20 = vpop.f32.mrb[0].mxu1 }
  0xee   : > { %v6057_v21 = vpop.f32.mrb[1].mxu0  ;;  %v6059_v22 = vpop.f32.mrb[1].mxu1  ;;  %vm278_vm2 = vcmp.ge.f32.partialorder %v6053_v19, 1.0  ;;  %vm367_vm3 = vcmp.ge.f32.partialorder %v6055_v20, 1.0 }
  0xef   : > { %vm277_vm4 = vcmp.ge.f32.partialorder %v6057_v21, 1.0  ;;  %vm366_vm5 = vcmp.ge.f32.partialorder %v6059_v22, 1.0  ;;  %v6124_v26 = vsel %vm278_vm2, 1.0, %v5885_v11  ;;  %v6131_v28 = vsel %vm367_vm3, 1.0, %v5885_v11 }
  0xf0   : > { %vm3775_vm6 = vmpackc.low %vm278_vm2, %vm277_vm4  ;;  %v6114_v24 = vsel %vm277_vm4, 1.0, %v5885_v11  ;;  %v6119_v25 = vsel %vm366_vm5, 1.0, %v5885_v11  ;;  %v505_v34 = vsub.f32 %v6053_v19, %v6124_v26  ;;  %v519_v38 = vsub.f32 %v6055_v20, %v6131_v28 }
  0xf1   : > { %4586 = vmatmul.mubr.msk.bf16.vlgmr.msra.gmra.mrb[4].mxu0 %vm3775_vm6, %v5887_v23  ;;  %vm3777_vm7 = vmpackc.low %vm367_vm3, %vm366_vm5  ;;  %v504_v27 = vsub.f32 %v6057_v21, %v6114_v24  ;;  %v518_v30 = vsub.f32 %v6059_v22, %v6119_v25 }
  0xf2   : > { %4606 = vmatmul.mubr.msk.bf16.vlgmr.msra.gmra.mrb[4].mxu1 %vm3777_vm7, %v5887_v23  ;;  %4610 = vmatpush3.bf16.msra.mxu0 %v5978_v8 }
  0xf3   : > { %4630 = vmatpush3.bf16.msra.mxu1 %v5978_v8  ;;  %4611 = vmatprep.subr.bf16.mxu0 %v5885_v11 }
  0xf4   : > { %4631 = vmatprep.subr.bf16.mxu1 %v5885_v11  ;;  %4625 = vmatprep.mubr.msk.bf16.mxu0 %vm5886_vm1, %v5885_v11 }
  0xf5   : > { %4645 = vmatprep.mubr.msk.bf16.mxu1 %vm5886_vm1, %v5885_v11 }
  0xf6   : > { %4612 = vmatpush3.bf16.msra.mxu0 %v5987_v12 }
  0xf7   : > { %4632 = vmatpush3.bf16.msra.mxu1 %v5987_v12  ;;  %4613 = vmatprep.subr.bf16.mxu0 %v5885_v11 }
  0xf8   : > { %4633 = vmatprep.subr.bf16.mxu1 %v5885_v11 }
  0xfa   : > { %4614 = vmatpush3.bf16.msra.mxu0 %v5996_v13 }
  0xfb   : > { %4634 = vmatpush3.bf16.msra.mxu1 %v5996_v13  ;;  %4615 = vmatprep.subr.bf16.mxu0 %v5885_v11 }
  0xfc   : > { %4635 = vmatprep.subr.bf16.mxu1 %v5885_v11 }
  0xfe   : > { %4616 = vmatpush3.bf16.msra.mxu0 %v6005_v14 }
  0xff   : > { %4636 = vmatpush3.bf16.msra.mxu1 %v6005_v14  ;;  %4617 = vmatprep.subr.bf16.mxu0 %v5885_v11 }
 0x100   : > { %4637 = vmatprep.subr.bf16.mxu1 %v5885_v11 }
 0x102   : > { %4618 = vmatpush3.bf16.msra.mxu0 %v6014_v15 }
 0x103   : > { %4638 = vmatpush3.bf16.msra.mxu1 %v6014_v15  ;;  %4619 = vmatprep.subr.bf16.mxu0 %v5885_v11 }
 0x104   : > { %4639 = vmatprep.subr.bf16.mxu1 %v5885_v11 }
 0x106   : > { %4620 = vmatpush3.bf16.msra.mxu0 %v6023_v16 }
 0x107   : > { %4640 = vmatpush3.bf16.msra.mxu1 %v6023_v16  ;;  %4621 = vmatprep.subr.bf16.mxu0 %v5885_v11 }
 0x108   : > { %4641 = vmatprep.subr.bf16.mxu1 %v5885_v11 }
 0x10a   : > { %4622 = vmatpush3.bf16.msra.mxu0 %v6032_v17 }
 0x10b   : > { %4642 = vmatpush3.bf16.msra.mxu1 %v6032_v17  ;;  %4623 = vmatprep.subr.bf16.mxu0 %v5885_v11 }
 0x10c   : > { %4643 = vmatprep.subr.bf16.mxu1 %v5885_v11 }
 0x10e   : > { %4624 = vmatpush3.bf16.msra.mxu0 %v6043_v18 }
 0x10f   : > { %4644 = vmatpush3.bf16.msra.mxu1 %v6043_v18  ;;  %4649 = vmatprep.subr.bf16.mxu0 %v5885_v11 }
 0x110   : > { %4669 = vmatprep.subr.bf16.mxu1 %v5885_v11 }
 0x1c4   : > { %v455_v29 = vpop.f32.mrb[4].mxu0 }
 0x1c5   : > { %v506_v31 = vadd.f32 %v504_v27, %v455_v29  ;;  %v497_v32 = vpop.f32.mrb[4].mxu1  ;;  %v4587_v33 = vpop.f32.mrb[5].mxu0 }
 0x1c6   : > { %v520_v35 = vadd.f32 %v518_v30, %v497_v32  ;;  %v4607_v36 = vpop.f32.mrb[5].mxu1  ;;  %v458_v37 = vpop.f32.mrb[6].mxu0 }
 0x1c7   : > { %v508_v39 = vadd.f32 %v506_v31, %v6057_v21  ;;  %v507_v40 = vadd.f32 %v505_v34, %v458_v37  ;;  %v500_v41 = vpop.f32.mrb[6].mxu1  ;;  %v4588_v42 = vpop.f32.mrb[7].mxu0 }
 0x1c8   : > { %v522_v43 = vadd.f32 %v520_v35, %v6059_v22  ;;  %v521_v44 = vadd.f32 %v519_v38, %v500_v41  ;;  %v4608_v45 = vpop.f32.mrb[7].mxu1 }
 0x1c9   : > { %vm510_vm8 = vcmp.ge.f32.partialorder %v508_v39, 1.0  ;;  %v509_v46 = vadd.f32 %v6053_v19, %v507_v40 }
 0x1ca   : > { %vm524_vm9 = vcmp.ge.f32.partialorder %v522_v43, 1.0  ;;  %v6143_v47 = vadd.f32 %v6055_v20, %v521_v44  ;;  %v3779_v48 = vsel %vm510_vm8, 1.0, %v5885_v11 }
 0x1cb   : > { %vm511_vm10 = vcmp.ge.f32.partialorder %v509_v46, 1.0  ;;  %v616_v49 = vsub.f32 %v508_v39, %v3779_v48  ;;  %v3781_v50 = vsel %vm524_vm9, 1.0, %v5885_v11  ;;  %v516_v3 = vadd.f32 %v3779_v48, %v6114_v24 }
 0x1cc   : > { %vm3783_vm11 = vmpackc.low %vm511_vm10, %vm510_vm8  ;;  %vm525_vm12 = vcmp.ge.f32.partialorder %v6143_v47, 1.0  ;;  %v630_v51 = vsub.f32 %v522_v43, %v3781_v50  ;;  %v3780_v52 = vsel %vm511_vm10, 1.0, %v5885_v11  ;;  %v530_v7 = vadd.f32 %v3781_v50, %v6119_v25 }
 0x1cd   : > { %vm3785_vm13 = vmpackc.low %vm525_vm12, %vm524_vm9  ;;  %4626 = vmatmul.mubr.msk.bf16.vlgmr.msra.gmra.mrb[8].mxu0 %vm3783_vm11, %v5887_v23  ;;  %v617_v53 = vsub.f32 %v509_v46, %v3780_v52  ;;  %v3782_v54 = vsel %vm525_vm12, 1.0, %v5885_v11  ;;  %v517_v9 = vadd.f32 %v3780_v52, %v6124_v26 }
 0x1ce   : > { %4646 = vmatmul.mubr.msk.bf16.vlgmr.msra.gmra.mrb[8].mxu1 %vm3785_vm13, %v5887_v23  ;;  %4650 = vmatpush3.bf16.msra.mxu0 %v5978_v8  ;;  %v631_v55 = vsub.f32 %v6143_v47, %v3782_v54  ;;  %v531_v27 = vadd.f32 %v3782_v54, %v6131_v28 }
 0x1cf   : > { %4670 = vmatpush3.bf16.msra.mxu1 %v5978_v8  ;;  %4651 = vmatprep.subr.bf16.mxu0 %v5885_v11 }
 0x1d0   : > { %4671 = vmatprep.subr.bf16.mxu1 %v5885_v11  ;;  %4665 = vmatprep.mubr.msk.bf16.mxu0 %vm5886_vm1, %v5885_v11 }
 0x1d1   : > { %4685 = vmatprep.mubr.msk.bf16.mxu1 %vm5886_vm1, %v5885_v11 }
 0x1d2   : > { %4652 = vmatpush3.bf16.msra.mxu0 %v5987_v12 }
 0x1d3   : > { %4672 = vmatpush3.bf16.msra.mxu1 %v5987_v12  ;;  %4653 = vmatprep.subr.bf16.mxu0 %v5885_v11 }
 0x1d4   : > { %4673 = vmatprep.subr.bf16.mxu1 %v5885_v11 }
 0x1d6   : > { %4654 = vmatpush3.bf16.msra.mxu0 %v5996_v13 }
 0x1d7   : > { %4674 = vmatpush3.bf16.msra.mxu1 %v5996_v13  ;;  %4655 = vmatprep.subr.bf16.mxu0 %v5885_v11 }
 0x1d8   : > { %4675 = vmatprep.subr.bf16.mxu1 %v5885_v11 }
 0x1da   : > { %4656 = vmatpush3.bf16.msra.mxu0 %v6005_v14 }
 0x1db   : > { %4676 = vmatpush3.bf16.msra.mxu1 %v6005_v14  ;;  %4657 = vmatprep.subr.bf16.mxu0 %v5885_v11 }
 0x1dc   : > { %4677 = vmatprep.subr.bf16.mxu1 %v5885_v11 }
 0x1de   : > { %4658 = vmatpush3.bf16.msra.mxu0 %v6014_v15 }
 0x1df   : > { %4678 = vmatpush3.bf16.msra.mxu1 %v6014_v15  ;;  %4659 = vmatprep.subr.bf16.mxu0 %v5885_v11 }
 0x1e0   : > { %4679 = vmatprep.subr.bf16.mxu1 %v5885_v11 }
 0x1e2   : > { %4660 = vmatpush3.bf16.msra.mxu0 %v6023_v16 }
 0x1e3   : > { %4680 = vmatpush3.bf16.msra.mxu1 %v6023_v16  ;;  %4661 = vmatprep.subr.bf16.mxu0 %v5885_v11 }
 0x1e4   : > { %4681 = vmatprep.subr.bf16.mxu1 %v5885_v11 }
 0x1e6   : > { %4662 = vmatpush3.bf16.msra.mxu0 %v6032_v17 }
 0x1e7   : > { %4682 = vmatpush3.bf16.msra.mxu1 %v6032_v17  ;;  %4663 = vmatprep.subr.bf16.mxu0 %v5885_v11 }
 0x1e8   : > { %4683 = vmatprep.subr.bf16.mxu1 %v5885_v11 }
 0x1ea   : > { %4664 = vmatpush3.bf16.msra.mxu0 %v6043_v18 }
 0x1eb   : > { %4684 = vmatpush3.bf16.msra.mxu1 %v6043_v18  ;;  %4689 = vmatprep.subr.bf16.mxu0 %v5885_v11 }
 0x1ec   : > { %4709 = vmatprep.subr.bf16.mxu1 %v5885_v11 }
 0x2a0   : > { %v567_v56 = vpop.f32.mrb[8].mxu0 }
 0x2a1   : > { %v618_v57 = vadd.f32 %v616_v49, %v567_v56  ;;  %v609_v58 = vpop.f32.mrb[8].mxu1  ;;  %v4627_v59 = vpop.f32.mrb[9].mxu0 }
 0x2a2   : > { %v632_v60 = vadd.f32 %v630_v51, %v609_v58  ;;  %v4647_v61 = vpop.f32.mrb[9].mxu1  ;;  %v570_v62 = vpop.f32.mrb[10].mxu0 }
 0x2a3   : > { %v6190_v63 = vadd.f32 %v618_v57, %v6057_v21  ;;  %v619_v0 = vadd.f32 %v617_v53, %v570_v62  ;;  %v612_v1 = vpop.f32.mrb[10].mxu1  ;;  %v4628_v2 = vpop.f32.mrb[11].mxu0 }
 0x2a4   : > { %v6194_v4 = vadd.f32 %v632_v60, %v6059_v22  ;;  %v633_v5 = vadd.f32 %v631_v55, %v612_v1  ;;  %v4648_v6 = vpop.f32.mrb[11].mxu1 }
 0x2a5   : > { %vm622_vm14 = vcmp.ge.f32.partialorder %v6190_v63, 1.0  ;;  %v6200_v10 = vadd.f32 %v6053_v19, %v619_v0 }
 0x2a6   : > { %vm636_vm15 = vcmp.ge.f32.partialorder %v6194_v4, 1.0  ;;  %v6205_v24 = vadd.f32 %v6055_v20, %v633_v5  ;;  %v3787_v29 = vsel %vm622_vm14, 1.0, %v5885_v11 }
 0x2a7   : > { %vm623_vm0 = vcmp.ge.f32.partialorder %v6200_v10, 1.0  ;;  %v6209_v30 = vadd.f32 %v3787_v29, %v516_v3  ;;  %v728_v25 = vsub.f32 %v6190_v63, %v3787_v29  ;;  %v3789_v26 = vsel %vm636_vm15, 1.0, %v5885_v11 }
 0x2a8   : > { %vm3791_vm2 = vmpackc.low %vm623_vm0, %vm622_vm14  ;;  %vm637_vm3 = vcmp.ge.f32.partialorder %v6205_v24, 1.0  ;;  %v6214_v31 = vadd.f32 %v3789_v26, %v530_v7  ;;  %v742_v28 = vsub.f32 %v6194_v4, %v3789_v26  ;;  %v3788_v32 = vsel %vm623_vm0, 1.0, %v5885_v11 }
 0x2a9   : > { %vm3793_vm4 = vmpackc.low %vm637_vm3, %vm636_vm15  ;;  %4666 = vmatmul.mubr.msk.bf16.vlgmr.msra.gmra.mrb[12].mxu0 %vm3791_vm2, %v5887_v23  ;;  %v6219_v33 = vadd.f32 %v3788_v32, %v517_v9  ;;  %v729_v34 = vsub.f32 %v6200_v10, %v3788_v32  ;;  %v3790_v35 = vsel %vm637_vm3, 1.0, %v5885_v11 }
 0x2aa   : > { %4686 = vmatmul.mubr.msk.bf16.vlgmr.msra.gmra.mrb[12].mxu1 %vm3793_vm4, %v5887_v23  ;;  %4690 = vmatpush3.bf16.msra.mxu0 %v5978_v8  ;;  %v6225_v36 = vadd.f32 %v3790_v35, %v531_v27  ;;  %v743_v37 = vsub.f32 %v6205_v24, %v3790_v35 }
 0x2ab   : > { %4710 = vmatpush3.bf16.msra.mxu1 %v5978_v8  ;;  %4691 = vmatprep.subr.bf16.mxu0 %v5885_v11 }
 0x2ac   : > { %4711 = vmatprep.subr.bf16.mxu1 %v5885_v11  ;;  %4705 = vmatprep.mubr.msk.bf16.mxu0 %vm5886_vm1, %v5885_v11 }
 0x2ad   : > { %4725 = vmatprep.mubr.msk.bf16.mxu1 %vm5886_vm1, %v5885_v11 }
 0x2ae   : > { %4692 = vmatpush3.bf16.msra.mxu0 %v5987_v12 }
 0x2af   : > { %4712 = vmatpush3.bf16.msra.mxu1 %v5987_v12  ;;  %4693 = vmatprep.subr.bf16.mxu0 %v5885_v11 }
 0x2b0   : > { %4713 = vmatprep.subr.bf16.mxu1 %v5885_v11 }
 0x2b2   : > { %4694 = vmatpush3.bf16.msra.mxu0 %v5996_v13 }
 0x2b3   : > { %4714 = vmatpush3.bf16.msra.mxu1 %v5996_v13  ;;  %4695 = vmatprep.subr.bf16.mxu0 %v5885_v11 }
 0x2b4   : > { %4715 = vmatprep.subr.bf16.mxu1 %v5885_v11 }
 0x2b6   : > { %4696 = vmatpush3.bf16.msra.mxu0 %v6005_v14 }
 0x2b7   : > { %4716 = vmatpush3.bf16.msra.mxu1 %v6005_v14  ;;  %4697 = vmatprep.subr.bf16.mxu0 %v5885_v11 }
 0x2b8   : > { %4717 = vmatprep.subr.bf16.mxu1 %v5885_v11 }
 0x2ba   : > { %4698 = vmatpush3.bf16.msra.mxu0 %v6014_v15 }
 0x2bb   : > { %4718 = vmatpush3.bf16.msra.mxu1 %v6014_v15  ;;  %4699 = vmatprep.subr.bf16.mxu0 %v5885_v11 }
 0x2bc   : > { %4719 = vmatprep.subr.bf16.mxu1 %v5885_v11 }
 0x2be   : > { %4700 = vmatpush3.bf16.msra.mxu0 %v6023_v16 }
 0x2bf   : > { %4720 = vmatpush3.bf16.msra.mxu1 %v6023_v16  ;;  %4701 = vmatprep.subr.bf16.mxu0 %v5885_v11 }
 0x2c0   : > { %4721 = vmatprep.subr.bf16.mxu1 %v5885_v11 }
 0x2c2   : > { %4702 = vmatpush3.bf16.msra.mxu0 %v6032_v17 }
 0x2c3   : > { %4722 = vmatpush3.bf16.msra.mxu1 %v6032_v17  ;;  %4703 = vmatprep.subr.bf16.mxu0 %v5885_v11 }
 0x2c4   : > { %4723 = vmatprep.subr.bf16.mxu1 %v5885_v11 }
 0x2c6   : > { %4704 = vmatpush3.bf16.msra.mxu0 %v6043_v18 }
 0x2c7   : > { %4724 = vmatpush3.bf16.msra.mxu1 %v6043_v18  ;;  %4729 = vmatprep.subr.bf16.mxu0 %v5885_v11 }
 0x2c8   : > { %4749 = vmatprep.subr.bf16.mxu1 %v5885_v11 }
 0x37c   : > { %v679_v38 = vpop.f32.mrb[12].mxu0 }
 0x37d   : > { %v730_v39 = vadd.f32 %v728_v25, %v679_v38  ;;  %v721_v40 = vpop.f32.mrb[12].mxu1  ;;  %v4667_v41 = vpop.f32.mrb[13].mxu0 }
 0x37e   : > { %v744_v42 = vadd.f32 %v742_v28, %v721_v40  ;;  %v4687_v43 = vpop.f32.mrb[13].mxu1  ;;  %v682_v44 = vpop.f32.mrb[14].mxu0 }
 0x37f   : > { %v6264_v45 = vadd.f32 %v730_v39, %v6057_v21  ;;  %v731_v46 = vadd.f32 %v729_v34, %v682_v44  ;;  %v724_v47 = vpop.f32.mrb[14].mxu1  ;;  %v4668_v48 = vpop.f32.mrb[15].mxu0 }
 0x380   : > { %v6267_v49 = vadd.f32 %v744_v42, %v6059_v22  ;;  %v745_v50 = vadd.f32 %v743_v37, %v724_v47  ;;  %v4688_v51 = vpop.f32.mrb[15].mxu1 }
 0x381   : > { %vm734_vm5 = vcmp.ge.f32.partialorder %v6264_v45, 1.0  ;;  %v6271_v52 = vadd.f32 %v6053_v19, %v731_v46 }
 0x382   : > { %vm748_vm6 = vcmp.ge.f32.partialorder %v6267_v49, 1.0  ;;  %v6275_v53 = vadd.f32 %v6055_v20, %v745_v50  ;;  %v3795_v54 = vsel %vm734_vm5, 1.0, %v5885_v11 }
 0x383   : > { %vm735_vm7 = vcmp.ge.f32.partialorder %v6271_v52, 1.0  ;;  %v6280_v55 = vadd.f32 %v3795_v54, %v6209_v30  ;;  %v840_v56 = vsub.f32 %v6264_v45, %v3795_v54  ;;  %v3797_v57 = vsel %vm748_vm6, 1.0, %v5885_v11 }
 0x384   : > { %vm3799_vm8 = vmpackc.low %vm735_vm7, %vm734_vm5  ;;  %vm749_vm9 = vcmp.ge.f32.partialorder %v6275_v53, 1.0  ;;  %v6286_v58 = vadd.f32 %v3797_v57, %v6214_v31  ;;  %v854_v59 = vsub.f32 %v6267_v49, %v3797_v57  ;;  %v3796_v60 = vsel %vm735_vm7, 1.0, %v5885_v11 }
 0x385   : > { %vm3801_vm10 = vmpackc.low %vm749_vm9, %vm748_vm6  ;;  %4706 = vmatmul.mubr.msk.bf16.vlgmr.msra.gmra.mrb[16].mxu0 %vm3799_vm8, %v5887_v23  ;;  %v6292_v61 = vadd.f32 %v3796_v60, %v6219_v33  ;;  %v841_v62 = vsub.f32 %v6271_v52, %v3796_v60  ;;  %v3798_v63 = vsel %vm749_vm9, 1.0, %v5885_v11 }
 0x386   : > { %4726 = vmatmul.mubr.msk.bf16.vlgmr.msra.gmra.mrb[16].mxu1 %vm3801_vm10, %v5887_v23  ;;  %4730 = vmatpush3.bf16.msra.mxu0 %v5978_v8  ;;  %v6299_v0 = vadd.f32 %v3798_v63, %v6225_v36  ;;  %v855_v1 = vsub.f32 %v6275_v53, %v3798_v63 }
 0x387   : > { %4750 = vmatpush3.bf16.msra.mxu1 %v5978_v8  ;;  %4731 = vmatprep.subr.bf16.mxu0 %v5885_v11 }
 0x388   : > { %4751 = vmatprep.subr.bf16.mxu1 %v5885_v11  ;;  %4745 = vmatprep.mubr.msk.bf16.mxu0 %vm5886_vm1, %v5885_v11 }
 0x389   : > { %4765 = vmatprep.mubr.msk.bf16.mxu1 %vm5886_vm1, %v5885_v11 }
 0x38a   : > { %4732 = vmatpush3.bf16.msra.mxu0 %v5987_v12 }
 0x38b   : > { %4752 = vmatpush3.bf16.msra.mxu1 %v5987_v12  ;;  %4733 = vmatprep.subr.bf16.mxu0 %v5885_v11 }
 0x38c   : > { %4753 = vmatprep.subr.bf16.mxu1 %v5885_v11 }
 0x38e   : > { %4734 = vmatpush3.bf16.msra.mxu0 %v5996_v13 }
 0x38f   : > { %4754 = vmatpush3.bf16.msra.mxu1 %v5996_v13  ;;  %4735 = vmatprep.subr.bf16.mxu0 %v5885_v11 }
 0x390   : > { %4755 = vmatprep.subr.bf16.mxu1 %v5885_v11 }
 0x392   : > { %4736 = vmatpush3.bf16.msra.mxu0 %v6005_v14 }
 0x393   : > { %4756 = vmatpush3.bf16.msra.mxu1 %v6005_v14  ;;  %4737 = vmatprep.subr.bf16.mxu0 %v5885_v11 }
 0x394   : > { %4757 = vmatprep.subr.bf16.mxu1 %v5885_v11 }
 0x396   : > { %4738 = vmatpush3.bf16.msra.mxu0 %v6014_v15 }
 0x397   : > { %4758 = vmatpush3.bf16.msra.mxu1 %v6014_v15  ;;  %4739 = vmatprep.subr.bf16.mxu0 %v5885_v11 }
 0x398   : > { %4759 = vmatprep.subr.bf16.mxu1 %v5885_v11 }
 0x39a   : > { %4740 = vmatpush3.bf16.msra.mxu0 %v6023_v16 }
 0x39b   : > { %4760 = vmatpush3.bf16.msra.mxu1 %v6023_v16  ;;  %4741 = vmatprep.subr.bf16.mxu0 %v5885_v11 }
 0x39c   : > { %4761 = vmatprep.subr.bf16.mxu1 %v5885_v11 }
 0x39e   : > { %4742 = vmatpush3.bf16.msra.mxu0 %v6032_v17 }
 0x39f   : > { %4762 = vmatpush3.bf16.msra.mxu1 %v6032_v17  ;;  %4743 = vmatprep.subr.bf16.mxu0 %v5885_v11 }
 0x3a0   : > { %4763 = vmatprep.subr.bf16.mxu1 %v5885_v11 }
 0x3a2   : > { %4744 = vmatpush3.bf16.msra.mxu0 %v6043_v18 }
 0x3a3   : > { %4764 = vmatpush3.bf16.msra.mxu1 %v6043_v18  ;;  %4769 = vmatprep.subr.bf16.mxu0 %v5885_v11 }
 0x3a4   : > { %4789 = vmatprep.subr.bf16.mxu1 %v5885_v11 }
 0x458   : > { %v791_v2 = vpop.f32.mrb[16].mxu0 }
 0x459   : > { %v842_v3 = vadd.f32 %v840_v56, %v791_v2  ;;  %v833_v4 = vpop.f32.mrb[16].mxu1  ;;  %v4707_v5 = vpop.f32.mrb[17].mxu0 }
 0x45a   : > { %v856_v6 = vadd.f32 %v854_v59, %v833_v4  ;;  %v4727_v7 = vpop.f32.mrb[17].mxu1  ;;  %v794_v9 = vpop.f32.mrb[18].mxu0 }
 0x45b   : > { %v6338_v10 = vadd.f32 %v842_v3, %v6057_v21  ;;  %v843_v27 = vadd.f32 %v841_v62, %v794_v9  ;;  %v836_v24 = vpop.f32.mrb[18].mxu1  ;;  %v4708_v29 = vpop.f32.mrb[19].mxu0 }
 0x45c   : > { %v6341_v30 = vadd.f32 %v856_v6, %v6059_v22  ;;  %v857_v25 = vadd.f32 %v855_v1, %v836_v24  ;;  %v4728_v26 = vpop.f32.mrb[19].mxu1 }
 0x45d   : > { %vm846_vm11 = vcmp.ge.f32.partialorder %v6338_v10, 1.0  ;;  %v6345_v31 = vadd.f32 %v6053_v19, %v843_v27 }
 0x45e   : > { %vm860_vm12 = vcmp.ge.f32.partialorder %v6341_v30, 1.0  ;;  %v6349_v28 = vadd.f32 %v6055_v20, %v857_v25  ;;  %v3803_v32 = vsel %vm846_vm11, 1.0, %v5885_v11 }
 0x45f   : > { %vm847_vm13 = vcmp.ge.f32.partialorder %v6345_v31, 1.0  ;;  %v6354_v33 = vadd.f32 %v3803_v32, %v6280_v55  ;;  %v952_v34 = vsub.f32 %v6338_v10, %v3803_v32  ;;  %v3805_v35 = vsel %vm860_vm12, 1.0, %v5885_v11 }
 0x460   : > { %vm3807_vm14 = vmpackc.low %vm847_vm13, %vm846_vm11  ;;  %vm861_vm15 = vcmp.ge.f32.partialorder %v6349_v28, 1.0  ;;  %v6360_v36 = vadd.f32 %v3805_v35, %v6286_v58  ;;  %v966_v37 = vsub.f32 %v6341_v30, %v3805_v35  ;;  %v3804_v38 = vsel %vm847_vm13, 1.0, %v5885_v11 }
 0x461   : > { %vm3809_vm0 = vmpackc.low %vm861_vm15, %vm860_vm12  ;;  %4746 = vmatmul.mubr.msk.bf16.vlgmr.msra.gmra.mrb[20].mxu0 %vm3807_vm14, %v5887_v23  ;;  %v6366_v39 = vadd.f32 %v3804_v38, %v6292_v61  ;;  %v953_v40 = vsub.f32 %v6345_v31, %v3804_v38  ;;  %v3806_v41 = vsel %vm861_vm15, 1.0, %v5885_v11 }
 0x462   : > { %4766 = vmatmul.mubr.msk.bf16.vlgmr.msra.gmra.mrb[20].mxu1 %vm3809_vm0, %v5887_v23  ;;  %4770 = vmatpush3.bf16.msra.mxu0 %v5978_v8  ;;  %v6373_v42 = vadd.f32 %v3806_v41, %v6299_v0  ;;  %v967_v43 = vsub.f32 %v6349_v28, %v3806_v41 }
 0x463   : > { %4790 = vmatpush3.bf16.msra.mxu1 %v5978_v8  ;;  %4771 = vmatprep.subr.bf16.mxu0 %v5885_v11 }
 0x464   : > { %4791 = vmatprep.subr.bf16.mxu1 %v5885_v11  ;;  %4785 = vmatprep.mubr.msk.bf16.mxu0 %vm5886_vm1, %v5885_v11 }
 0x465   : > { %4805 = vmatprep.mubr.msk.bf16.mxu1 %vm5886_vm1, %v5885_v11 }
 0x466   : > { %4772 = vmatpush3.bf16.msra.mxu0 %v5987_v12 }
 0x467   : > { %4792 = vmatpush3.bf16.msra.mxu1 %v5987_v12  ;;  %4773 = vmatprep.subr.bf16.mxu0 %v5885_v11 }
 0x468   : > { %4793 = vmatprep.subr.bf16.mxu1 %v5885_v11 }
 0x46a   : > { %4774 = vmatpush3.bf16.msra.mxu0 %v5996_v13 }
 0x46b   : > { %4794 = vmatpush3.bf16.msra.mxu1 %v5996_v13  ;;  %4775 = vmatprep.subr.bf16.mxu0 %v5885_v11 }
 0x46c   : > { %4795 = vmatprep.subr.bf16.mxu1 %v5885_v11 }
 0x46e   : > { %4776 = vmatpush3.bf16.msra.mxu0 %v6005_v14 }
 0x46f   : > { %4796 = vmatpush3.bf16.msra.mxu1 %v6005_v14  ;;  %4777 = vmatprep.subr.bf16.mxu0 %v5885_v11 }
 0x470   : > { %4797 = vmatprep.subr.bf16.mxu1 %v5885_v11 }
 0x472   : > { %4778 = vmatpush3.bf16.msra.mxu0 %v6014_v15 }
 0x473   : > { %4798 = vmatpush3.bf16.msra.mxu1 %v6014_v15  ;;  %4779 = vmatprep.subr.bf16.mxu0 %v5885_v11 }
 0x474   : > { %4799 = vmatprep.subr.bf16.mxu1 %v5885_v11 }
 0x476   : > { %4780 = vmatpush3.bf16.msra.mxu0 %v6023_v16 }
 0x477   : > { %4800 = vmatpush3.bf16.msra.mxu1 %v6023_v16  ;;  %4781 = vmatprep.subr.bf16.mxu0 %v5885_v11 }
 0x478   : > { %4801 = vmatprep.subr.bf16.mxu1 %v5885_v11 }
 0x47a   : > { %4782 = vmatpush3.bf16.msra.mxu0 %v6032_v17 }
 0x47b   : > { %4802 = vmatpush3.bf16.msra.mxu1 %v6032_v17  ;;  %4783 = vmatprep.subr.bf16.mxu0 %v5885_v11 }
 0x47c   : > { %4803 = vmatprep.subr.bf16.mxu1 %v5885_v11 }
 0x47e   : > { %4784 = vmatpush3.bf16.msra.mxu0 %v6043_v18 }
 0x47f   : > { %4804 = vmatpush3.bf16.msra.mxu1 %v6043_v18  ;;  %4809 = vmatprep.subr.bf16.mxu0 %v5885_v11 }
 0x480   : > { %4829 = vmatprep.subr.bf16.mxu1 %v5885_v11 }
 0x534   : > { %v903_v44 = vpop.f32.mrb[20].mxu0 }
 0x535   : > { %v954_v45 = vadd.f32 %v952_v34, %v903_v44  ;;  %v945_v46 = vpop.f32.mrb[20].mxu1  ;;  %v4747_v47 = vpop.f32.mrb[21].mxu0 }
 0x536   : > { %v968_v48 = vadd.f32 %v966_v37, %v945_v46  ;;  %v4767_v49 = vpop.f32.mrb[21].mxu1  ;;  %v906_v50 = vpop.f32.mrb[22].mxu0 }
 0x537   : > { %v6412_v51 = vadd.f32 %v954_v45, %v6057_v21  ;;  %v955_v52 = vadd.f32 %v953_v40, %v906_v50  ;;  %v948_v53 = vpop.f32.mrb[22].mxu1  ;;  %v4748_v54 = vpop.f32.mrb[23].mxu0 }
 0x538   : > { %v6415_v55 = vadd.f32 %v968_v48, %v6059_v22  ;;  %v969_v56 = vadd.f32 %v967_v43, %v948_v53  ;;  %v4768_v57 = vpop.f32.mrb[23].mxu1 }
 0x539   : > { %vm958_vm2 = vcmp.ge.f32.partialorder %v6412_v51, 1.0  ;;  %v6419_v58 = vadd.f32 %v6053_v19, %v955_v52 }
 0x53a   : > { %vm972_vm3 = vcmp.ge.f32.partialorder %v6415_v55, 1.0  ;;  %v6423_v59 = vadd.f32 %v6055_v20, %v969_v56  ;;  %v3811_v60 = vsel %vm958_vm2, 1.0, %v5885_v11 }
 0x53b   : > { %vm959_vm4 = vcmp.ge.f32.partialorder %v6419_v58, 1.0  ;;  %v6428_v61 = vadd.f32 %v3811_v60, %v6354_v33  ;;  %v1064_v62 = vsub.f32 %v6412_v51, %v3811_v60  ;;  %v3813_v63 = vsel %vm972_vm3, 1.0, %v5885_v11 }
 0x53c   : > { %vm3815_vm5 = vmpackc.low %vm959_vm4, %vm958_vm2  ;;  %vm973_vm6 = vcmp.ge.f32.partialorder %v6423_v59, 1.0  ;;  %v6434_v0 = vadd.f32 %v3813_v63, %v6360_v36  ;;  %v1078_v1 = vsub.f32 %v6415_v55, %v3813_v63  ;;  %v3812_v2 = vsel %vm959_vm4, 1.0, %v5885_v11 }
 0x53d   : > { %vm3817_vm7 = vmpackc.low %vm973_vm6, %vm972_vm3  ;;  %4786 = vmatmul.mubr.msk.bf16.vlgmr.msra.gmra.mrb[24].mxu0 %vm3815_vm5, %v5887_v23  ;;  %v6440_v3 = vadd.f32 %v3812_v2, %v6366_v39  ;;  %v1065_v4 = vsub.f32 %v6419_v58, %v3812_v2  ;;  %v3814_v5 = vsel %vm973_vm6, 1.0, %v5885_v11 }
 0x53e   : > { %4806 = vmatmul.mubr.msk.bf16.vlgmr.msra.gmra.mrb[24].mxu1 %vm3817_vm7, %v5887_v23  ;;  %4810 = vmatpush3.bf16.msra.mxu0 %v5978_v8  ;;  %v6447_v6 = vadd.f32 %v3814_v5, %v6373_v42  ;;  %v1079_v7 = vsub.f32 %v6423_v59, %v3814_v5 }
 0x53f   : > { %4830 = vmatpush3.bf16.msra.mxu1 %v5978_v8  ;;  %4811 = vmatprep.subr.bf16.mxu0 %v5885_v11 }
 0x540   : > { %4831 = vmatprep.subr.bf16.mxu1 %v5885_v11  ;;  %4825 = vmatprep.mubr.msk.bf16.mxu0 %vm5886_vm1, %v5885_v11 }
 0x541   : > { %4845 = vmatprep.mubr.msk.bf16.mxu1 %vm5886_vm1, %v5885_v11 }
 0x542   : > { %4812 = vmatpush3.bf16.msra.mxu0 %v5987_v12 }
 0x543   : > { %4832 = vmatpush3.bf16.msra.mxu1 %v5987_v12  ;;  %4813 = vmatprep.subr.bf16.mxu0 %v5885_v11 }
 0x544   : > { %4833 = vmatprep.subr.bf16.mxu1 %v5885_v11 }
 0x546   : > { %4814 = vmatpush3.bf16.msra.mxu0 %v5996_v13 }
 0x547   : > { %4834 = vmatpush3.bf16.msra.mxu1 %v5996_v13  ;;  %4815 = vmatprep.subr.bf16.mxu0 %v5885_v11 }
 0x548   : > { %4835 = vmatprep.subr.bf16.mxu1 %v5885_v11 }
 0x54a   : > { %4816 = vmatpush3.bf16.msra.mxu0 %v6005_v14 }
 0x54b   : > { %4836 = vmatpush3.bf16.msra.mxu1 %v6005_v14  ;;  %4817 = vmatprep.subr.bf16.mxu0 %v5885_v11 }
 0x54c   : > { %4837 = vmatprep.subr.bf16.mxu1 %v5885_v11 }
 0x54e   : > { %4818 = vmatpush3.bf16.msra.mxu0 %v6014_v15 }
 0x54f   : > { %4838 = vmatpush3.bf16.msra.mxu1 %v6014_v15  ;;  %4819 = vmatprep.subr.bf16.mxu0 %v5885_v11 }
 0x550   : > { %4839 = vmatprep.subr.bf16.mxu1 %v5885_v11 }
 0x552   : > { %4820 = vmatpush3.bf16.msra.mxu0 %v6023_v16 }
 0x553   : > { %4840 = vmatpush3.bf16.msra.mxu1 %v6023_v16  ;;  %4821 = vmatprep.subr.bf16.mxu0 %v5885_v11 }
 0x554   : > { %4841 = vmatprep.subr.bf16.mxu1 %v5885_v11 }
 0x556   : > { %4822 = vmatpush3.bf16.msra.mxu0 %v6032_v17 }
 0x557   : > { %4842 = vmatpush3.bf16.msra.mxu1 %v6032_v17  ;;  %4823 = vmatprep.subr.bf16.mxu0 %v5885_v11 }
 0x558   : > { %4843 = vmatprep.subr.bf16.mxu1 %v5885_v11 }
 0x55a   : > { %4824 = vmatpush3.bf16.msra.mxu0 %v6043_v18 }
 0x55b   : > { %4844 = vmatpush3.bf16.msra.mxu1 %v6043_v18  ;;  %4849 = vmatprep.subr.bf16.mxu0 %v5885_v11 }
 0x55c   : > { %4869 = vmatprep.subr.bf16.mxu1 %v5885_v11 }
 0x610   : > { %v1015_v9 = vpop.f32.mrb[24].mxu0 }
 0x611   : > { %v1066_v10 = vadd.f32 %v1064_v62, %v1015_v9  ;;  %v1057_v27 = vpop.f32.mrb[24].mxu1  ;;  %v4787_v24 = vpop.f32.mrb[25].mxu0  ;;  %v6622_v9 = vld [vmem:[%s8301_s2 + $0x10] sm:$0xff]  }
 0x612   : > { %v1080_v29 = vadd.f32 %v1078_v1, %v1057_v27  ;;  %v4807_v30 = vpop.f32.mrb[25].mxu1  ;;  %v1018_v25 = vpop.f32.mrb[26].mxu0  ;;  %v6640_v27 = vld [vmem:[%s8301_s2 + $0x20] sm:$0xff]   ;;  %v6649_v24 = vld [vmem:[%s8301_s2 + $0x28] sm:$0xff]  }
 0x613   : > { %v6486_v26 = vadd.f32 %v1066_v10, %v6057_v21  ;;  %v1067_v31 = vadd.f32 %v1065_v4, %v1018_v25  ;;  %v1060_v28 = vpop.f32.mrb[26].mxu1  ;;  %v4788_v32 = vpop.f32.mrb[27].mxu0  ;;  %v6596_v4 = vld [vmem:[%s8301_s2] sm:$0xff]   ;;  %v6631_v10 = vld [vmem:[%s8301_s2 + $0x18] sm:$0xff]  }
 0x614   : > { %v6489_v33 = vadd.f32 %v1080_v29, %v6059_v22  ;;  %v1081_v34 = vadd.f32 %v1079_v7, %v1060_v28  ;;  %v4808_v35 = vpop.f32.mrb[27].mxu1  ;;  %v6613_v7 = vld [vmem:[%s8301_s2 + $0x8] sm:$0xff]   ;;  %v6658_v29 = vld [vmem:[%s8301_s2 + $0x30] sm:$0xff]   ;;  %v6667_v30 = vld [vmem:[%s8301_s2 + $0x38] sm:$0xff]  }
 0x615   : > { %vm1070_vm8 = vcmp.ge.f32.partialorder %v6486_v26, 1.0  ;;  %v6493_v36 = vadd.f32 %v6053_v19, %v1067_v31 }
 0x616   : > { %vm1084_vm9 = vcmp.ge.f32.partialorder %v6489_v33, 1.0  ;;  %v6497_v37 = vadd.f32 %v6055_v20, %v1081_v34  ;;  %v3819_v38 = vsel %vm1070_vm8, 1.0, %v5885_v11 }
 0x617   : > { %vm1071_vm10 = vcmp.ge.f32.partialorder %v6493_v36, 1.0  ;;  %v6502_v39 = vadd.f32 %v3819_v38, %v6428_v61  ;;  %v1176_v40 = vsub.f32 %v6486_v26, %v3819_v38  ;;  %v3821_v41 = vsel %vm1084_vm9, 1.0, %v5885_v11 }
 0x618   : > { %vm3823_vm11 = vmpackc.low %vm1071_vm10, %vm1070_vm8  ;;  %vm1085_vm12 = vcmp.ge.f32.partialorder %v6497_v37, 1.0  ;;  %v6508_v42 = vadd.f32 %v3821_v41, %v6434_v0  ;;  %v1190_v43 = vsub.f32 %v6489_v33, %v3821_v41  ;;  %v3820_v44 = vsel %vm1071_vm10, 1.0, %v5885_v11 }
 0x619   : > { %vm3825_vm13 = vmpackc.low %vm1085_vm12, %vm1084_vm9  ;;  %4826 = vmatmul.mubr.msk.bf16.vlgmr.msra.gmra.mrb[28].mxu0 %vm3823_vm11, %v5887_v23  ;;  %v6514_v45 = vadd.f32 %v3820_v44, %v6440_v3  ;;  %v1177_v46 = vsub.f32 %v6493_v36, %v3820_v44  ;;  %v3822_v47 = vsel %vm1085_vm12, 1.0, %v5885_v11 }
 0x61a   : > { %4846 = vmatmul.mubr.msk.bf16.vlgmr.msra.gmra.mrb[28].mxu1 %vm3825_vm13, %v5887_v23  ;;  %4850 = vmatpush3.bf16.msra.mxu0 %v5978_v8  ;;  %v6521_v48 = vadd.f32 %v3822_v47, %v6447_v6  ;;  %v1191_v49 = vsub.f32 %v6497_v37, %v3822_v47 }
 0x61b   : > { %4870 = vmatpush3.bf16.msra.mxu1 %v5978_v8  ;;  %4851 = vmatprep.subr.bf16.mxu0 %v5885_v11 }
 0x61c   : > { %4871 = vmatprep.subr.bf16.mxu1 %v5885_v11  ;;  %4865 = vmatprep.mubr.msk.bf16.mxu0 %vm5886_vm1, %v5885_v11 }
 0x61d   : > { %4885 = vmatprep.mubr.msk.bf16.mxu1 %vm5886_vm1, %v5885_v11 }
 0x61e   : > { %4852 = vmatpush3.bf16.msra.mxu0 %v5987_v12 }
 0x61f   : > { %4872 = vmatpush3.bf16.msra.mxu1 %v5987_v12  ;;  %4853 = vmatprep.subr.bf16.mxu0 %v5885_v11 }
 0x620   : > { %4873 = vmatprep.subr.bf16.mxu1 %v5885_v11 }
 0x622   : > { %4854 = vmatpush3.bf16.msra.mxu0 %v5996_v13 }
 0x623   : > { %4874 = vmatpush3.bf16.msra.mxu1 %v5996_v13  ;;  %4855 = vmatprep.subr.bf16.mxu0 %v5885_v11 }
 0x624   : > { %4875 = vmatprep.subr.bf16.mxu1 %v5885_v11 }
 0x626   : > { %4856 = vmatpush3.bf16.msra.mxu0 %v6005_v14 }
 0x627   : > { %4876 = vmatpush3.bf16.msra.mxu1 %v6005_v14  ;;  %4857 = vmatprep.subr.bf16.mxu0 %v5885_v11 }
 0x628   : > { %4877 = vmatprep.subr.bf16.mxu1 %v5885_v11 }
 0x62a   : > { %4858 = vmatpush3.bf16.msra.mxu0 %v6014_v15 }
 0x62b   : > { %4878 = vmatpush3.bf16.msra.mxu1 %v6014_v15  ;;  %4859 = vmatprep.subr.bf16.mxu0 %v5885_v11 }
 0x62c   : > { %4879 = vmatprep.subr.bf16.mxu1 %v5885_v11 }
 0x62e   : > { %4860 = vmatpush3.bf16.msra.mxu0 %v6023_v16 }
 0x62f   : > { %4880 = vmatpush3.bf16.msra.mxu1 %v6023_v16  ;;  %4861 = vmatprep.subr.bf16.mxu0 %v5885_v11 }
 0x630   : > { %4881 = vmatprep.subr.bf16.mxu1 %v5885_v11 }
 0x632   : > { %4862 = vmatpush3.bf16.msra.mxu0 %v6032_v17 }
 0x633   : > { %4882 = vmatpush3.bf16.msra.mxu1 %v6032_v17  ;;  %4863 = vmatprep.subr.bf16.mxu0 %v5885_v11 }
 0x634   : > { %4883 = vmatprep.subr.bf16.mxu1 %v5885_v11 }
 0x636   : > { %4864 = vmatpush3.bf16.msra.mxu0 %v6043_v18 }
 0x637   : > { %4884 = vmatpush3.bf16.msra.mxu1 %v6043_v18  ;;  %4889 = vmatprep.subr.bf16.mxu0 %v5885_v11 }
 0x638   : > { %4909 = vmatprep.subr.bf16.mxu1 %v5885_v11 }
 0x6ec   : > { %v1127_v8 = vpop.f32.mrb[28].mxu0 }
 0x6ed   : > { %v1178_v12 = vadd.f32 %v1176_v40, %v1127_v8  ;;  %v1169_v13 = vpop.f32.mrb[28].mxu1  ;;  %v4827_v14 = vpop.f32.mrb[29].mxu0 }
 0x6ee   : > { %v1192_v15 = vadd.f32 %v1190_v43, %v1169_v13  ;;  %v4847_v16 = vpop.f32.mrb[29].mxu1  ;;  %v1130_v50 = vpop.f32.mrb[30].mxu0 }
 0x6ef   : > { %v6560_v17 = vadd.f32 %v1178_v12, %v6057_v21  ;;  %v1179_v51 = vadd.f32 %v1177_v46, %v1130_v50  ;;  %v1172_v52 = vpop.f32.mrb[30].mxu1  ;;  %v4828_v53 = vpop.f32.mrb[31].mxu0 }
 0x6f0   : > { %v6563_v54 = vadd.f32 %v1192_v15, %v6059_v22  ;;  %v1193_v18 = vadd.f32 %v1191_v49, %v1172_v52  ;;  %v4848_v55 = vpop.f32.mrb[31].mxu1 }
 0x6f1   : > { %vm1182_vm14 = vcmp.ge.f32.partialorder %v6560_v17, 1.0  ;;  %v6567_v56 = vadd.f32 %v6053_v19, %v1179_v51 }
 0x6f2   : > { %vm1196_vm15 = vcmp.ge.f32.partialorder %v6563_v54, 1.0  ;;  %v6571_v57 = vadd.f32 %v6055_v20, %v1193_v18  ;;  %v3827_v58 = vsel %vm1182_vm14, 1.0, %v5885_v11 }
 0x6f3   : > { %vm1183_vm0 = vcmp.ge.f32.partialorder %v6567_v56, 1.0  ;;  %v6576_v59 = vadd.f32 %v3827_v58, %v6502_v39  ;;  %v1288_v60 = vsub.f32 %v6560_v17, %v3827_v58  ;;  %v3829_v61 = vsel %vm1196_vm15, 1.0, %v5885_v11 }
 0x6f4   : > { %vm3831_vm2 = vmpackc.low %vm1183_vm0, %vm1182_vm14  ;;  %vm1197_vm3 = vcmp.ge.f32.partialorder %v6571_v57, 1.0  ;;  %v6582_v62 = vadd.f32 %v3829_v61, %v6508_v42  ;;  %v1302_v63 = vsub.f32 %v6563_v54, %v3829_v61  ;;  %v3828_v0 = vsel %vm1183_vm0, 1.0, %v5885_v11 }
 0x6f5   : > { %vm3833_vm4 = vmpackc.low %vm1197_vm3, %vm1196_vm15  ;;  %4866 = vmatmul.mubr.msk.bf16.vlgmr.msra.gmra.mrb[32].mxu0 %vm3831_vm2, %v5887_v23  ;;  %v6588_v1 = vadd.f32 %v3828_v0, %v6514_v45  ;;  %v1289_v2 = vsub.f32 %v6567_v56, %v3828_v0  ;;  %v3830_v3 = vsel %vm1197_vm3, 1.0, %v5885_v11 }
 0x6f6   : > { %4886 = vmatmul.mubr.msk.bf16.vlgmr.msra.gmra.mrb[32].mxu1 %vm3833_vm4, %v5887_v23  ;;  %4890 = vmatpush3.bf16.msra.mxu0 %v6596_v4  ;;  %v6600_v5 = vadd.f32 %v3830_v3, %v6521_v48  ;;  %v1303_v6 = vsub.f32 %v6571_v57, %v3830_v3 }
 0x6f7   : > { %4910 = vmatpush3.bf16.msra.mxu1 %v6596_v4  ;;  %4891 = vmatprep.subr.bf16.mxu0 %v5885_v11 }
 0x6f8   : > { %4911 = vmatprep.subr.bf16.mxu1 %v5885_v11  ;;  %4905 = vmatprep.mubr.msk.bf16.mxu0 %vm5886_vm1, %v5885_v11 }
 0x6f9   : > { %4925 = vmatprep.mubr.msk.bf16.mxu1 %vm5886_vm1, %v5885_v11 }
 0x6fa   : > { %4892 = vmatpush3.bf16.msra.mxu0 %v6613_v7 }
 0x6fb   : > { %4912 = vmatpush3.bf16.msra.mxu1 %v6613_v7  ;;  %4893 = vmatprep.subr.bf16.mxu0 %v5885_v11 }
 0x6fc   : > { %4913 = vmatprep.subr.bf16.mxu1 %v5885_v11 }
 0x6fe   : > { %4894 = vmatpush3.bf16.msra.mxu0 %v6622_v9 }
 0x6ff   : > { %4914 = vmatpush3.bf16.msra.mxu1 %v6622_v9  ;;  %4895 = vmatprep.subr.bf16.mxu0 %v5885_v11 }
 0x700   : > { %4915 = vmatprep.subr.bf16.mxu1 %v5885_v11 }
 0x702   : > { %4896 = vmatpush3.bf16.msra.mxu0 %v6631_v10 }
 0x703   : > { %4916 = vmatpush3.bf16.msra.mxu1 %v6631_v10  ;;  %4897 = vmatprep.subr.bf16.mxu0 %v5885_v11 }
 0x704   : > { %4917 = vmatprep.subr.bf16.mxu1 %v5885_v11 }
 0x706   : > { %4898 = vmatpush3.bf16.msra.mxu0 %v6640_v27 }
 0x707   : > { %4918 = vmatpush3.bf16.msra.mxu1 %v6640_v27  ;;  %4899 = vmatprep.subr.bf16.mxu0 %v5885_v11 }
 0x708   : > { %4919 = vmatprep.subr.bf16.mxu1 %v5885_v11 }
 0x70a   : > { %4900 = vmatpush3.bf16.msra.mxu0 %v6649_v24 }
 0x70b   : > { %4920 = vmatpush3.bf16.msra.mxu1 %v6649_v24  ;;  %4901 = vmatprep.subr.bf16.mxu0 %v5885_v11 }
 0x70c   : > { %4921 = vmatprep.subr.bf16.mxu1 %v5885_v11 }
 0x70e   : > { %4902 = vmatpush3.bf16.msra.mxu0 %v6658_v29 }
 0x70f   : > { %4922 = vmatpush3.bf16.msra.mxu1 %v6658_v29  ;;  %4903 = vmatprep.subr.bf16.mxu0 %v5885_v11 }
 0x710   : > { %4923 = vmatprep.subr.bf16.mxu1 %v5885_v11 }
 0x712   : > { %4904 = vmatpush3.bf16.msra.mxu0 %v6667_v30 }
 0x713   : > { %4924 = vmatpush3.bf16.msra.mxu1 %v6667_v30  ;;  %4929 = vmatprep.subr.bf16.mxu0 %v5885_v11 }
 0x714   : > { %4949 = vmatprep.subr.bf16.mxu1 %v5885_v11 }
 0x7c8   : > { %v1239_v25 = vpop.f32.mrb[32].mxu0 }
 0x7c9   : > { %v1290_v26 = vadd.f32 %v1288_v60, %v1239_v25  ;;  %v1281_v31 = vpop.f32.mrb[32].mxu1  ;;  %v4867_v28 = vpop.f32.mrb[33].mxu0 }
 0x7ca   : > { %v1304_v32 = vadd.f32 %v1302_v63, %v1281_v31  ;;  %v4887_v33 = vpop.f32.mrb[33].mxu1  ;;  %v1242_v34 = vpop.f32.mrb[34].mxu0 }
 0x7cb   : > { %v6674_v35 = vadd.f32 %v1290_v26, %v6057_v21  ;;  %v1291_v36 = vadd.f32 %v1289_v2, %v1242_v34  ;;  %v1284_v37 = vpop.f32.mrb[34].mxu1  ;;  %v4868_v38 = vpop.f32.mrb[35].mxu0 }
 0x7cc   : > { %v6677_v39 = vadd.f32 %v1304_v32, %v6059_v22  ;;  %v1305_v40 = vadd.f32 %v1303_v6, %v1284_v37  ;;  %v4888_v41 = vpop.f32.mrb[35].mxu1 }
 0x7cd   : > { %vm1294_vm5 = vcmp.ge.f32.partialorder %v6674_v35, 1.0  ;;  %v6681_v42 = vadd.f32 %v6053_v19, %v1291_v36 }
 0x7ce   : > { %vm1308_vm6 = vcmp.ge.f32.partialorder %v6677_v39, 1.0  ;;  %v6685_v43 = vadd.f32 %v6055_v20, %v1305_v40  ;;  %v3835_v44 = vsel %vm1294_vm5, 1.0, %v5885_v11 }
 0x7cf   : > { %vm1295_vm7 = vcmp.ge.f32.partialorder %v6681_v42, 1.0  ;;  %v6690_v45 = vadd.f32 %v3835_v44, %v6576_v59  ;;  %v1400_v46 = vsub.f32 %v6674_v35, %v3835_v44  ;;  %v3837_v47 = vsel %vm1308_vm6, 1.0, %v5885_v11 }
 0x7d0   : > { %vm3839_vm8 = vmpackc.low %vm1295_vm7, %vm1294_vm5  ;;  %vm1309_vm9 = vcmp.ge.f32.partialorder %v6685_v43, 1.0  ;;  %v6696_v48 = vadd.f32 %v3837_v47, %v6582_v62  ;;  %v1414_v49 = vsub.f32 %v6677_v39, %v3837_v47  ;;  %v3836_v8 = vsel %vm1295_vm7, 1.0, %v5885_v11 }
 0x7d1   : > { %vm3841_vm10 = vmpackc.low %vm1309_vm9, %vm1308_vm6  ;;  %4906 = vmatmul.mubr.msk.bf16.vlgmr.msra.gmra.mrb[36].mxu0 %vm3839_vm8, %v5887_v23  ;;  %v6702_v12 = vadd.f32 %v3836_v8, %v6588_v1  ;;  %v1401_v13 = vsub.f32 %v6681_v42, %v3836_v8  ;;  %v3838_v14 = vsel %vm1309_vm9, 1.0, %v5885_v11 }
 0x7d2   : > { %4926 = vmatmul.mubr.msk.bf16.vlgmr.msra.gmra.mrb[36].mxu1 %vm3841_vm10, %v5887_v23  ;;  %4930 = vmatpush3.bf16.msra.mxu0 %v6596_v4  ;;  %v6709_v15 = vadd.f32 %v3838_v14, %v6600_v5  ;;  %v1415_v16 = vsub.f32 %v6685_v43, %v3838_v14 }
 0x7d3   : > { %4950 = vmatpush3.bf16.msra.mxu1 %v6596_v4  ;;  %4931 = vmatprep.subr.bf16.mxu0 %v5885_v11 }
 0x7d4   : > { %4951 = vmatprep.subr.bf16.mxu1 %v5885_v11  ;;  %4945 = vmatprep.mubr.msk.bf16.mxu0 %vm5886_vm1, %v5885_v11 }
 0x7d5   : > { %4965 = vmatprep.mubr.msk.bf16.mxu1 %vm5886_vm1, %v5885_v11 }
 0x7d6   : > { %4932 = vmatpush3.bf16.msra.mxu0 %v6613_v7 }
 0x7d7   : > { %4952 = vmatpush3.bf16.msra.mxu1 %v6613_v7  ;;  %4933 = vmatprep.subr.bf16.mxu0 %v5885_v11 }
 0x7d8   : > { %4953 = vmatprep.subr.bf16.mxu1 %v5885_v11 }
 0x7da   : > { %4934 = vmatpush3.bf16.msra.mxu0 %v6622_v9 }
 0x7db   : > { %4954 = vmatpush3.bf16.msra.mxu1 %v6622_v9  ;;  %4935 = vmatprep.subr.bf16.mxu0 %v5885_v11 }
 0x7dc   : > { %4955 = vmatprep.subr.bf16.mxu1 %v5885_v11 }
 0x7de   : > { %4936 = vmatpush3.bf16.msra.mxu0 %v6631_v10 }
 0x7df   : > { %4956 = vmatpush3.bf16.msra.mxu1 %v6631_v10  ;;  %4937 = vmatprep.subr.bf16.mxu0 %v5885_v11 }
 0x7e0   : > { %4957 = vmatprep.subr.bf16.mxu1 %v5885_v11 }
 0x7e2   : > { %4938 = vmatpush3.bf16.msra.mxu0 %v6640_v27 }
 0x7e3   : > { %4958 = vmatpush3.bf16.msra.mxu1 %v6640_v27  ;;  %4939 = vmatprep.subr.bf16.mxu0 %v5885_v11 }
 0x7e4   : > { %4959 = vmatprep.subr.bf16.mxu1 %v5885_v11 }
 0x7e6   : > { %4940 = vmatpush3.bf16.msra.mxu0 %v6649_v24 }
 0x7e7   : > { %4960 = vmatpush3.bf16.msra.mxu1 %v6649_v24  ;;  %4941 = vmatprep.subr.bf16.mxu0 %v5885_v11 }
 0x7e8   : > { %4961 = vmatprep.subr.bf16.mxu1 %v5885_v11 }
 0x7ea   : > { %4942 = vmatpush3.bf16.msra.mxu0 %v6658_v29 }
 0x7eb   : > { %4962 = vmatpush3.bf16.msra.mxu1 %v6658_v29  ;;  %4943 = vmatprep.subr.bf16.mxu0 %v5885_v11 }
 0x7ec   : > { %4963 = vmatprep.subr.bf16.mxu1 %v5885_v11 }
 0x7ee   : > { %4944 = vmatpush3.bf16.msra.mxu0 %v6667_v30 }
 0x7ef   : > { %4964 = vmatpush3.bf16.msra.mxu1 %v6667_v30  ;;  %4969 = vmatprep.subr.bf16.mxu0 %v5885_v11 }
 0x7f0   : > { %4989 = vmatprep.subr.bf16.mxu1 %v5885_v11 }
 0x8a4   : > { %v1351_v50 = vpop.f32.mrb[36].mxu0 }
 0x8a5   : > { %v1402_v17 = vadd.f32 %v1400_v46, %v1351_v50  ;;  %v1393_v51 = vpop.f32.mrb[36].mxu1  ;;  %v4907_v52 = vpop.f32.mrb[37].mxu0 }
 0x8a6   : > { %v1416_v53 = vadd.f32 %v1414_v49, %v1393_v51  ;;  %v4927_v54 = vpop.f32.mrb[37].mxu1  ;;  %v1354_v18 = vpop.f32.mrb[38].mxu0 }
 0x8a7   : > { %v6748_v55 = vadd.f32 %v1402_v17, %v6057_v21  ;;  %v1403_v56 = vadd.f32 %v1401_v13, %v1354_v18  ;;  %v1396_v57 = vpop.f32.mrb[38].mxu1  ;;  %v4908_v58 = vpop.f32.mrb[39].mxu0 }
 0x8a8   : > { %v6751_v59 = vadd.f32 %v1416_v53, %v6059_v22  ;;  %v1417_v60 = vadd.f32 %v1415_v16, %v1396_v57  ;;  %v4928_v61 = vpop.f32.mrb[39].mxu1 }
 0x8a9   : > { %vm1406_vm11 = vcmp.ge.f32.partialorder %v6748_v55, 1.0  ;;  %v6755_v62 = vadd.f32 %v6053_v19, %v1403_v56 }
 0x8aa   : > { %vm1420_vm12 = vcmp.ge.f32.partialorder %v6751_v59, 1.0  ;;  %v6759_v63 = vadd.f32 %v6055_v20, %v1417_v60  ;;  %v3843_v0 = vsel %vm1406_vm11, 1.0, %v5885_v11 }
 0x8ab   : > { %vm1407_vm13 = vcmp.ge.f32.partialorder %v6755_v62, 1.0  ;;  %v6764_v1 = vadd.f32 %v3843_v0, %v6690_v45  ;;  %v1512_v2 = vsub.f32 %v6748_v55, %v3843_v0  ;;  %v3845_v3 = vsel %vm1420_vm12, 1.0, %v5885_v11 }
 0x8ac   : > { %vm3847_vm14 = vmpackc.low %vm1407_vm13, %vm1406_vm11  ;;  %vm1421_vm15 = vcmp.ge.f32.partialorder %v6759_v63, 1.0  ;;  %v6770_v5 = vadd.f32 %v3845_v3, %v6696_v48  ;;  %v1526_v6 = vsub.f32 %v6751_v59, %v3845_v3  ;;  %v3844_v25 = vsel %vm1407_vm13, 1.0, %v5885_v11 }
 0x8ad   : > { %vm3849_vm0 = vmpackc.low %vm1421_vm15, %vm1420_vm12  ;;  %4946 = vmatmul.mubr.msk.bf16.vlgmr.msra.gmra.mrb[40].mxu0 %vm3847_vm14, %v5887_v23  ;;  %v6776_v26 = vadd.f32 %v3844_v25, %v6702_v12  ;;  %v1513_v31 = vsub.f32 %v6755_v62, %v3844_v25  ;;  %v3846_v28 = vsel %vm1421_vm15, 1.0, %v5885_v11 }
 0x8ae   : > { %4966 = vmatmul.mubr.msk.bf16.vlgmr.msra.gmra.mrb[40].mxu1 %vm3849_vm0, %v5887_v23  ;;  %4970 = vmatpush3.bf16.msra.mxu0 %v6596_v4  ;;  %v6783_v32 = vadd.f32 %v3846_v28, %v6709_v15  ;;  %v1527_v33 = vsub.f32 %v6759_v63, %v3846_v28 }
 0x8af   : > { %4990 = vmatpush3.bf16.msra.mxu1 %v6596_v4  ;;  %4971 = vmatprep.subr.bf16.mxu0 %v5885_v11 }
 0x8b0   : > { %4991 = vmatprep.subr.bf16.mxu1 %v5885_v11  ;;  %4985 = vmatprep.mubr.msk.bf16.mxu0 %vm5886_vm1, %v5885_v11 }
 0x8b1   : > { %5005 = vmatprep.mubr.msk.bf16.mxu1 %vm5886_vm1, %v5885_v11 }
 0x8b2   : > { %4972 = vmatpush3.bf16.msra.mxu0 %v6613_v7 }
 0x8b3   : > { %4992 = vmatpush3.bf16.msra.mxu1 %v6613_v7  ;;  %4973 = vmatprep.subr.bf16.mxu0 %v5885_v11 }
 0x8b4   : > { %4993 = vmatprep.subr.bf16.mxu1 %v5885_v11 }
 0x8b6   : > { %4974 = vmatpush3.bf16.msra.mxu0 %v6622_v9 }
 0x8b7   : > { %4994 = vmatpush3.bf16.msra.mxu1 %v6622_v9  ;;  %4975 = vmatprep.subr.bf16.mxu0 %v5885_v11 }
 0x8b8   : > { %4995 = vmatprep.subr.bf16.mxu1 %v5885_v11 }
 0x8ba   : > { %4976 = vmatpush3.bf16.msra.mxu0 %v6631_v10 }
 0x8bb   : > { %4996 = vmatpush3.bf16.msra.mxu1 %v6631_v10  ;;  %4977 = vmatprep.subr.bf16.mxu0 %v5885_v11 }
 0x8bc   : > { %4997 = vmatprep.subr.bf16.mxu1 %v5885_v11 }
 0x8be   : > { %4978 = vmatpush3.bf16.msra.mxu0 %v6640_v27 }
 0x8bf   : > { %4998 = vmatpush3.bf16.msra.mxu1 %v6640_v27  ;;  %4979 = vmatprep.subr.bf16.mxu0 %v5885_v11 }
 0x8c0   : > { %4999 = vmatprep.subr.bf16.mxu1 %v5885_v11 }
 0x8c2   : > { %4980 = vmatpush3.bf16.msra.mxu0 %v6649_v24 }
 0x8c3   : > { %5000 = vmatpush3.bf16.msra.mxu1 %v6649_v24  ;;  %4981 = vmatprep.subr.bf16.mxu0 %v5885_v11 }
 0x8c4   : > { %5001 = vmatprep.subr.bf16.mxu1 %v5885_v11 }
 0x8c6   : > { %4982 = vmatpush3.bf16.msra.mxu0 %v6658_v29 }
 0x8c7   : > { %5002 = vmatpush3.bf16.msra.mxu1 %v6658_v29  ;;  %4983 = vmatprep.subr.bf16.mxu0 %v5885_v11 }
 0x8c8   : > { %5003 = vmatprep.subr.bf16.mxu1 %v5885_v11 }
 0x8ca   : > { %4984 = vmatpush3.bf16.msra.mxu0 %v6667_v30 }
 0x8cb   : > { %5004 = vmatpush3.bf16.msra.mxu1 %v6667_v30  ;;  %5009 = vmatprep.subr.bf16.mxu0 %v5885_v11 }
 0x8cc   : > { %5029 = vmatprep.subr.bf16.mxu1 %v5885_v11 }
 0x980   : > { %v1463_v34 = vpop.f32.mrb[40].mxu0 }
 0x981   : > { %v1514_v35 = vadd.f32 %v1512_v2, %v1463_v34  ;;  %v1505_v36 = vpop.f32.mrb[40].mxu1  ;;  %v4947_v37 = vpop.f32.mrb[41].mxu0 }
 0x982   : > { %v1528_v38 = vadd.f32 %v1526_v6, %v1505_v36  ;;  %v4967_v39 = vpop.f32.mrb[41].mxu1  ;;  %v1466_v40 = vpop.f32.mrb[42].mxu0 }
 0x983   : > { %v6822_v41 = vadd.f32 %v1514_v35, %v6057_v21  ;;  %v1515_v42 = vadd.f32 %v1513_v31, %v1466_v40  ;;  %v1508_v43 = vpop.f32.mrb[42].mxu1  ;;  %v4948_v44 = vpop.f32.mrb[43].mxu0 }
 0x984   : > { %v6825_v45 = vadd.f32 %v1528_v38, %v6059_v22  ;;  %v1529_v46 = vadd.f32 %v1527_v33, %v1508_v43  ;;  %v4968_v47 = vpop.f32.mrb[43].mxu1 }
 0x985   : > { %vm1518_vm2 = vcmp.ge.f32.partialorder %v6822_v41, 1.0  ;;  %v6829_v48 = vadd.f32 %v6053_v19, %v1515_v42 }
 0x986   : > { %vm1532_vm3 = vcmp.ge.f32.partialorder %v6825_v45, 1.0  ;;  %v6833_v49 = vadd.f32 %v6055_v20, %v1529_v46  ;;  %v3851_v8 = vsel %vm1518_vm2, 1.0, %v5885_v11 }
 0x987   : > { %vm1519_vm4 = vcmp.ge.f32.partialorder %v6829_v48, 1.0  ;;  %v6838_v12 = vadd.f32 %v3851_v8, %v6764_v1  ;;  %v1624_v13 = vsub.f32 %v6822_v41, %v3851_v8  ;;  %v3853_v14 = vsel %vm1532_vm3, 1.0, %v5885_v11 }
 0x988   : > { %vm3855_vm5 = vmpackc.low %vm1519_vm4, %vm1518_vm2  ;;  %vm1533_vm6 = vcmp.ge.f32.partialorder %v6833_v49, 1.0  ;;  %v6844_v15 = vadd.f32 %v3853_v14, %v6770_v5  ;;  %v1638_v16 = vsub.f32 %v6825_v45, %v3853_v14  ;;  %v3852_v50 = vsel %vm1519_vm4, 1.0, %v5885_v11 }
 0x989   : > { %vm3857_vm7 = vmpackc.low %vm1533_vm6, %vm1532_vm3  ;;  %4986 = vmatmul.mubr.msk.bf16.vlgmr.msra.gmra.mrb[44].mxu0 %vm3855_vm5, %v5887_v23  ;;  %v6850_v17 = vadd.f32 %v3852_v50, %v6776_v26  ;;  %v1625_v51 = vsub.f32 %v6829_v48, %v3852_v50  ;;  %v3854_v52 = vsel %vm1533_vm6, 1.0, %v5885_v11 }
 0x98a   : > { %5006 = vmatmul.mubr.msk.bf16.vlgmr.msra.gmra.mrb[44].mxu1 %vm3857_vm7, %v5887_v23  ;;  %5010 = vmatpush3.bf16.msra.mxu0 %v6596_v4  ;;  %v6857_v53 = vadd.f32 %v3854_v52, %v6783_v32  ;;  %v1639_v54 = vsub.f32 %v6833_v49, %v3854_v52 }
 0x98b   : > { %5030 = vmatpush3.bf16.msra.mxu1 %v6596_v4  ;;  %5011 = vmatprep.subr.bf16.mxu0 %v5885_v11 }
 0x98c   : > { %5031 = vmatprep.subr.bf16.mxu1 %v5885_v11  ;;  %5025 = vmatprep.mubr.msk.bf16.mxu0 %vm5886_vm1, %v5885_v11 }
 0x98d   : > { %5045 = vmatprep.mubr.msk.bf16.mxu1 %vm5886_vm1, %v5885_v11 }
 0x98e   : > { %5012 = vmatpush3.bf16.msra.mxu0 %v6613_v7 }
 0x98f   : > { %5032 = vmatpush3.bf16.msra.mxu1 %v6613_v7  ;;  %5013 = vmatprep.subr.bf16.mxu0 %v5885_v11 }
 0x990   : > { %5033 = vmatprep.subr.bf16.mxu1 %v5885_v11 }
 0x992   : > { %5014 = vmatpush3.bf16.msra.mxu0 %v6622_v9 }
 0x993   : > { %5034 = vmatpush3.bf16.msra.mxu1 %v6622_v9  ;;  %5015 = vmatprep.subr.bf16.mxu0 %v5885_v11 }
 0x994   : > { %5035 = vmatprep.subr.bf16.mxu1 %v5885_v11 }
 0x996   : > { %5016 = vmatpush3.bf16.msra.mxu0 %v6631_v10 }
 0x997   : > { %5036 = vmatpush3.bf16.msra.mxu1 %v6631_v10  ;;  %5017 = vmatprep.subr.bf16.mxu0 %v5885_v11 }
 0x998   : > { %5037 = vmatprep.subr.bf16.mxu1 %v5885_v11 }
 0x99a   : > { %5018 = vmatpush3.bf16.msra.mxu0 %v6640_v27 }
 0x99b   : > { %5038 = vmatpush3.bf16.msra.mxu1 %v6640_v27  ;;  %5019 = vmatprep.subr.bf16.mxu0 %v5885_v11 }
 0x99c   : > { %5039 = vmatprep.subr.bf16.mxu1 %v5885_v11 }
 0x99e   : > { %5020 = vmatpush3.bf16.msra.mxu0 %v6649_v24 }
 0x99f   : > { %5040 = vmatpush3.bf16.msra.mxu1 %v6649_v24  ;;  %5021 = vmatprep.subr.bf16.mxu0 %v5885_v11 }
 0x9a0   : > { %5041 = vmatprep.subr.bf16.mxu1 %v5885_v11 }
 0x9a2   : > { %5022 = vmatpush3.bf16.msra.mxu0 %v6658_v29 }
 0x9a3   : > { %5042 = vmatpush3.bf16.msra.mxu1 %v6658_v29  ;;  %5023 = vmatprep.subr.bf16.mxu0 %v5885_v11 }
 0x9a4   : > { %5043 = vmatprep.subr.bf16.mxu1 %v5885_v11 }
 0x9a6   : > { %5024 = vmatpush3.bf16.msra.mxu0 %v6667_v30 }
 0x9a7   : > { %5044 = vmatpush3.bf16.msra.mxu1 %v6667_v30  ;;  %5049 = vmatprep.subr.bf16.mxu0 %v5885_v11 }
 0x9a8   : > { %5069 = vmatprep.subr.bf16.mxu1 %v5885_v11 }
 0xa5c   : > { %v1575_v18 = vpop.f32.mrb[44].mxu0 }
 0xa5d   : > { %v1626_v55 = vadd.f32 %v1624_v13, %v1575_v18  ;;  %v1617_v56 = vpop.f32.mrb[44].mxu1  ;;  %v4987_v57 = vpop.f32.mrb[45].mxu0 }
 0xa5e   : > { %v1640_v58 = vadd.f32 %v1638_v16, %v1617_v56  ;;  %v5007_v59 = vpop.f32.mrb[45].mxu1  ;;  %v1578_v60 = vpop.f32.mrb[46].mxu0 }
 0xa5f   : > { %v6896_v61 = vadd.f32 %v1626_v55, %v6057_v21  ;;  %v1627_v62 = vadd.f32 %v1625_v51, %v1578_v60  ;;  %v1620_v63 = vpop.f32.mrb[46].mxu1  ;;  %v4988_v0 = vpop.f32.mrb[47].mxu0 }
 0xa60   : > { %v6899_v1 = vadd.f32 %v1640_v58, %v6059_v22  ;;  %v1641_v2 = vadd.f32 %v1639_v54, %v1620_v63  ;;  %v5008_v3 = vpop.f32.mrb[47].mxu1 }
 0xa61   : > { %vm1630_vm8 = vcmp.ge.f32.partialorder %v6896_v61, 1.0  ;;  %v6903_v5 = vadd.f32 %v6053_v19, %v1627_v62 }
 0xa62   : > { %vm1644_vm9 = vcmp.ge.f32.partialorder %v6899_v1, 1.0  ;;  %v6907_v6 = vadd.f32 %v6055_v20, %v1641_v2  ;;  %v3859_v25 = vsel %vm1630_vm8, 1.0, %v5885_v11 }
 0xa63   : > { %vm1631_vm10 = vcmp.ge.f32.partialorder %v6903_v5, 1.0  ;;  %v6912_v26 = vadd.f32 %v3859_v25, %v6838_v12  ;;  %v1736_v31 = vsub.f32 %v6896_v61, %v3859_v25  ;;  %v3861_v28 = vsel %vm1644_vm9, 1.0, %v5885_v11 }
 0xa64   : > { %vm3863_vm11 = vmpackc.low %vm1631_vm10, %vm1630_vm8  ;;  %vm1645_vm12 = vcmp.ge.f32.partialorder %v6907_v6, 1.0  ;;  %v6918_v32 = vadd.f32 %v3861_v28, %v6844_v15  ;;  %v1750_v33 = vsub.f32 %v6899_v1, %v3861_v28  ;;  %v3860_v34 = vsel %vm1631_vm10, 1.0, %v5885_v11 }
 0xa65   : > { %vm3865_vm13 = vmpackc.low %vm1645_vm12, %vm1644_vm9  ;;  %5026 = vmatmul.mubr.msk.bf16.vlgmr.msra.gmra.mrb[48].mxu0 %vm3863_vm11, %v5887_v23  ;;  %v6924_v35 = vadd.f32 %v3860_v34, %v6850_v17  ;;  %v1737_v36 = vsub.f32 %v6903_v5, %v3860_v34  ;;  %v3862_v37 = vsel %vm1645_vm12, 1.0, %v5885_v11 }
 0xa66   : > { %5046 = vmatmul.mubr.msk.bf16.vlgmr.msra.gmra.mrb[48].mxu1 %vm3865_vm13, %v5887_v23  ;;  %5050 = vmatpush3.bf16.msra.mxu0 %v6596_v4  ;;  %v6931_v38 = vadd.f32 %v3862_v37, %v6857_v53  ;;  %v1751_v39 = vsub.f32 %v6907_v6, %v3862_v37 }
 0xa67   : > { %5070 = vmatpush3.bf16.msra.mxu1 %v6596_v4  ;;  %5051 = vmatprep.subr.bf16.mxu0 %v5885_v11 }
 0xa68   : > { %5071 = vmatprep.subr.bf16.mxu1 %v5885_v11  ;;  %5065 = vmatprep.mubr.msk.bf16.mxu0 %vm5886_vm1, %v5885_v11 }
 0xa69   : > { %5085 = vmatprep.mubr.msk.bf16.mxu1 %vm5886_vm1, %v5885_v11 }
 0xa6a   : > { %5052 = vmatpush3.bf16.msra.mxu0 %v6613_v7 }
 0xa6b   : > { %5072 = vmatpush3.bf16.msra.mxu1 %v6613_v7  ;;  %5053 = vmatprep.subr.bf16.mxu0 %v5885_v11 }
 0xa6c   : > { %5073 = vmatprep.subr.bf16.mxu1 %v5885_v11 }
 0xa6e   : > { %5054 = vmatpush3.bf16.msra.mxu0 %v6622_v9 }
 0xa6f   : > { %5074 = vmatpush3.bf16.msra.mxu1 %v6622_v9  ;;  %5055 = vmatprep.subr.bf16.mxu0 %v5885_v11 }
 0xa70   : > { %5075 = vmatprep.subr.bf16.mxu1 %v5885_v11 }
 0xa72   : > { %5056 = vmatpush3.bf16.msra.mxu0 %v6631_v10 }
 0xa73   : > { %5076 = vmatpush3.bf16.msra.mxu1 %v6631_v10  ;;  %5057 = vmatprep.subr.bf16.mxu0 %v5885_v11 }
 0xa74   : > { %5077 = vmatprep.subr.bf16.mxu1 %v5885_v11 }
 0xa76   : > { %5058 = vmatpush3.bf16.msra.mxu0 %v6640_v27 }
 0xa77   : > { %5078 = vmatpush3.bf16.msra.mxu1 %v6640_v27  ;;  %5059 = vmatprep.subr.bf16.mxu0 %v5885_v11 }
 0xa78   : > { %5079 = vmatprep.subr.bf16.mxu1 %v5885_v11 }
 0xa7a   : > { %5060 = vmatpush3.bf16.msra.mxu0 %v6649_v24 }
 0xa7b   : > { %5080 = vmatpush3.bf16.msra.mxu1 %v6649_v24  ;;  %5061 = vmatprep.subr.bf16.mxu0 %v5885_v11 }
 0xa7c   : > { %5081 = vmatprep.subr.bf16.mxu1 %v5885_v11 }
 0xa7e   : > { %5062 = vmatpush3.bf16.msra.mxu0 %v6658_v29 }
 0xa7f   : > { %5082 = vmatpush3.bf16.msra.mxu1 %v6658_v29  ;;  %5063 = vmatprep.subr.bf16.mxu0 %v5885_v11 }
 0xa80   : > { %5083 = vmatprep.subr.bf16.mxu1 %v5885_v11 }
 0xa82   : > { %5064 = vmatpush3.bf16.msra.mxu0 %v6667_v30 }
 0xa83   : > { %5084 = vmatpush3.bf16.msra.mxu1 %v6667_v30  ;;  %5089 = vmatprep.subr.bf16.mxu0 %v5885_v11 }
 0xa84   : > { %5109 = vmatprep.subr.bf16.mxu1 %v5885_v11 }
 0xb38   : > { %v1687_v40 = vpop.f32.mrb[48].mxu0 }
 0xb39   : > { %v1738_v41 = vadd.f32 %v1736_v31, %v1687_v40  ;;  %v1729_v42 = vpop.f32.mrb[48].mxu1  ;;  %v5027_v43 = vpop.f32.mrb[49].mxu0 }
 0xb3a   : > { %v1752_v44 = vadd.f32 %v1750_v33, %v1729_v42  ;;  %v5047_v45 = vpop.f32.mrb[49].mxu1  ;;  %v1690_v46 = vpop.f32.mrb[50].mxu0 }
 0xb3b   : > { %v6970_v47 = vadd.f32 %v1738_v41, %v6057_v21  ;;  %v1739_v48 = vadd.f32 %v1737_v36, %v1690_v46  ;;  %v1732_v49 = vpop.f32.mrb[50].mxu1  ;;  %v5028_v8 = vpop.f32.mrb[51].mxu0 }
 0xb3c   : > { %v6973_v12 = vadd.f32 %v1752_v44, %v6059_v22  ;;  %v1753_v13 = vadd.f32 %v1751_v39, %v1732_v49  ;;  %v5048_v14 = vpop.f32.mrb[51].mxu1 }
 0xb3d   : > { %vm1742_vm14 = vcmp.ge.f32.partialorder %v6970_v47, 1.0  ;;  %v6977_v15 = vadd.f32 %v6053_v19, %v1739_v48 }
 0xb3e   : > { %vm1756_vm15 = vcmp.ge.f32.partialorder %v6973_v12, 1.0  ;;  %v6981_v16 = vadd.f32 %v6055_v20, %v1753_v13  ;;  %v3867_v50 = vsel %vm1742_vm14, 1.0, %v5885_v11 }
 0xb3f   : > { %vm1743_vm0 = vcmp.ge.f32.partialorder %v6977_v15, 1.0  ;;  %v6986_v17 = vadd.f32 %v3867_v50, %v6912_v26  ;;  %v1848_v51 = vsub.f32 %v6970_v47, %v3867_v50  ;;  %v3869_v52 = vsel %vm1756_vm15, 1.0, %v5885_v11 }
 0xb40   : > { %vm3871_vm2 = vmpackc.low %vm1743_vm0, %vm1742_vm14  ;;  %vm1757_vm3 = vcmp.ge.f32.partialorder %v6981_v16, 1.0  ;;  %v6992_v53 = vadd.f32 %v3869_v52, %v6918_v32  ;;  %v1862_v54 = vsub.f32 %v6973_v12, %v3869_v52  ;;  %v3868_v18 = vsel %vm1743_vm0, 1.0, %v5885_v11 }
 0xb41   : > { %vm3873_vm4 = vmpackc.low %vm1757_vm3, %vm1756_vm15  ;;  %5066 = vmatmul.mubr.msk.bf16.vlgmr.msra.gmra.mrb[52].mxu0 %vm3871_vm2, %v5887_v23  ;;  %v6998_v55 = vadd.f32 %v3868_v18, %v6924_v35  ;;  %v1849_v56 = vsub.f32 %v6977_v15, %v3868_v18  ;;  %v3870_v57 = vsel %vm1757_vm3, 1.0, %v5885_v11 }
 0xb42   : > { %5086 = vmatmul.mubr.msk.bf16.vlgmr.msra.gmra.mrb[52].mxu1 %vm3873_vm4, %v5887_v23  ;;  %5090 = vmatpush3.bf16.msra.mxu0 %v6596_v4  ;;  %v7005_v58 = vadd.f32 %v3870_v57, %v6931_v38  ;;  %v1863_v59 = vsub.f32 %v6981_v16, %v3870_v57 }
 0xb43   : > { %5110 = vmatpush3.bf16.msra.mxu1 %v6596_v4  ;;  %5091 = vmatprep.subr.bf16.mxu0 %v5885_v11 }
 0xb44   : > { %5111 = vmatprep.subr.bf16.mxu1 %v5885_v11  ;;  %5105 = vmatprep.mubr.msk.bf16.mxu0 %vm5886_vm1, %v5885_v11 }
 0xb45   : > { %5125 = vmatprep.mubr.msk.bf16.mxu1 %vm5886_vm1, %v5885_v11 }
 0xb46   : > { %5092 = vmatpush3.bf16.msra.mxu0 %v6613_v7 }
 0xb47   : > { %5112 = vmatpush3.bf16.msra.mxu1 %v6613_v7  ;;  %5093 = vmatprep.subr.bf16.mxu0 %v5885_v11 }
 0xb48   : > { %5113 = vmatprep.subr.bf16.mxu1 %v5885_v11 }
 0xb4a   : > { %5094 = vmatpush3.bf16.msra.mxu0 %v6622_v9 }
 0xb4b   : > { %5114 = vmatpush3.bf16.msra.mxu1 %v6622_v9  ;;  %5095 = vmatprep.subr.bf16.mxu0 %v5885_v11 }
 0xb4c   : > { %5115 = vmatprep.subr.bf16.mxu1 %v5885_v11 }
 0xb4e   : > { %5096 = vmatpush3.bf16.msra.mxu0 %v6631_v10 }
 0xb4f   : > { %5116 = vmatpush3.bf16.msra.mxu1 %v6631_v10  ;;  %5097 = vmatprep.subr.bf16.mxu0 %v5885_v11 }
 0xb50   : > { %5117 = vmatprep.subr.bf16.mxu1 %v5885_v11 }
 0xb52   : > { %5098 = vmatpush3.bf16.msra.mxu0 %v6640_v27 }
 0xb53   : > { %5118 = vmatpush3.bf16.msra.mxu1 %v6640_v27  ;;  %5099 = vmatprep.subr.bf16.mxu0 %v5885_v11 }
 0xb54   : > { %5119 = vmatprep.subr.bf16.mxu1 %v5885_v11 }
 0xb56   : > { %5100 = vmatpush3.bf16.msra.mxu0 %v6649_v24 }
 0xb57   : > { %5120 = vmatpush3.bf16.msra.mxu1 %v6649_v24  ;;  %5101 = vmatprep.subr.bf16.mxu0 %v5885_v11 }
 0xb58   : > { %5121 = vmatprep.subr.bf16.mxu1 %v5885_v11 }
 0xb5a   : > { %5102 = vmatpush3.bf16.msra.mxu0 %v6658_v29 }
 0xb5b   : > { %5122 = vmatpush3.bf16.msra.mxu1 %v6658_v29  ;;  %5103 = vmatprep.subr.bf16.mxu0 %v5885_v11 }
 0xb5c   : > { %5123 = vmatprep.subr.bf16.mxu1 %v5885_v11 }
 0xb5e   : > { %5104 = vmatpush3.bf16.msra.mxu0 %v6667_v30 }
 0xb5f   : > { %5124 = vmatpush3.bf16.msra.mxu1 %v6667_v30  ;;  %5129 = vmatprep.subr.bf16.mxu0 %v5885_v11 }
 0xb60   : > { %5149 = vmatprep.subr.bf16.mxu1 %v5885_v11 }
 0xc14   : > { %v1799_v60 = vpop.f32.mrb[52].mxu0 }
 0xc15   : > { %v1850_v61 = vadd.f32 %v1848_v51, %v1799_v60  ;;  %v1841_v62 = vpop.f32.mrb[52].mxu1  ;;  %v5067_v63 = vpop.f32.mrb[53].mxu0 }
 0xc16   : > { %v1864_v0 = vadd.f32 %v1862_v54, %v1841_v62  ;;  %v5087_v1 = vpop.f32.mrb[53].mxu1  ;;  %v1802_v2 = vpop.f32.mrb[54].mxu0 }
 0xc17   : > { %v7044_v3 = vadd.f32 %v1850_v61, %v6057_v21  ;;  %v1851_v5 = vadd.f32 %v1849_v56, %v1802_v2  ;;  %v1844_v6 = vpop.f32.mrb[54].mxu1  ;;  %v5068_v25 = vpop.f32.mrb[55].mxu0 }
 0xc18   : > { %v7047_v26 = vadd.f32 %v1864_v0, %v6059_v22  ;;  %v1865_v31 = vadd.f32 %v1863_v59, %v1844_v6  ;;  %v5088_v28 = vpop.f32.mrb[55].mxu1 }
 0xc19   : > { %vm1854_vm5 = vcmp.ge.f32.partialorder %v7044_v3, 1.0  ;;  %v7051_v32 = vadd.f32 %v6053_v19, %v1851_v5 }
 0xc1a   : > { %vm1868_vm6 = vcmp.ge.f32.partialorder %v7047_v26, 1.0  ;;  %v7055_v33 = vadd.f32 %v6055_v20, %v1865_v31  ;;  %v3875_v34 = vsel %vm1854_vm5, 1.0, %v5885_v11 }
 0xc1b   : > { %vm1855_vm7 = vcmp.ge.f32.partialorder %v7051_v32, 1.0  ;;  %v7060_v35 = vadd.f32 %v3875_v34, %v6986_v17  ;;  %v1960_v36 = vsub.f32 %v7044_v3, %v3875_v34  ;;  %v3877_v37 = vsel %vm1868_vm6, 1.0, %v5885_v11 }
 0xc1c   : > { %vm3879_vm8 = vmpackc.low %vm1855_vm7, %vm1854_vm5  ;;  %vm1869_vm9 = vcmp.ge.f32.partialorder %v7055_v33, 1.0  ;;  %v7066_v38 = vadd.f32 %v3877_v37, %v6992_v53  ;;  %v1974_v39 = vsub.f32 %v7047_v26, %v3877_v37  ;;  %v3876_v40 = vsel %vm1855_vm7, 1.0, %v5885_v11 }
 0xc1d   : > { %vm3881_vm10 = vmpackc.low %vm1869_vm9, %vm1868_vm6  ;;  %5106 = vmatmul.mubr.msk.bf16.vlgmr.msra.gmra.mrb[56].mxu0 %vm3879_vm8, %v5887_v23  ;;  %v7072_v41 = vadd.f32 %v3876_v40, %v6998_v55  ;;  %v1961_v42 = vsub.f32 %v7051_v32, %v3876_v40  ;;  %v3878_v43 = vsel %vm1869_vm9, 1.0, %v5885_v11 }
 0xc1e   : > { %5126 = vmatmul.mubr.msk.bf16.vlgmr.msra.gmra.mrb[56].mxu1 %vm3881_vm10, %v5887_v23  ;;  %5130 = vmatpush3.bf16.msra.mxu0 %v6596_v4  ;;  %v7079_v44 = vadd.f32 %v3878_v43, %v7005_v58  ;;  %v1975_v45 = vsub.f32 %v7055_v33, %v3878_v43 }
 0xc1f   : > { %5150 = vmatpush3.bf16.msra.mxu1 %v6596_v4  ;;  %5131 = vmatprep.subr.bf16.mxu0 %v5885_v11 }
 0xc20   : > { %5151 = vmatprep.subr.bf16.mxu1 %v5885_v11  ;;  %5145 = vmatprep.mubr.msk.bf16.mxu0 %vm5886_vm1, %v5885_v11 }
 0xc21   : > { %5165 = vmatprep.mubr.msk.bf16.mxu1 %vm5886_vm1, %v5885_v11 }
 0xc22   : > { %5132 = vmatpush3.bf16.msra.mxu0 %v6613_v7 }
 0xc23   : > { %5152 = vmatpush3.bf16.msra.mxu1 %v6613_v7  ;;  %5133 = vmatprep.subr.bf16.mxu0 %v5885_v11 }
 0xc24   : > { %5153 = vmatprep.subr.bf16.mxu1 %v5885_v11 }
 0xc26   : > { %5134 = vmatpush3.bf16.msra.mxu0 %v6622_v9 }
 0xc27   : > { %5154 = vmatpush3.bf16.msra.mxu1 %v6622_v9  ;;  %5135 = vmatprep.subr.bf16.mxu0 %v5885_v11 }
 0xc28   : > { %5155 = vmatprep.subr.bf16.mxu1 %v5885_v11 }
 0xc2a   : > { %5136 = vmatpush3.bf16.msra.mxu0 %v6631_v10 }
 0xc2b   : > { %5156 = vmatpush3.bf16.msra.mxu1 %v6631_v10  ;;  %5137 = vmatprep.subr.bf16.mxu0 %v5885_v11 }
 0xc2c   : > { %5157 = vmatprep.subr.bf16.mxu1 %v5885_v11 }
 0xc2e   : > { %5138 = vmatpush3.bf16.msra.mxu0 %v6640_v27 }
 0xc2f   : > { %5158 = vmatpush3.bf16.msra.mxu1 %v6640_v27  ;;  %5139 = vmatprep.subr.bf16.mxu0 %v5885_v11 }
 0xc30   : > { %5159 = vmatprep.subr.bf16.mxu1 %v5885_v11 }
 0xc32   : > { %5140 = vmatpush3.bf16.msra.mxu0 %v6649_v24 }
 0xc33   : > { %5160 = vmatpush3.bf16.msra.mxu1 %v6649_v24  ;;  %5141 = vmatprep.subr.bf16.mxu0 %v5885_v11 }
 0xc34   : > { %5161 = vmatprep.subr.bf16.mxu1 %v5885_v11 }
 0xc36   : > { %5142 = vmatpush3.bf16.msra.mxu0 %v6658_v29 }
 0xc37   : > { %5162 = vmatpush3.bf16.msra.mxu1 %v6658_v29  ;;  %5143 = vmatprep.subr.bf16.mxu0 %v5885_v11 }
 0xc38   : > { %5163 = vmatprep.subr.bf16.mxu1 %v5885_v11 }
 0xc3a   : > { %5144 = vmatpush3.bf16.msra.mxu0 %v6667_v30 }
 0xc3b   : > { %5164 = vmatpush3.bf16.msra.mxu1 %v6667_v30  ;;  %5169 = vmatprep.subr.bf16.mxu0 %v5885_v11 }
 0xc3c   : > { %5189 = vmatprep.subr.bf16.mxu1 %v5885_v11 }
 0xcf0   : > { %v1911_v46 = vpop.f32.mrb[56].mxu0 }
 0xcf1   : > { %v1962_v47 = vadd.f32 %v1960_v36, %v1911_v46  ;;  %v1953_v48 = vpop.f32.mrb[56].mxu1  ;;  %v5107_v49 = vpop.f32.mrb[57].mxu0  ;;  %v7254_v46 = vld [vmem:[%s8301_s2 + $0x10] sm:$0xff]  }
 0xcf2   : > { %v1976_v8 = vadd.f32 %v1974_v39, %v1953_v48  ;;  %v5127_v12 = vpop.f32.mrb[57].mxu1  ;;  %v1914_v13 = vpop.f32.mrb[58].mxu0  ;;  %v7272_v48 = vld [vmem:[%s8301_s2 + $0x20] sm:$0xff]   ;;  %v7281_v49 = vld [vmem:[%s8301_s2 + $0x28] sm:$0xff]  }
 0xcf3   : > { %v7118_v14 = vadd.f32 %v1962_v47, %v6057_v21  ;;  %v1963_v15 = vadd.f32 %v1961_v42, %v1914_v13  ;;  %v1956_v16 = vpop.f32.mrb[58].mxu1  ;;  %v5108_v50 = vpop.f32.mrb[59].mxu0  ;;  %v7228_v42 = vld [vmem:[%s8301_s2] sm:$0xff]   ;;  %v7263_v47 = vld [vmem:[%s8301_s2 + $0x18] sm:$0xff]  }
 0xcf4   : > { %v7121_v17 = vadd.f32 %v1976_v8, %v6059_v22  ;;  %v1977_v51 = vadd.f32 %v1975_v45, %v1956_v16  ;;  %v5128_v52 = vpop.f32.mrb[59].mxu1  ;;  %v7245_v45 = vld [vmem:[%s8301_s2 + $0x8] sm:$0xff]   ;;  %v7290_v8 = vld [vmem:[%s8301_s2 + $0x30] sm:$0xff]   ;;  %v7299_v12 = vld [vmem:[%s8301_s2 + $0x38] sm:$0xff]  }
 0xcf5   : > { %vm1966_vm11 = vcmp.ge.f32.partialorder %v7118_v14, 1.0  ;;  %v7125_v53 = vadd.f32 %v6053_v19, %v1963_v15 }
 0xcf6   : > { %vm1980_vm12 = vcmp.ge.f32.partialorder %v7121_v17, 1.0  ;;  %v7129_v54 = vadd.f32 %v6055_v20, %v1977_v51  ;;  %v3883_v18 = vsel %vm1966_vm11, 1.0, %v5885_v11 }
 0xcf7   : > { %vm1967_vm13 = vcmp.ge.f32.partialorder %v7125_v53, 1.0  ;;  %v7134_v55 = vadd.f32 %v3883_v18, %v7060_v35  ;;  %v2072_v56 = vsub.f32 %v7118_v14, %v3883_v18  ;;  %v3885_v57 = vsel %vm1980_vm12, 1.0, %v5885_v11 }
 0xcf8   : > { %vm3887_vm14 = vmpackc.low %vm1967_vm13, %vm1966_vm11  ;;  %vm1981_vm15 = vcmp.ge.f32.partialorder %v7129_v54, 1.0  ;;  %v7140_v58 = vadd.f32 %v3885_v57, %v7066_v38  ;;  %v2086_v59 = vsub.f32 %v7121_v17, %v3885_v57  ;;  %v3884_v60 = vsel %vm1967_vm13, 1.0, %v5885_v11 }
 0xcf9   : > { %vm3889_vm0 = vmpackc.low %vm1981_vm15, %vm1980_vm12  ;;  %5146 = vmatmul.mubr.msk.bf16.vlgmr.msra.gmra.mrb[60].mxu0 %vm3887_vm14, %v5887_v23  ;;  %v7146_v61 = vadd.f32 %v3884_v60, %v7072_v41  ;;  %v2073_v62 = vsub.f32 %v7125_v53, %v3884_v60  ;;  %v3886_v63 = vsel %vm1981_vm15, 1.0, %v5885_v11 }
 0xcfa   : > { %5166 = vmatmul.mubr.msk.bf16.vlgmr.msra.gmra.mrb[60].mxu1 %vm3889_vm0, %v5887_v23  ;;  %5170 = vmatpush3.bf16.msra.mxu0 %v6596_v4  ;;  %v7153_v0 = vadd.f32 %v3886_v63, %v7079_v44  ;;  %v2087_v1 = vsub.f32 %v7129_v54, %v3886_v63 }
 0xcfb   : > { %5190 = vmatpush3.bf16.msra.mxu1 %v6596_v4  ;;  %5171 = vmatprep.subr.bf16.mxu0 %v5885_v11 }
 0xcfc   : > { %5191 = vmatprep.subr.bf16.mxu1 %v5885_v11  ;;  %5185 = vmatprep.mubr.msk.bf16.mxu0 %vm5886_vm1, %v5885_v11 }
 0xcfd   : > { %5205 = vmatprep.mubr.msk.bf16.mxu1 %vm5886_vm1, %v5885_v11 }
 0xcfe   : > { %5172 = vmatpush3.bf16.msra.mxu0 %v6613_v7 }
 0xcff   : > { %5192 = vmatpush3.bf16.msra.mxu1 %v6613_v7  ;;  %5173 = vmatprep.subr.bf16.mxu0 %v5885_v11 }
 0xd00   : > { %5193 = vmatprep.subr.bf16.mxu1 %v5885_v11 }
 0xd02   : > { %5174 = vmatpush3.bf16.msra.mxu0 %v6622_v9 }
 0xd03   : > { %5194 = vmatpush3.bf16.msra.mxu1 %v6622_v9  ;;  %5175 = vmatprep.subr.bf16.mxu0 %v5885_v11 }
 0xd04   : > { %5195 = vmatprep.subr.bf16.mxu1 %v5885_v11 }
 0xd06   : > { %5176 = vmatpush3.bf16.msra.mxu0 %v6631_v10 }
 0xd07   : > { %5196 = vmatpush3.bf16.msra.mxu1 %v6631_v10  ;;  %5177 = vmatprep.subr.bf16.mxu0 %v5885_v11 }
 0xd08   : > { %5197 = vmatprep.subr.bf16.mxu1 %v5885_v11 }
 0xd0a   : > { %5178 = vmatpush3.bf16.msra.mxu0 %v6640_v27 }
 0xd0b   : > { %5198 = vmatpush3.bf16.msra.mxu1 %v6640_v27  ;;  %5179 = vmatprep.subr.bf16.mxu0 %v5885_v11 }
 0xd0c   : > { %5199 = vmatprep.subr.bf16.mxu1 %v5885_v11 }
 0xd0e   : > { %5180 = vmatpush3.bf16.msra.mxu0 %v6649_v24 }
 0xd0f   : > { %5200 = vmatpush3.bf16.msra.mxu1 %v6649_v24  ;;  %5181 = vmatprep.subr.bf16.mxu0 %v5885_v11 }
 0xd10   : > { %5201 = vmatprep.subr.bf16.mxu1 %v5885_v11 }
 0xd12   : > { %5182 = vmatpush3.bf16.msra.mxu0 %v6658_v29 }
 0xd13   : > { %5202 = vmatpush3.bf16.msra.mxu1 %v6658_v29  ;;  %5183 = vmatprep.subr.bf16.mxu0 %v5885_v11 }
 0xd14   : > { %5203 = vmatprep.subr.bf16.mxu1 %v5885_v11 }
 0xd16   : > { %5184 = vmatpush3.bf16.msra.mxu0 %v6667_v30 }
 0xd17   : > { %5204 = vmatpush3.bf16.msra.mxu1 %v6667_v30  ;;  %5209 = vmatprep.subr.bf16.mxu0 %v5885_v11 }
 0xd18   : > { %5229 = vmatprep.subr.bf16.mxu1 %v5885_v11 }
 0xdcc   : > { %v2023_v4 = vpop.f32.mrb[60].mxu0 }
 0xdcd   : > { %v2074_v7 = vadd.f32 %v2072_v56, %v2023_v4  ;;  %v2065_v9 = vpop.f32.mrb[60].mxu1  ;;  %v5147_v10 = vpop.f32.mrb[61].mxu0 }
 0xdce   : > { %v2088_v27 = vadd.f32 %v2086_v59, %v2065_v9  ;;  %v5167_v24 = vpop.f32.mrb[61].mxu1  ;;  %v2026_v2 = vpop.f32.mrb[62].mxu0 }
 0xdcf   : > { %v7192_v29 = vadd.f32 %v2074_v7, %v6057_v21  ;;  %v2075_v3 = vadd.f32 %v2073_v62, %v2026_v2  ;;  %v2068_v5 = vpop.f32.mrb[62].mxu1  ;;  %v5148_v6 = vpop.f32.mrb[63].mxu0 }
 0xdd0   : > { %v7195_v25 = vadd.f32 %v2088_v27, %v6059_v22  ;;  %v2089_v30 = vadd.f32 %v2087_v1, %v2068_v5  ;;  %v5168_v26 = vpop.f32.mrb[63].mxu1 }
 0xdd1   : > { %vm2078_vm2 = vcmp.ge.f32.partialorder %v7192_v29, 1.0  ;;  %v7199_v31 = vadd.f32 %v6053_v19, %v2075_v3 }
 0xdd2   : > { %vm2092_vm3 = vcmp.ge.f32.partialorder %v7195_v25, 1.0  ;;  %v7203_v28 = vadd.f32 %v6055_v20, %v2089_v30  ;;  %v3891_v32 = vsel %vm2078_vm2, 1.0, %v5885_v11 }
 0xdd3   : > { %vm2079_vm4 = vcmp.ge.f32.partialorder %v7199_v31, 1.0  ;;  %v7208_v33 = vadd.f32 %v3891_v32, %v7134_v55  ;;  %v2184_v34 = vsub.f32 %v7192_v29, %v3891_v32  ;;  %v3893_v35 = vsel %vm2092_vm3, 1.0, %v5885_v11 }
 0xdd4   : > { %vm3895_vm5 = vmpackc.low %vm2079_vm4, %vm2078_vm2  ;;  %vm2093_vm6 = vcmp.ge.f32.partialorder %v7203_v28, 1.0  ;;  %v7214_v36 = vadd.f32 %v3893_v35, %v7140_v58  ;;  %v2198_v37 = vsub.f32 %v7195_v25, %v3893_v35  ;;  %v3892_v38 = vsel %vm2079_vm4, 1.0, %v5885_v11 }
 0xdd5   : > { %vm3897_vm7 = vmpackc.low %vm2093_vm6, %vm2092_vm3  ;;  %5186 = vmatmul.mubr.msk.bf16.vlgmr.msra.gmra.mrb[64].mxu0 %vm3895_vm5, %v5887_v23  ;;  %v7220_v39 = vadd.f32 %v3892_v38, %v7146_v61  ;;  %v2185_v40 = vsub.f32 %v7199_v31, %v3892_v38  ;;  %v3894_v41 = vsel %vm2093_vm6, 1.0, %v5885_v11 }
 0xdd6   : > { %5206 = vmatmul.mubr.msk.bf16.vlgmr.msra.gmra.mrb[64].mxu1 %vm3897_vm7, %v5887_v23  ;;  %5210 = vmatpush3.bf16.msra.mxu0 %v7228_v42  ;;  %v7232_v43 = vadd.f32 %v3894_v41, %v7153_v0  ;;  %v2199_v44 = vsub.f32 %v7203_v28, %v3894_v41 }
 0xdd7   : > { %5230 = vmatpush3.bf16.msra.mxu1 %v7228_v42  ;;  %5211 = vmatprep.subr.bf16.mxu0 %v5885_v11 }
 0xdd8   : > { %5231 = vmatprep.subr.bf16.mxu1 %v5885_v11  ;;  %5225 = vmatprep.mubr.msk.bf16.mxu0 %vm5886_vm1, %v5885_v11 }
 0xdd9   : > { %5245 = vmatprep.mubr.msk.bf16.mxu1 %vm5886_vm1, %v5885_v11 }
 0xdda   : > { %5212 = vmatpush3.bf16.msra.mxu0 %v7245_v45 }
 0xddb   : > { %5232 = vmatpush3.bf16.msra.mxu1 %v7245_v45  ;;  %5213 = vmatprep.subr.bf16.mxu0 %v5885_v11 }
 0xddc   : > { %5233 = vmatprep.subr.bf16.mxu1 %v5885_v11 }
 0xdde   : > { %5214 = vmatpush3.bf16.msra.mxu0 %v7254_v46 }
 0xddf   : > { %5234 = vmatpush3.bf16.msra.mxu1 %v7254_v46  ;;  %5215 = vmatprep.subr.bf16.mxu0 %v5885_v11 }
 0xde0   : > { %5235 = vmatprep.subr.bf16.mxu1 %v5885_v11 }
 0xde2   : > { %5216 = vmatpush3.bf16.msra.mxu0 %v7263_v47 }
 0xde3   : > { %5236 = vmatpush3.bf16.msra.mxu1 %v7263_v47  ;;  %5217 = vmatprep.subr.bf16.mxu0 %v5885_v11 }
 0xde4   : > { %5237 = vmatprep.subr.bf16.mxu1 %v5885_v11 }
 0xde6   : > { %5218 = vmatpush3.bf16.msra.mxu0 %v7272_v48 }
 0xde7   : > { %5238 = vmatpush3.bf16.msra.mxu1 %v7272_v48  ;;  %5219 = vmatprep.subr.bf16.mxu0 %v5885_v11 }
 0xde8   : > { %5239 = vmatprep.subr.bf16.mxu1 %v5885_v11 }
 0xdea   : > { %5220 = vmatpush3.bf16.msra.mxu0 %v7281_v49 }
 0xdeb   : > { %5240 = vmatpush3.bf16.msra.mxu1 %v7281_v49  ;;  %5221 = vmatprep.subr.bf16.mxu0 %v5885_v11 }
 0xdec   : > { %5241 = vmatprep.subr.bf16.mxu1 %v5885_v11 }
 0xdee   : > { %5222 = vmatpush3.bf16.msra.mxu0 %v7290_v8 }
 0xdef   : > { %5242 = vmatpush3.bf16.msra.mxu1 %v7290_v8  ;;  %5223 = vmatprep.subr.bf16.mxu0 %v5885_v11 }
 0xdf0   : > { %5243 = vmatprep.subr.bf16.mxu1 %v5885_v11 }
 0xdf2   : > { %5224 = vmatpush3.bf16.msra.mxu0 %v7299_v12 }
 0xdf3   : > { %5244 = vmatpush3.bf16.msra.mxu1 %v7299_v12  ;;  %5249 = vmatprep.subr.bf16.mxu0 %v5885_v11 }
 0xdf4   : > { %5269 = vmatprep.subr.bf16.mxu1 %v5885_v11 }
 0xea8   : > { %v2135_v13 = vpop.f32.mrb[64].mxu0 }
 0xea9   : > { %v2186_v14 = vadd.f32 %v2184_v34, %v2135_v13  ;;  %v2177_v15 = vpop.f32.mrb[64].mxu1  ;;  %v5187_v16 = vpop.f32.mrb[65].mxu0 }
 0xeaa   : > { %v2200_v50 = vadd.f32 %v2198_v37, %v2177_v15  ;;  %v5207_v17 = vpop.f32.mrb[65].mxu1  ;;  %v2138_v51 = vpop.f32.mrb[66].mxu0 }
 0xeab   : > { %v7306_v52 = vadd.f32 %v2186_v14, %v6057_v21  ;;  %v2187_v53 = vadd.f32 %v2185_v40, %v2138_v51  ;;  %v2180_v54 = vpop.f32.mrb[66].mxu1  ;;  %v5188_v18 = vpop.f32.mrb[67].mxu0 }
 0xeac   : > { %v7309_v55 = vadd.f32 %v2200_v50, %v6059_v22  ;;  %v2201_v56 = vadd.f32 %v2199_v44, %v2180_v54  ;;  %v5208_v57 = vpop.f32.mrb[67].mxu1 }
 0xead   : > { %vm2190_vm8 = vcmp.ge.f32.partialorder %v7306_v52, 1.0  ;;  %v7313_v58 = vadd.f32 %v6053_v19, %v2187_v53 }
 0xeae   : > { %vm2204_vm9 = vcmp.ge.f32.partialorder %v7309_v55, 1.0  ;;  %v7317_v59 = vadd.f32 %v6055_v20, %v2201_v56  ;;  %v3899_v60 = vsel %vm2190_vm8, 1.0, %v5885_v11 }
 0xeaf   : > { %vm2191_vm10 = vcmp.ge.f32.partialorder %v7313_v58, 1.0  ;;  %v7322_v61 = vadd.f32 %v3899_v60, %v7208_v33  ;;  %v2296_v62 = vsub.f32 %v7306_v52, %v3899_v60  ;;  %v3901_v63 = vsel %vm2204_vm9, 1.0, %v5885_v11 }
 0xeb0   : > { %vm3903_vm11 = vmpackc.low %vm2191_vm10, %vm2190_vm8  ;;  %vm2205_vm12 = vcmp.ge.f32.partialorder %v7317_v59, 1.0  ;;  %v7328_v0 = vadd.f32 %v3901_v63, %v7214_v36  ;;  %v2310_v1 = vsub.f32 %v7309_v55, %v3901_v63  ;;  %v3900_v4 = vsel %vm2191_vm10, 1.0, %v5885_v11 }
 0xeb1   : > { %vm3905_vm13 = vmpackc.low %vm2205_vm12, %vm2204_vm9  ;;  %5226 = vmatmul.mubr.msk.bf16.vlgmr.msra.gmra.mrb[68].mxu0 %vm3903_vm11, %v5887_v23  ;;  %v7334_v7 = vadd.f32 %v3900_v4, %v7220_v39  ;;  %v2297_v9 = vsub.f32 %v7313_v58, %v3900_v4  ;;  %v3902_v10 = vsel %vm2205_vm12, 1.0, %v5885_v11 }
 0xeb2   : > { %5246 = vmatmul.mubr.msk.bf16.vlgmr.msra.gmra.mrb[68].mxu1 %vm3905_vm13, %v5887_v23  ;;  %5250 = vmatpush3.bf16.msra.mxu0 %v7228_v42  ;;  %v7341_v27 = vadd.f32 %v3902_v10, %v7232_v43  ;;  %v2311_v24 = vsub.f32 %v7317_v59, %v3902_v10 }
 0xeb3   : > { %5270 = vmatpush3.bf16.msra.mxu1 %v7228_v42  ;;  %5251 = vmatprep.subr.bf16.mxu0 %v5885_v11 }
 0xeb4   : > { %5271 = vmatprep.subr.bf16.mxu1 %v5885_v11  ;;  %5265 = vmatprep.mubr.msk.bf16.mxu0 %vm5886_vm1, %v5885_v11 }
 0xeb5   : > { %5285 = vmatprep.mubr.msk.bf16.mxu1 %vm5886_vm1, %v5885_v11 }
 0xeb6   : > { %5252 = vmatpush3.bf16.msra.mxu0 %v7245_v45 }
 0xeb7   : > { %5272 = vmatpush3.bf16.msra.mxu1 %v7245_v45  ;;  %5253 = vmatprep.subr.bf16.mxu0 %v5885_v11 }
 0xeb8   : > { %5273 = vmatprep.subr.bf16.mxu1 %v5885_v11 }
 0xeba   : > { %5254 = vmatpush3.bf16.msra.mxu0 %v7254_v46 }
 0xebb   : > { %5274 = vmatpush3.bf16.msra.mxu1 %v7254_v46  ;;  %5255 = vmatprep.subr.bf16.mxu0 %v5885_v11 }
 0xebc   : > { %5275 = vmatprep.subr.bf16.mxu1 %v5885_v11 }
 0xebe   : > { %5256 = vmatpush3.bf16.msra.mxu0 %v7263_v47 }
 0xebf   : > { %5276 = vmatpush3.bf16.msra.mxu1 %v7263_v47  ;;  %5257 = vmatprep.subr.bf16.mxu0 %v5885_v11 }
 0xec0   : > { %5277 = vmatprep.subr.bf16.mxu1 %v5885_v11 }
 0xec2   : > { %5258 = vmatpush3.bf16.msra.mxu0 %v7272_v48 }
 0xec3   : > { %5278 = vmatpush3.bf16.msra.mxu1 %v7272_v48  ;;  %5259 = vmatprep.subr.bf16.mxu0 %v5885_v11 }
 0xec4   : > { %5279 = vmatprep.subr.bf16.mxu1 %v5885_v11 }
 0xec6   : > { %5260 = vmatpush3.bf16.msra.mxu0 %v7281_v49 }
 0xec7   : > { %5280 = vmatpush3.bf16.msra.mxu1 %v7281_v49  ;;  %5261 = vmatprep.subr.bf16.mxu0 %v5885_v11 }
 0xec8   : > { %5281 = vmatprep.subr.bf16.mxu1 %v5885_v11 }
 0xeca   : > { %5262 = vmatpush3.bf16.msra.mxu0 %v7290_v8 }
 0xecb   : > { %5282 = vmatpush3.bf16.msra.mxu1 %v7290_v8  ;;  %5263 = vmatprep.subr.bf16.mxu0 %v5885_v11 }
 0xecc   : > { %5283 = vmatprep.subr.bf16.mxu1 %v5885_v11 }
 0xece   : > { %5264 = vmatpush3.bf16.msra.mxu0 %v7299_v12 }
 0xecf   : > { %5284 = vmatpush3.bf16.msra.mxu1 %v7299_v12  ;;  %5289 = vmatprep.subr.bf16.mxu0 %v5885_v11 }
 0xed0   : > { %5309 = vmatprep.subr.bf16.mxu1 %v5885_v11 }
 0xf84   : > { %v2247_v2 = vpop.f32.mrb[68].mxu0 }
 0xf85   : > { %v2298_v29 = vadd.f32 %v2296_v62, %v2247_v2  ;;  %v2289_v3 = vpop.f32.mrb[68].mxu1  ;;  %v5227_v5 = vpop.f32.mrb[69].mxu0 }
 0xf86   : > { %v2312_v6 = vadd.f32 %v2310_v1, %v2289_v3  ;;  %v5247_v25 = vpop.f32.mrb[69].mxu1  ;;  %v2250_v30 = vpop.f32.mrb[70].mxu0 }
 0xf87   : > { %v7380_v26 = vadd.f32 %v2298_v29, %v6057_v21  ;;  %v2299_v31 = vadd.f32 %v2297_v9, %v2250_v30  ;;  %v2292_v28 = vpop.f32.mrb[70].mxu1  ;;  %v5228_v32 = vpop.f32.mrb[71].mxu0 }
 0xf88   : > { %v7383_v33 = vadd.f32 %v2312_v6, %v6059_v22  ;;  %v2313_v34 = vadd.f32 %v2311_v24, %v2292_v28  ;;  %v5248_v35 = vpop.f32.mrb[71].mxu1 }
 0xf89   : > { %vm2302_vm14 = vcmp.ge.f32.partialorder %v7380_v26, 1.0  ;;  %v7387_v36 = vadd.f32 %v6053_v19, %v2299_v31 }
 0xf8a   : > { %vm2316_vm15 = vcmp.ge.f32.partialorder %v7383_v33, 1.0  ;;  %v7391_v37 = vadd.f32 %v6055_v20, %v2313_v34  ;;  %v3907_v38 = vsel %vm2302_vm14, 1.0, %v5885_v11 }
 0xf8b   : > { %vm2303_vm0 = vcmp.ge.f32.partialorder %v7387_v36, 1.0  ;;  %v7396_v39 = vadd.f32 %v3907_v38, %v7322_v61  ;;  %v2408_v40 = vsub.f32 %v7380_v26, %v3907_v38  ;;  %v3909_v41 = vsel %vm2316_vm15, 1.0, %v5885_v11 }
 0xf8c   : > { %vm3911_vm2 = vmpackc.low %vm2303_vm0, %vm2302_vm14  ;;  %vm2317_vm3 = vcmp.ge.f32.partialorder %v7391_v37, 1.0  ;;  %v7402_v43 = vadd.f32 %v3909_v41, %v7328_v0  ;;  %v2422_v44 = vsub.f32 %v7383_v33, %v3909_v41  ;;  %v3908_v13 = vsel %vm2303_vm0, 1.0, %v5885_v11 }
 0xf8d   : > { %vm3913_vm4 = vmpackc.low %vm2317_vm3, %vm2316_vm15  ;;  %5266 = vmatmul.mubr.msk.bf16.vlgmr.msra.gmra.mrb[72].mxu0 %vm3911_vm2, %v5887_v23  ;;  %v7408_v14 = vadd.f32 %v3908_v13, %v7334_v7  ;;  %v2409_v15 = vsub.f32 %v7387_v36, %v3908_v13  ;;  %v3910_v16 = vsel %vm2317_vm3, 1.0, %v5885_v11 }
 0xf8e   : > { %5286 = vmatmul.mubr.msk.bf16.vlgmr.msra.gmra.mrb[72].mxu1 %vm3913_vm4, %v5887_v23  ;;  %5290 = vmatpush3.bf16.msra.mxu0 %v7228_v42  ;;  %v7415_v50 = vadd.f32 %v3910_v16, %v7341_v27  ;;  %v2423_v17 = vsub.f32 %v7391_v37, %v3910_v16 }
 0xf8f   : > { %5310 = vmatpush3.bf16.msra.mxu1 %v7228_v42  ;;  %5291 = vmatprep.subr.bf16.mxu0 %v5885_v11 }
 0xf90   : > { %5311 = vmatprep.subr.bf16.mxu1 %v5885_v11  ;;  %5305 = vmatprep.mubr.msk.bf16.mxu0 %vm5886_vm1, %v5885_v11 }
 0xf91   : > { %5325 = vmatprep.mubr.msk.bf16.mxu1 %vm5886_vm1, %v5885_v11 }
 0xf92   : > { %5292 = vmatpush3.bf16.msra.mxu0 %v7245_v45 }
 0xf93   : > { %5312 = vmatpush3.bf16.msra.mxu1 %v7245_v45  ;;  %5293 = vmatprep.subr.bf16.mxu0 %v5885_v11 }
 0xf94   : > { %5313 = vmatprep.subr.bf16.mxu1 %v5885_v11 }
 0xf96   : > { %5294 = vmatpush3.bf16.msra.mxu0 %v7254_v46 }
 0xf97   : > { %5314 = vmatpush3.bf16.msra.mxu1 %v7254_v46  ;;  %5295 = vmatprep.subr.bf16.mxu0 %v5885_v11 }
 0xf98   : > { %5315 = vmatprep.subr.bf16.mxu1 %v5885_v11 }
 0xf9a   : > { %5296 = vmatpush3.bf16.msra.mxu0 %v7263_v47 }
 0xf9b   : > { %5316 = vmatpush3.bf16.msra.mxu1 %v7263_v47  ;;  %5297 = vmatprep.subr.bf16.mxu0 %v5885_v11 }
 0xf9c   : > { %5317 = vmatprep.subr.bf16.mxu1 %v5885_v11 }
 0xf9e   : > { %5298 = vmatpush3.bf16.msra.mxu0 %v7272_v48 }
 0xf9f   : > { %5318 = vmatpush3.bf16.msra.mxu1 %v7272_v48  ;;  %5299 = vmatprep.subr.bf16.mxu0 %v5885_v11 }
 0xfa0   : > { %5319 = vmatprep.subr.bf16.mxu1 %v5885_v11 }
 0xfa2   : > { %5300 = vmatpush3.bf16.msra.mxu0 %v7281_v49 }
 0xfa3   : > { %5320 = vmatpush3.bf16.msra.mxu1 %v7281_v49  ;;  %5301 = vmatprep.subr.bf16.mxu0 %v5885_v11 }
 0xfa4   : > { %5321 = vmatprep.subr.bf16.mxu1 %v5885_v11 }
 0xfa6   : > { %5302 = vmatpush3.bf16.msra.mxu0 %v7290_v8 }
 0xfa7   : > { %5322 = vmatpush3.bf16.msra.mxu1 %v7290_v8  ;;  %5303 = vmatprep.subr.bf16.mxu0 %v5885_v11 }
 0xfa8   : > { %5323 = vmatprep.subr.bf16.mxu1 %v5885_v11 }
 0xfaa   : > { %5304 = vmatpush3.bf16.msra.mxu0 %v7299_v12 }
 0xfab   : > { %5324 = vmatpush3.bf16.msra.mxu1 %v7299_v12  ;;  %5329 = vmatprep.subr.bf16.mxu0 %v5885_v11 }
 0xfac   : > { %5349 = vmatprep.subr.bf16.mxu1 %v5885_v11 }
0x1060   : > { %v2359_v51 = vpop.f32.mrb[72].mxu0 }
0x1061   : > { %v2410_v52 = vadd.f32 %v2408_v40, %v2359_v51  ;;  %v2401_v53 = vpop.f32.mrb[72].mxu1  ;;  %v5267_v54 = vpop.f32.mrb[73].mxu0 }
0x1062   : > { %v2424_v18 = vadd.f32 %v2422_v44, %v2401_v53  ;;  %v5287_v55 = vpop.f32.mrb[73].mxu1  ;;  %v2362_v56 = vpop.f32.mrb[74].mxu0 }
0x1063   : > { %v7454_v57 = vadd.f32 %v2410_v52, %v6057_v21  ;;  %v2411_v58 = vadd.f32 %v2409_v15, %v2362_v56  ;;  %v2404_v59 = vpop.f32.mrb[74].mxu1  ;;  %v5268_v60 = vpop.f32.mrb[75].mxu0 }
0x1064   : > { %v7457_v61 = vadd.f32 %v2424_v18, %v6059_v22  ;;  %v2425_v62 = vadd.f32 %v2423_v17, %v2404_v59  ;;  %v5288_v63 = vpop.f32.mrb[75].mxu1 }
0x1065   : > { %vm2414_vm5 = vcmp.ge.f32.partialorder %v7454_v57, 1.0  ;;  %v7461_v0 = vadd.f32 %v6053_v19, %v2411_v58 }
0x1066   : > { %vm2428_vm6 = vcmp.ge.f32.partialorder %v7457_v61, 1.0  ;;  %v7465_v1 = vadd.f32 %v6055_v20, %v2425_v62  ;;  %v3915_v4 = vsel %vm2414_vm5, 1.0, %v5885_v11 }
0x1067   : > { %vm2415_vm7 = vcmp.ge.f32.partialorder %v7461_v0, 1.0  ;;  %v7470_v7 = vadd.f32 %v3915_v4, %v7396_v39  ;;  %v2520_v9 = vsub.f32 %v7454_v57, %v3915_v4  ;;  %v3917_v10 = vsel %vm2428_vm6, 1.0, %v5885_v11 }
0x1068   : > { %vm3919_vm8 = vmpackc.low %vm2415_vm7, %vm2414_vm5  ;;  %vm2429_vm9 = vcmp.ge.f32.partialorder %v7465_v1, 1.0  ;;  %v7476_v27 = vadd.f32 %v3917_v10, %v7402_v43  ;;  %v2534_v24 = vsub.f32 %v7457_v61, %v3917_v10  ;;  %v3916_v2 = vsel %vm2415_vm7, 1.0, %v5885_v11 }
0x1069   : > { %vm3921_vm10 = vmpackc.low %vm2429_vm9, %vm2428_vm6  ;;  %5306 = vmatmul.mubr.msk.bf16.vlgmr.msra.gmra.mrb[76].mxu0 %vm3919_vm8, %v5887_v23  ;;  %v7482_v29 = vadd.f32 %v3916_v2, %v7408_v14  ;;  %v2521_v3 = vsub.f32 %v7461_v0, %v3916_v2  ;;  %v3918_v5 = vsel %vm2429_vm9, 1.0, %v5885_v11 }
0x106a   : > { %5326 = vmatmul.mubr.msk.bf16.vlgmr.msra.gmra.mrb[76].mxu1 %vm3921_vm10, %v5887_v23  ;;  %5330 = vmatpush3.bf16.msra.mxu0 %v7228_v42  ;;  %v7489_v6 = vadd.f32 %v3918_v5, %v7415_v50  ;;  %v2535_v25 = vsub.f32 %v7465_v1, %v3918_v5 }
0x106b   : > { %5350 = vmatpush3.bf16.msra.mxu1 %v7228_v42  ;;  %5331 = vmatprep.subr.bf16.mxu0 %v5885_v11 }
0x106c   : > { %5351 = vmatprep.subr.bf16.mxu1 %v5885_v11  ;;  %5345 = vmatprep.mubr.msk.bf16.mxu0 %vm5886_vm1, %v5885_v11 }
0x106d   : > { %5365 = vmatprep.mubr.msk.bf16.mxu1 %vm5886_vm1, %v5885_v11 }
0x106e   : > { %5332 = vmatpush3.bf16.msra.mxu0 %v7245_v45 }
0x106f   : > { %5352 = vmatpush3.bf16.msra.mxu1 %v7245_v45  ;;  %5333 = vmatprep.subr.bf16.mxu0 %v5885_v11 }
0x1070   : > { %5353 = vmatprep.subr.bf16.mxu1 %v5885_v11 }
0x1072   : > { %5334 = vmatpush3.bf16.msra.mxu0 %v7254_v46 }
0x1073   : > { %5354 = vmatpush3.bf16.msra.mxu1 %v7254_v46  ;;  %5335 = vmatprep.subr.bf16.mxu0 %v5885_v11 }
0x1074   : > { %5355 = vmatprep.subr.bf16.mxu1 %v5885_v11 }
0x1076   : > { %5336 = vmatpush3.bf16.msra.mxu0 %v7263_v47 }
0x1077   : > { %5356 = vmatpush3.bf16.msra.mxu1 %v7263_v47  ;;  %5337 = vmatprep.subr.bf16.mxu0 %v5885_v11 }
0x1078   : > { %5357 = vmatprep.subr.bf16.mxu1 %v5885_v11 }
0x107a   : > { %5338 = vmatpush3.bf16.msra.mxu0 %v7272_v48 }
0x107b   : > { %5358 = vmatpush3.bf16.msra.mxu1 %v7272_v48  ;;  %5339 = vmatprep.subr.bf16.mxu0 %v5885_v11 }
0x107c   : > { %5359 = vmatprep.subr.bf16.mxu1 %v5885_v11 }
0x107e   : > { %5340 = vmatpush3.bf16.msra.mxu0 %v7281_v49 }
0x107f   : > { %5360 = vmatpush3.bf16.msra.mxu1 %v7281_v49  ;;  %5341 = vmatprep.subr.bf16.mxu0 %v5885_v11 }
0x1080   : > { %5361 = vmatprep.subr.bf16.mxu1 %v5885_v11 }
0x1082   : > { %5342 = vmatpush3.bf16.msra.mxu0 %v7290_v8 }
0x1083   : > { %5362 = vmatpush3.bf16.msra.mxu1 %v7290_v8  ;;  %5343 = vmatprep.subr.bf16.mxu0 %v5885_v11 }
0x1084   : > { %5363 = vmatprep.subr.bf16.mxu1 %v5885_v11 }
0x1086   : > { %5344 = vmatpush3.bf16.msra.mxu0 %v7299_v12 }
0x1087   : > { %5364 = vmatpush3.bf16.msra.mxu1 %v7299_v12  ;;  %5369 = vmatprep.subr.bf16.mxu0 %v5885_v11 }
0x1088   : > { %5389 = vmatprep.subr.bf16.mxu1 %v5885_v11 }
0x113c   : > { %v2471_v30 = vpop.f32.mrb[76].mxu0 }
0x113d   : > { %v2522_v26 = vadd.f32 %v2520_v9, %v2471_v30  ;;  %v2513_v31 = vpop.f32.mrb[76].mxu1  ;;  %v5307_v28 = vpop.f32.mrb[77].mxu0 }
0x113e   : > { %v2536_v32 = vadd.f32 %v2534_v24, %v2513_v31  ;;  %v5327_v33 = vpop.f32.mrb[77].mxu1  ;;  %v2474_v34 = vpop.f32.mrb[78].mxu0 }
0x113f   : > { %v7528_v35 = vadd.f32 %v2522_v26, %v6057_v21  ;;  %v2523_v36 = vadd.f32 %v2521_v3, %v2474_v34  ;;  %v2516_v37 = vpop.f32.mrb[78].mxu1  ;;  %v5308_v38 = vpop.f32.mrb[79].mxu0 }
0x1140   : > { %v7531_v39 = vadd.f32 %v2536_v32, %v6059_v22  ;;  %v2537_v40 = vadd.f32 %v2535_v25, %v2516_v37  ;;  %v5328_v41 = vpop.f32.mrb[79].mxu1 }
0x1141   : > { %vm2526_vm11 = vcmp.ge.f32.partialorder %v7528_v35, 1.0  ;;  %v7535_v43 = vadd.f32 %v6053_v19, %v2523_v36 }
0x1142   : > { %vm2540_vm12 = vcmp.ge.f32.partialorder %v7531_v39, 1.0  ;;  %v7539_v44 = vadd.f32 %v6055_v20, %v2537_v40  ;;  %v3923_v13 = vsel %vm2526_vm11, 1.0, %v5885_v11 }
0x1143   : > { %vm2527_vm13 = vcmp.ge.f32.partialorder %v7535_v43, 1.0  ;;  %v7544_v14 = vadd.f32 %v3923_v13, %v7470_v7  ;;  %v2632_v15 = vsub.f32 %v7528_v35, %v3923_v13  ;;  %v3925_v16 = vsel %vm2540_vm12, 1.0, %v5885_v11 }
0x1144   : > { %vm3927_vm14 = vmpackc.low %vm2527_vm13, %vm2526_vm11  ;;  %vm2541_vm15 = vcmp.ge.f32.partialorder %v7539_v44, 1.0  ;;  %v7550_v50 = vadd.f32 %v3925_v16, %v7476_v27  ;;  %v2646_v17 = vsub.f32 %v7531_v39, %v3925_v16  ;;  %v3924_v51 = vsel %vm2527_vm13, 1.0, %v5885_v11 }
0x1145   : > { %vm3929_vm0 = vmpackc.low %vm2541_vm15, %vm2540_vm12  ;;  %5346 = vmatmul.mubr.msk.bf16.vlgmr.msra.gmra.mrb[80].mxu0 %vm3927_vm14, %v5887_v23  ;;  %v7556_v52 = vadd.f32 %v3924_v51, %v7482_v29  ;;  %v2633_v53 = vsub.f32 %v7535_v43, %v3924_v51  ;;  %v3926_v54 = vsel %vm2541_vm15, 1.0, %v5885_v11 }
0x1146   : > { %5366 = vmatmul.mubr.msk.bf16.vlgmr.msra.gmra.mrb[80].mxu1 %vm3929_vm0, %v5887_v23  ;;  %5370 = vmatpush3.bf16.msra.mxu0 %v7228_v42  ;;  %v7563_v18 = vadd.f32 %v3926_v54, %v7489_v6  ;;  %v2647_v55 = vsub.f32 %v7539_v44, %v3926_v54 }
0x1147   : > { %5390 = vmatpush3.bf16.msra.mxu1 %v7228_v42  ;;  %5371 = vmatprep.subr.bf16.mxu0 %v5885_v11 }
0x1148   : > { %5391 = vmatprep.subr.bf16.mxu1 %v5885_v11  ;;  %5385 = vmatprep.mubr.msk.bf16.mxu0 %vm5886_vm1, %v5885_v11 }
0x1149   : > { %5405 = vmatprep.mubr.msk.bf16.mxu1 %vm5886_vm1, %v5885_v11 }
0x114a   : > { %5372 = vmatpush3.bf16.msra.mxu0 %v7245_v45 }
0x114b   : > { %5392 = vmatpush3.bf16.msra.mxu1 %v7245_v45  ;;  %5373 = vmatprep.subr.bf16.mxu0 %v5885_v11 }
0x114c   : > { %5393 = vmatprep.subr.bf16.mxu1 %v5885_v11 }
0x114e   : > { %5374 = vmatpush3.bf16.msra.mxu0 %v7254_v46 }
0x114f   : > { %5394 = vmatpush3.bf16.msra.mxu1 %v7254_v46  ;;  %5375 = vmatprep.subr.bf16.mxu0 %v5885_v11 }
0x1150   : > { %5395 = vmatprep.subr.bf16.mxu1 %v5885_v11 }
0x1152   : > { %5376 = vmatpush3.bf16.msra.mxu0 %v7263_v47 }
0x1153   : > { %5396 = vmatpush3.bf16.msra.mxu1 %v7263_v47  ;;  %5377 = vmatprep.subr.bf16.mxu0 %v5885_v11 }
0x1154   : > { %5397 = vmatprep.subr.bf16.mxu1 %v5885_v11 }
0x1156   : > { %5378 = vmatpush3.bf16.msra.mxu0 %v7272_v48 }
0x1157   : > { %5398 = vmatpush3.bf16.msra.mxu1 %v7272_v48  ;;  %5379 = vmatprep.subr.bf16.mxu0 %v5885_v11 }
0x1158   : > { %5399 = vmatprep.subr.bf16.mxu1 %v5885_v11 }
0x115a   : > { %5380 = vmatpush3.bf16.msra.mxu0 %v7281_v49 }
0x115b   : > { %5400 = vmatpush3.bf16.msra.mxu1 %v7281_v49  ;;  %5381 = vmatprep.subr.bf16.mxu0 %v5885_v11 }
0x115c   : > { %5401 = vmatprep.subr.bf16.mxu1 %v5885_v11 }
0x115e   : > { %5382 = vmatpush3.bf16.msra.mxu0 %v7290_v8 }
0x115f   : > { %5402 = vmatpush3.bf16.msra.mxu1 %v7290_v8  ;;  %5383 = vmatprep.subr.bf16.mxu0 %v5885_v11 }
0x1160   : > { %5403 = vmatprep.subr.bf16.mxu1 %v5885_v11 }
0x1162   : > { %5384 = vmatpush3.bf16.msra.mxu0 %v7299_v12 }
0x1163   : > { %5404 = vmatpush3.bf16.msra.mxu1 %v7299_v12  ;;  %5409 = vmatprep.subr.bf16.mxu0 %v5885_v11 }
0x1164   : > { %5429 = vmatprep.subr.bf16.mxu1 %v5885_v11 }
0x1218   : > { %v2583_v56 = vpop.f32.mrb[80].mxu0 }
0x1219   : > { %v2634_v57 = vadd.f32 %v2632_v15, %v2583_v56  ;;  %v2625_v58 = vpop.f32.mrb[80].mxu1  ;;  %v5347_v59 = vpop.f32.mrb[81].mxu0 }
0x121a   : > { %v2648_v60 = vadd.f32 %v2646_v17, %v2625_v58  ;;  %v5367_v61 = vpop.f32.mrb[81].mxu1  ;;  %v2586_v62 = vpop.f32.mrb[82].mxu0 }
0x121b   : > { %v7602_v63 = vadd.f32 %v2634_v57, %v6057_v21  ;;  %v2635_v0 = vadd.f32 %v2633_v53, %v2586_v62  ;;  %v2628_v1 = vpop.f32.mrb[82].mxu1  ;;  %v5348_v4 = vpop.f32.mrb[83].mxu0 }
0x121c   : > { %v7605_v7 = vadd.f32 %v2648_v60, %v6059_v22  ;;  %v2649_v9 = vadd.f32 %v2647_v55, %v2628_v1  ;;  %v5368_v10 = vpop.f32.mrb[83].mxu1 }
0x121d   : > { %vm2638_vm2 = vcmp.ge.f32.partialorder %v7602_v63, 1.0  ;;  %v7609_v27 = vadd.f32 %v6053_v19, %v2635_v0 }
0x121e   : > { %vm2652_vm3 = vcmp.ge.f32.partialorder %v7605_v7, 1.0  ;;  %v7613_v24 = vadd.f32 %v6055_v20, %v2649_v9  ;;  %v3931_v2 = vsel %vm2638_vm2, 1.0, %v5885_v11 }
0x121f   : > { %vm2639_vm4 = vcmp.ge.f32.partialorder %v7609_v27, 1.0  ;;  %v7618_v29 = vadd.f32 %v3931_v2, %v7544_v14  ;;  %v2744_v3 = vsub.f32 %v7602_v63, %v3931_v2  ;;  %v3933_v5 = vsel %vm2652_vm3, 1.0, %v5885_v11 }
0x1220   : > { %vm3935_vm5 = vmpackc.low %vm2639_vm4, %vm2638_vm2  ;;  %vm2653_vm6 = vcmp.ge.f32.partialorder %v7613_v24, 1.0  ;;  %v7624_v6 = vadd.f32 %v3933_v5, %v7550_v50  ;;  %v2758_v25 = vsub.f32 %v7605_v7, %v3933_v5  ;;  %v3932_v30 = vsel %vm2639_vm4, 1.0, %v5885_v11 }
0x1221   : > { %vm3937_vm7 = vmpackc.low %vm2653_vm6, %vm2652_vm3  ;;  %5386 = vmatmul.mubr.msk.bf16.vlgmr.msra.gmra.mrb[84].mxu0 %vm3935_vm5, %v5887_v23  ;;  %v7630_v26 = vadd.f32 %v3932_v30, %v7556_v52  ;;  %v2745_v31 = vsub.f32 %v7609_v27, %v3932_v30  ;;  %v3934_v28 = vsel %vm2653_vm6, 1.0, %v5885_v11 }
0x1222   : > { %5406 = vmatmul.mubr.msk.bf16.vlgmr.msra.gmra.mrb[84].mxu1 %vm3937_vm7, %v5887_v23  ;;  %5410 = vmatpush3.bf16.msra.mxu0 %v7228_v42  ;;  %v7637_v32 = vadd.f32 %v3934_v28, %v7563_v18  ;;  %v2759_v33 = vsub.f32 %v7613_v24, %v3934_v28 }
0x1223   : > { %5430 = vmatpush3.bf16.msra.mxu1 %v7228_v42  ;;  %5411 = vmatprep.subr.bf16.mxu0 %v5885_v11 }
0x1224   : > { %5431 = vmatprep.subr.bf16.mxu1 %v5885_v11  ;;  %5425 = vmatprep.mubr.msk.bf16.mxu0 %vm5886_vm1, %v5885_v11 }
0x1225   : > { %5445 = vmatprep.mubr.msk.bf16.mxu1 %vm5886_vm1, %v5885_v11 }
0x1226   : > { %5412 = vmatpush3.bf16.msra.mxu0 %v7245_v45 }
0x1227   : > { %5432 = vmatpush3.bf16.msra.mxu1 %v7245_v45  ;;  %5413 = vmatprep.subr.bf16.mxu0 %v5885_v11 }
0x1228   : > { %5433 = vmatprep.subr.bf16.mxu1 %v5885_v11 }
0x122a   : > { %5414 = vmatpush3.bf16.msra.mxu0 %v7254_v46 }
0x122b   : > { %5434 = vmatpush3.bf16.msra.mxu1 %v7254_v46  ;;  %5415 = vmatprep.subr.bf16.mxu0 %v5885_v11 }
0x122c   : > { %5435 = vmatprep.subr.bf16.mxu1 %v5885_v11 }
0x122e   : > { %5416 = vmatpush3.bf16.msra.mxu0 %v7263_v47 }
0x122f   : > { %5436 = vmatpush3.bf16.msra.mxu1 %v7263_v47  ;;  %5417 = vmatprep.subr.bf16.mxu0 %v5885_v11 }
0x1230   : > { %5437 = vmatprep.subr.bf16.mxu1 %v5885_v11 }
0x1232   : > { %5418 = vmatpush3.bf16.msra.mxu0 %v7272_v48 }
0x1233   : > { %5438 = vmatpush3.bf16.msra.mxu1 %v7272_v48  ;;  %5419 = vmatprep.subr.bf16.mxu0 %v5885_v11 }
0x1234   : > { %5439 = vmatprep.subr.bf16.mxu1 %v5885_v11 }
0x1236   : > { %5420 = vmatpush3.bf16.msra.mxu0 %v7281_v49 }
0x1237   : > { %5440 = vmatpush3.bf16.msra.mxu1 %v7281_v49  ;;  %5421 = vmatprep.subr.bf16.mxu0 %v5885_v11 }
0x1238   : > { %5441 = vmatprep.subr.bf16.mxu1 %v5885_v11 }
0x123a   : > { %5422 = vmatpush3.bf16.msra.mxu0 %v7290_v8 }
0x123b   : > { %5442 = vmatpush3.bf16.msra.mxu1 %v7290_v8  ;;  %5423 = vmatprep.subr.bf16.mxu0 %v5885_v11 }
0x123c   : > { %5443 = vmatprep.subr.bf16.mxu1 %v5885_v11 }
0x123e   : > { %5424 = vmatpush3.bf16.msra.mxu0 %v7299_v12 }
0x123f   : > { %5444 = vmatpush3.bf16.msra.mxu1 %v7299_v12  ;;  %5449 = vmatprep.subr.bf16.mxu0 %v5885_v11 }
0x1240   : > { %5469 = vmatprep.subr.bf16.mxu1 %v5885_v11 }
0x12f4   : > { %v2695_v34 = vpop.f32.mrb[84].mxu0 }
0x12f5   : > { %v2746_v35 = vadd.f32 %v2744_v3, %v2695_v34  ;;  %v2737_v36 = vpop.f32.mrb[84].mxu1  ;;  %v5387_v37 = vpop.f32.mrb[85].mxu0 }
0x12f6   : > { %v2760_v38 = vadd.f32 %v2758_v25, %v2737_v36  ;;  %v5407_v39 = vpop.f32.mrb[85].mxu1  ;;  %v2698_v40 = vpop.f32.mrb[86].mxu0 }
0x12f7   : > { %v7676_v41 = vadd.f32 %v2746_v35, %v6057_v21  ;;  %v2747_v43 = vadd.f32 %v2745_v31, %v2698_v40  ;;  %v2740_v44 = vpop.f32.mrb[86].mxu1  ;;  %v5388_v13 = vpop.f32.mrb[87].mxu0 }
0x12f8   : > { %v7679_v14 = vadd.f32 %v2760_v38, %v6059_v22  ;;  %v2761_v15 = vadd.f32 %v2759_v33, %v2740_v44  ;;  %v5408_v16 = vpop.f32.mrb[87].mxu1 }
0x12f9   : > { %vm2750_vm8 = vcmp.ge.f32.partialorder %v7676_v41, 1.0  ;;  %v7683_v50 = vadd.f32 %v6053_v19, %v2747_v43 }
0x12fa   : > { %vm2764_vm9 = vcmp.ge.f32.partialorder %v7679_v14, 1.0  ;;  %v7687_v17 = vadd.f32 %v6055_v20, %v2761_v15  ;;  %v3939_v51 = vsel %vm2750_vm8, 1.0, %v5885_v11 }
0x12fb   : > { %vm2751_vm10 = vcmp.ge.f32.partialorder %v7683_v50, 1.0  ;;  %v7692_v52 = vadd.f32 %v3939_v51, %v7618_v29  ;;  %v2856_v53 = vsub.f32 %v7676_v41, %v3939_v51  ;;  %v3941_v54 = vsel %vm2764_vm9, 1.0, %v5885_v11 }
0x12fc   : > { %vm3943_vm11 = vmpackc.low %vm2751_vm10, %vm2750_vm8  ;;  %vm2765_vm12 = vcmp.ge.f32.partialorder %v7687_v17, 1.0  ;;  %v7698_v18 = vadd.f32 %v3941_v54, %v7624_v6  ;;  %v2870_v55 = vsub.f32 %v7679_v14, %v3941_v54  ;;  %v3940_v56 = vsel %vm2751_vm10, 1.0, %v5885_v11 }
0x12fd   : > { %vm3945_vm13 = vmpackc.low %vm2765_vm12, %vm2764_vm9  ;;  %5426 = vmatmul.mubr.msk.bf16.vlgmr.msra.gmra.mrb[88].mxu0 %vm3943_vm11, %v5887_v23  ;;  %v7704_v57 = vadd.f32 %v3940_v56, %v7630_v26  ;;  %v2857_v58 = vsub.f32 %v7683_v50, %v3940_v56  ;;  %v3942_v59 = vsel %vm2765_vm12, 1.0, %v5885_v11 }
0x12fe   : > { %5446 = vmatmul.mubr.msk.bf16.vlgmr.msra.gmra.mrb[88].mxu1 %vm3945_vm13, %v5887_v23  ;;  %5450 = vmatpush3.bf16.msra.mxu0 %v7228_v42  ;;  %v7711_v60 = vadd.f32 %v3942_v59, %v7637_v32  ;;  %v2871_v61 = vsub.f32 %v7687_v17, %v3942_v59 }
0x12ff   : > { %5470 = vmatpush3.bf16.msra.mxu1 %v7228_v42  ;;  %5451 = vmatprep.subr.bf16.mxu0 %v5885_v11 }
0x1300   : > { %5471 = vmatprep.subr.bf16.mxu1 %v5885_v11  ;;  %5465 = vmatprep.mubr.msk.bf16.mxu0 %vm5886_vm1, %v5885_v11 }
0x1301   : > { %5485 = vmatprep.mubr.msk.bf16.mxu1 %vm5886_vm1, %v5885_v11 }
0x1302   : > { %5452 = vmatpush3.bf16.msra.mxu0 %v7245_v45 }
0x1303   : > { %5472 = vmatpush3.bf16.msra.mxu1 %v7245_v45  ;;  %5453 = vmatprep.subr.bf16.mxu0 %v5885_v11 }
0x1304   : > { %5473 = vmatprep.subr.bf16.mxu1 %v5885_v11 }
0x1306   : > { %5454 = vmatpush3.bf16.msra.mxu0 %v7254_v46 }
0x1307   : > { %5474 = vmatpush3.bf16.msra.mxu1 %v7254_v46  ;;  %5455 = vmatprep.subr.bf16.mxu0 %v5885_v11 }
0x1308   : > { %5475 = vmatprep.subr.bf16.mxu1 %v5885_v11 }
0x130a   : > { %5456 = vmatpush3.bf16.msra.mxu0 %v7263_v47 }
0x130b   : > { %5476 = vmatpush3.bf16.msra.mxu1 %v7263_v47  ;;  %5457 = vmatprep.subr.bf16.mxu0 %v5885_v11 }
0x130c   : > { %5477 = vmatprep.subr.bf16.mxu1 %v5885_v11 }
0x130e   : > { %5458 = vmatpush3.bf16.msra.mxu0 %v7272_v48 }
0x130f   : > { %5478 = vmatpush3.bf16.msra.mxu1 %v7272_v48  ;;  %5459 = vmatprep.subr.bf16.mxu0 %v5885_v11 }
0x1310   : > { %5479 = vmatprep.subr.bf16.mxu1 %v5885_v11 }
0x1312   : > { %5460 = vmatpush3.bf16.msra.mxu0 %v7281_v49 }
0x1313   : > { %5480 = vmatpush3.bf16.msra.mxu1 %v7281_v49  ;;  %5461 = vmatprep.subr.bf16.mxu0 %v5885_v11 }
0x1314   : > { %5481 = vmatprep.subr.bf16.mxu1 %v5885_v11 }
0x1316   : > { %5462 = vmatpush3.bf16.msra.mxu0 %v7290_v8 }
0x1317   : > { %5482 = vmatpush3.bf16.msra.mxu1 %v7290_v8  ;;  %5463 = vmatprep.subr.bf16.mxu0 %v5885_v11 }
0x1318   : > { %5483 = vmatprep.subr.bf16.mxu1 %v5885_v11 }
0x131a   : > { %5464 = vmatpush3.bf16.msra.mxu0 %v7299_v12 }
0x131b   : > { %5484 = vmatpush3.bf16.msra.mxu1 %v7299_v12  ;;  %5489 = vmatprep.subr.bf16.mxu0 %v5885_v11 }
0x131c   : > { %5509 = vmatprep.subr.bf16.mxu1 %v5885_v11 }
0x13d0   : > { %v2807_v62 = vpop.f32.mrb[88].mxu0 }
0x13d1   : > { %v2858_v63 = vadd.f32 %v2856_v53, %v2807_v62  ;;  %v2849_v0 = vpop.f32.mrb[88].mxu1  ;;  %v5427_v1 = vpop.f32.mrb[89].mxu0  ;;  %v7886_v62 = vld [vmem:[%s8301_s2 + $0x10] sm:$0xff]  }
0x13d2   : > { %v2872_v4 = vadd.f32 %v2870_v55, %v2849_v0  ;;  %v5447_v7 = vpop.f32.mrb[89].mxu1  ;;  %v2810_v9 = vpop.f32.mrb[90].mxu0  ;;  %v7904_v0 = vld [vmem:[%s8301_s2 + $0x20] sm:$0xff]   ;;  %v7913_v1 = vld [vmem:[%s8301_s2 + $0x28] sm:$0xff]  }
0x13d3   : > { %v7750_v10 = vadd.f32 %v2858_v63, %v6057_v21  ;;  %v2859_v27 = vadd.f32 %v2857_v58, %v2810_v9  ;;  %v2852_v24 = vpop.f32.mrb[90].mxu1  ;;  %v5428_v2 = vpop.f32.mrb[91].mxu0  ;;  %v7860_v58 = vld [vmem:[%s8301_s2] sm:$0xff]   ;;  %v7895_v63 = vld [vmem:[%s8301_s2 + $0x18] sm:$0xff]  }
0x13d4   : > { %v7753_v29 = vadd.f32 %v2872_v4, %v6059_v22  ;;  %v2873_v3 = vadd.f32 %v2871_v61, %v2852_v24  ;;  %v5448_v5 = vpop.f32.mrb[91].mxu1  ;;  %v7877_v61 = vld [vmem:[%s8301_s2 + $0x8] sm:$0xff]   ;;  %v7922_v4 = vld [vmem:[%s8301_s2 + $0x30] sm:$0xff]   ;;  %v7931_v7 = vld [vmem:[%s8301_s2 + $0x38] sm:$0xff]  }
0x13d5   : > { %vm2862_vm14 = vcmp.ge.f32.partialorder %v7750_v10, 1.0  ;;  %v7757_v6 = vadd.f32 %v6053_v19, %v2859_v27 }
0x13d6   : > { %vm2876_vm15 = vcmp.ge.f32.partialorder %v7753_v29, 1.0  ;;  %v7761_v25 = vadd.f32 %v6055_v20, %v2873_v3  ;;  %v3947_v30 = vsel %vm2862_vm14, 1.0, %v5885_v11 }
0x13d7   : > { %vm2863_vm0 = vcmp.ge.f32.partialorder %v7757_v6, 1.0  ;;  %v7766_v26 = vadd.f32 %v3947_v30, %v7692_v52  ;;  %v2968_v31 = vsub.f32 %v7750_v10, %v3947_v30  ;;  %v3949_v28 = vsel %vm2876_vm15, 1.0, %v5885_v11 }
0x13d8   : > { %vm3951_vm2 = vmpackc.low %vm2863_vm0, %vm2862_vm14  ;;  %vm2877_vm3 = vcmp.ge.f32.partialorder %v7761_v25, 1.0  ;;  %v7772_v32 = vadd.f32 %v3949_v28, %v7698_v18  ;;  %v2982_v33 = vsub.f32 %v7753_v29, %v3949_v28  ;;  %v3948_v34 = vsel %vm2863_vm0, 1.0, %v5885_v11 }
0x13d9   : > { %vm3953_vm4 = vmpackc.low %vm2877_vm3, %vm2876_vm15  ;;  %5466 = vmatmul.mubr.msk.bf16.vlgmr.msra.gmra.mrb[92].mxu0 %vm3951_vm2, %v5887_v23  ;;  %v7778_v35 = vadd.f32 %v3948_v34, %v7704_v57  ;;  %v2969_v36 = vsub.f32 %v7757_v6, %v3948_v34  ;;  %v3950_v37 = vsel %vm2877_vm3, 1.0, %v5885_v11 }
0x13da   : > { %5486 = vmatmul.mubr.msk.bf16.vlgmr.msra.gmra.mrb[92].mxu1 %vm3953_vm4, %v5887_v23  ;;  %5490 = vmatpush3.bf16.msra.mxu0 %v7228_v42  ;;  %v7785_v38 = vadd.f32 %v3950_v37, %v7711_v60  ;;  %v2983_v39 = vsub.f32 %v7761_v25, %v3950_v37 }
0x13db   : > { %5510 = vmatpush3.bf16.msra.mxu1 %v7228_v42  ;;  %5491 = vmatprep.subr.bf16.mxu0 %v5885_v11 }
0x13dc   : > { %5511 = vmatprep.subr.bf16.mxu1 %v5885_v11  ;;  %5505 = vmatprep.mubr.msk.bf16.mxu0 %vm5886_vm1, %v5885_v11 }
0x13dd   : > { %5525 = vmatprep.mubr.msk.bf16.mxu1 %vm5886_vm1, %v5885_v11 }
0x13de   : > { %5492 = vmatpush3.bf16.msra.mxu0 %v7245_v45 }
0x13df   : > { %5512 = vmatpush3.bf16.msra.mxu1 %v7245_v45  ;;  %5493 = vmatprep.subr.bf16.mxu0 %v5885_v11 }
0x13e0   : > { %5513 = vmatprep.subr.bf16.mxu1 %v5885_v11 }
0x13e2   : > { %5494 = vmatpush3.bf16.msra.mxu0 %v7254_v46 }
0x13e3   : > { %5514 = vmatpush3.bf16.msra.mxu1 %v7254_v46  ;;  %5495 = vmatprep.subr.bf16.mxu0 %v5885_v11 }
0x13e4   : > { %5515 = vmatprep.subr.bf16.mxu1 %v5885_v11 }
0x13e6   : > { %5496 = vmatpush3.bf16.msra.mxu0 %v7263_v47 }
0x13e7   : > { %5516 = vmatpush3.bf16.msra.mxu1 %v7263_v47  ;;  %5497 = vmatprep.subr.bf16.mxu0 %v5885_v11 }
0x13e8   : > { %5517 = vmatprep.subr.bf16.mxu1 %v5885_v11 }
0x13ea   : > { %5498 = vmatpush3.bf16.msra.mxu0 %v7272_v48 }
0x13eb   : > { %5518 = vmatpush3.bf16.msra.mxu1 %v7272_v48  ;;  %5499 = vmatprep.subr.bf16.mxu0 %v5885_v11 }
0x13ec   : > { %5519 = vmatprep.subr.bf16.mxu1 %v5885_v11 }
0x13ee   : > { %5500 = vmatpush3.bf16.msra.mxu0 %v7281_v49 }
0x13ef   : > { %5520 = vmatpush3.bf16.msra.mxu1 %v7281_v49  ;;  %5501 = vmatprep.subr.bf16.mxu0 %v5885_v11 }
0x13f0   : > { %5521 = vmatprep.subr.bf16.mxu1 %v5885_v11 }
0x13f2   : > { %5502 = vmatpush3.bf16.msra.mxu0 %v7290_v8 }
0x13f3   : > { %5522 = vmatpush3.bf16.msra.mxu1 %v7290_v8  ;;  %5503 = vmatprep.subr.bf16.mxu0 %v5885_v11 }
0x13f4   : > { %5523 = vmatprep.subr.bf16.mxu1 %v5885_v11 }
0x13f6   : > { %5504 = vmatpush3.bf16.msra.mxu0 %v7299_v12 }
0x13f7   : > { %5524 = vmatpush3.bf16.msra.mxu1 %v7299_v12  ;;  %5529 = vmatprep.subr.bf16.mxu0 %v5885_v11 }
0x13f8   : > { %5549 = vmatprep.subr.bf16.mxu1 %v5885_v11 }
0x14ac   : > { %v2919_v42 = vpop.f32.mrb[92].mxu0 }
0x14ad   : > { %v2970_v45 = vadd.f32 %v2968_v31, %v2919_v42  ;;  %v2961_v46 = vpop.f32.mrb[92].mxu1  ;;  %v5467_v47 = vpop.f32.mrb[93].mxu0 }
0x14ae   : > { %v2984_v48 = vadd.f32 %v2982_v33, %v2961_v46  ;;  %v5487_v49 = vpop.f32.mrb[93].mxu1  ;;  %v2922_v40 = vpop.f32.mrb[94].mxu0 }
0x14af   : > { %v7824_v8 = vadd.f32 %v2970_v45, %v6057_v21  ;;  %v2971_v41 = vadd.f32 %v2969_v36, %v2922_v40  ;;  %v2964_v43 = vpop.f32.mrb[94].mxu1  ;;  %v5468_v44 = vpop.f32.mrb[95].mxu0 }
0x14b0   : > { %v7827_v13 = vadd.f32 %v2984_v48, %v6059_v22  ;;  %v2985_v12 = vadd.f32 %v2983_v39, %v2964_v43  ;;  %v5488_v14 = vpop.f32.mrb[95].mxu1 }
0x14b1   : > { %vm2974_vm5 = vcmp.ge.f32.partialorder %v7824_v8, 1.0  ;;  %v7831_v15 = vadd.f32 %v6053_v19, %v2971_v41 }
0x14b2   : > { %vm2988_vm6 = vcmp.ge.f32.partialorder %v7827_v13, 1.0  ;;  %v7835_v16 = vadd.f32 %v6055_v20, %v2985_v12  ;;  %v3955_v50 = vsel %vm2974_vm5, 1.0, %v5885_v11 }
0x14b3   : > { %vm2975_vm7 = vcmp.ge.f32.partialorder %v7831_v15, 1.0  ;;  %v7840_v17 = vadd.f32 %v3955_v50, %v7766_v26  ;;  %v3080_v51 = vsub.f32 %v7824_v8, %v3955_v50  ;;  %v3957_v52 = vsel %vm2988_vm6, 1.0, %v5885_v11 }
0x14b4   : > { %vm3959_vm8 = vmpackc.low %vm2975_vm7, %vm2974_vm5  ;;  %vm2989_vm9 = vcmp.ge.f32.partialorder %v7835_v16, 1.0  ;;  %v7846_v53 = vadd.f32 %v3957_v52, %v7772_v32  ;;  %v3094_v54 = vsub.f32 %v7827_v13, %v3957_v52  ;;  %v3956_v18 = vsel %vm2975_vm7, 1.0, %v5885_v11 }
0x14b5   : > { %vm3961_vm10 = vmpackc.low %vm2989_vm9, %vm2988_vm6  ;;  %5506 = vmatmul.mubr.msk.bf16.vlgmr.msra.gmra.mrb[96].mxu0 %vm3959_vm8, %v5887_v23  ;;  %v7852_v55 = vadd.f32 %v3956_v18, %v7778_v35  ;;  %v3081_v56 = vsub.f32 %v7831_v15, %v3956_v18  ;;  %v3958_v57 = vsel %vm2989_vm9, 1.0, %v5885_v11 }
0x14b6   : > { %5526 = vmatmul.mubr.msk.bf16.vlgmr.msra.gmra.mrb[96].mxu1 %vm3961_vm10, %v5887_v23  ;;  %5530 = vmatpush3.bf16.msra.mxu0 %v7860_v58  ;;  %v7864_v59 = vadd.f32 %v3958_v57, %v7785_v38  ;;  %v3095_v60 = vsub.f32 %v7835_v16, %v3958_v57 }
0x14b7   : > { %5550 = vmatpush3.bf16.msra.mxu1 %v7860_v58  ;;  %5531 = vmatprep.subr.bf16.mxu0 %v5885_v11 }
0x14b8   : > { %5551 = vmatprep.subr.bf16.mxu1 %v5885_v11  ;;  %5545 = vmatprep.mubr.msk.bf16.mxu0 %vm5886_vm1, %v5885_v11 }
0x14b9   : > { %5565 = vmatprep.mubr.msk.bf16.mxu1 %vm5886_vm1, %v5885_v11 }
0x14ba   : > { %5532 = vmatpush3.bf16.msra.mxu0 %v7877_v61 }
0x14bb   : > { %5552 = vmatpush3.bf16.msra.mxu1 %v7877_v61  ;;  %5533 = vmatprep.subr.bf16.mxu0 %v5885_v11 }
0x14bc   : > { %5553 = vmatprep.subr.bf16.mxu1 %v5885_v11 }
0x14be   : > { %5534 = vmatpush3.bf16.msra.mxu0 %v7886_v62 }
0x14bf   : > { %5554 = vmatpush3.bf16.msra.mxu1 %v7886_v62  ;;  %5535 = vmatprep.subr.bf16.mxu0 %v5885_v11 }
0x14c0   : > { %5555 = vmatprep.subr.bf16.mxu1 %v5885_v11 }
0x14c2   : > { %5536 = vmatpush3.bf16.msra.mxu0 %v7895_v63 }
0x14c3   : > { %5556 = vmatpush3.bf16.msra.mxu1 %v7895_v63  ;;  %5537 = vmatprep.subr.bf16.mxu0 %v5885_v11 }
0x14c4   : > { %5557 = vmatprep.subr.bf16.mxu1 %v5885_v11 }
0x14c6   : > { %5538 = vmatpush3.bf16.msra.mxu0 %v7904_v0 }
0x14c7   : > { %5558 = vmatpush3.bf16.msra.mxu1 %v7904_v0  ;;  %5539 = vmatprep.subr.bf16.mxu0 %v5885_v11 }
0x14c8   : > { %5559 = vmatprep.subr.bf16.mxu1 %v5885_v11 }
0x14ca   : > { %5540 = vmatpush3.bf16.msra.mxu0 %v7913_v1 }
0x14cb   : > { %5560 = vmatpush3.bf16.msra.mxu1 %v7913_v1  ;;  %5541 = vmatprep.subr.bf16.mxu0 %v5885_v11 }
0x14cc   : > { %5561 = vmatprep.subr.bf16.mxu1 %v5885_v11 }
0x14ce   : > { %5542 = vmatpush3.bf16.msra.mxu0 %v7922_v4 }
0x14cf   : > { %5562 = vmatpush3.bf16.msra.mxu1 %v7922_v4  ;;  %5543 = vmatprep.subr.bf16.mxu0 %v5885_v11 }
0x14d0   : > { %5563 = vmatprep.subr.bf16.mxu1 %v5885_v11 }
0x14d2   : > { %5544 = vmatpush3.bf16.msra.mxu0 %v7931_v7 }
0x14d3   : > { %5564 = vmatpush3.bf16.msra.mxu1 %v7931_v7  ;;  %5569 = vmatprep.subr.bf16.mxu0 %v5885_v11 }
0x14d4   : > { %5589 = vmatprep.subr.bf16.mxu1 %v5885_v11 }
0x1588   : > { %v3031_v9 = vpop.f32.mrb[96].mxu0 }
0x1589   : > { %v3082_v10 = vadd.f32 %v3080_v51, %v3031_v9  ;;  %v3073_v27 = vpop.f32.mrb[96].mxu1  ;;  %v5507_v24 = vpop.f32.mrb[97].mxu0 }
0x158a   : > { %v3096_v2 = vadd.f32 %v3094_v54, %v3073_v27  ;;  %v5527_v29 = vpop.f32.mrb[97].mxu1  ;;  %v3034_v3 = vpop.f32.mrb[98].mxu0 }
0x158b   : > { %v7938_v5 = vadd.f32 %v3082_v10, %v6057_v21  ;;  %v3083_v6 = vadd.f32 %v3081_v56, %v3034_v3  ;;  %v3076_v25 = vpop.f32.mrb[98].mxu1  ;;  %v5508_v30 = vpop.f32.mrb[99].mxu0 }
0x158c   : > { %v7941_v26 = vadd.f32 %v3096_v2, %v6059_v22  ;;  %v3097_v31 = vadd.f32 %v3095_v60, %v3076_v25  ;;  %v5528_v28 = vpop.f32.mrb[99].mxu1 }
0x158d   : > { %vm3086_vm11 = vcmp.ge.f32.partialorder %v7938_v5, 1.0  ;;  %v7945_v32 = vadd.f32 %v6053_v19, %v3083_v6 }
0x158e   : > { %vm3100_vm12 = vcmp.ge.f32.partialorder %v7941_v26, 1.0  ;;  %v7949_v33 = vadd.f32 %v6055_v20, %v3097_v31  ;;  %v3963_v34 = vsel %vm3086_vm11, 1.0, %v5885_v11 }
0x158f   : > { %vm3087_vm13 = vcmp.ge.f32.partialorder %v7945_v32, 1.0  ;;  %v7954_v35 = vadd.f32 %v3963_v34, %v7840_v17  ;;  %v3192_v36 = vsub.f32 %v7938_v5, %v3963_v34  ;;  %v3965_v37 = vsel %vm3100_vm12, 1.0, %v5885_v11 }
0x1590   : > { %vm3967_vm14 = vmpackc.low %vm3087_vm13, %vm3086_vm11  ;;  %vm3101_vm15 = vcmp.ge.f32.partialorder %v7949_v33, 1.0  ;;  %v7960_v38 = vadd.f32 %v3965_v37, %v7846_v53  ;;  %v3206_v39 = vsub.f32 %v7941_v26, %v3965_v37  ;;  %v3964_v42 = vsel %vm3087_vm13, 1.0, %v5885_v11 }
0x1591   : > { %vm3969_vm0 = vmpackc.low %vm3101_vm15, %vm3100_vm12  ;;  %5546 = vmatmul.mubr.msk.bf16.vlgmr.msra.gmra.mrb[100].mxu0 %vm3967_vm14, %v5887_v23  ;;  %v7966_v45 = vadd.f32 %v3964_v42, %v7852_v55  ;;  %v3193_v46 = vsub.f32 %v7945_v32, %v3964_v42  ;;  %v3966_v47 = vsel %vm3101_vm15, 1.0, %v5885_v11 }
0x1592   : > { %5566 = vmatmul.mubr.msk.bf16.vlgmr.msra.gmra.mrb[100].mxu1 %vm3969_vm0, %v5887_v23  ;;  %5570 = vmatpush3.bf16.msra.mxu0 %v7860_v58  ;;  %v7973_v48 = vadd.f32 %v3966_v47, %v7864_v59  ;;  %v3207_v49 = vsub.f32 %v7949_v33, %v3966_v47 }
0x1593   : > { %5590 = vmatpush3.bf16.msra.mxu1 %v7860_v58  ;;  %5571 = vmatprep.subr.bf16.mxu0 %v5885_v11 }
0x1594   : > { %5591 = vmatprep.subr.bf16.mxu1 %v5885_v11  ;;  %5585 = vmatprep.mubr.msk.bf16.mxu0 %vm5886_vm1, %v5885_v11 }
0x1595   : > { %5605 = vmatprep.mubr.msk.bf16.mxu1 %vm5886_vm1, %v5885_v11 }
0x1596   : > { %5572 = vmatpush3.bf16.msra.mxu0 %v7877_v61 }
0x1597   : > { %5592 = vmatpush3.bf16.msra.mxu1 %v7877_v61  ;;  %5573 = vmatprep.subr.bf16.mxu0 %v5885_v11 }
0x1598   : > { %5593 = vmatprep.subr.bf16.mxu1 %v5885_v11 }
0x159a   : > { %5574 = vmatpush3.bf16.msra.mxu0 %v7886_v62 }
0x159b   : > { %5594 = vmatpush3.bf16.msra.mxu1 %v7886_v62  ;;  %5575 = vmatprep.subr.bf16.mxu0 %v5885_v11 }
0x159c   : > { %5595 = vmatprep.subr.bf16.mxu1 %v5885_v11 }
0x159e   : > { %5576 = vmatpush3.bf16.msra.mxu0 %v7895_v63 }
0x159f   : > { %5596 = vmatpush3.bf16.msra.mxu1 %v7895_v63  ;;  %5577 = vmatprep.subr.bf16.mxu0 %v5885_v11 }
0x15a0   : > { %5597 = vmatprep.subr.bf16.mxu1 %v5885_v11 }
0x15a2   : > { %5578 = vmatpush3.bf16.msra.mxu0 %v7904_v0 }
0x15a3   : > { %5598 = vmatpush3.bf16.msra.mxu1 %v7904_v0  ;;  %5579 = vmatprep.subr.bf16.mxu0 %v5885_v11 }
0x15a4   : > { %5599 = vmatprep.subr.bf16.mxu1 %v5885_v11 }
0x15a6   : > { %5580 = vmatpush3.bf16.msra.mxu0 %v7913_v1 }
0x15a7   : > { %5600 = vmatpush3.bf16.msra.mxu1 %v7913_v1  ;;  %5581 = vmatprep.subr.bf16.mxu0 %v5885_v11 }
0x15a8   : > { %5601 = vmatprep.subr.bf16.mxu1 %v5885_v11 }
0x15aa   : > { %5582 = vmatpush3.bf16.msra.mxu0 %v7922_v4 }
0x15ab   : > { %5602 = vmatpush3.bf16.msra.mxu1 %v7922_v4  ;;  %5583 = vmatprep.subr.bf16.mxu0 %v5885_v11 }
0x15ac   : > { %5603 = vmatprep.subr.bf16.mxu1 %v5885_v11 }
0x15ae   : > { %5584 = vmatpush3.bf16.msra.mxu0 %v7931_v7 }
0x15af   : > { %5604 = vmatpush3.bf16.msra.mxu1 %v7931_v7  ;;  %5609 = vmatprep.subr.bf16.mxu0 %v5885_v11 }
0x15b0   : > { %5629 = vmatprep.subr.bf16.mxu1 %v5885_v11 }
0x1664   : > { %v3143_v40 = vpop.f32.mrb[100].mxu0 }
0x1665   : > { %v3194_v8 = vadd.f32 %v3192_v36, %v3143_v40  ;;  %v3185_v41 = vpop.f32.mrb[100].mxu1  ;;  %v5547_v43 = vpop.f32.mrb[101].mxu0 }
0x1666   : > { %v3208_v44 = vadd.f32 %v3206_v39, %v3185_v41  ;;  %v5567_v13 = vpop.f32.mrb[101].mxu1  ;;  %v3146_v12 = vpop.f32.mrb[102].mxu0 }
0x1667   : > { %v8012_v14 = vadd.f32 %v3194_v8, %v6057_v21  ;;  %v3195_v15 = vadd.f32 %v3193_v46, %v3146_v12  ;;  %v3188_v16 = vpop.f32.mrb[102].mxu1  ;;  %v5548_v50 = vpop.f32.mrb[103].mxu0 }
0x1668   : > { %v8015_v17 = vadd.f32 %v3208_v44, %v6059_v22  ;;  %v3209_v51 = vadd.f32 %v3207_v49, %v3188_v16  ;;  %v5568_v52 = vpop.f32.mrb[103].mxu1 }
0x1669   : > { %vm3198_vm2 = vcmp.ge.f32.partialorder %v8012_v14, 1.0  ;;  %v8019_v53 = vadd.f32 %v6053_v19, %v3195_v15 }
0x166a   : > { %vm3212_vm3 = vcmp.ge.f32.partialorder %v8015_v17, 1.0  ;;  %v8023_v54 = vadd.f32 %v6055_v20, %v3209_v51  ;;  %v3971_v18 = vsel %vm3198_vm2, 1.0, %v5885_v11 }
0x166b   : > { %vm3199_vm4 = vcmp.ge.f32.partialorder %v8019_v53, 1.0  ;;  %v8028_v55 = vadd.f32 %v3971_v18, %v7954_v35  ;;  %v3304_v56 = vsub.f32 %v8012_v14, %v3971_v18  ;;  %v3973_v57 = vsel %vm3212_vm3, 1.0, %v5885_v11 }
0x166c   : > { %vm3975_vm5 = vmpackc.low %vm3199_vm4, %vm3198_vm2  ;;  %vm3213_vm6 = vcmp.ge.f32.partialorder %v8023_v54, 1.0  ;;  %v8034_v59 = vadd.f32 %v3973_v57, %v7960_v38  ;;  %v3318_v60 = vsub.f32 %v8015_v17, %v3973_v57  ;;  %v3972_v9 = vsel %vm3199_vm4, 1.0, %v5885_v11 }
0x166d   : > { %vm3977_vm7 = vmpackc.low %vm3213_vm6, %vm3212_vm3  ;;  %5586 = vmatmul.mubr.msk.bf16.vlgmr.msra.gmra.mrb[104].mxu0 %vm3975_vm5, %v5887_v23  ;;  %v8040_v10 = vadd.f32 %v3972_v9, %v7966_v45  ;;  %v3305_v27 = vsub.f32 %v8019_v53, %v3972_v9  ;;  %v3974_v24 = vsel %vm3213_vm6, 1.0, %v5885_v11 }
0x166e   : > { %5606 = vmatmul.mubr.msk.bf16.vlgmr.msra.gmra.mrb[104].mxu1 %vm3977_vm7, %v5887_v23  ;;  %5610 = vmatpush3.bf16.msra.mxu0 %v7860_v58  ;;  %v8047_v2 = vadd.f32 %v3974_v24, %v7973_v48  ;;  %v3319_v29 = vsub.f32 %v8023_v54, %v3974_v24 }
0x166f   : > { %5630 = vmatpush3.bf16.msra.mxu1 %v7860_v58  ;;  %5611 = vmatprep.subr.bf16.mxu0 %v5885_v11 }
0x1670   : > { %5631 = vmatprep.subr.bf16.mxu1 %v5885_v11  ;;  %5625 = vmatprep.mubr.msk.bf16.mxu0 %vm5886_vm1, %v5885_v11 }
0x1671   : > { %5645 = vmatprep.mubr.msk.bf16.mxu1 %vm5886_vm1, %v5885_v11 }
0x1672   : > { %5612 = vmatpush3.bf16.msra.mxu0 %v7877_v61 }
0x1673   : > { %5632 = vmatpush3.bf16.msra.mxu1 %v7877_v61  ;;  %5613 = vmatprep.subr.bf16.mxu0 %v5885_v11 }
0x1674   : > { %5633 = vmatprep.subr.bf16.mxu1 %v5885_v11 }
0x1676   : > { %5614 = vmatpush3.bf16.msra.mxu0 %v7886_v62 }
0x1677   : > { %5634 = vmatpush3.bf16.msra.mxu1 %v7886_v62  ;;  %5615 = vmatprep.subr.bf16.mxu0 %v5885_v11 }
0x1678   : > { %5635 = vmatprep.subr.bf16.mxu1 %v5885_v11 }
0x167a   : > { %5616 = vmatpush3.bf16.msra.mxu0 %v7895_v63 }
0x167b   : > { %5636 = vmatpush3.bf16.msra.mxu1 %v7895_v63  ;;  %5617 = vmatprep.subr.bf16.mxu0 %v5885_v11 }
0x167c   : > { %5637 = vmatprep.subr.bf16.mxu1 %v5885_v11 }
0x167e   : > { %5618 = vmatpush3.bf16.msra.mxu0 %v7904_v0 }
0x167f   : > { %5638 = vmatpush3.bf16.msra.mxu1 %v7904_v0  ;;  %5619 = vmatprep.subr.bf16.mxu0 %v5885_v11 }
0x1680   : > { %5639 = vmatprep.subr.bf16.mxu1 %v5885_v11 }
0x1682   : > { %5620 = vmatpush3.bf16.msra.mxu0 %v7913_v1 }
0x1683   : > { %5640 = vmatpush3.bf16.msra.mxu1 %v7913_v1  ;;  %5621 = vmatprep.subr.bf16.mxu0 %v5885_v11 }
0x1684   : > { %5641 = vmatprep.subr.bf16.mxu1 %v5885_v11 }
0x1686   : > { %5622 = vmatpush3.bf16.msra.mxu0 %v7922_v4 }
0x1687   : > { %5642 = vmatpush3.bf16.msra.mxu1 %v7922_v4  ;;  %5623 = vmatprep.subr.bf16.mxu0 %v5885_v11 }
0x1688   : > { %5643 = vmatprep.subr.bf16.mxu1 %v5885_v11 }
0x168a   : > { %5624 = vmatpush3.bf16.msra.mxu0 %v7931_v7 }
0x168b   : > { %5644 = vmatpush3.bf16.msra.mxu1 %v7931_v7  ;;  %5649 = vmatprep.subr.bf16.mxu0 %v5885_v11 }
0x168c   : > { %5669 = vmatprep.subr.bf16.mxu1 %v5885_v11 }
0x1740   : > { %v3255_v3 = vpop.f32.mrb[104].mxu0 }
0x1741   : > { %v3306_v5 = vadd.f32 %v3304_v56, %v3255_v3  ;;  %v3297_v6 = vpop.f32.mrb[104].mxu1  ;;  %v5587_v25 = vpop.f32.mrb[105].mxu0 }
0x1742   : > { %v3320_v30 = vadd.f32 %v3318_v60, %v3297_v6  ;;  %v5607_v26 = vpop.f32.mrb[105].mxu1  ;;  %v3258_v31 = vpop.f32.mrb[106].mxu0 }
0x1743   : > { %v8086_v28 = vadd.f32 %v3306_v5, %v6057_v21  ;;  %v3307_v32 = vadd.f32 %v3305_v27, %v3258_v31  ;;  %v3300_v33 = vpop.f32.mrb[106].mxu1  ;;  %v5588_v34 = vpop.f32.mrb[107].mxu0 }
0x1744   : > { %v8089_v35 = vadd.f32 %v3320_v30, %v6059_v22  ;;  %v3321_v36 = vadd.f32 %v3319_v29, %v3300_v33  ;;  %v5608_v37 = vpop.f32.mrb[107].mxu1 }
0x1745   : > { %vm3310_vm8 = vcmp.ge.f32.partialorder %v8086_v28, 1.0  ;;  %v8093_v38 = vadd.f32 %v6053_v19, %v3307_v32 }
0x1746   : > { %vm3324_vm9 = vcmp.ge.f32.partialorder %v8089_v35, 1.0  ;;  %v8097_v39 = vadd.f32 %v6055_v20, %v3321_v36  ;;  %v3979_v42 = vsel %vm3310_vm8, 1.0, %v5885_v11 }
0x1747   : > { %vm3311_vm10 = vcmp.ge.f32.partialorder %v8093_v38, 1.0  ;;  %v8102_v45 = vadd.f32 %v3979_v42, %v8028_v55  ;;  %v3416_v46 = vsub.f32 %v8086_v28, %v3979_v42  ;;  %v3981_v47 = vsel %vm3324_vm9, 1.0, %v5885_v11 }
0x1748   : > { %vm3983_vm11 = vmpackc.low %vm3311_vm10, %vm3310_vm8  ;;  %vm3325_vm12 = vcmp.ge.f32.partialorder %v8097_v39, 1.0  ;;  %v8108_v48 = vadd.f32 %v3981_v47, %v8034_v59  ;;  %v3430_v49 = vsub.f32 %v8089_v35, %v3981_v47  ;;  %v3980_v40 = vsel %vm3311_vm10, 1.0, %v5885_v11 }
0x1749   : > { %vm3985_vm13 = vmpackc.low %vm3325_vm12, %vm3324_vm9  ;;  %5626 = vmatmul.mubr.msk.bf16.vlgmr.msra.gmra.mrb[108].mxu0 %vm3983_vm11, %v5887_v23  ;;  %v8114_v8 = vadd.f32 %v3980_v40, %v8040_v10  ;;  %v3417_v41 = vsub.f32 %v8093_v38, %v3980_v40  ;;  %v3982_v43 = vsel %vm3325_vm12, 1.0, %v5885_v11 }
0x174a   : > { %5646 = vmatmul.mubr.msk.bf16.vlgmr.msra.gmra.mrb[108].mxu1 %vm3985_vm13, %v5887_v23  ;;  %5650 = vmatpush3.bf16.msra.mxu0 %v7860_v58  ;;  %v8121_v44 = vadd.f32 %v3982_v43, %v8047_v2  ;;  %v3431_v13 = vsub.f32 %v8097_v39, %v3982_v43 }
0x174b   : > { %5670 = vmatpush3.bf16.msra.mxu1 %v7860_v58  ;;  %5651 = vmatprep.subr.bf16.mxu0 %v5885_v11 }
0x174c   : > { %5671 = vmatprep.subr.bf16.mxu1 %v5885_v11  ;;  %5665 = vmatprep.mubr.msk.bf16.mxu0 %vm5886_vm1, %v5885_v11 }
0x174d   : > { %5685 = vmatprep.mubr.msk.bf16.mxu1 %vm5886_vm1, %v5885_v11 }
0x174e   : > { %5652 = vmatpush3.bf16.msra.mxu0 %v7877_v61 }
0x174f   : > { %5672 = vmatpush3.bf16.msra.mxu1 %v7877_v61  ;;  %5653 = vmatprep.subr.bf16.mxu0 %v5885_v11 }
0x1750   : > { %5673 = vmatprep.subr.bf16.mxu1 %v5885_v11 }
0x1752   : > { %5654 = vmatpush3.bf16.msra.mxu0 %v7886_v62 }
0x1753   : > { %5674 = vmatpush3.bf16.msra.mxu1 %v7886_v62  ;;  %5655 = vmatprep.subr.bf16.mxu0 %v5885_v11 }
0x1754   : > { %5675 = vmatprep.subr.bf16.mxu1 %v5885_v11 }
0x1756   : > { %5656 = vmatpush3.bf16.msra.mxu0 %v7895_v63 }
0x1757   : > { %5676 = vmatpush3.bf16.msra.mxu1 %v7895_v63  ;;  %5657 = vmatprep.subr.bf16.mxu0 %v5885_v11 }
0x1758   : > { %5677 = vmatprep.subr.bf16.mxu1 %v5885_v11 }
0x175a   : > { %5658 = vmatpush3.bf16.msra.mxu0 %v7904_v0 }
0x175b   : > { %5678 = vmatpush3.bf16.msra.mxu1 %v7904_v0  ;;  %5659 = vmatprep.subr.bf16.mxu0 %v5885_v11 }
0x175c   : > { %5679 = vmatprep.subr.bf16.mxu1 %v5885_v11 }
0x175e   : > { %5660 = vmatpush3.bf16.msra.mxu0 %v7913_v1 }
0x175f   : > { %5680 = vmatpush3.bf16.msra.mxu1 %v7913_v1  ;;  %5661 = vmatprep.subr.bf16.mxu0 %v5885_v11 }
0x1760   : > { %5681 = vmatprep.subr.bf16.mxu1 %v5885_v11 }
0x1762   : > { %5662 = vmatpush3.bf16.msra.mxu0 %v7922_v4 }
0x1763   : > { %5682 = vmatpush3.bf16.msra.mxu1 %v7922_v4  ;;  %5663 = vmatprep.subr.bf16.mxu0 %v5885_v11 }
0x1764   : > { %5683 = vmatprep.subr.bf16.mxu1 %v5885_v11 }
0x1766   : > { %5664 = vmatpush3.bf16.msra.mxu0 %v7931_v7 }
0x1767   : > { %5684 = vmatpush3.bf16.msra.mxu1 %v7931_v7  ;;  %5689 = vmatprep.subr.bf16.mxu0 %v5885_v11 }
0x1768   : > { %5709 = vmatprep.subr.bf16.mxu1 %v5885_v11 }
0x181c   : > { %v3367_v12 = vpop.f32.mrb[108].mxu0 }
0x181d   : > { %v3418_v14 = vadd.f32 %v3416_v46, %v3367_v12  ;;  %v3409_v15 = vpop.f32.mrb[108].mxu1  ;;  %v5627_v16 = vpop.f32.mrb[109].mxu0 }
0x181e   : > { %v3432_v50 = vadd.f32 %v3430_v49, %v3409_v15  ;;  %v5647_v17 = vpop.f32.mrb[109].mxu1  ;;  %v3370_v51 = vpop.f32.mrb[110].mxu0 }
0x181f   : > { %v8160_v52 = vadd.f32 %v3418_v14, %v6057_v21  ;;  %v3419_v53 = vadd.f32 %v3417_v41, %v3370_v51  ;;  %v3412_v54 = vpop.f32.mrb[110].mxu1  ;;  %v5628_v18 = vpop.f32.mrb[111].mxu0 }
0x1820   : > { %v3434_v55 = vadd.f32 %v3432_v50, %v6059_v22  ;;  %v3433_v56 = vadd.f32 %v3431_v13, %v3412_v54  ;;  %v5648_v57 = vpop.f32.mrb[111].mxu1 }
0x1821   : > { %vm3422_vm14 = vcmp.ge.f32.partialorder %v8160_v52, 1.0  ;;  %v3421_v59 = vadd.f32 %v6053_v19, %v3419_v53 }
0x1822   : > { %vm3436_vm15 = vcmp.ge.f32.partialorder %v3434_v55, 1.0  ;;  %v8166_v60 = vadd.f32 %v6055_v20, %v3433_v56  ;;  %v3987_v9 = vsel %vm3422_vm14, 1.0, %v5885_v11 }
0x1823   : > { %vm3423_vm0 = vcmp.ge.f32.partialorder %v3421_v59, 1.0  ;;  %v8170_v10 = vadd.f32 %v3987_v9, %v8102_v45  ;;  %v3528_v27 = vsub.f32 %v8160_v52, %v3987_v9  ;;  %v3989_v24 = vsel %vm3436_vm15, 1.0, %v5885_v11 }
0x1824   : > { %vm3991_vm2 = vmpackc.low %vm3423_vm0, %vm3422_vm14  ;;  %vm3437_vm3 = vcmp.ge.f32.partialorder %v8166_v60, 1.0  ;;  %v8176_v2 = vadd.f32 %v3989_v24, %v8108_v48  ;;  %v3542_v29 = vsub.f32 %v3434_v55, %v3989_v24  ;;  %v3988_v3 = vsel %vm3423_vm0, 1.0, %v5885_v11 }
0x1825   : > { %vm3993_vm4 = vmpackc.low %vm3437_vm3, %vm3436_vm15  ;;  %5666 = vmatmul.mubr.msk.bf16.vlgmr.msra.gmra.mrb[112].mxu0 %vm3991_vm2, %v5887_v23  ;;  %v8181_v5 = vadd.f32 %v3988_v3, %v8114_v8  ;;  %v3529_v6 = vsub.f32 %v3421_v59, %v3988_v3  ;;  %v3990_v25 = vsel %vm3437_vm3, 1.0, %v5885_v11 }
0x1826   : > { %5686 = vmatmul.mubr.msk.bf16.vlgmr.msra.gmra.mrb[112].mxu1 %vm3993_vm4, %v5887_v23  ;;  %5690 = vmatpush3.bf16.msra.mxu0 %v7860_v58  ;;  %v8187_v30 = vadd.f32 %v3990_v25, %v8121_v44  ;;  %v3543_v26 = vsub.f32 %v8166_v60, %v3990_v25 }
0x1827   : > { %5710 = vmatpush3.bf16.msra.mxu1 %v7860_v58  ;;  %5691 = vmatprep.subr.bf16.mxu0 %v5885_v11 }
0x1828   : > { %5711 = vmatprep.subr.bf16.mxu1 %v5885_v11  ;;  %5705 = vmatprep.mubr.msk.bf16.mxu0 %vm5886_vm1, %v5885_v11 }
0x1829   : > { %5725 = vmatprep.mubr.msk.bf16.mxu1 %vm5886_vm1, %v5885_v11 }
0x182a   : > { %5692 = vmatpush3.bf16.msra.mxu0 %v7877_v61 }
0x182b   : > { %5712 = vmatpush3.bf16.msra.mxu1 %v7877_v61  ;;  %5693 = vmatprep.subr.bf16.mxu0 %v5885_v11 }
0x182c   : > { %5713 = vmatprep.subr.bf16.mxu1 %v5885_v11 }
0x182e   : > { %5694 = vmatpush3.bf16.msra.mxu0 %v7886_v62 }
0x182f   : > { %5714 = vmatpush3.bf16.msra.mxu1 %v7886_v62  ;;  %5695 = vmatprep.subr.bf16.mxu0 %v5885_v11 }
0x1830   : > { %5715 = vmatprep.subr.bf16.mxu1 %v5885_v11 }
0x1832   : > { %5696 = vmatpush3.bf16.msra.mxu0 %v7895_v63 }
0x1833   : > { %5716 = vmatpush3.bf16.msra.mxu1 %v7895_v63  ;;  %5697 = vmatprep.subr.bf16.mxu0 %v5885_v11 }
0x1834   : > { %5717 = vmatprep.subr.bf16.mxu1 %v5885_v11 }
0x1836   : > { %5698 = vmatpush3.bf16.msra.mxu0 %v7904_v0 }
0x1837   : > { %5718 = vmatpush3.bf16.msra.mxu1 %v7904_v0  ;;  %5699 = vmatprep.subr.bf16.mxu0 %v5885_v11 }
0x1838   : > { %5719 = vmatprep.subr.bf16.mxu1 %v5885_v11 }
0x183a   : > { %5700 = vmatpush3.bf16.msra.mxu0 %v7913_v1 }
0x183b   : > { %5720 = vmatpush3.bf16.msra.mxu1 %v7913_v1  ;;  %5701 = vmatprep.subr.bf16.mxu0 %v5885_v11 }
0x183c   : > { %5721 = vmatprep.subr.bf16.mxu1 %v5885_v11 }
0x183e   : > { %5702 = vmatpush3.bf16.msra.mxu0 %v7922_v4 }
0x183f   : > { %5722 = vmatpush3.bf16.msra.mxu1 %v7922_v4  ;;  %5703 = vmatprep.subr.bf16.mxu0 %v5885_v11 }
0x1840   : > { %5723 = vmatprep.subr.bf16.mxu1 %v5885_v11 }
0x1842   : > { %5704 = vmatpush3.bf16.msra.mxu0 %v7931_v7 }
0x1843   : > { %5724 = vmatpush3.bf16.msra.mxu1 %v7931_v7 }
0x18f8   : > { %v3479_v58 = vpop.f32.mrb[112].mxu0 }
0x18f9   : > { %v3530_v61 = vadd.f32 %v3528_v27, %v3479_v58  ;;  %v3521_v62 = vpop.f32.mrb[112].mxu1  ;;  %v5667_v63 = vpop.f32.mrb[113].mxu0 }
0x18fa   : > { %v3544_v0 = vadd.f32 %v3542_v29, %v3521_v62  ;;  %v5687_v1 = vpop.f32.mrb[113].mxu1  ;;  %v3482_v31 = vpop.f32.mrb[114].mxu0 }
0x18fb   : > { %v3532_v28 = vadd.f32 %v3530_v61, %v6057_v21  ;;  %v3531_v32 = vadd.f32 %v3529_v6, %v3482_v31  ;;  %v3524_v33 = vpop.f32.mrb[114].mxu1  ;;  %v5668_v4 = vpop.f32.mrb[115].mxu0 }
0x18fc   : > { %v3546_v34 = vadd.f32 %v3544_v0, %v6059_v22  ;;  %v3545_v35 = vadd.f32 %v3543_v26, %v3524_v33  ;;  %v5688_v36 = vpop.f32.mrb[115].mxu1 }
0x18fd   : > { %vm3534_vm1 = vcmp.ge.f32.partialorder %v3532_v28, 1.0  ;;  %v3533_v37 = vadd.f32 %v6053_v19, %v3531_v32 }
0x18fe   : > { %vm3548_vm5 = vcmp.ge.f32.partialorder %v3546_v34, 1.0  ;;  %v3547_v7 = vadd.f32 %v6055_v20, %v3545_v35  ;;  %v3995_v38 = vsel %vm3534_vm1, 1.0, %v5885_v11 }
0x18ff   : > { %vm3535_vm6 = vcmp.ge.f32.partialorder %v3533_v37, 1.0  ;;  %v3540_v39 = vadd.f32 %v3995_v38, %v8170_v10  ;;  %v3640_v42 = vsub.f32 %v3532_v28, %v3995_v38  ;;  %v3997_v45 = vsel %vm3548_vm5, 1.0, %v5885_v11 }
0x1900   : > { %vm3999_vm7 = vmpackc.low %vm3535_vm6, %vm3534_vm1  ;;  %vm3549_vm8 = vcmp.ge.f32.partialorder %v3547_v7, 1.0  ;;  %v3554_v46 = vadd.f32 %v3997_v45, %v8176_v2  ;;  %v3654_v47 = vsub.f32 %v3546_v34, %v3997_v45  ;;  %v3996_v48 = vsel %vm3535_vm6, 1.0, %v5885_v11 }
0x1901   : > { %vm4001_vm9 = vmpackc.low %vm3549_vm8, %vm3548_vm5  ;;  %5706 = vmatmul.mubr.msk.bf16.vlgmr.msra.gmra.mrb[116].mxu0 %vm3999_vm7, %v5887_v23  ;;  %v3541_v49 = vadd.f32 %v3996_v48, %v8181_v5  ;;  %v3641_v40 = vsub.f32 %v3533_v37, %v3996_v48  ;;  %v3998_v8 = vsel %vm3549_vm8, 1.0, %v5885_v11 }
0x1902   : > { %5726 = vmatmul.mubr.msk.bf16.vlgmr.msra.gmra.mrb[116].mxu1 %vm4001_vm9, %v5887_v23  ;;  %v3555_v41 = vadd.f32 %v3998_v8, %v8187_v30  ;;  %v3655_v43 = vsub.f32 %v3547_v7, %v3998_v8 }
0x19d4   : > { %v3591_v44 = vpop.f32.mrb[116].mxu0 }
0x19d5   : > { %v3642_v13 = vadd.f32 %v3640_v42, %v3591_v44  ;;  %v3633_v12 = vpop.f32.mrb[116].mxu1  ;;  %v5707_v14 = vpop.f32.mrb[117].mxu0 }
0x19d6   : > { %v3656_v15 = vadd.f32 %v3654_v47, %v3633_v12  ;;  %v5727_v16 = vpop.f32.mrb[117].mxu1  ;;  %v3594_v50 = vpop.f32.mrb[118].mxu0 }
0x19d7   : > { %v3644_v17 = vadd.f32 %v3642_v13, %v6057_v21  ;;  %v3643_v51 = vadd.f32 %v3641_v40, %v3594_v50  ;;  %v3636_v52 = vpop.f32.mrb[118].mxu1  ;;  %v5708_v53 = vpop.f32.mrb[119].mxu0 }
0x19d8   : > { %v3658_v23 = vadd.f32 %v3656_v15, %v6059_v22  ;;  %v3657_v54 = vadd.f32 %v3655_v43, %v3636_v52  ;;  %v5728_v18 = vpop.f32.mrb[119].mxu1 }
0x19d9   : > { %vm3646_vm10 = vcmp.ge.f32.partialorder %v3644_v17, 1.0  ;;  %v3645_v55 = vadd.f32 %v6053_v19, %v3643_v51 }
0x19da   : > { %v4003_v56 = vsel %vm3646_vm10, 1.0, %v5885_v11  ;;  %vm3660_vm11 = vcmp.ge.f32.partialorder %v3658_v23, 1.0  ;;  %v3659_v57 = vadd.f32 %v6055_v20, %v3657_v54 }
0x19db   : > { %v3652_v59 = vadd.f32 %v4003_v56, %v3540_v39  ;;  %v4005_v60 = vsel %vm3660_vm11, 1.0, %v5885_v11  ;;  %vm3647_vm12 = vcmp.ge.f32.partialorder %v3645_v55, 1.0 }
0x19dc   : > { %v3666_v21 = vadd.f32 %v4005_v60, %v3554_v46  ;;  %v4004_v9 = vsel %vm3647_vm12, 1.0, %v5885_v11  ;;  %vm3661_vm13 = vcmp.ge.f32.partialorder %v3659_v57, 1.0 }
0x19dd   : > { %v3668_v22 = vmul.f32 0.033333335, %v3652_v59  ;;  %v3653_v19 = vadd.f32 %v4004_v9, %v3541_v49  ;;  %v4006_v10 = vsel %vm3661_vm13, 1.0, %v5885_v11 }
0x19de   : > { %v3672_v27 = vmul.f32 0.033333335, %v3666_v21  ;;  %v3667_v24 = vadd.f32 %v4006_v10, %v3555_v41 }
0x19df   : > { %3670 = vst [vmem:[%s164_s5] sm:$0xff] %v3668_v22  ;;  %v3669_v20 = vmul.f32 0.033333335, %v3653_v19 }
0x19e0   : > { %3674 = vst [vmem:[%s164_s5 + $0x10] sm:$0xff] %v3672_v27  ;;  %v3673_v2 = vmul.f32 0.033333335, %v3667_v24 }
0x19e1   : > { %3671 = vst [vmem:[%s164_s5 + $0x8] sm:$0xff] %v3669_v20 }
0x19e2   : > { %3675 = vst [vmem:[%s164_s5 + $0x18] sm:$0xff] %v3673_v2 }
0x19e3   : > { %5834 = shalt.err (!%p5831_p3)
}
0x19e4   : > { %s5835_s20 = scalar_lea.hbm %s8252_s9, 512  ;;  %s5839_s26 = scalar_lea.hbm %s8302_s3, 1024 }
0x19e5   : > { %p5836_p4 = scmp.ne.s32.totalorder %s8252_s9, %s5835_s20  ;;  %p5840_p9 = scmp.lt.u32.totalorder %s8252_s9, %s8302_s3 }
0x19e6   : > { %p5841_p10 = scmp.lt.u32.totalorder %s5839_s26, %s5835_s20  ;;  %p5843_p12 = scmp.lt.u32.totalorder %s5835_s20, %s8252_s9 }
0x19e7   : > { %p5837_p7 = pnand %p5836_p4, %p5949_p5 }
0x19e8   : > { %p5842_p11 = por %p5841_p10, %p5840_p9 }
0x19e9   : > { %p5838_p8 = pneg %p5837_p7 }
0x19ea   : > { %p5844_p13 = por %p5843_p12, %p5842_p11 }
0x19ec   : > { %p5845_p0 = pnand %p5844_p13, %p5838_p8 }
0x19ee   : > { %5848 = shalt.err (!%p5845_p0)
}
0x19ef   : > { %s5889_s29 = smov 128   ;;  %s5890_s30 = smov 8  }
0x19f0   : > { %5745 = dma.vmem_to_hbm [thread:$0]  (%p5949_p5), %s8254_s6, 512, %s8252_s9, %s8258_s16, %s5889_s29, %s5889_s29, %s5890_s30  }
0x19f1 PF: > { %p5751_p1 = scmp.ge.s32.totalorder %s5883_s15, 2  ;;  %s3705_s4 = sand.u32 1, %s5871_s12  }
0x19f2   : > { %s3706_s5 = scalar_lea.sflag [#allocation3], %s3705_s4 }
0x19f3   : > { %p5748_p2 = pnand %p5751_p1, %p5953_p6 }
0x19f5   : > { %5866 = dma.done.wait (!%p5748_p2), %s3706_s5, 512  }
0x19f6   : > { %5868 = vsyncadd (!%p5748_p2), %s3706_s5, 4294966784  ;;  %p13_p3 = scmp.ge.s32.totalorder %s5936_s18, 4   ;;  %s8305_s12 = smov %s5875_s13 }
0x19f7   : > { %s8306_s13 = smov %s5879_s14  ;;  %s8307_s14 = smov %s5947_s21 }
0x19f8   : > { %s8308_s15 = smov %s5936_s18  ;;  %15 = sbr.rel (!%p13_p3) target bundleno = 3 (0x3), region = 67 }
0x19ff   :  { %3711 = vsyncpa [#allocation3], 1 }
0x1a00   :  { %3713 = vsyncpa [#allocation3 + $0x1], 1 }

// kernel: tpu_custom_call.1
= control target key start
LH: loop header
LB: loop body
LE: loop exit
PB: predicated region body
PF: predicated region fallthrough
CT: control target
= control target key end

     0   :  { %8 = vsyncpa [#allocation3], 0  ;;  %s8299_s0 = inlined_call_operand.vmem [shape: f32[64,32], index: 0, kind: input, shape index: {}]   ;;  %s8300_s1 = inlined_call_operand.vmem [shape: f32[32,128], index: 1, kind: input, shape index: {}]   ;;  %s8301_s2 = inlined_call_operand.vmem [shape: bf16[128,128], index: 2, kind: input, shape index: {}]   ;;  %s8302_s3 = inlined_call_operand.hbm [shape: f32[64,128], index: 3, kind: output, shape index: {}]  }
   0x1   :  { %10 = vsyncpa [#allocation3 + $0x1], 0  ;;  %s5911_s12 = smov 0   ;;  %s5913_s13 = smov 0  }
   0x2   :  { %s5915_s14 = smov 0   ;;  %s5917_s15 = smov 0  }
   0x3 LB: > { %s5932_s16 = sadd.s32 4294967295, %s5883_s15   ;;  %s3752_s17 = sadd.s32 4294967294, %s5883_s15   ;;  %s5883_s15 = sphi %s5917_s15, %s8308_s15   ;;  %s5879_s14 = sphi %s5915_s14, %s8307_s14   ;;  %s5875_s13 = sphi %s5913_s13, %s8306_s13   ;;  %s5871_s12 = sphi %s5911_s12, %s8305_s12  }
   0x4   : > { %s5936_s18 = sadd.s32 1, %s5883_s15   ;;  %s91_s19 = sadd.s32 1, %s5879_s14 }
   0x5   : > { %s88_s20 = ssub.s32 %s5883_s15, %s5936_s18  ;;  %p101_p0 = scmp.ne.s32.totalorder %s5879_s14, %s5875_s13 }
   0x6   : > { %p89_p1 = scmp.eq.s32.totalorder %s88_s20, 0  ;;  %p102_p2 = scmp.eq.s32.totalorder %s5932_s16, 1 }
   0x7   : > { %p107_p3 = scmp.ne.s32.totalorder %s5875_s13, %s5871_s12  ;;  %p108_p4 = scmp.eq.s32.totalorder %s3752_s17, 1 }
   0x8   : > { %s5947_s21 = scalar_select %p89_p1, %s5879_s14, %s91_s19  }
   0x9   : > { %p5949_p5 = por %p102_p2, %p101_p0  ;;  %p5953_p6 = por %p108_p4, %p107_p3 }
   0xa   : > { %p3755_p7 = scmp.ge.s32.totalorder %s5883_s15, 1  ;;  %p141_p8 = scmp.lt.s32.totalorder %s5883_s15, 3 }
   0xc   : > { %p142_p9 = pnand %p3755_p7, %p141_p8 }
   0xd   : > { %v173_v0 = vld [vmem:[%s8300_s1] sm:$0xff] (!%p142_p9)  ;;  %v174_v1 = vld [vmem:[%s8300_s1 + $0x8] sm:$0xff] (!%p142_p9)  ;;  %v175_v2 = vld [vmem:[%s8300_s1 + $0x10] sm:$0xff] (!%p142_p9)  ;;  %s3757_s30 = sshll.u32 (!%p142_p9), %s5932_s16, 2  ;;  %vm195_vm0 = vcmask (!%p142_p9), 261120   ;;  %v5885_v11 = vmov (!%p142_p9), 0.0  }
   0xe   : > { %145 = sbr.rel (%p142_p9) target bundleno = 6641 (0x19f1), region = 32  ;;  %v5729_v3 = vpack.c.bf16 (!%p142_p9), %v174_v1, %v173_v0  ;;  %v176_v4 = vld [vmem:[%s8300_s1 + $0x18] sm:$0xff] (!%p142_p9)  ;;  %p166_p10 = scmp.lt.s32.totalorder (!%p142_p9), %s3757_s30, 7  ;;  %v5978_v8 = vld [vmem:[%s8301_s2] sm:$0xff] (!%p142_p9)   ;;  %v5987_v12 = vld [vmem:[%s8301_s2 + $0x8] sm:$0xff] (!%p142_p9)   ;;  %vm5886_vm1 = vmmov (!%p142_p9), 0  }
   0xf   : > { %v5733_v5 = vpack.c.bf16 (!%p142_p9), %v176_v4, %v175_v2  ;;  %v5996_v13 = vld [vmem:[%s8301_s2 + $0x10] sm:$0xff] (!%p142_p9)   ;;  %v6005_v14 = vld [vmem:[%s8301_s2 + $0x18] sm:$0xff] (!%p142_p9)   ;;  %v6014_v15 = vld [vmem:[%s8301_s2 + $0x20] sm:$0xff] (!%p142_p9)   ;;  %v5887_v23 = vmov (!%p142_p9), 1.0|1.0   ;;  %s162_s29 = sand.u32 (!%p142_p9), 1, %s5875_s13  }
  0x10   : > { %5730 = vmatprep.subr.bf16.mxu0 (!%p142_p9), %v5729_v3  ;;  %5738 = vmatprep.subr.bf16.mxu1 (!%p142_p9), %v5729_v3  ;;  %v6023_v16 = vld [vmem:[%s8301_s2 + $0x28] sm:$0xff] (!%p142_p9)   ;;  %v6032_v17 = vld [vmem:[%s8301_s2 + $0x30] sm:$0xff] (!%p142_p9)   ;;  %v6043_v18 = vld [vmem:[%s8301_s2 + $0x38] sm:$0xff] (!%p142_p9)   ;;  %s4012_s4 = sshll.u32 (!%p142_p9), %s5932_s16, 9  ;;  %s8258_s16 = scalar_lea.sflag (!%p142_p9), [#allocation3], %s162_s29 }
  0x11   : > { %5732 = vmatpush3.bf16.msra.mxu0 (!%p142_p9), %v5729_v3  ;;  %5740 = vmatpush3.bf16.msra.mxu1 (!%p142_p9), %v5729_v3  ;;  %s5888_s11 = smov (!%p142_p9), [#allocation2]  }
  0x12   : > { %5734 = vmatprep.subr.bf16.mxu0 (!%p142_p9), %v5733_v5  ;;  %5742 = vmatprep.subr.bf16.mxu1 (!%p142_p9), %v5733_v5  ;;  %s5825_s17 = sshll.u32 (!%p142_p9), %s5888_s11, 4  ;;  %s5826_s17 = int_to_ptr.vmem [resolvable:$false] %s5825_s17 }
  0x13   : > { %s5827_s19 = scalar_lea.vmem (!%p142_p9), %s5826_s17, 1024 }
  0x15   : > { %s8310_s30 = smov (!%p166_p10, %s3757_s30), 7  ;;  %5736 = vmatpush3.bf16.msra.mxu0 %v5733_v5  ;;  %5744 = vmatpush3.bf16.msra.mxu1 %v5733_v5 }
  0x16   : > { %s3758_s6 = sshll.u32 %s8310_s30, 3  ;;  %4569 = vmatprep.subr.bf16.mxu0 %v5885_v11  ;;  %4589 = vmatprep.subr.bf16.mxu1 %v5885_v11  ;;  %s3756_s30 = sshll.u32 %s162_s29, 5 }
  0x17   : > { %s169_s9 = scalar_lea.vmem %s8299_s0, %s3758_s6  ;;  %s164_s5 = scalar_lea.vmem [#allocation2], %s3756_s30 }
  0x18   : > { %v193_v6 = vld [vmem:[%s169_s9] sm:$0xff]  ;;  %v283_v7 = vld [vmem:[%s169_s9 + $0x10] sm:$0xff]  ;;  %v194_v9 = vld [vmem:[%s169_s9 + $0x8] sm:$0xff]  ;;  %s3690_s6 = sshll.u32 %s164_s5, 4  ;;  %s8254_s6 = int_to_ptr.vmem [resolvable:$true] %s3690_s6 }
  0x19   : > { %v284_v10 = vld [vmem:[%s169_s9 + $0x18] sm:$0xff]  ;;  %4555 = vmatprep.mubr.msk.f32.mxu0 %vm195_vm0, %v193_v6  ;;  %4566 = vmatprep.mubr.msk.f32.mxu1 %vm195_vm0, %v283_v7  ;;  %s8252_s9 = scalar_lea.hbm %s8302_s3, %s4012_s4  ;;  %s5821_s10 = scalar_lea.vmem %s8254_s6, 512 }
  0x1a   : > { %4556 = vmatmul.mubr.msk.f32.vlgmr.msra.gmra.mrb[0].mxu0 %vm195_vm0, %v194_v9  ;;  %4567 = vmatmul.mubr.msk.f32.vlgmr.msra.gmra.mrb[0].mxu1 %vm195_vm0, %v284_v10  ;;  %p5822_p11 = scmp.ne.s32.totalorder %s8254_s6, %s5821_s10  ;;  %p5828_p0 = scmp.lt.s32.totalorder %s8254_s6, %s5826_s17 }
  0x1b   : > { %4570 = vmatpush3.bf16.msra.mxu0 %v5978_v8  ;;  %4590 = vmatpush3.bf16.msra.mxu1 %v5978_v8  ;;  %p5829_p1 = scmp.lt.s32.totalorder %s5827_s19, %s5821_s10 }
  0x1c   : > { %4571 = vmatprep.subr.bf16.mxu0 %v5885_v11  ;;  %4591 = vmatprep.subr.bf16.mxu1 %v5885_v11  ;;  %p5823_p12 = pnand %p5822_p11, %p5949_p5 }
  0x1d   : > { %4585 = vmatprep.mubr.msk.bf16.mxu0 %vm5886_vm1, %v5885_v11  ;;  %4605 = vmatprep.mubr.msk.bf16.mxu1 %vm5886_vm1, %v5885_v11  ;;  %p5830_p2 = por %p5829_p1, %p5828_p0 }
  0x1e   : > { %p5824_p13 = pneg %p5823_p12 }
  0x1f   : > { %4572 = vmatpush3.bf16.msra.mxu0 %v5987_v12  ;;  %4592 = vmatpush3.bf16.msra.mxu1 %v5987_v12 }
  0x20   : > { %4573 = vmatprep.subr.bf16.mxu0 %v5885_v11  ;;  %4593 = vmatprep.subr.bf16.mxu1 %v5885_v11  ;;  %p5831_p3 = pnand %p5830_p2, %p5824_p13 }
  0x23   : > { %4574 = vmatpush3.bf16.msra.mxu0 %v5996_v13  ;;  %4594 = vmatpush3.bf16.msra.mxu1 %v5996_v13 }
  0x24   : > { %4575 = vmatprep.subr.bf16.mxu0 %v5885_v11  ;;  %4595 = vmatprep.subr.bf16.mxu1 %v5885_v11 }
  0x27   : > { %4576 = vmatpush3.bf16.msra.mxu0 %v6005_v14  ;;  %4596 = vmatpush3.bf16.msra.mxu1 %v6005_v14 }
  0x28   : > { %4577 = vmatprep.subr.bf16.mxu0 %v5885_v11  ;;  %4597 = vmatprep.subr.bf16.mxu1 %v5885_v11 }
  0x2b   : > { %4578 = vmatpush3.bf16.msra.mxu0 %v6014_v15  ;;  %4598 = vmatpush3.bf16.msra.mxu1 %v6014_v15 }
  0x2c   : > { %4579 = vmatprep.subr.bf16.mxu0 %v5885_v11  ;;  %4599 = vmatprep.subr.bf16.mxu1 %v5885_v11 }
  0x2f   : > { %4580 = vmatpush3.bf16.msra.mxu0 %v6023_v16  ;;  %4600 = vmatpush3.bf16.msra.mxu1 %v6023_v16 }
  0x30   : > { %4581 = vmatprep.subr.bf16.mxu0 %v5885_v11  ;;  %4601 = vmatprep.subr.bf16.mxu1 %v5885_v11 }
  0x33   : > { %4582 = vmatpush3.bf16.msra.mxu0 %v6032_v17  ;;  %4602 = vmatpush3.bf16.msra.mxu1 %v6032_v17 }
  0x34   : > { %4583 = vmatprep.subr.bf16.mxu0 %v5885_v11  ;;  %4603 = vmatprep.subr.bf16.mxu1 %v5885_v11 }
  0x37   : > { %4584 = vmatpush3.bf16.msra.mxu0 %v6043_v18  ;;  %4604 = vmatpush3.bf16.msra.mxu1 %v6043_v18 }
  0x38   : > { %4609 = vmatprep.subr.bf16.mxu0 %v5885_v11  ;;  %4629 = vmatprep.subr.bf16.mxu1 %v5885_v11 }
  0xed   : > { %v6053_v19 = vpop.f32.mrb[0].mxu0  ;;  %v6055_v20 = vpop.f32.mrb[0].mxu1 }
  0xee   : > { %v6057_v21 = vpop.f32.mrb[1].mxu0  ;;  %v6059_v22 = vpop.f32.mrb[1].mxu1  ;;  %vm278_vm2 = vcmp.ge.f32.partialorder %v6053_v19, 1.0  ;;  %vm367_vm3 = vcmp.ge.f32.partialorder %v6055_v20, 1.0 }
  0xef   : > { %vm277_vm4 = vcmp.ge.f32.partialorder %v6057_v21, 1.0  ;;  %vm366_vm5 = vcmp.ge.f32.partialorder %v6059_v22, 1.0  ;;  %v6124_v26 = vsel %vm278_vm2, 1.0, %v5885_v11  ;;  %v6131_v28 = vsel %vm367_vm3, 1.0, %v5885_v11 }
  0xf0   : > { %vm3775_vm6 = vmpackc.low %vm278_vm2, %vm277_vm4  ;;  %v6114_v24 = vsel %vm277_vm4, 1.0, %v5885_v11  ;;  %v6119_v25 = vsel %vm366_vm5, 1.0, %v5885_v11  ;;  %v505_v34 = vsub.f32 %v6053_v19, %v6124_v26  ;;  %v519_v38 = vsub.f32 %v6055_v20, %v6131_v28 }
  0xf1   : > { %4586 = vmatmul.mubr.msk.bf16.vlgmr.msra.gmra.mrb[4].mxu0 %vm3775_vm6, %v5887_v23  ;;  %vm3777_vm7 = vmpackc.low %vm367_vm3, %vm366_vm5  ;;  %v504_v27 = vsub.f32 %v6057_v21, %v6114_v24  ;;  %v518_v30 = vsub.f32 %v6059_v22, %v6119_v25 }
  0xf2   : > { %4606 = vmatmul.mubr.msk.bf16.vlgmr.msra.gmra.mrb[4].mxu1 %vm3777_vm7, %v5887_v23  ;;  %4610 = vmatpush3.bf16.msra.mxu0 %v5978_v8 }
  0xf3   : > { %4630 = vmatpush3.bf16.msra.mxu1 %v5978_v8  ;;  %4611 = vmatprep.subr.bf16.mxu0 %v5885_v11 }
  0xf4   : > { %4631 = vmatprep.subr.bf16.mxu1 %v5885_v11  ;;  %4625 = vmatprep.mubr.msk.bf16.mxu0 %vm5886_vm1, %v5885_v11 }
  0xf5   : > { %4645 = vmatprep.mubr.msk.bf16.mxu1 %vm5886_vm1, %v5885_v11 }
  0xf6   : > { %4612 = vmatpush3.bf16.msra.mxu0 %v5987_v12 }
  0xf7   : > { %4632 = vmatpush3.bf16.msra.mxu1 %v5987_v12  ;;  %4613 = vmatprep.subr.bf16.mxu0 %v5885_v11 }
  0xf8   : > { %4633 = vmatprep.subr.bf16.mxu1 %v5885_v11 }
  0xfa   : > { %4614 = vmatpush3.bf16.msra.mxu0 %v5996_v13 }
  0xfb   : > { %4634 = vmatpush3.bf16.msra.mxu1 %v5996_v13  ;;  %4615 = vmatprep.subr.bf16.mxu0 %v5885_v11 }
  0xfc   : > { %4635 = vmatprep.subr.bf16.mxu1 %v5885_v11 }
  0xfe   : > { %4616 = vmatpush3.bf16.msra.mxu0 %v6005_v14 }
  0xff   : > { %4636 = vmatpush3.bf16.msra.mxu1 %v6005_v14  ;;  %4617 = vmatprep.subr.bf16.mxu0 %v5885_v11 }
 0x100   : > { %4637 = vmatprep.subr.bf16.mxu1 %v5885_v11 }
 0x102   : > { %4618 = vmatpush3.bf16.msra.mxu0 %v6014_v15 }
 0x103   : > { %4638 = vmatpush3.bf16.msra.mxu1 %v6014_v15  ;;  %4619 = vmatprep.subr.bf16.mxu0 %v5885_v11 }
 0x104   : > { %4639 = vmatprep.subr.bf16.mxu1 %v5885_v11 }
 0x106   : > { %4620 = vmatpush3.bf16.msra.mxu0 %v6023_v16 }
 0x107   : > { %4640 = vmatpush3.bf16.msra.mxu1 %v6023_v16  ;;  %4621 = vmatprep.subr.bf16.mxu0 %v5885_v11 }
 0x108   : > { %4641 = vmatprep.subr.bf16.mxu1 %v5885_v11 }
 0x10a   : > { %4622 = vmatpush3.bf16.msra.mxu0 %v6032_v17 }
 0x10b   : > { %4642 = vmatpush3.bf16.msra.mxu1 %v6032_v17  ;;  %4623 = vmatprep.subr.bf16.mxu0 %v5885_v11 }
 0x10c   : > { %4643 = vmatprep.subr.bf16.mxu1 %v5885_v11 }
 0x10e   : > { %4624 = vmatpush3.bf16.msra.mxu0 %v6043_v18 }
 0x10f   : > { %4644 = vmatpush3.bf16.msra.mxu1 %v6043_v18  ;;  %4649 = vmatprep.subr.bf16.mxu0 %v5885_v11 }
 0x110   : > { %4669 = vmatprep.subr.bf16.mxu1 %v5885_v11 }
 0x1c4   : > { %v455_v29 = vpop.f32.mrb[4].mxu0 }
 0x1c5   : > { %v506_v31 = vadd.f32 %v504_v27, %v455_v29  ;;  %v497_v32 = vpop.f32.mrb[4].mxu1  ;;  %v4587_v33 = vpop.f32.mrb[5].mxu0 }
 0x1c6   : > { %v520_v35 = vadd.f32 %v518_v30, %v497_v32  ;;  %v4607_v36 = vpop.f32.mrb[5].mxu1  ;;  %v458_v37 = vpop.f32.mrb[6].mxu0 }
 0x1c7   : > { %v508_v39 = vadd.f32 %v506_v31, %v6057_v21  ;;  %v507_v40 = vadd.f32 %v505_v34, %v458_v37  ;;  %v500_v41 = vpop.f32.mrb[6].mxu1  ;;  %v4588_v42 = vpop.f32.mrb[7].mxu0 }
 0x1c8   : > { %v522_v43 = vadd.f32 %v520_v35, %v6059_v22  ;;  %v521_v44 = vadd.f32 %v519_v38, %v500_v41  ;;  %v4608_v45 = vpop.f32.mrb[7].mxu1 }
 0x1c9   : > { %vm510_vm8 = vcmp.ge.f32.partialorder %v508_v39, 1.0  ;;  %v509_v46 = vadd.f32 %v6053_v19, %v507_v40 }
 0x1ca   : > { %vm524_vm9 = vcmp.ge.f32.partialorder %v522_v43, 1.0  ;;  %v6143_v47 = vadd.f32 %v6055_v20, %v521_v44  ;;  %v3779_v48 = vsel %vm510_vm8, 1.0, %v5885_v11 }
 0x1cb   : > { %vm511_vm10 = vcmp.ge.f32.partialorder %v509_v46, 1.0  ;;  %v616_v49 = vsub.f32 %v508_v39, %v3779_v48  ;;  %v3781_v50 = vsel %vm524_vm9, 1.0, %v5885_v11  ;;  %v516_v3 = vadd.f32 %v3779_v48, %v6114_v24 }
 0x1cc   : > { %vm3783_vm11 = vmpackc.low %vm511_vm10, %vm510_vm8  ;;  %vm525_vm12 = vcmp.ge.f32.partialorder %v6143_v47, 1.0  ;;  %v630_v51 = vsub.f32 %v522_v43, %v3781_v50  ;;  %v3780_v52 = vsel %vm511_vm10, 1.0, %v5885_v11  ;;  %v530_v7 = vadd.f32 %v3781_v50, %v6119_v25 }
 0x1cd   : > { %vm3785_vm13 = vmpackc.low %vm525_vm12, %vm524_vm9  ;;  %4626 = vmatmul.mubr.msk.bf16.vlgmr.msra.gmra.mrb[8].mxu0 %vm3783_vm11, %v5887_v23  ;;  %v617_v53 = vsub.f32 %v509_v46, %v3780_v52  ;;  %v3782_v54 = vsel %vm525_vm12, 1.0, %v5885_v11  ;;  %v517_v9 = vadd.f32 %v3780_v52, %v6124_v26 }
 0x1ce   : > { %4646 = vmatmul.mubr.msk.bf16.vlgmr.msra.gmra.mrb[8].mxu1 %vm3785_vm13, %v5887_v23  ;;  %4650 = vmatpush3.bf16.msra.mxu0 %v5978_v8  ;;  %v631_v55 = vsub.f32 %v6143_v47, %v3782_v54  ;;  %v531_v27 = vadd.f32 %v3782_v54, %v6131_v28 }
 0x1cf   : > { %4670 = vmatpush3.bf16.msra.mxu1 %v5978_v8  ;;  %4651 = vmatprep.subr.bf16.mxu0 %v5885_v11 }
 0x1d0   : > { %4671 = vmatprep.subr.bf16.mxu1 %v5885_v11  ;;  %4665 = vmatprep.mubr.msk.bf16.mxu0 %vm5886_vm1, %v5885_v11 }
 0x1d1   : > { %4685 = vmatprep.mubr.msk.bf16.mxu1 %vm5886_vm1, %v5885_v11 }
 0x1d2   : > { %4652 = vmatpush3.bf16.msra.mxu0 %v5987_v12 }
 0x1d3   : > { %4672 = vmatpush3.bf16.msra.mxu1 %v5987_v12  ;;  %4653 = vmatprep.subr.bf16.mxu0 %v5885_v11 }
 0x1d4   : > { %4673 = vmatprep.subr.bf16.mxu1 %v5885_v11 }
 0x1d6   : > { %4654 = vmatpush3.bf16.msra.mxu0 %v5996_v13 }
 0x1d7   : > { %4674 = vmatpush3.bf16.msra.mxu1 %v5996_v13  ;;  %4655 = vmatprep.subr.bf16.mxu0 %v5885_v11 }
 0x1d8   : > { %4675 = vmatprep.subr.bf16.mxu1 %v5885_v11 }
 0x1da   : > { %4656 = vmatpush3.bf16.msra.mxu0 %v6005_v14 }
 0x1db   : > { %4676 = vmatpush3.bf16.msra.mxu1 %v6005_v14  ;;  %4657 = vmatprep.subr.bf16.mxu0 %v5885_v11 }
 0x1dc   : > { %4677 = vmatprep.subr.bf16.mxu1 %v5885_v11 }
 0x1de   : > { %4658 = vmatpush3.bf16.msra.mxu0 %v6014_v15 }
 0x1df   : > { %4678 = vmatpush3.bf16.msra.mxu1 %v6014_v15  ;;  %4659 = vmatprep.subr.bf16.mxu0 %v5885_v11 }
 0x1e0   : > { %4679 = vmatprep.subr.bf16.mxu1 %v5885_v11 }
 0x1e2   : > { %4660 = vmatpush3.bf16.msra.mxu0 %v6023_v16 }
 0x1e3   : > { %4680 = vmatpush3.bf16.msra.mxu1 %v6023_v16  ;;  %4661 = vmatprep.subr.bf16.mxu0 %v5885_v11 }
 0x1e4   : > { %4681 = vmatprep.subr.bf16.mxu1 %v5885_v11 }
 0x1e6   : > { %4662 = vmatpush3.bf16.msra.mxu0 %v6032_v17 }
 0x1e7   : > { %4682 = vmatpush3.bf16.msra.mxu1 %v6032_v17  ;;  %4663 = vmatprep.subr.bf16.mxu0 %v5885_v11 }
 0x1e8   : > { %4683 = vmatprep.subr.bf16.mxu1 %v5885_v11 }
 0x1ea   : > { %4664 = vmatpush3.bf16.msra.mxu0 %v6043_v18 }
 0x1eb   : > { %4684 = vmatpush3.bf16.msra.mxu1 %v6043_v18  ;;  %4689 = vmatprep.subr.bf16.mxu0 %v5885_v11 }
 0x1ec   : > { %4709 = vmatprep.subr.bf16.mxu1 %v5885_v11 }
 0x2a0   : > { %v567_v56 = vpop.f32.mrb[8].mxu0 }
 0x2a1   : > { %v618_v57 = vadd.f32 %v616_v49, %v567_v56  ;;  %v609_v58 = vpop.f32.mrb[8].mxu1  ;;  %v4627_v59 = vpop.f32.mrb[9].mxu0 }
 0x2a2   : > { %v632_v60 = vadd.f32 %v630_v51, %v609_v58  ;;  %v4647_v61 = vpop.f32.mrb[9].mxu1  ;;  %v570_v62 = vpop.f32.mrb[10].mxu0 }
 0x2a3   : > { %v6190_v63 = vadd.f32 %v618_v57, %v6057_v21  ;;  %v619_v0 = vadd.f32 %v617_v53, %v570_v62  ;;  %v612_v1 = vpop.f32.mrb[10].mxu1  ;;  %v4628_v2 = vpop.f32.mrb[11].mxu0 }
 0x2a4   : > { %v6194_v4 = vadd.f32 %v632_v60, %v6059_v22  ;;  %v633_v5 = vadd.f32 %v631_v55, %v612_v1  ;;  %v4648_v6 = vpop.f32.mrb[11].mxu1 }
 0x2a5   : > { %vm622_vm14 = vcmp.ge.f32.partialorder %v6190_v63, 1.0  ;;  %v6200_v10 = vadd.f32 %v6053_v19, %v619_v0 }
 0x2a6   : > { %vm636_vm15 = vcmp.ge.f32.partialorder %v6194_v4, 1.0  ;;  %v6205_v24 = vadd.f32 %v6055_v20, %v633_v5  ;;  %v3787_v29 = vsel %vm622_vm14, 1.0, %v5885_v11 }
 0x2a7   : > { %vm623_vm0 = vcmp.ge.f32.partialorder %v6200_v10, 1.0  ;;  %v6209_v30 = vadd.f32 %v3787_v29, %v516_v3  ;;  %v728_v25 = vsub.f32 %v6190_v63, %v3787_v29  ;;  %v3789_v26 = vsel %vm636_vm15, 1.0, %v5885_v11 }
 0x2a8   : > { %vm3791_vm2 = vmpackc.low %vm623_vm0, %vm622_vm14  ;;  %vm637_vm3 = vcmp.ge.f32.partialorder %v6205_v24, 1.0  ;;  %v6214_v31 = vadd.f32 %v3789_v26, %v530_v7  ;;  %v742_v28 = vsub.f32 %v6194_v4, %v3789_v26  ;;  %v3788_v32 = vsel %vm623_vm0, 1.0, %v5885_v11 }
 0x2a9   : > { %vm3793_vm4 = vmpackc.low %vm637_vm3, %vm636_vm15  ;;  %4666 = vmatmul.mubr.msk.bf16.vlgmr.msra.gmra.mrb[12].mxu0 %vm3791_vm2, %v5887_v23  ;;  %v6219_v33 = vadd.f32 %v3788_v32, %v517_v9  ;;  %v729_v34 = vsub.f32 %v6200_v10, %v3788_v32  ;;  %v3790_v35 = vsel %vm637_vm3, 1.0, %v5885_v11 }
 0x2aa   : > { %4686 = vmatmul.mubr.msk.bf16.vlgmr.msra.gmra.mrb[12].mxu1 %vm3793_vm4, %v5887_v23  ;;  %4690 = vmatpush3.bf16.msra.mxu0 %v5978_v8  ;;  %v6225_v36 = vadd.f32 %v3790_v35, %v531_v27  ;;  %v743_v37 = vsub.f32 %v6205_v24, %v3790_v35 }
 0x2ab   : > { %4710 = vmatpush3.bf16.msra.mxu1 %v5978_v8  ;;  %4691 = vmatprep.subr.bf16.mxu0 %v5885_v11 }
 0x2ac   : > { %4711 = vmatprep.subr.bf16.mxu1 %v5885_v11  ;;  %4705 = vmatprep.mubr.msk.bf16.mxu0 %vm5886_vm1, %v5885_v11 }
 0x2ad   : > { %4725 = vmatprep.mubr.msk.bf16.mxu1 %vm5886_vm1, %v5885_v11 }
 0x2ae   : > { %4692 = vmatpush3.bf16.msra.mxu0 %v5987_v12 }
 0x2af   : > { %4712 = vmatpush3.bf16.msra.mxu1 %v5987_v12  ;;  %4693 = vmatprep.subr.bf16.mxu0 %v5885_v11 }
 0x2b0   : > { %4713 = vmatprep.subr.bf16.mxu1 %v5885_v11 }
 0x2b2   : > { %4694 = vmatpush3.bf16.msra.mxu0 %v5996_v13 }
 0x2b3   : > { %4714 = vmatpush3.bf16.msra.mxu1 %v5996_v13  ;;  %4695 = vmatprep.subr.bf16.mxu0 %v5885_v11 }
 0x2b4   : > { %4715 = vmatprep.subr.bf16.mxu1 %v5885_v11 }
 0x2b6   : > { %4696 = vmatpush3.bf16.msra.mxu0 %v6005_v14 }
 0x2b7   : > { %4716 = vmatpush3.bf16.msra.mxu1 %v6005_v14  ;;  %4697 = vmatprep.subr.bf16.mxu0 %v5885_v11 }
 0x2b8   : > { %4717 = vmatprep.subr.bf16.mxu1 %v5885_v11 }
 0x2ba   : > { %4698 = vmatpush3.bf16.msra.mxu0 %v6014_v15 }
 0x2bb   : > { %4718 = vmatpush3.bf16.msra.mxu1 %v6014_v15  ;;  %4699 = vmatprep.subr.bf16.mxu0 %v5885_v11 }
 0x2bc   : > { %4719 = vmatprep.subr.bf16.mxu1 %v5885_v11 }
 0x2be   : > { %4700 = vmatpush3.bf16.msra.mxu0 %v6023_v16 }
 0x2bf   : > { %4720 = vmatpush3.bf16.msra.mxu1 %v6023_v16  ;;  %4701 = vmatprep.subr.bf16.mxu0 %v5885_v11 }
 0x2c0   : > { %4721 = vmatprep.subr.bf16.mxu1 %v5885_v11 }
 0x2c2   : > { %4702 = vmatpush3.bf16.msra.mxu0 %v6032_v17 }
 0x2c3   : > { %4722 = vmatpush3.bf16.msra.mxu1 %v6032_v17  ;;  %4703 = vmatprep.subr.bf16.mxu0 %v5885_v11 }
 0x2c4   : > { %4723 = vmatprep.subr.bf16.mxu1 %v5885_v11 }
 0x2c6   : > { %4704 = vmatpush3.bf16.msra.mxu0 %v6043_v18 }
 0x2c7   : > { %4724 = vmatpush3.bf16.msra.mxu1 %v6043_v18  ;;  %4729 = vmatprep.subr.bf16.mxu0 %v5885_v11 }
 0x2c8   : > { %4749 = vmatprep.subr.bf16.mxu1 %v5885_v11 }
 0x37c   : > { %v679_v38 = vpop.f32.mrb[12].mxu0 }
 0x37d   : > { %v730_v39 = vadd.f32 %v728_v25, %v679_v38  ;;  %v721_v40 = vpop.f32.mrb[12].mxu1  ;;  %v4667_v41 = vpop.f32.mrb[13].mxu0 }
 0x37e   : > { %v744_v42 = vadd.f32 %v742_v28, %v721_v40  ;;  %v4687_v43 = vpop.f32.mrb[13].mxu1  ;;  %v682_v44 = vpop.f32.mrb[14].mxu0 }
 0x37f   : > { %v6264_v45 = vadd.f32 %v730_v39, %v6057_v21  ;;  %v731_v46 = vadd.f32 %v729_v34, %v682_v44  ;;  %v724_v47 = vpop.f32.mrb[14].mxu1  ;;  %v4668_v48 = vpop.f32.mrb[15].mxu0 }
 0x380   : > { %v6267_v49 = vadd.f32 %v744_v42, %v6059_v22  ;;  %v745_v50 = vadd.f32 %v743_v37, %v724_v47  ;;  %v4688_v51 = vpop.f32.mrb[15].mxu1 }
 0x381   : > { %vm734_vm5 = vcmp.ge.f32.partialorder %v6264_v45, 1.0  ;;  %v6271_v52 = vadd.f32 %v6053_v19, %v731_v46 }
 0x382   : > { %vm748_vm6 = vcmp.ge.f32.partialorder %v6267_v49, 1.0  ;;  %v6275_v53 = vadd.f32 %v6055_v20, %v745_v50  ;;  %v3795_v54 = vsel %vm734_vm5, 1.0, %v5885_v11 }
 0x383   : > { %vm735_vm7 = vcmp.ge.f32.partialorder %v6271_v52, 1.0  ;;  %v6280_v55 = vadd.f32 %v3795_v54, %v6209_v30  ;;  %v840_v56 = vsub.f32 %v6264_v45, %v3795_v54  ;;  %v3797_v57 = vsel %vm748_vm6, 1.0, %v5885_v11 }
 0x384   : > { %vm3799_vm8 = vmpackc.low %vm735_vm7, %vm734_vm5  ;;  %vm749_vm9 = vcmp.ge.f32.partialorder %v6275_v53, 1.0  ;;  %v6286_v58 = vadd.f32 %v3797_v57, %v6214_v31  ;;  %v854_v59 = vsub.f32 %v6267_v49, %v3797_v57  ;;  %v3796_v60 = vsel %vm735_vm7, 1.0, %v5885_v11 }
 0x385   : > { %vm3801_vm10 = vmpackc.low %vm749_vm9, %vm748_vm6  ;;  %4706 = vmatmul.mubr.msk.bf16.vlgmr.msra.gmra.mrb[16].mxu0 %vm3799_vm8, %v5887_v23  ;;  %v6292_v61 = vadd.f32 %v3796_v60, %v6219_v33  ;;  %v841_v62 = vsub.f32 %v6271_v52, %v3796_v60  ;;  %v3798_v63 = vsel %vm749_vm9, 1.0, %v5885_v11 }
 0x386   : > { %4726 = vmatmul.mubr.msk.bf16.vlgmr.msra.gmra.mrb[16].mxu1 %vm3801_vm10, %v5887_v23  ;;  %4730 = vmatpush3.bf16.msra.mxu0 %v5978_v8  ;;  %v6299_v0 = vadd.f32 %v3798_v63, %v6225_v36  ;;  %v855_v1 = vsub.f32 %v6275_v53, %v3798_v63 }
 0x387   : > { %4750 = vmatpush3.bf16.msra.mxu1 %v5978_v8  ;;  %4731 = vmatprep.subr.bf16.mxu0 %v5885_v11 }
 0x388   : > { %4751 = vmatprep.subr.bf16.mxu1 %v5885_v11  ;;  %4745 = vmatprep.mubr.msk.bf16.mxu0 %vm5886_vm1, %v5885_v11 }
 0x389   : > { %4765 = vmatprep.mubr.msk.bf16.mxu1 %vm5886_vm1, %v5885_v11 }
 0x38a   : > { %4732 = vmatpush3.bf16.msra.mxu0 %v5987_v12 }
 0x38b   : > { %4752 = vmatpush3.bf16.msra.mxu1 %v5987_v12  ;;  %4733 = vmatprep.subr.bf16.mxu0 %v5885_v11 }
 0x38c   : > { %4753 = vmatprep.subr.bf16.mxu1 %v5885_v11 }
 0x38e   : > { %4734 = vmatpush3.bf16.msra.mxu0 %v5996_v13 }
 0x38f   : > { %4754 = vmatpush3.bf16.msra.mxu1 %v5996_v13  ;;  %4735 = vmatprep.subr.bf16.mxu0 %v5885_v11 }
 0x390   : > { %4755 = vmatprep.subr.bf16.mxu1 %v5885_v11 }
 0x392   : > { %4736 = vmatpush3.bf16.msra.mxu0 %v6005_v14 }
 0x393   : > { %4756 = vmatpush3.bf16.msra.mxu1 %v6005_v14  ;;  %4737 = vmatprep.subr.bf16.mxu0 %v5885_v11 }
 0x394   : > { %4757 = vmatprep.subr.bf16.mxu1 %v5885_v11 }
 0x396   : > { %4738 = vmatpush3.bf16.msra.mxu0 %v6014_v15 }
 0x397   : > { %4758 = vmatpush3.bf16.msra.mxu1 %v6014_v15  ;;  %4739 = vmatprep.subr.bf16.mxu0 %v5885_v11 }
 0x398   : > { %4759 = vmatprep.subr.bf16.mxu1 %v5885_v11 }
 0x39a   : > { %4740 = vmatpush3.bf16.msra.mxu0 %v6023_v16 }
 0x39b   : > { %4760 = vmatpush3.bf16.msra.mxu1 %v6023_v16  ;;  %4741 = vmatprep.subr.bf16.mxu0 %v5885_v11 }
 0x39c   : > { %4761 = vmatprep.subr.bf16.mxu1 %v5885_v11 }
 0x39e   : > { %4742 = vmatpush3.bf16.msra.mxu0 %v6032_v17 }
 0x39f   : > { %4762 = vmatpush3.bf16.msra.mxu1 %v6032_v17  ;;  %4743 = vmatprep.subr.bf16.mxu0 %v5885_v11 }
 0x3a0   : > { %4763 = vmatprep.subr.bf16.mxu1 %v5885_v11 }
 0x3a2   : > { %4744 = vmatpush3.bf16.msra.mxu0 %v6043_v18 }
 0x3a3   : > { %4764 = vmatpush3.bf16.msra.mxu1 %v6043_v18  ;;  %4769 = vmatprep.subr.bf16.mxu0 %v5885_v11 }
 0x3a4   : > { %4789 = vmatprep.subr.bf16.mxu1 %v5885_v11 }
 0x458   : > { %v791_v2 = vpop.f32.mrb[16].mxu0 }
 0x459   : > { %v842_v3 = vadd.f32 %v840_v56, %v791_v2  ;;  %v833_v4 = vpop.f32.mrb[16].mxu1  ;;  %v4707_v5 = vpop.f32.mrb[17].mxu0 }
 0x45a   : > { %v856_v6 = vadd.f32 %v854_v59, %v833_v4  ;;  %v4727_v7 = vpop.f32.mrb[17].mxu1  ;;  %v794_v9 = vpop.f32.mrb[18].mxu0 }
 0x45b   : > { %v6338_v10 = vadd.f32 %v842_v3, %v6057_v21  ;;  %v843_v27 = vadd.f32 %v841_v62, %v794_v9  ;;  %v836_v24 = vpop.f32.mrb[18].mxu1  ;;  %v4708_v29 = vpop.f32.mrb[19].mxu0 }
 0x45c   : > { %v6341_v30 = vadd.f32 %v856_v6, %v6059_v22  ;;  %v857_v25 = vadd.f32 %v855_v1, %v836_v24  ;;  %v4728_v26 = vpop.f32.mrb[19].mxu1 }
 0x45d   : > { %vm846_vm11 = vcmp.ge.f32.partialorder %v6338_v10, 1.0  ;;  %v6345_v31 = vadd.f32 %v6053_v19, %v843_v27 }
 0x45e   : > { %vm860_vm12 = vcmp.ge.f32.partialorder %v6341_v30, 1.0  ;;  %v6349_v28 = vadd.f32 %v6055_v20, %v857_v25  ;;  %v3803_v32 = vsel %vm846_vm11, 1.0, %v5885_v11 }
 0x45f   : > { %vm847_vm13 = vcmp.ge.f32.partialorder %v6345_v31, 1.0  ;;  %v6354_v33 = vadd.f32 %v3803_v32, %v6280_v55  ;;  %v952_v34 = vsub.f32 %v6338_v10, %v3803_v32  ;;  %v3805_v35 = vsel %vm860_vm12, 1.0, %v5885_v11 }
 0x460   : > { %vm3807_vm14 = vmpackc.low %vm847_vm13, %vm846_vm11  ;;  %vm861_vm15 = vcmp.ge.f32.partialorder %v6349_v28, 1.0  ;;  %v6360_v36 = vadd.f32 %v3805_v35, %v6286_v58  ;;  %v966_v37 = vsub.f32 %v6341_v30, %v3805_v35  ;;  %v3804_v38 = vsel %vm847_vm13, 1.0, %v5885_v11 }
 0x461   : > { %vm3809_vm0 = vmpackc.low %vm861_vm15, %vm860_vm12  ;;  %4746 = vmatmul.mubr.msk.bf16.vlgmr.msra.gmra.mrb[20].mxu0 %vm3807_vm14, %v5887_v23  ;;  %v6366_v39 = vadd.f32 %v3804_v38, %v6292_v61  ;;  %v953_v40 = vsub.f32 %v6345_v31, %v3804_v38  ;;  %v3806_v41 = vsel %vm861_vm15, 1.0, %v5885_v11 }
 0x462   : > { %4766 = vmatmul.mubr.msk.bf16.vlgmr.msra.gmra.mrb[20].mxu1 %vm3809_vm0, %v5887_v23  ;;  %4770 = vmatpush3.bf16.msra.mxu0 %v5978_v8  ;;  %v6373_v42 = vadd.f32 %v3806_v41, %v6299_v0  ;;  %v967_v43 = vsub.f32 %v6349_v28, %v3806_v41 }
 0x463   : > { %4790 = vmatpush3.bf16.msra.mxu1 %v5978_v8  ;;  %4771 = vmatprep.subr.bf16.mxu0 %v5885_v11 }
 0x464   : > { %4791 = vmatprep.subr.bf16.mxu1 %v5885_v11  ;;  %4785 = vmatprep.mubr.msk.bf16.mxu0 %vm5886_vm1, %v5885_v11 }
 0x465   : > { %4805 = vmatprep.mubr.msk.bf16.mxu1 %vm5886_vm1, %v5885_v11 }
 0x466   : > { %4772 = vmatpush3.bf16.msra.mxu0 %v5987_v12 }
 0x467   : > { %4792 = vmatpush3.bf16.msra.mxu1 %v5987_v12  ;;  %4773 = vmatprep.subr.bf16.mxu0 %v5885_v11 }
 0x468   : > { %4793 = vmatprep.subr.bf16.mxu1 %v5885_v11 }
 0x46a   : > { %4774 = vmatpush3.bf16.msra.mxu0 %v5996_v13 }
 0x46b   : > { %4794 = vmatpush3.bf16.msra.mxu1 %v5996_v13  ;;  %4775 = vmatprep.subr.bf16.mxu0 %v5885_v11 }
 0x46c   : > { %4795 = vmatprep.subr.bf16.mxu1 %v5885_v11 }
 0x46e   : > { %4776 = vmatpush3.bf16.msra.mxu0 %v6005_v14 }
 0x46f   : > { %4796 = vmatpush3.bf16.msra.mxu1 %v6005_v14  ;;  %4777 = vmatprep.subr.bf16.mxu0 %v5885_v11 }
 0x470   : > { %4797 = vmatprep.subr.bf16.mxu1 %v5885_v11 }
 0x472   : > { %4778 = vmatpush3.bf16.msra.mxu0 %v6014_v15 }
 0x473   : > { %4798 = vmatpush3.bf16.msra.mxu1 %v6014_v15  ;;  %4779 = vmatprep.subr.bf16.mxu0 %v5885_v11 }
 0x474   : > { %4799 = vmatprep.subr.bf16.mxu1 %v5885_v11 }
 0x476   : > { %4780 = vmatpush3.bf16.msra.mxu0 %v6023_v16 }
 0x477   : > { %4800 = vmatpush3.bf16.msra.mxu1 %v6023_v16  ;;  %4781 = vmatprep.subr.bf16.mxu0 %v5885_v11 }
 0x478   : > { %4801 = vmatprep.subr.bf16.mxu1 %v5885_v11 }
 0x47a   : > { %4782 = vmatpush3.bf16.msra.mxu0 %v6032_v17 }
 0x47b   : > { %4802 = vmatpush3.bf16.msra.mxu1 %v6032_v17  ;;  %4783 = vmatprep.subr.bf16.mxu0 %v5885_v11 }
 0x47c   : > { %4803 = vmatprep.subr.bf16.mxu1 %v5885_v11 }
 0x47e   : > { %4784 = vmatpush3.bf16.msra.mxu0 %v6043_v18 }
 0x47f   : > { %4804 = vmatpush3.bf16.msra.mxu1 %v6043_v18  ;;  %4809 = vmatprep.subr.bf16.mxu0 %v5885_v11 }
 0x480   : > { %4829 = vmatprep.subr.bf16.mxu1 %v5885_v11 }
 0x534   : > { %v903_v44 = vpop.f32.mrb[20].mxu0 }
 0x535   : > { %v954_v45 = vadd.f32 %v952_v34, %v903_v44  ;;  %v945_v46 = vpop.f32.mrb[20].mxu1  ;;  %v4747_v47 = vpop.f32.mrb[21].mxu0 }
 0x536   : > { %v968_v48 = vadd.f32 %v966_v37, %v945_v46  ;;  %v4767_v49 = vpop.f32.mrb[21].mxu1  ;;  %v906_v50 = vpop.f32.mrb[22].mxu0 }
 0x537   : > { %v6412_v51 = vadd.f32 %v954_v45, %v6057_v21  ;;  %v955_v52 = vadd.f32 %v953_v40, %v906_v50  ;;  %v948_v53 = vpop.f32.mrb[22].mxu1  ;;  %v4748_v54 = vpop.f32.mrb[23].mxu0 }
 0x538   : > { %v6415_v55 = vadd.f32 %v968_v48, %v6059_v22  ;;  %v969_v56 = vadd.f32 %v967_v43, %v948_v53  ;;  %v4768_v57 = vpop.f32.mrb[23].mxu1 }
 0x539   : > { %vm958_vm2 = vcmp.ge.f32.partialorder %v6412_v51, 1.0  ;;  %v6419_v58 = vadd.f32 %v6053_v19, %v955_v52 }
 0x53a   : > { %vm972_vm3 = vcmp.ge.f32.partialorder %v6415_v55, 1.0  ;;  %v6423_v59 = vadd.f32 %v6055_v20, %v969_v56  ;;  %v3811_v60 = vsel %vm958_vm2, 1.0, %v5885_v11 }
 0x53b   : > { %vm959_vm4 = vcmp.ge.f32.partialorder %v6419_v58, 1.0  ;;  %v6428_v61 = vadd.f32 %v3811_v60, %v6354_v33  ;;  %v1064_v62 = vsub.f32 %v6412_v51, %v3811_v60  ;;  %v3813_v63 = vsel %vm972_vm3, 1.0, %v5885_v11 }
 0x53c   : > { %vm3815_vm5 = vmpackc.low %vm959_vm4, %vm958_vm2  ;;  %vm973_vm6 = vcmp.ge.f32.partialorder %v6423_v59, 1.0  ;;  %v6434_v0 = vadd.f32 %v3813_v63, %v6360_v36  ;;  %v1078_v1 = vsub.f32 %v6415_v55, %v3813_v63  ;;  %v3812_v2 = vsel %vm959_vm4, 1.0, %v5885_v11 }
 0x53d   : > { %vm3817_vm7 = vmpackc.low %vm973_vm6, %vm972_vm3  ;;  %4786 = vmatmul.mubr.msk.bf16.vlgmr.msra.gmra.mrb[24].mxu0 %vm3815_vm5, %v5887_v23  ;;  %v6440_v3 = vadd.f32 %v3812_v2, %v6366_v39  ;;  %v1065_v4 = vsub.f32 %v6419_v58, %v3812_v2  ;;  %v3814_v5 = vsel %vm973_vm6, 1.0, %v5885_v11 }
 0x53e   : > { %4806 = vmatmul.mubr.msk.bf16.vlgmr.msra.gmra.mrb[24].mxu1 %vm3817_vm7, %v5887_v23  ;;  %4810 = vmatpush3.bf16.msra.mxu0 %v5978_v8  ;;  %v6447_v6 = vadd.f32 %v3814_v5, %v6373_v42  ;;  %v1079_v7 = vsub.f32 %v6423_v59, %v3814_v5 }
 0x53f   : > { %4830 = vmatpush3.bf16.msra.mxu1 %v5978_v8  ;;  %4811 = vmatprep.subr.bf16.mxu0 %v5885_v11 }
 0x540   : > { %4831 = vmatprep.subr.bf16.mxu1 %v5885_v11  ;;  %4825 = vmatprep.mubr.msk.bf16.mxu0 %vm5886_vm1, %v5885_v11 }
 0x541   : > { %4845 = vmatprep.mubr.msk.bf16.mxu1 %vm5886_vm1, %v5885_v11 }
 0x542   : > { %4812 = vmatpush3.bf16.msra.mxu0 %v5987_v12 }
 0x543   : > { %4832 = vmatpush3.bf16.msra.mxu1 %v5987_v12  ;;  %4813 = vmatprep.subr.bf16.mxu0 %v5885_v11 }
 0x544   : > { %4833 = vmatprep.subr.bf16.mxu1 %v5885_v11 }
 0x546   : > { %4814 = vmatpush3.bf16.msra.mxu0 %v5996_v13 }
 0x547   : > { %4834 = vmatpush3.bf16.msra.mxu1 %v5996_v13  ;;  %4815 = vmatprep.subr.bf16.mxu0 %v5885_v11 }
 0x548   : > { %4835 = vmatprep.subr.bf16.mxu1 %v5885_v11 }
 0x54a   : > { %4816 = vmatpush3.bf16.msra.mxu0 %v6005_v14 }
 0x54b   : > { %4836 = vmatpush3.bf16.msra.mxu1 %v6005_v14  ;;  %4817 = vmatprep.subr.bf16.mxu0 %v5885_v11 }
 0x54c   : > { %4837 = vmatprep.subr.bf16.mxu1 %v5885_v11 }
 0x54e   : > { %4818 = vmatpush3.bf16.msra.mxu0 %v6014_v15 }
 0x54f   : > { %4838 = vmatpush3.bf16.msra.mxu1 %v6014_v15  ;;  %4819 = vmatprep.subr.bf16.mxu0 %v5885_v11 }
 0x550   : > { %4839 = vmatprep.subr.bf16.mxu1 %v5885_v11 }
 0x552   : > { %4820 = vmatpush3.bf16.msra.mxu0 %v6023_v16 }
 0x553   : > { %4840 = vmatpush3.bf16.msra.mxu1 %v6023_v16  ;;  %4821 = vmatprep.subr.bf16.mxu0 %v5885_v11 }
 0x554   : > { %4841 = vmatprep.subr.bf16.mxu1 %v5885_v11 }
 0x556   : > { %4822 = vmatpush3.bf16.msra.mxu0 %v6032_v17 }
 0x557   : > { %4842 = vmatpush3.bf16.msra.mxu1 %v6032_v17  ;;  %4823 = vmatprep.subr.bf16.mxu0 %v5885_v11 }
 0x558   : > { %4843 = vmatprep.subr.bf16.mxu1 %v5885_v11 }
 0x55a   : > { %4824 = vmatpush3.bf16.msra.mxu0 %v6043_v18 }
 0x55b   : > { %4844 = vmatpush3.bf16.msra.mxu1 %v6043_v18  ;;  %4849 = vmatprep.subr.bf16.mxu0 %v5885_v11 }
 0x55c   : > { %4869 = vmatprep.subr.bf16.mxu1 %v5885_v11 }
 0x610   : > { %v1015_v9 = vpop.f32.mrb[24].mxu0 }
 0x611   : > { %v1066_v10 = vadd.f32 %v1064_v62, %v1015_v9  ;;  %v1057_v27 = vpop.f32.mrb[24].mxu1  ;;  %v4787_v24 = vpop.f32.mrb[25].mxu0  ;;  %v6622_v9 = vld [vmem:[%s8301_s2 + $0x10] sm:$0xff]  }
 0x612   : > { %v1080_v29 = vadd.f32 %v1078_v1, %v1057_v27  ;;  %v4807_v30 = vpop.f32.mrb[25].mxu1  ;;  %v1018_v25 = vpop.f32.mrb[26].mxu0  ;;  %v6640_v27 = vld [vmem:[%s8301_s2 + $0x20] sm:$0xff]   ;;  %v6649_v24 = vld [vmem:[%s8301_s2 + $0x28] sm:$0xff]  }
 0x613   : > { %v6486_v26 = vadd.f32 %v1066_v10, %v6057_v21  ;;  %v1067_v31 = vadd.f32 %v1065_v4, %v1018_v25  ;;  %v1060_v28 = vpop.f32.mrb[26].mxu1  ;;  %v4788_v32 = vpop.f32.mrb[27].mxu0  ;;  %v6596_v4 = vld [vmem:[%s8301_s2] sm:$0xff]   ;;  %v6631_v10 = vld [vmem:[%s8301_s2 + $0x18] sm:$0xff]  }
 0x614   : > { %v6489_v33 = vadd.f32 %v1080_v29, %v6059_v22  ;;  %v1081_v34 = vadd.f32 %v1079_v7, %v1060_v28  ;;  %v4808_v35 = vpop.f32.mrb[27].mxu1  ;;  %v6613_v7 = vld [vmem:[%s8301_s2 + $0x8] sm:$0xff]   ;;  %v6658_v29 = vld [vmem:[%s8301_s2 + $0x30] sm:$0xff]   ;;  %v6667_v30 = vld [vmem:[%s8301_s2 + $0x38] sm:$0xff]  }
 0x615   : > { %vm1070_vm8 = vcmp.ge.f32.partialorder %v6486_v26, 1.0  ;;  %v6493_v36 = vadd.f32 %v6053_v19, %v1067_v31 }
 0x616   : > { %vm1084_vm9 = vcmp.ge.f32.partialorder %v6489_v33, 1.0  ;;  %v6497_v37 = vadd.f32 %v6055_v20, %v1081_v34  ;;  %v3819_v38 = vsel %vm1070_vm8, 1.0, %v5885_v11 }
 0x617   : > { %vm1071_vm10 = vcmp.ge.f32.partialorder %v6493_v36, 1.0  ;;  %v6502_v39 = vadd.f32 %v3819_v38, %v6428_v61  ;;  %v1176_v40 = vsub.f32 %v6486_v26, %v3819_v38  ;;  %v3821_v41 = vsel %vm1084_vm9, 1.0, %v5885_v11 }
 0x618   : > { %vm3823_vm11 = vmpackc.low %vm1071_vm10, %vm1070_vm8  ;;  %vm1085_vm12 = vcmp.ge.f32.partialorder %v6497_v37, 1.0  ;;  %v6508_v42 = vadd.f32 %v3821_v41, %v6434_v0  ;;  %v1190_v43 = vsub.f32 %v6489_v33, %v3821_v41  ;;  %v3820_v44 = vsel %vm1071_vm10, 1.0, %v5885_v11 }
 0x619   : > { %vm3825_vm13 = vmpackc.low %vm1085_vm12, %vm1084_vm9  ;;  %4826 = vmatmul.mubr.msk.bf16.vlgmr.msra.gmra.mrb[28].mxu0 %vm3823_vm11, %v5887_v23  ;;  %v6514_v45 = vadd.f32 %v3820_v44, %v6440_v3  ;;  %v1177_v46 = vsub.f32 %v6493_v36, %v3820_v44  ;;  %v3822_v47 = vsel %vm1085_vm12, 1.0, %v5885_v11 }
 0x61a   : > { %4846 = vmatmul.mubr.msk.bf16.vlgmr.msra.gmra.mrb[28].mxu1 %vm3825_vm13, %v5887_v23  ;;  %4850 = vmatpush3.bf16.msra.mxu0 %v5978_v8  ;;  %v6521_v48 = vadd.f32 %v3822_v47, %v6447_v6  ;;  %v1191_v49 = vsub.f32 %v6497_v37, %v3822_v47 }
 0x61b   : > { %4870 = vmatpush3.bf16.msra.mxu1 %v5978_v8  ;;  %4851 = vmatprep.subr.bf16.mxu0 %v5885_v11 }
 0x61c   : > { %4871 = vmatprep.subr.bf16.mxu1 %v5885_v11  ;;  %4865 = vmatprep.mubr.msk.bf16.mxu0 %vm5886_vm1, %v5885_v11 }
 0x61d   : > { %4885 = vmatprep.mubr.msk.bf16.mxu1 %vm5886_vm1, %v5885_v11 }
 0x61e   : > { %4852 = vmatpush3.bf16.msra.mxu0 %v5987_v12 }
 0x61f   : > { %4872 = vmatpush3.bf16.msra.mxu1 %v5987_v12  ;;  %4853 = vmatprep.subr.bf16.mxu0 %v5885_v11 }
 0x620   : > { %4873 = vmatprep.subr.bf16.mxu1 %v5885_v11 }
 0x622   : > { %4854 = vmatpush3.bf16.msra.mxu0 %v5996_v13 }
 0x623   : > { %4874 = vmatpush3.bf16.msra.mxu1 %v5996_v13  ;;  %4855 = vmatprep.subr.bf16.mxu0 %v5885_v11 }
 0x624   : > { %4875 = vmatprep.subr.bf16.mxu1 %v5885_v11 }
 0x626   : > { %4856 = vmatpush3.bf16.msra.mxu0 %v6005_v14 }
 0x627   : > { %4876 = vmatpush3.bf16.msra.mxu1 %v6005_v14  ;;  %4857 = vmatprep.subr.bf16.mxu0 %v5885_v11 }
 0x628   : > { %4877 = vmatprep.subr.bf16.mxu1 %v5885_v11 }
 0x62a   : > { %4858 = vmatpush3.bf16.msra.mxu0 %v6014_v15 }
 0x62b   : > { %4878 = vmatpush3.bf16.msra.mxu1 %v6014_v15  ;;  %4859 = vmatprep.subr.bf16.mxu0 %v5885_v11 }
 0x62c   : > { %4879 = vmatprep.subr.bf16.mxu1 %v5885_v11 }
 0x62e   : > { %4860 = vmatpush3.bf16.msra.mxu0 %v6023_v16 }
 0x62f   : > { %4880 = vmatpush3.bf16.msra.mxu1 %v6023_v16  ;;  %4861 = vmatprep.subr.bf16.mxu0 %v5885_v11 }
 0x630   : > { %4881 = vmatprep.subr.bf16.mxu1 %v5885_v11 }
 0x632   : > { %4862 = vmatpush3.bf16.msra.mxu0 %v6032_v17 }
 0x633   : > { %4882 = vmatpush3.bf16.msra.mxu1 %v6032_v17  ;;  %4863 = vmatprep.subr.bf16.mxu0 %v5885_v11 }
 0x634   : > { %4883 = vmatprep.subr.bf16.mxu1 %v5885_v11 }
 0x636   : > { %4864 = vmatpush3.bf16.msra.mxu0 %v6043_v18 }
 0x637   : > { %4884 = vmatpush3.bf16.msra.mxu1 %v6043_v18  ;;  %4889 = vmatprep.subr.bf16.mxu0 %v5885_v11 }
 0x638   : > { %4909 = vmatprep.subr.bf16.mxu1 %v5885_v11 }
 0x6ec   : > { %v1127_v8 = vpop.f32.mrb[28].mxu0 }
 0x6ed   : > { %v1178_v12 = vadd.f32 %v1176_v40, %v1127_v8  ;;  %v1169_v13 = vpop.f32.mrb[28].mxu1  ;;  %v4827_v14 = vpop.f32.mrb[29].mxu0 }
 0x6ee   : > { %v1192_v15 = vadd.f32 %v1190_v43, %v1169_v13  ;;  %v4847_v16 = vpop.f32.mrb[29].mxu1  ;;  %v1130_v50 = vpop.f32.mrb[30].mxu0 }
 0x6ef   : > { %v6560_v17 = vadd.f32 %v1178_v12, %v6057_v21  ;;  %v1179_v51 = vadd.f32 %v1177_v46, %v1130_v50  ;;  %v1172_v52 = vpop.f32.mrb[30].mxu1  ;;  %v4828_v53 = vpop.f32.mrb[31].mxu0 }
 0x6f0   : > { %v6563_v54 = vadd.f32 %v1192_v15, %v6059_v22  ;;  %v1193_v18 = vadd.f32 %v1191_v49, %v1172_v52  ;;  %v4848_v55 = vpop.f32.mrb[31].mxu1 }
 0x6f1   : > { %vm1182_vm14 = vcmp.ge.f32.partialorder %v6560_v17, 1.0  ;;  %v6567_v56 = vadd.f32 %v6053_v19, %v1179_v51 }
 0x6f2   : > { %vm1196_vm15 = vcmp.ge.f32.partialorder %v6563_v54, 1.0  ;;  %v6571_v57 = vadd.f32 %v6055_v20, %v1193_v18  ;;  %v3827_v58 = vsel %vm1182_vm14, 1.0, %v5885_v11 }
 0x6f3   : > { %vm1183_vm0 = vcmp.ge.f32.partialorder %v6567_v56, 1.0  ;;  %v6576_v59 = vadd.f32 %v3827_v58, %v6502_v39  ;;  %v1288_v60 = vsub.f32 %v6560_v17, %v3827_v58  ;;  %v3829_v61 = vsel %vm1196_vm15, 1.0, %v5885_v11 }
 0x6f4   : > { %vm3831_vm2 = vmpackc.low %vm1183_vm0, %vm1182_vm14  ;;  %vm1197_vm3 = vcmp.ge.f32.partialorder %v6571_v57, 1.0  ;;  %v6582_v62 = vadd.f32 %v3829_v61, %v6508_v42  ;;  %v1302_v63 = vsub.f32 %v6563_v54, %v3829_v61  ;;  %v3828_v0 = vsel %vm1183_vm0, 1.0, %v5885_v11 }
 0x6f5   : > { %vm3833_vm4 = vmpackc.low %vm1197_vm3, %vm1196_vm15  ;;  %4866 = vmatmul.mubr.msk.bf16.vlgmr.msra.gmra.mrb[32].mxu0 %vm3831_vm2, %v5887_v23  ;;  %v6588_v1 = vadd.f32 %v3828_v0, %v6514_v45  ;;  %v1289_v2 = vsub.f32 %v6567_v56, %v3828_v0  ;;  %v3830_v3 = vsel %vm1197_vm3, 1.0, %v5885_v11 }
 0x6f6   : > { %4886 = vmatmul.mubr.msk.bf16.vlgmr.msra.gmra.mrb[32].mxu1 %vm3833_vm4, %v5887_v23  ;;  %4890 = vmatpush3.bf16.msra.mxu0 %v6596_v4  ;;  %v6600_v5 = vadd.f32 %v3830_v3, %v6521_v48  ;;  %v1303_v6 = vsub.f32 %v6571_v57, %v3830_v3 }
 0x6f7   : > { %4910 = vmatpush3.bf16.msra.mxu1 %v6596_v4  ;;  %4891 = vmatprep.subr.bf16.mxu0 %v5885_v11 }
 0x6f8   : > { %4911 = vmatprep.subr.bf16.mxu1 %v5885_v11  ;;  %4905 = vmatprep.mubr.msk.bf16.mxu0 %vm5886_vm1, %v5885_v11 }
 0x6f9   : > { %4925 = vmatprep.mubr.msk.bf16.mxu1 %vm5886_vm1, %v5885_v11 }
 0x6fa   : > { %4892 = vmatpush3.bf16.msra.mxu0 %v6613_v7 }
 0x6fb   : > { %4912 = vmatpush3.bf16.msra.mxu1 %v6613_v7  ;;  %4893 = vmatprep.subr.bf16.mxu0 %v5885_v11 }
 0x6fc   : > { %4913 = vmatprep.subr.bf16.mxu1 %v5885_v11 }
 0x6fe   : > { %4894 = vmatpush3.bf16.msra.mxu0 %v6622_v9 }
 0x6ff   : > { %4914 = vmatpush3.bf16.msra.mxu1 %v6622_v9  ;;  %4895 = vmatprep.subr.bf16.mxu0 %v5885_v11 }
 0x700   : > { %4915 = vmatprep.subr.bf16.mxu1 %v5885_v11 }
 0x702   : > { %4896 = vmatpush3.bf16.msra.mxu0 %v6631_v10 }
 0x703   : > { %4916 = vmatpush3.bf16.msra.mxu1 %v6631_v10  ;;  %4897 = vmatprep.subr.bf16.mxu0 %v5885_v11 }
 0x704   : > { %4917 = vmatprep.subr.bf16.mxu1 %v5885_v11 }
 0x706   : > { %4898 = vmatpush3.bf16.msra.mxu0 %v6640_v27 }
 0x707   : > { %4918 = vmatpush3.bf16.msra.mxu1 %v6640_v27  ;;  %4899 = vmatprep.subr.bf16.mxu0 %v5885_v11 }
 0x708   : > { %4919 = vmatprep.subr.bf16.mxu1 %v5885_v11 }
 0x70a   : > { %4900 = vmatpush3.bf16.msra.mxu0 %v6649_v24 }
 0x70b   : > { %4920 = vmatpush3.bf16.msra.mxu1 %v6649_v24  ;;  %4901 = vmatprep.subr.bf16.mxu0 %v5885_v11 }
 0x70c   : > { %4921 = vmatprep.subr.bf16.mxu1 %v5885_v11 }
 0x70e   : > { %4902 = vmatpush3.bf16.msra.mxu0 %v6658_v29 }
 0x70f   : > { %4922 = vmatpush3.bf16.msra.mxu1 %v6658_v29  ;;  %4903 = vmatprep.subr.bf16.mxu0 %v5885_v11 }
 0x710   : > { %4923 = vmatprep.subr.bf16.mxu1 %v5885_v11 }
 0x712   : > { %4904 = vmatpush3.bf16.msra.mxu0 %v6667_v30 }
 0x713   : > { %4924 = vmatpush3.bf16.msra.mxu1 %v6667_v30  ;;  %4929 = vmatprep.subr.bf16.mxu0 %v5885_v11 }
 0x714   : > { %4949 = vmatprep.subr.bf16.mxu1 %v5885_v11 }
 0x7c8   : > { %v1239_v25 = vpop.f32.mrb[32].mxu0 }
 0x7c9   : > { %v1290_v26 = vadd.f32 %v1288_v60, %v1239_v25  ;;  %v1281_v31 = vpop.f32.mrb[32].mxu1  ;;  %v4867_v28 = vpop.f32.mrb[33].mxu0 }
 0x7ca   : > { %v1304_v32 = vadd.f32 %v1302_v63, %v1281_v31  ;;  %v4887_v33 = vpop.f32.mrb[33].mxu1  ;;  %v1242_v34 = vpop.f32.mrb[34].mxu0 }
 0x7cb   : > { %v6674_v35 = vadd.f32 %v1290_v26, %v6057_v21  ;;  %v1291_v36 = vadd.f32 %v1289_v2, %v1242_v34  ;;  %v1284_v37 = vpop.f32.mrb[34].mxu1  ;;  %v4868_v38 = vpop.f32.mrb[35].mxu0 }
 0x7cc   : > { %v6677_v39 = vadd.f32 %v1304_v32, %v6059_v22  ;;  %v1305_v40 = vadd.f32 %v1303_v6, %v1284_v37  ;;  %v4888_v41 = vpop.f32.mrb[35].mxu1 }
 0x7cd   : > { %vm1294_vm5 = vcmp.ge.f32.partialorder %v6674_v35, 1.0  ;;  %v6681_v42 = vadd.f32 %v6053_v19, %v1291_v36 }
 0x7ce   : > { %vm1308_vm6 = vcmp.ge.f32.partialorder %v6677_v39, 1.0  ;;  %v6685_v43 = vadd.f32 %v6055_v20, %v1305_v40  ;;  %v3835_v44 = vsel %vm1294_vm5, 1.0, %v5885_v11 }
 0x7cf   : > { %vm1295_vm7 = vcmp.ge.f32.partialorder %v6681_v42, 1.0  ;;  %v6690_v45 = vadd.f32 %v3835_v44, %v6576_v59  ;;  %v1400_v46 = vsub.f32 %v6674_v35, %v3835_v44  ;;  %v3837_v47 = vsel %vm1308_vm6, 1.0, %v5885_v11 }
 0x7d0   : > { %vm3839_vm8 = vmpackc.low %vm1295_vm7, %vm1294_vm5  ;;  %vm1309_vm9 = vcmp.ge.f32.partialorder %v6685_v43, 1.0  ;;  %v6696_v48 = vadd.f32 %v3837_v47, %v6582_v62  ;;  %v1414_v49 = vsub.f32 %v6677_v39, %v3837_v47  ;;  %v3836_v8 = vsel %vm1295_vm7, 1.0, %v5885_v11 }
 0x7d1   : > { %vm3841_vm10 = vmpackc.low %vm1309_vm9, %vm1308_vm6  ;;  %4906 = vmatmul.mubr.msk.bf16.vlgmr.msra.gmra.mrb[36].mxu0 %vm3839_vm8, %v5887_v23  ;;  %v6702_v12 = vadd.f32 %v3836_v8, %v6588_v1  ;;  %v1401_v13 = vsub.f32 %v6681_v42, %v3836_v8  ;;  %v3838_v14 = vsel %vm1309_vm9, 1.0, %v5885_v11 }
 0x7d2   : > { %4926 = vmatmul.mubr.msk.bf16.vlgmr.msra.gmra.mrb[36].mxu1 %vm3841_vm10, %v5887_v23  ;;  %4930 = vmatpush3.bf16.msra.mxu0 %v6596_v4  ;;  %v6709_v15 = vadd.f32 %v3838_v14, %v6600_v5  ;;  %v1415_v16 = vsub.f32 %v6685_v43, %v3838_v14 }
 0x7d3   : > { %4950 = vmatpush3.bf16.msra.mxu1 %v6596_v4  ;;  %4931 = vmatprep.subr.bf16.mxu0 %v5885_v11 }
 0x7d4   : > { %4951 = vmatprep.subr.bf16.mxu1 %v5885_v11  ;;  %4945 = vmatprep.mubr.msk.bf16.mxu0 %vm5886_vm1, %v5885_v11 }
 0x7d5   : > { %4965 = vmatprep.mubr.msk.bf16.mxu1 %vm5886_vm1, %v5885_v11 }
 0x7d6   : > { %4932 = vmatpush3.bf16.msra.mxu0 %v6613_v7 }
 0x7d7   : > { %4952 = vmatpush3.bf16.msra.mxu1 %v6613_v7  ;;  %4933 = vmatprep.subr.bf16.mxu0 %v5885_v11 }
 0x7d8   : > { %4953 = vmatprep.subr.bf16.mxu1 %v5885_v11 }
 0x7da   : > { %4934 = vmatpush3.bf16.msra.mxu0 %v6622_v9 }
 0x7db   : > { %4954 = vmatpush3.bf16.msra.mxu1 %v6622_v9  ;;  %4935 = vmatprep.subr.bf16.mxu0 %v5885_v11 }
 0x7dc   : > { %4955 = vmatprep.subr.bf16.mxu1 %v5885_v11 }
 0x7de   : > { %4936 = vmatpush3.bf16.msra.mxu0 %v6631_v10 }
 0x7df   : > { %4956 = vmatpush3.bf16.msra.mxu1 %v6631_v10  ;;  %4937 = vmatprep.subr.bf16.mxu0 %v5885_v11 }
 0x7e0   : > { %4957 = vmatprep.subr.bf16.mxu1 %v5885_v11 }
 0x7e2   : > { %4938 = vmatpush3.bf16.msra.mxu0 %v6640_v27 }
 0x7e3   : > { %4958 = vmatpush3.bf16.msra.mxu1 %v6640_v27  ;;  %4939 = vmatprep.subr.bf16.mxu0 %v5885_v11 }
 0x7e4   : > { %4959 = vmatprep.subr.bf16.mxu1 %v5885_v11 }
 0x7e6   : > { %4940 = vmatpush3.bf16.msra.mxu0 %v6649_v24 }
 0x7e7   : > { %4960 = vmatpush3.bf16.msra.mxu1 %v6649_v24  ;;  %4941 = vmatprep.subr.bf16.mxu0 %v5885_v11 }
 0x7e8   : > { %4961 = vmatprep.subr.bf16.mxu1 %v5885_v11 }
 0x7ea   : > { %4942 = vmatpush3.bf16.msra.mxu0 %v6658_v29 }
 0x7eb   : > { %4962 = vmatpush3.bf16.msra.mxu1 %v6658_v29  ;;  %4943 = vmatprep.subr.bf16.mxu0 %v5885_v11 }
 0x7ec   : > { %4963 = vmatprep.subr.bf16.mxu1 %v5885_v11 }
 0x7ee   : > { %4944 = vmatpush3.bf16.msra.mxu0 %v6667_v30 }
 0x7ef   : > { %4964 = vmatpush3.bf16.msra.mxu1 %v6667_v30  ;;  %4969 = vmatprep.subr.bf16.mxu0 %v5885_v11 }
 0x7f0   : > { %4989 = vmatprep.subr.bf16.mxu1 %v5885_v11 }
 0x8a4   : > { %v1351_v50 = vpop.f32.mrb[36].mxu0 }
 0x8a5   : > { %v1402_v17 = vadd.f32 %v1400_v46, %v1351_v50  ;;  %v1393_v51 = vpop.f32.mrb[36].mxu1  ;;  %v4907_v52 = vpop.f32.mrb[37].mxu0 }
 0x8a6   : > { %v1416_v53 = vadd.f32 %v1414_v49, %v1393_v51  ;;  %v4927_v54 = vpop.f32.mrb[37].mxu1  ;;  %v1354_v18 = vpop.f32.mrb[38].mxu0 }
 0x8a7   : > { %v6748_v55 = vadd.f32 %v1402_v17, %v6057_v21  ;;  %v1403_v56 = vadd.f32 %v1401_v13, %v1354_v18  ;;  %v1396_v57 = vpop.f32.mrb[38].mxu1  ;;  %v4908_v58 = vpop.f32.mrb[39].mxu0 }
 0x8a8   : > { %v6751_v59 = vadd.f32 %v1416_v53, %v6059_v22  ;;  %v1417_v60 = vadd.f32 %v1415_v16, %v1396_v57  ;;  %v4928_v61 = vpop.f32.mrb[39].mxu1 }
 0x8a9   : > { %vm1406_vm11 = vcmp.ge.f32.partialorder %v6748_v55, 1.0  ;;  %v6755_v62 = vadd.f32 %v6053_v19, %v1403_v56 }
 0x8aa   : > { %vm1420_vm12 = vcmp.ge.f32.partialorder %v6751_v59, 1.0  ;;  %v6759_v63 = vadd.f32 %v6055_v20, %v1417_v60  ;;  %v3843_v0 = vsel %vm1406_vm11, 1.0, %v5885_v11 }
 0x8ab   : > { %vm1407_vm13 = vcmp.ge.f32.partialorder %v6755_v62, 1.0  ;;  %v6764_v1 = vadd.f32 %v3843_v0, %v6690_v45  ;;  %v1512_v2 = vsub.f32 %v6748_v55, %v3843_v0  ;;  %v3845_v3 = vsel %vm1420_vm12, 1.0, %v5885_v11 }
 0x8ac   : > { %vm3847_vm14 = vmpackc.low %vm1407_vm13, %vm1406_vm11  ;;  %vm1421_vm15 = vcmp.ge.f32.partialorder %v6759_v63, 1.0  ;;  %v6770_v5 = vadd.f32 %v3845_v3, %v6696_v48  ;;  %v1526_v6 = vsub.f32 %v6751_v59, %v3845_v3  ;;  %v3844_v25 = vsel %vm1407_vm13, 1.0, %v5885_v11 }
 0x8ad   : > { %vm3849_vm0 = vmpackc.low %vm1421_vm15, %vm1420_vm12  ;;  %4946 = vmatmul.mubr.msk.bf16.vlgmr.msra.gmra.mrb[40].mxu0 %vm3847_vm14, %v5887_v23  ;;  %v6776_v26 = vadd.f32 %v3844_v25, %v6702_v12  ;;  %v1513_v31 = vsub.f32 %v6755_v62, %v3844_v25  ;;  %v3846_v28 = vsel %vm1421_vm15, 1.0, %v5885_v11 }
 0x8ae   : > { %4966 = vmatmul.mubr.msk.bf16.vlgmr.msra.gmra.mrb[40].mxu1 %vm3849_vm0, %v5887_v23  ;;  %4970 = vmatpush3.bf16.msra.mxu0 %v6596_v4  ;;  %v6783_v32 = vadd.f32 %v3846_v28, %v6709_v15  ;;  %v1527_v33 = vsub.f32 %v6759_v63, %v3846_v28 }
 0x8af   : > { %4990 = vmatpush3.bf16.msra.mxu1 %v6596_v4  ;;  %4971 = vmatprep.subr.bf16.mxu0 %v5885_v11 }
 0x8b0   : > { %4991 = vmatprep.subr.bf16.mxu1 %v5885_v11  ;;  %4985 = vmatprep.mubr.msk.bf16.mxu0 %vm5886_vm1, %v5885_v11 }
 0x8b1   : > { %5005 = vmatprep.mubr.msk.bf16.mxu1 %vm5886_vm1, %v5885_v11 }
 0x8b2   : > { %4972 = vmatpush3.bf16.msra.mxu0 %v6613_v7 }
 0x8b3   : > { %4992 = vmatpush3.bf16.msra.mxu1 %v6613_v7  ;;  %4973 = vmatprep.subr.bf16.mxu0 %v5885_v11 }
 0x8b4   : > { %4993 = vmatprep.subr.bf16.mxu1 %v5885_v11 }
 0x8b6   : > { %4974 = vmatpush3.bf16.msra.mxu0 %v6622_v9 }
 0x8b7   : > { %4994 = vmatpush3.bf16.msra.mxu1 %v6622_v9  ;;  %4975 = vmatprep.subr.bf16.mxu0 %v5885_v11 }
 0x8b8   : > { %4995 = vmatprep.subr.bf16.mxu1 %v5885_v11 }
 0x8ba   : > { %4976 = vmatpush3.bf16.msra.mxu0 %v6631_v10 }
 0x8bb   : > { %4996 = vmatpush3.bf16.msra.mxu1 %v6631_v10  ;;  %4977 = vmatprep.subr.bf16.mxu0 %v5885_v11 }
 0x8bc   : > { %4997 = vmatprep.subr.bf16.mxu1 %v5885_v11 }
 0x8be   : > { %4978 = vmatpush3.bf16.msra.mxu0 %v6640_v27 }
 0x8bf   : > { %4998 = vmatpush3.bf16.msra.mxu1 %v6640_v27  ;;  %4979 = vmatprep.subr.bf16.mxu0 %v5885_v11 }
 0x8c0   : > { %4999 = vmatprep.subr.bf16.mxu1 %v5885_v11 }
 0x8c2   : > { %4980 = vmatpush3.bf16.msra.mxu0 %v6649_v24 }
 0x8c3   : > { %5000 = vmatpush3.bf16.msra.mxu1 %v6649_v24  ;;  %4981 = vmatprep.subr.bf16.mxu0 %v5885_v11 }
 0x8c4   : > { %5001 = vmatprep.subr.bf16.mxu1 %v5885_v11 }
 0x8c6   : > { %4982 = vmatpush3.bf16.msra.mxu0 %v6658_v29 }
 0x8c7   : > { %5002 = vmatpush3.bf16.msra.mxu1 %v6658_v29  ;;  %4983 = vmatprep.subr.bf16.mxu0 %v5885_v11 }
 0x8c8   : > { %5003 = vmatprep.subr.bf16.mxu1 %v5885_v11 }
 0x8ca   : > { %4984 = vmatpush3.bf16.msra.mxu0 %v6667_v30 }
 0x8cb   : > { %5004 = vmatpush3.bf16.msra.mxu1 %v6667_v30  ;;  %5009 = vmatprep.subr.bf16.mxu0 %v5885_v11 }
 0x8cc   : > { %5029 = vmatprep.subr.bf16.mxu1 %v5885_v11 }
 0x980   : > { %v1463_v34 = vpop.f32.mrb[40].mxu0 }
 0x981   : > { %v1514_v35 = vadd.f32 %v1512_v2, %v1463_v34  ;;  %v1505_v36 = vpop.f32.mrb[40].mxu1  ;;  %v4947_v37 = vpop.f32.mrb[41].mxu0 }
 0x982   : > { %v1528_v38 = vadd.f32 %v1526_v6, %v1505_v36  ;;  %v4967_v39 = vpop.f32.mrb[41].mxu1  ;;  %v1466_v40 = vpop.f32.mrb[42].mxu0 }
 0x983   : > { %v6822_v41 = vadd.f32 %v1514_v35, %v6057_v21  ;;  %v1515_v42 = vadd.f32 %v1513_v31, %v1466_v40  ;;  %v1508_v43 = vpop.f32.mrb[42].mxu1  ;;  %v4948_v44 = vpop.f32.mrb[43].mxu0 }
 0x984   : > { %v6825_v45 = vadd.f32 %v1528_v38, %v6059_v22  ;;  %v1529_v46 = vadd.f32 %v1527_v33, %v1508_v43  ;;  %v4968_v47 = vpop.f32.mrb[43].mxu1 }
 0x985   : > { %vm1518_vm2 = vcmp.ge.f32.partialorder %v6822_v41, 1.0  ;;  %v6829_v48 = vadd.f32 %v6053_v19, %v1515_v42 }
 0x986   : > { %vm1532_vm3 = vcmp.ge.f32.partialorder %v6825_v45, 1.0  ;;  %v6833_v49 = vadd.f32 %v6055_v20, %v1529_v46  ;;  %v3851_v8 = vsel %vm1518_vm2, 1.0, %v5885_v11 }
 0x987   : > { %vm1519_vm4 = vcmp.ge.f32.partialorder %v6829_v48, 1.0  ;;  %v6838_v12 = vadd.f32 %v3851_v8, %v6764_v1  ;;  %v1624_v13 = vsub.f32 %v6822_v41, %v3851_v8  ;;  %v3853_v14 = vsel %vm1532_vm3, 1.0, %v5885_v11 }
 0x988   : > { %vm3855_vm5 = vmpackc.low %vm1519_vm4, %vm1518_vm2  ;;  %vm1533_vm6 = vcmp.ge.f32.partialorder %v6833_v49, 1.0  ;;  %v6844_v15 = vadd.f32 %v3853_v14, %v6770_v5  ;;  %v1638_v16 = vsub.f32 %v6825_v45, %v3853_v14  ;;  %v3852_v50 = vsel %vm1519_vm4, 1.0, %v5885_v11 }
 0x989   : > { %vm3857_vm7 = vmpackc.low %vm1533_vm6, %vm1532_vm3  ;;  %4986 = vmatmul.mubr.msk.bf16.vlgmr.msra.gmra.mrb[44].mxu0 %vm3855_vm5, %v5887_v23  ;;  %v6850_v17 = vadd.f32 %v3852_v50, %v6776_v26  ;;  %v1625_v51 = vsub.f32 %v6829_v48, %v3852_v50  ;;  %v3854_v52 = vsel %vm1533_vm6, 1.0, %v5885_v11 }
 0x98a   : > { %5006 = vmatmul.mubr.msk.bf16.vlgmr.msra.gmra.mrb[44].mxu1 %vm3857_vm7, %v5887_v23  ;;  %5010 = vmatpush3.bf16.msra.mxu0 %v6596_v4  ;;  %v6857_v53 = vadd.f32 %v3854_v52, %v6783_v32  ;;  %v1639_v54 = vsub.f32 %v6833_v49, %v3854_v52 }
 0x98b   : > { %5030 = vmatpush3.bf16.msra.mxu1 %v6596_v4  ;;  %5011 = vmatprep.subr.bf16.mxu0 %v5885_v11 }
 0x98c   : > { %5031 = vmatprep.subr.bf16.mxu1 %v5885_v11  ;;  %5025 = vmatprep.mubr.msk.bf16.mxu0 %vm5886_vm1, %v5885_v11 }
 0x98d   : > { %5045 = vmatprep.mubr.msk.bf16.mxu1 %vm5886_vm1, %v5885_v11 }
 0x98e   : > { %5012 = vmatpush3.bf16.msra.mxu0 %v6613_v7 }
 0x98f   : > { %5032 = vmatpush3.bf16.msra.mxu1 %v6613_v7  ;;  %5013 = vmatprep.subr.bf16.mxu0 %v5885_v11 }
 0x990   : > { %5033 = vmatprep.subr.bf16.mxu1 %v5885_v11 }
 0x992   : > { %5014 = vmatpush3.bf16.msra.mxu0 %v6622_v9 }
 0x993   : > { %5034 = vmatpush3.bf16.msra.mxu1 %v6622_v9  ;;  %5015 = vmatprep.subr.bf16.mxu0 %v5885_v11 }
 0x994   : > { %5035 = vmatprep.subr.bf16.mxu1 %v5885_v11 }
 0x996   : > { %5016 = vmatpush3.bf16.msra.mxu0 %v6631_v10 }
 0x997   : > { %5036 = vmatpush3.bf16.msra.mxu1 %v6631_v10  ;;  %5017 = vmatprep.subr.bf16.mxu0 %v5885_v11 }
 0x998   : > { %5037 = vmatprep.subr.bf16.mxu1 %v5885_v11 }
 0x99a   : > { %5018 = vmatpush3.bf16.msra.mxu0 %v6640_v27 }
 0x99b   : > { %5038 = vmatpush3.bf16.msra.mxu1 %v6640_v27  ;;  %5019 = vmatprep.subr.bf16.mxu0 %v5885_v11 }
 0x99c   : > { %5039 = vmatprep.subr.bf16.mxu1 %v5885_v11 }
 0x99e   : > { %5020 = vmatpush3.bf16.msra.mxu0 %v6649_v24 }
 0x99f   : > { %5040 = vmatpush3.bf16.msra.mxu1 %v6649_v24  ;;  %5021 = vmatprep.subr.bf16.mxu0 %v5885_v11 }
 0x9a0   : > { %5041 = vmatprep.subr.bf16.mxu1 %v5885_v11 }
 0x9a2   : > { %5022 = vmatpush3.bf16.msra.mxu0 %v6658_v29 }
 0x9a3   : > { %5042 = vmatpush3.bf16.msra.mxu1 %v6658_v29  ;;  %5023 = vmatprep.subr.bf16.mxu0 %v5885_v11 }
 0x9a4   : > { %5043 = vmatprep.subr.bf16.mxu1 %v5885_v11 }
 0x9a6   : > { %5024 = vmatpush3.bf16.msra.mxu0 %v6667_v30 }
 0x9a7   : > { %5044 = vmatpush3.bf16.msra.mxu1 %v6667_v30  ;;  %5049 = vmatprep.subr.bf16.mxu0 %v5885_v11 }
 0x9a8   : > { %5069 = vmatprep.subr.bf16.mxu1 %v5885_v11 }
 0xa5c   : > { %v1575_v18 = vpop.f32.mrb[44].mxu0 }
 0xa5d   : > { %v1626_v55 = vadd.f32 %v1624_v13, %v1575_v18  ;;  %v1617_v56 = vpop.f32.mrb[44].mxu1  ;;  %v4987_v57 = vpop.f32.mrb[45].mxu0 }
 0xa5e   : > { %v1640_v58 = vadd.f32 %v1638_v16, %v1617_v56  ;;  %v5007_v59 = vpop.f32.mrb[45].mxu1  ;;  %v1578_v60 = vpop.f32.mrb[46].mxu0 }
 0xa5f   : > { %v6896_v61 = vadd.f32 %v1626_v55, %v6057_v21  ;;  %v1627_v62 = vadd.f32 %v1625_v51, %v1578_v60  ;;  %v1620_v63 = vpop.f32.mrb[46].mxu1  ;;  %v4988_v0 = vpop.f32.mrb[47].mxu0 }
 0xa60   : > { %v6899_v1 = vadd.f32 %v1640_v58, %v6059_v22  ;;  %v1641_v2 = vadd.f32 %v1639_v54, %v1620_v63  ;;  %v5008_v3 = vpop.f32.mrb[47].mxu1 }
 0xa61   : > { %vm1630_vm8 = vcmp.ge.f32.partialorder %v6896_v61, 1.0  ;;  %v6903_v5 = vadd.f32 %v6053_v19, %v1627_v62 }
 0xa62   : > { %vm1644_vm9 = vcmp.ge.f32.partialorder %v6899_v1, 1.0  ;;  %v6907_v6 = vadd.f32 %v6055_v20, %v1641_v2  ;;  %v3859_v25 = vsel %vm1630_vm8, 1.0, %v5885_v11 }
 0xa63   : > { %vm1631_vm10 = vcmp.ge.f32.partialorder %v6903_v5, 1.0  ;;  %v6912_v26 = vadd.f32 %v3859_v25, %v6838_v12  ;;  %v1736_v31 = vsub.f32 %v6896_v61, %v3859_v25  ;;  %v3861_v28 = vsel %vm1644_vm9, 1.0, %v5885_v11 }
 0xa64   : > { %vm3863_vm11 = vmpackc.low %vm1631_vm10, %vm1630_vm8  ;;  %vm1645_vm12 = vcmp.ge.f32.partialorder %v6907_v6, 1.0  ;;  %v6918_v32 = vadd.f32 %v3861_v28, %v6844_v15  ;;  %v1750_v33 = vsub.f32 %v6899_v1, %v3861_v28  ;;  %v3860_v34 = vsel %vm1631_vm10, 1.0, %v5885_v11 }
 0xa65   : > { %vm3865_vm13 = vmpackc.low %vm1645_vm12, %vm1644_vm9  ;;  %5026 = vmatmul.mubr.msk.bf16.vlgmr.msra.gmra.mrb[48].mxu0 %vm3863_vm11, %v5887_v23  ;;  %v6924_v35 = vadd.f32 %v3860_v34, %v6850_v17  ;;  %v1737_v36 = vsub.f32 %v6903_v5, %v3860_v34  ;;  %v3862_v37 = vsel %vm1645_vm12, 1.0, %v5885_v11 }
 0xa66   : > { %5046 = vmatmul.mubr.msk.bf16.vlgmr.msra.gmra.mrb[48].mxu1 %vm3865_vm13, %v5887_v23  ;;  %5050 = vmatpush3.bf16.msra.mxu0 %v6596_v4  ;;  %v6931_v38 = vadd.f32 %v3862_v37, %v6857_v53  ;;  %v1751_v39 = vsub.f32 %v6907_v6, %v3862_v37 }
 0xa67   : > { %5070 = vmatpush3.bf16.msra.mxu1 %v6596_v4  ;;  %5051 = vmatprep.subr.bf16.mxu0 %v5885_v11 }
 0xa68   : > { %5071 = vmatprep.subr.bf16.mxu1 %v5885_v11  ;;  %5065 = vmatprep.mubr.msk.bf16.mxu0 %vm5886_vm1, %v5885_v11 }
 0xa69   : > { %5085 = vmatprep.mubr.msk.bf16.mxu1 %vm5886_vm1, %v5885_v11 }
 0xa6a   : > { %5052 = vmatpush3.bf16.msra.mxu0 %v6613_v7 }
 0xa6b   : > { %5072 = vmatpush3.bf16.msra.mxu1 %v6613_v7  ;;  %5053 = vmatprep.subr.bf16.mxu0 %v5885_v11 }
 0xa6c   : > { %5073 = vmatprep.subr.bf16.mxu1 %v5885_v11 }
 0xa6e   : > { %5054 = vmatpush3.bf16.msra.mxu0 %v6622_v9 }
 0xa6f   : > { %5074 = vmatpush3.bf16.msra.mxu1 %v6622_v9  ;;  %5055 = vmatprep.subr.bf16.mxu0 %v5885_v11 }
 0xa70   : > { %5075 = vmatprep.subr.bf16.mxu1 %v5885_v11 }
 0xa72   : > { %5056 = vmatpush3.bf16.msra.mxu0 %v6631_v10 }
 0xa73   : > { %5076 = vmatpush3.bf16.msra.mxu1 %v6631_v10  ;;  %5057 = vmatprep.subr.bf16.mxu0 %v5885_v11 }
 0xa74   : > { %5077 = vmatprep.subr.bf16.mxu1 %v5885_v11 }
 0xa76   : > { %5058 = vmatpush3.bf16.msra.mxu0 %v6640_v27 }
 0xa77   : > { %5078 = vmatpush3.bf16.msra.mxu1 %v6640_v27  ;;  %5059 = vmatprep.subr.bf16.mxu0 %v5885_v11 }
 0xa78   : > { %5079 = vmatprep.subr.bf16.mxu1 %v5885_v11 }
 0xa7a   : > { %5060 = vmatpush3.bf16.msra.mxu0 %v6649_v24 }
 0xa7b   : > { %5080 = vmatpush3.bf16.msra.mxu1 %v6649_v24  ;;  %5061 = vmatprep.subr.bf16.mxu0 %v5885_v11 }
 0xa7c   : > { %5081 = vmatprep.subr.bf16.mxu1 %v5885_v11 }
 0xa7e   : > { %5062 = vmatpush3.bf16.msra.mxu0 %v6658_v29 }
 0xa7f   : > { %5082 = vmatpush3.bf16.msra.mxu1 %v6658_v29  ;;  %5063 = vmatprep.subr.bf16.mxu0 %v5885_v11 }
 0xa80   : > { %5083 = vmatprep.subr.bf16.mxu1 %v5885_v11 }
 0xa82   : > { %5064 = vmatpush3.bf16.msra.mxu0 %v6667_v30 }
 0xa83   : > { %5084 = vmatpush3.bf16.msra.mxu1 %v6667_v30  ;;  %5089 = vmatprep.subr.bf16.mxu0 %v5885_v11 }
 0xa84   : > { %5109 = vmatprep.subr.bf16.mxu1 %v5885_v11 }
 0xb38   : > { %v1687_v40 = vpop.f32.mrb[48].mxu0 }
 0xb39   : > { %v1738_v41 = vadd.f32 %v1736_v31, %v1687_v40  ;;  %v1729_v42 = vpop.f32.mrb[48].mxu1  ;;  %v5027_v43 = vpop.f32.mrb[49].mxu0 }
 0xb3a   : > { %v1752_v44 = vadd.f32 %v1750_v33, %v1729_v42  ;;  %v5047_v45 = vpop.f32.mrb[49].mxu1  ;;  %v1690_v46 = vpop.f32.mrb[50].mxu0 }
 0xb3b   : > { %v6970_v47 = vadd.f32 %v1738_v41, %v6057_v21  ;;  %v1739_v48 = vadd.f32 %v1737_v36, %v1690_v46  ;;  %v1732_v49 = vpop.f32.mrb[50].mxu1  ;;  %v5028_v8 = vpop.f32.mrb[51].mxu0 }
 0xb3c   : > { %v6973_v12 = vadd.f32 %v1752_v44, %v6059_v22  ;;  %v1753_v13 = vadd.f32 %v1751_v39, %v1732_v49  ;;  %v5048_v14 = vpop.f32.mrb[51].mxu1 }
 0xb3d   : > { %vm1742_vm14 = vcmp.ge.f32.partialorder %v6970_v47, 1.0  ;;  %v6977_v15 = vadd.f32 %v6053_v19, %v1739_v48 }
 0xb3e   : > { %vm1756_vm15 = vcmp.ge.f32.partialorder %v6973_v12, 1.0  ;;  %v6981_v16 = vadd.f32 %v6055_v20, %v1753_v13  ;;  %v3867_v50 = vsel %vm1742_vm14, 1.0, %v5885_v11 }
 0xb3f   : > { %vm1743_vm0 = vcmp.ge.f32.partialorder %v6977_v15, 1.0  ;;  %v6986_v17 = vadd.f32 %v3867_v50, %v6912_v26  ;;  %v1848_v51 = vsub.f32 %v6970_v47, %v3867_v50  ;;  %v3869_v52 = vsel %vm1756_vm15, 1.0, %v5885_v11 }
 0xb40   : > { %vm3871_vm2 = vmpackc.low %vm1743_vm0, %vm1742_vm14  ;;  %vm1757_vm3 = vcmp.ge.f32.partialorder %v6981_v16, 1.0  ;;  %v6992_v53 = vadd.f32 %v3869_v52, %v6918_v32  ;;  %v1862_v54 = vsub.f32 %v6973_v12, %v3869_v52  ;;  %v3868_v18 = vsel %vm1743_vm0, 1.0, %v5885_v11 }
 0xb41   : > { %vm3873_vm4 = vmpackc.low %vm1757_vm3, %vm1756_vm15  ;;  %5066 = vmatmul.mubr.msk.bf16.vlgmr.msra.gmra.mrb[52].mxu0 %vm3871_vm2, %v5887_v23  ;;  %v6998_v55 = vadd.f32 %v3868_v18, %v6924_v35  ;;  %v1849_v56 = vsub.f32 %v6977_v15, %v3868_v18  ;;  %v3870_v57 = vsel %vm1757_vm3, 1.0, %v5885_v11 }
 0xb42   : > { %5086 = vmatmul.mubr.msk.bf16.vlgmr.msra.gmra.mrb[52].mxu1 %vm3873_vm4, %v5887_v23  ;;  %5090 = vmatpush3.bf16.msra.mxu0 %v6596_v4  ;;  %v7005_v58 = vadd.f32 %v3870_v57, %v6931_v38  ;;  %v1863_v59 = vsub.f32 %v6981_v16, %v3870_v57 }
 0xb43   : > { %5110 = vmatpush3.bf16.msra.mxu1 %v6596_v4  ;;  %5091 = vmatprep.subr.bf16.mxu0 %v5885_v11 }
 0xb44   : > { %5111 = vmatprep.subr.bf16.mxu1 %v5885_v11  ;;  %5105 = vmatprep.mubr.msk.bf16.mxu0 %vm5886_vm1, %v5885_v11 }
 0xb45   : > { %5125 = vmatprep.mubr.msk.bf16.mxu1 %vm5886_vm1, %v5885_v11 }
 0xb46   : > { %5092 = vmatpush3.bf16.msra.mxu0 %v6613_v7 }
 0xb47   : > { %5112 = vmatpush3.bf16.msra.mxu1 %v6613_v7  ;;  %5093 = vmatprep.subr.bf16.mxu0 %v5885_v11 }
 0xb48   : > { %5113 = vmatprep.subr.bf16.mxu1 %v5885_v11 }
 0xb4a   : > { %5094 = vmatpush3.bf16.msra.mxu0 %v6622_v9 }
 0xb4b   : > { %5114 = vmatpush3.bf16.msra.mxu1 %v6622_v9  ;;  %5095 = vmatprep.subr.bf16.mxu0 %v5885_v11 }
 0xb4c   : > { %5115 = vmatprep.subr.bf16.mxu1 %v5885_v11 }
 0xb4e   : > { %5096 = vmatpush3.bf16.msra.mxu0 %v6631_v10 }
 0xb4f   : > { %5116 = vmatpush3.bf16.msra.mxu1 %v6631_v10  ;;  %5097 = vmatprep.subr.bf16.mxu0 %v5885_v11 }
 0xb50   : > { %5117 = vmatprep.subr.bf16.mxu1 %v5885_v11 }
 0xb52   : > { %5098 = vmatpush3.bf16.msra.mxu0 %v6640_v27 }
 0xb53   : > { %5118 = vmatpush3.bf16.msra.mxu1 %v6640_v27  ;;  %5099 = vmatprep.subr.bf16.mxu0 %v5885_v11 }
 0xb54   : > { %5119 = vmatprep.subr.bf16.mxu1 %v5885_v11 }
 0xb56   : > { %5100 = vmatpush3.bf16.msra.mxu0 %v6649_v24 }
 0xb57   : > { %5120 = vmatpush3.bf16.msra.mxu1 %v6649_v24  ;;  %5101 = vmatprep.subr.bf16.mxu0 %v5885_v11 }
 0xb58   : > { %5121 = vmatprep.subr.bf16.mxu1 %v5885_v11 }
 0xb5a   : > { %5102 = vmatpush3.bf16.msra.mxu0 %v6658_v29 }
 0xb5b   : > { %5122 = vmatpush3.bf16.msra.mxu1 %v6658_v29  ;;  %5103 = vmatprep.subr.bf16.mxu0 %v5885_v11 }
 0xb5c   : > { %5123 = vmatprep.subr.bf16.mxu1 %v5885_v11 }
 0xb5e   : > { %5104 = vmatpush3.bf16.msra.mxu0 %v6667_v30 }
 0xb5f   : > { %5124 = vmatpush3.bf16.msra.mxu1 %v6667_v30  ;;  %5129 = vmatprep.subr.bf16.mxu0 %v5885_v11 }
 0xb60   : > { %5149 = vmatprep.subr.bf16.mxu1 %v5885_v11 }
 0xc14   : > { %v1799_v60 = vpop.f32.mrb[52].mxu0 }
 0xc15   : > { %v1850_v61 = vadd.f32 %v1848_v51, %v1799_v60  ;;  %v1841_v62 = vpop.f32.mrb[52].mxu1  ;;  %v5067_v63 = vpop.f32.mrb[53].mxu0 }
 0xc16   : > { %v1864_v0 = vadd.f32 %v1862_v54, %v1841_v62  ;;  %v5087_v1 = vpop.f32.mrb[53].mxu1  ;;  %v1802_v2 = vpop.f32.mrb[54].mxu0 }
 0xc17   : > { %v7044_v3 = vadd.f32 %v1850_v61, %v6057_v21  ;;  %v1851_v5 = vadd.f32 %v1849_v56, %v1802_v2  ;;  %v1844_v6 = vpop.f32.mrb[54].mxu1  ;;  %v5068_v25 = vpop.f32.mrb[55].mxu0 }
 0xc18   : > { %v7047_v26 = vadd.f32 %v1864_v0, %v6059_v22  ;;  %v1865_v31 = vadd.f32 %v1863_v59, %v1844_v6  ;;  %v5088_v28 = vpop.f32.mrb[55].mxu1 }
 0xc19   : > { %vm1854_vm5 = vcmp.ge.f32.partialorder %v7044_v3, 1.0  ;;  %v7051_v32 = vadd.f32 %v6053_v19, %v1851_v5 }
 0xc1a   : > { %vm1868_vm6 = vcmp.ge.f32.partialorder %v7047_v26, 1.0  ;;  %v7055_v33 = vadd.f32 %v6055_v20, %v1865_v31  ;;  %v3875_v34 = vsel %vm1854_vm5, 1.0, %v5885_v11 }
 0xc1b   : > { %vm1855_vm7 = vcmp.ge.f32.partialorder %v7051_v32, 1.0  ;;  %v7060_v35 = vadd.f32 %v3875_v34, %v6986_v17  ;;  %v1960_v36 = vsub.f32 %v7044_v3, %v3875_v34  ;;  %v3877_v37 = vsel %vm1868_vm6, 1.0, %v5885_v11 }
 0xc1c   : > { %vm3879_vm8 = vmpackc.low %vm1855_vm7, %vm1854_vm5  ;;  %vm1869_vm9 = vcmp.ge.f32.partialorder %v7055_v33, 1.0  ;;  %v7066_v38 = vadd.f32 %v3877_v37, %v6992_v53  ;;  %v1974_v39 = vsub.f32 %v7047_v26, %v3877_v37  ;;  %v3876_v40 = vsel %vm1855_vm7, 1.0, %v5885_v11 }
 0xc1d   : > { %vm3881_vm10 = vmpackc.low %vm1869_vm9, %vm1868_vm6  ;;  %5106 = vmatmul.mubr.msk.bf16.vlgmr.msra.gmra.mrb[56].mxu0 %vm3879_vm8, %v5887_v23  ;;  %v7072_v41 = vadd.f32 %v3876_v40, %v6998_v55  ;;  %v1961_v42 = vsub.f32 %v7051_v32, %v3876_v40  ;;  %v3878_v43 = vsel %vm1869_vm9, 1.0, %v5885_v11 }
 0xc1e   : > { %5126 = vmatmul.mubr.msk.bf16.vlgmr.msra.gmra.mrb[56].mxu1 %vm3881_vm10, %v5887_v23  ;;  %5130 = vmatpush3.bf16.msra.mxu0 %v6596_v4  ;;  %v7079_v44 = vadd.f32 %v3878_v43, %v7005_v58  ;;  %v1975_v45 = vsub.f32 %v7055_v33, %v3878_v43 }
 0xc1f   : > { %5150 = vmatpush3.bf16.msra.mxu1 %v6596_v4  ;;  %5131 = vmatprep.subr.bf16.mxu0 %v5885_v11 }
 0xc20   : > { %5151 = vmatprep.subr.bf16.mxu1 %v5885_v11  ;;  %5145 = vmatprep.mubr.msk.bf16.mxu0 %vm5886_vm1, %v5885_v11 }
 0xc21   : > { %5165 = vmatprep.mubr.msk.bf16.mxu1 %vm5886_vm1, %v5885_v11 }
 0xc22   : > { %5132 = vmatpush3.bf16.msra.mxu0 %v6613_v7 }
 0xc23   : > { %5152 = vmatpush3.bf16.msra.mxu1 %v6613_v7  ;;  %5133 = vmatprep.subr.bf16.mxu0 %v5885_v11 }
 0xc24   : > { %5153 = vmatprep.subr.bf16.mxu1 %v5885_v11 }
 0xc26   : > { %5134 = vmatpush3.bf16.msra.mxu0 %v6622_v9 }
 0xc27   : > { %5154 = vmatpush3.bf16.msra.mxu1 %v6622_v9  ;;  %5135 = vmatprep.subr.bf16.mxu0 %v5885_v11 }
 0xc28   : > { %5155 = vmatprep.subr.bf16.mxu1 %v5885_v11 }
 0xc2a   : > { %5136 = vmatpush3.bf16.msra.mxu0 %v6631_v10 }
 0xc2b   : > { %5156 = vmatpush3.bf16.msra.mxu1 %v6631_v10  ;;  %5137 = vmatprep.subr.bf16.mxu0 %v5885_v11 }
 0xc2c   : > { %5157 = vmatprep.subr.bf16.mxu1 %v5885_v11 }
 0xc2e   : > { %5138 = vmatpush3.bf16.msra.mxu0 %v6640_v27 }
 0xc2f   : > { %5158 = vmatpush3.bf16.msra.mxu1 %v6640_v27  ;;  %5139 = vmatprep.subr.bf16.mxu0 %v5885_v11 }
 0xc30   : > { %5159 = vmatprep.subr.bf16.mxu1 %v5885_v11 }
 0xc32   : > { %5140 = vmatpush3.bf16.msra.mxu0 %v6649_v24 }
 0xc33   : > { %5160 = vmatpush3.bf16.msra.mxu1 %v6649_v24  ;;  %5141 = vmatprep.subr.bf16.mxu0 %v5885_v11 }
 0xc34   : > { %5161 = vmatprep.subr.bf16.mxu1 %v5885_v11 }
 0xc36   : > { %5142 = vmatpush3.bf16.msra.mxu0 %v6658_v29 }
 0xc37   : > { %5162 = vmatpush3.bf16.msra.mxu1 %v6658_v29  ;;  %5143 = vmatprep.subr.bf16.mxu0 %v5885_v11 }
 0xc38   : > { %5163 = vmatprep.subr.bf16.mxu1 %v5885_v11 }
 0xc3a   : > { %5144 = vmatpush3.bf16.msra.mxu0 %v6667_v30 }
 0xc3b   : > { %5164 = vmatpush3.bf16.msra.mxu1 %v6667_v30  ;;  %5169 = vmatprep.subr.bf16.mxu0 %v5885_v11 }
 0xc3c   : > { %5189 = vmatprep.subr.bf16.mxu1 %v5885_v11 }
 0xcf0   : > { %v1911_v46 = vpop.f32.mrb[56].mxu0 }
 0xcf1   : > { %v1962_v47 = vadd.f32 %v1960_v36, %v1911_v46  ;;  %v1953_v48 = vpop.f32.mrb[56].mxu1  ;;  %v5107_v49 = vpop.f32.mrb[57].mxu0  ;;  %v7254_v46 = vld [vmem:[%s8301_s2 + $0x10] sm:$0xff]  }
 0xcf2   : > { %v1976_v8 = vadd.f32 %v1974_v39, %v1953_v48  ;;  %v5127_v12 = vpop.f32.mrb[57].mxu1  ;;  %v1914_v13 = vpop.f32.mrb[58].mxu0  ;;  %v7272_v48 = vld [vmem:[%s8301_s2 + $0x20] sm:$0xff]   ;;  %v7281_v49 = vld [vmem:[%s8301_s2 + $0x28] sm:$0xff]  }
 0xcf3   : > { %v7118_v14 = vadd.f32 %v1962_v47, %v6057_v21  ;;  %v1963_v15 = vadd.f32 %v1961_v42, %v1914_v13  ;;  %v1956_v16 = vpop.f32.mrb[58].mxu1  ;;  %v5108_v50 = vpop.f32.mrb[59].mxu0  ;;  %v7228_v42 = vld [vmem:[%s8301_s2] sm:$0xff]   ;;  %v7263_v47 = vld [vmem:[%s8301_s2 + $0x18] sm:$0xff]  }
 0xcf4   : > { %v7121_v17 = vadd.f32 %v1976_v8, %v6059_v22  ;;  %v1977_v51 = vadd.f32 %v1975_v45, %v1956_v16  ;;  %v5128_v52 = vpop.f32.mrb[59].mxu1  ;;  %v7245_v45 = vld [vmem:[%s8301_s2 + $0x8] sm:$0xff]   ;;  %v7290_v8 = vld [vmem:[%s8301_s2 + $0x30] sm:$0xff]   ;;  %v7299_v12 = vld [vmem:[%s8301_s2 + $0x38] sm:$0xff]  }
 0xcf5   : > { %vm1966_vm11 = vcmp.ge.f32.partialorder %v7118_v14, 1.0  ;;  %v7125_v53 = vadd.f32 %v6053_v19, %v1963_v15 }
 0xcf6   : > { %vm1980_vm12 = vcmp.ge.f32.partialorder %v7121_v17, 1.0  ;;  %v7129_v54 = vadd.f32 %v6055_v20, %v1977_v51  ;;  %v3883_v18 = vsel %vm1966_vm11, 1.0, %v5885_v11 }
 0xcf7   : > { %vm1967_vm13 = vcmp.ge.f32.partialorder %v7125_v53, 1.0  ;;  %v7134_v55 = vadd.f32 %v3883_v18, %v7060_v35  ;;  %v2072_v56 = vsub.f32 %v7118_v14, %v3883_v18  ;;  %v3885_v57 = vsel %vm1980_vm12, 1.0, %v5885_v11 }
 0xcf8   : > { %vm3887_vm14 = vmpackc.low %vm1967_vm13, %vm1966_vm11  ;;  %vm1981_vm15 = vcmp.ge.f32.partialorder %v7129_v54, 1.0  ;;  %v7140_v58 = vadd.f32 %v3885_v57, %v7066_v38  ;;  %v2086_v59 = vsub.f32 %v7121_v17, %v3885_v57  ;;  %v3884_v60 = vsel %vm1967_vm13, 1.0, %v5885_v11 }
 0xcf9   : > { %vm3889_vm0 = vmpackc.low %vm1981_vm15, %vm1980_vm12  ;;  %5146 = vmatmul.mubr.msk.bf16.vlgmr.msra.gmra.mrb[60].mxu0 %vm3887_vm14, %v5887_v23  ;;  %v7146_v61 = vadd.f32 %v3884_v60, %v7072_v41  ;;  %v2073_v62 = vsub.f32 %v7125_v53, %v3884_v60  ;;  %v3886_v63 = vsel %vm1981_vm15, 1.0, %v5885_v11 }
 0xcfa   : > { %5166 = vmatmul.mubr.msk.bf16.vlgmr.msra.gmra.mrb[60].mxu1 %vm3889_vm0, %v5887_v23  ;;  %5170 = vmatpush3.bf16.msra.mxu0 %v6596_v4  ;;  %v7153_v0 = vadd.f32 %v3886_v63, %v7079_v44  ;;  %v2087_v1 = vsub.f32 %v7129_v54, %v3886_v63 }
 0xcfb   : > { %5190 = vmatpush3.bf16.msra.mxu1 %v6596_v4  ;;  %5171 = vmatprep.subr.bf16.mxu0 %v5885_v11 }
 0xcfc   : > { %5191 = vmatprep.subr.bf16.mxu1 %v5885_v11  ;;  %5185 = vmatprep.mubr.msk.bf16.mxu0 %vm5886_vm1, %v5885_v11 }
 0xcfd   : > { %5205 = vmatprep.mubr.msk.bf16.mxu1 %vm5886_vm1, %v5885_v11 }
 0xcfe   : > { %5172 = vmatpush3.bf16.msra.mxu0 %v6613_v7 }
 0xcff   : > { %5192 = vmatpush3.bf16.msra.mxu1 %v6613_v7  ;;  %5173 = vmatprep.subr.bf16.mxu0 %v5885_v11 }
 0xd00   : > { %5193 = vmatprep.subr.bf16.mxu1 %v5885_v11 }
 0xd02   : > { %5174 = vmatpush3.bf16.msra.mxu0 %v6622_v9 }
 0xd03   : > { %5194 = vmatpush3.bf16.msra.mxu1 %v6622_v9  ;;  %5175 = vmatprep.subr.bf16.mxu0 %v5885_v11 }
 0xd04   : > { %5195 = vmatprep.subr.bf16.mxu1 %v5885_v11 }
 0xd06   : > { %5176 = vmatpush3.bf16.msra.mxu0 %v6631_v10 }
 0xd07   : > { %5196 = vmatpush3.bf16.msra.mxu1 %v6631_v10  ;;  %5177 = vmatprep.subr.bf16.mxu0 %v5885_v11 }
 0xd08   : > { %5197 = vmatprep.subr.bf16.mxu1 %v5885_v11 }
 0xd0a   : > { %5178 = vmatpush3.bf16.msra.mxu0 %v6640_v27 }
 0xd0b   : > { %5198 = vmatpush3.bf16.msra.mxu1 %v6640_v27  ;;  %5179 = vmatprep.subr.bf16.mxu0 %v5885_v11 }
 0xd0c   : > { %5199 = vmatprep.subr.bf16.mxu1 %v5885_v11 }
 0xd0e   : > { %5180 = vmatpush3.bf16.msra.mxu0 %v6649_v24 }
 0xd0f   : > { %5200 = vmatpush3.bf16.msra.mxu1 %v6649_v24  ;;  %5181 = vmatprep.subr.bf16.mxu0 %v5885_v11 }
 0xd10   : > { %5201 = vmatprep.subr.bf16.mxu1 %v5885_v11 }
 0xd12   : > { %5182 = vmatpush3.bf16.msra.mxu0 %v6658_v29 }
 0xd13   : > { %5202 = vmatpush3.bf16.msra.mxu1 %v6658_v29  ;;  %5183 = vmatprep.subr.bf16.mxu0 %v5885_v11 }
 0xd14   : > { %5203 = vmatprep.subr.bf16.mxu1 %v5885_v11 }
 0xd16   : > { %5184 = vmatpush3.bf16.msra.mxu0 %v6667_v30 }
 0xd17   : > { %5204 = vmatpush3.bf16.msra.mxu1 %v6667_v30  ;;  %5209 = vmatprep.subr.bf16.mxu0 %v5885_v11 }
 0xd18   : > { %5229 = vmatprep.subr.bf16.mxu1 %v5885_v11 }
 0xdcc   : > { %v2023_v4 = vpop.f32.mrb[60].mxu0 }
 0xdcd   : > { %v2074_v7 = vadd.f32 %v2072_v56, %v2023_v4  ;;  %v2065_v9 = vpop.f32.mrb[60].mxu1  ;;  %v5147_v10 = vpop.f32.mrb[61].mxu0 }
 0xdce   : > { %v2088_v27 = vadd.f32 %v2086_v59, %v2065_v9  ;;  %v5167_v24 = vpop.f32.mrb[61].mxu1  ;;  %v2026_v2 = vpop.f32.mrb[62].mxu0 }
 0xdcf   : > { %v7192_v29 = vadd.f32 %v2074_v7, %v6057_v21  ;;  %v2075_v3 = vadd.f32 %v2073_v62, %v2026_v2  ;;  %v2068_v5 = vpop.f32.mrb[62].mxu1  ;;  %v5148_v6 = vpop.f32.mrb[63].mxu0 }
 0xdd0   : > { %v7195_v25 = vadd.f32 %v2088_v27, %v6059_v22  ;;  %v2089_v30 = vadd.f32 %v2087_v1, %v2068_v5  ;;  %v5168_v26 = vpop.f32.mrb[63].mxu1 }
 0xdd1   : > { %vm2078_vm2 = vcmp.ge.f32.partialorder %v7192_v29, 1.0  ;;  %v7199_v31 = vadd.f32 %v6053_v19, %v2075_v3 }
 0xdd2   : > { %vm2092_vm3 = vcmp.ge.f32.partialorder %v7195_v25, 1.0  ;;  %v7203_v28 = vadd.f32 %v6055_v20, %v2089_v30  ;;  %v3891_v32 = vsel %vm2078_vm2, 1.0, %v5885_v11 }
 0xdd3   : > { %vm2079_vm4 = vcmp.ge.f32.partialorder %v7199_v31, 1.0  ;;  %v7208_v33 = vadd.f32 %v3891_v32, %v7134_v55  ;;  %v2184_v34 = vsub.f32 %v7192_v29, %v3891_v32  ;;  %v3893_v35 = vsel %vm2092_vm3, 1.0, %v5885_v11 }
 0xdd4   : > { %vm3895_vm5 = vmpackc.low %vm2079_vm4, %vm2078_vm2  ;;  %vm2093_vm6 = vcmp.ge.f32.partialorder %v7203_v28, 1.0  ;;  %v7214_v36 = vadd.f32 %v3893_v35, %v7140_v58  ;;  %v2198_v37 = vsub.f32 %v7195_v25, %v3893_v35  ;;  %v3892_v38 = vsel %vm2079_vm4, 1.0, %v5885_v11 }
 0xdd5   : > { %vm3897_vm7 = vmpackc.low %vm2093_vm6, %vm2092_vm3  ;;  %5186 = vmatmul.mubr.msk.bf16.vlgmr.msra.gmra.mrb[64].mxu0 %vm3895_vm5, %v5887_v23  ;;  %v7220_v39 = vadd.f32 %v3892_v38, %v7146_v61  ;;  %v2185_v40 = vsub.f32 %v7199_v31, %v3892_v38  ;;  %v3894_v41 = vsel %vm2093_vm6, 1.0, %v5885_v11 }
 0xdd6   : > { %5206 = vmatmul.mubr.msk.bf16.vlgmr.msra.gmra.mrb[64].mxu1 %vm3897_vm7, %v5887_v23  ;;  %5210 = vmatpush3.bf16.msra.mxu0 %v7228_v42  ;;  %v7232_v43 = vadd.f32 %v3894_v41, %v7153_v0  ;;  %v2199_v44 = vsub.f32 %v7203_v28, %v3894_v41 }
 0xdd7   : > { %5230 = vmatpush3.bf16.msra.mxu1 %v7228_v42  ;;  %5211 = vmatprep.subr.bf16.mxu0 %v5885_v11 }
 0xdd8   : > { %5231 = vmatprep.subr.bf16.mxu1 %v5885_v11  ;;  %5225 = vmatprep.mubr.msk.bf16.mxu0 %vm5886_vm1, %v5885_v11 }
 0xdd9   : > { %5245 = vmatprep.mubr.msk.bf16.mxu1 %vm5886_vm1, %v5885_v11 }
 0xdda   : > { %5212 = vmatpush3.bf16.msra.mxu0 %v7245_v45 }
 0xddb   : > { %5232 = vmatpush3.bf16.msra.mxu1 %v7245_v45  ;;  %5213 = vmatprep.subr.bf16.mxu0 %v5885_v11 }
 0xddc   : > { %5233 = vmatprep.subr.bf16.mxu1 %v5885_v11 }
 0xdde   : > { %5214 = vmatpush3.bf16.msra.mxu0 %v7254_v46 }
 0xddf   : > { %5234 = vmatpush3.bf16.msra.mxu1 %v7254_v46  ;;  %5215 = vmatprep.subr.bf16.mxu0 %v5885_v11 }
 0xde0   : > { %5235 = vmatprep.subr.bf16.mxu1 %v5885_v11 }
 0xde2   : > { %5216 = vmatpush3.bf16.msra.mxu0 %v7263_v47 }
 0xde3   : > { %5236 = vmatpush3.bf16.msra.mxu1 %v7263_v47  ;;  %5217 = vmatprep.subr.bf16.mxu0 %v5885_v11 }
 0xde4   : > { %5237 = vmatprep.subr.bf16.mxu1 %v5885_v11 }
 0xde6   : > { %5218 = vmatpush3.bf16.msra.mxu0 %v7272_v48 }
 0xde7   : > { %5238 = vmatpush3.bf16.msra.mxu1 %v7272_v48  ;;  %5219 = vmatprep.subr.bf16.mxu0 %v5885_v11 }
 0xde8   : > { %5239 = vmatprep.subr.bf16.mxu1 %v5885_v11 }
 0xdea   : > { %5220 = vmatpush3.bf16.msra.mxu0 %v7281_v49 }
 0xdeb   : > { %5240 = vmatpush3.bf16.msra.mxu1 %v7281_v49  ;;  %5221 = vmatprep.subr.bf16.mxu0 %v5885_v11 }
 0xdec   : > { %5241 = vmatprep.subr.bf16.mxu1 %v5885_v11 }
 0xdee   : > { %5222 = vmatpush3.bf16.msra.mxu0 %v7290_v8 }
 0xdef   : > { %5242 = vmatpush3.bf16.msra.mxu1 %v7290_v8  ;;  %5223 = vmatprep.subr.bf16.mxu0 %v5885_v11 }
 0xdf0   : > { %5243 = vmatprep.subr.bf16.mxu1 %v5885_v11 }
 0xdf2   : > { %5224 = vmatpush3.bf16.msra.mxu0 %v7299_v12 }
 0xdf3   : > { %5244 = vmatpush3.bf16.msra.mxu1 %v7299_v12  ;;  %5249 = vmatprep.subr.bf16.mxu0 %v5885_v11 }
 0xdf4   : > { %5269 = vmatprep.subr.bf16.mxu1 %v5885_v11 }
 0xea8   : > { %v2135_v13 = vpop.f32.mrb[64].mxu0 }
 0xea9   : > { %v2186_v14 = vadd.f32 %v2184_v34, %v2135_v13  ;;  %v2177_v15 = vpop.f32.mrb[64].mxu1  ;;  %v5187_v16 = vpop.f32.mrb[65].mxu0 }
 0xeaa   : > { %v2200_v50 = vadd.f32 %v2198_v37, %v2177_v15  ;;  %v5207_v17 = vpop.f32.mrb[65].mxu1  ;;  %v2138_v51 = vpop.f32.mrb[66].mxu0 }
 0xeab   : > { %v7306_v52 = vadd.f32 %v2186_v14, %v6057_v21  ;;  %v2187_v53 = vadd.f32 %v2185_v40, %v2138_v51  ;;  %v2180_v54 = vpop.f32.mrb[66].mxu1  ;;  %v5188_v18 = vpop.f32.mrb[67].mxu0 }
 0xeac   : > { %v7309_v55 = vadd.f32 %v2200_v50, %v6059_v22  ;;  %v2201_v56 = vadd.f32 %v2199_v44, %v2180_v54  ;;  %v5208_v57 = vpop.f32.mrb[67].mxu1 }
 0xead   : > { %vm2190_vm8 = vcmp.ge.f32.partialorder %v7306_v52, 1.0  ;;  %v7313_v58 = vadd.f32 %v6053_v19, %v2187_v53 }
 0xeae   : > { %vm2204_vm9 = vcmp.ge.f32.partialorder %v7309_v55, 1.0  ;;  %v7317_v59 = vadd.f32 %v6055_v20, %v2201_v56  ;;  %v3899_v60 = vsel %vm2190_vm8, 1.0, %v5885_v11 }
 0xeaf   : > { %vm2191_vm10 = vcmp.ge.f32.partialorder %v7313_v58, 1.0  ;;  %v7322_v61 = vadd.f32 %v3899_v60, %v7208_v33  ;;  %v2296_v62 = vsub.f32 %v7306_v52, %v3899_v60  ;;  %v3901_v63 = vsel %vm2204_vm9, 1.0, %v5885_v11 }
 0xeb0   : > { %vm3903_vm11 = vmpackc.low %vm2191_vm10, %vm2190_vm8  ;;  %vm2205_vm12 = vcmp.ge.f32.partialorder %v7317_v59, 1.0  ;;  %v7328_v0 = vadd.f32 %v3901_v63, %v7214_v36  ;;  %v2310_v1 = vsub.f32 %v7309_v55, %v3901_v63  ;;  %v3900_v4 = vsel %vm2191_vm10, 1.0, %v5885_v11 }
 0xeb1   : > { %vm3905_vm13 = vmpackc.low %vm2205_vm12, %vm2204_vm9  ;;  %5226 = vmatmul.mubr.msk.bf16.vlgmr.msra.gmra.mrb[68].mxu0 %vm3903_vm11, %v5887_v23  ;;  %v7334_v7 = vadd.f32 %v3900_v4, %v7220_v39  ;;  %v2297_v9 = vsub.f32 %v7313_v58, %v3900_v4  ;;  %v3902_v10 = vsel %vm2205_vm12, 1.0, %v5885_v11 }
 0xeb2   : > { %5246 = vmatmul.mubr.msk.bf16.vlgmr.msra.gmra.mrb[68].mxu1 %vm3905_vm13, %v5887_v23  ;;  %5250 = vmatpush3.bf16.msra.mxu0 %v7228_v42  ;;  %v7341_v27 = vadd.f32 %v3902_v10, %v7232_v43  ;;  %v2311_v24 = vsub.f32 %v7317_v59, %v3902_v10 }
 0xeb3   : > { %5270 = vmatpush3.bf16.msra.mxu1 %v7228_v42  ;;  %5251 = vmatprep.subr.bf16.mxu0 %v5885_v11 }
 0xeb4   : > { %5271 = vmatprep.subr.bf16.mxu1 %v5885_v11  ;;  %5265 = vmatprep.mubr.msk.bf16.mxu0 %vm5886_vm1, %v5885_v11 }
 0xeb5   : > { %5285 = vmatprep.mubr.msk.bf16.mxu1 %vm5886_vm1, %v5885_v11 }
 0xeb6   : > { %5252 = vmatpush3.bf16.msra.mxu0 %v7245_v45 }
 0xeb7   : > { %5272 = vmatpush3.bf16.msra.mxu1 %v7245_v45  ;;  %5253 = vmatprep.subr.bf16.mxu0 %v5885_v11 }
 0xeb8   : > { %5273 = vmatprep.subr.bf16.mxu1 %v5885_v11 }
 0xeba   : > { %5254 = vmatpush3.bf16.msra.mxu0 %v7254_v46 }
 0xebb   : > { %5274 = vmatpush3.bf16.msra.mxu1 %v7254_v46  ;;  %5255 = vmatprep.subr.bf16.mxu0 %v5885_v11 }
 0xebc   : > { %5275 = vmatprep.subr.bf16.mxu1 %v5885_v11 }
 0xebe   : > { %5256 = vmatpush3.bf16.msra.mxu0 %v7263_v47 }
 0xebf   : > { %5276 = vmatpush3.bf16.msra.mxu1 %v7263_v47  ;;  %5257 = vmatprep.subr.bf16.mxu0 %v5885_v11 }
 0xec0   : > { %5277 = vmatprep.subr.bf16.mxu1 %v5885_v11 }
 0xec2   : > { %5258 = vmatpush3.bf16.msra.mxu0 %v7272_v48 }
 0xec3   : > { %5278 = vmatpush3.bf16.msra.mxu1 %v7272_v48  ;;  %5259 = vmatprep.subr.bf16.mxu0 %v5885_v11 }
 0xec4   : > { %5279 = vmatprep.subr.bf16.mxu1 %v5885_v11 }
 0xec6   : > { %5260 = vmatpush3.bf16.msra.mxu0 %v7281_v49 }
 0xec7   : > { %5280 = vmatpush3.bf16.msra.mxu1 %v7281_v49  ;;  %5261 = vmatprep.subr.bf16.mxu0 %v5885_v11 }
 0xec8   : > { %5281 = vmatprep.subr.bf16.mxu1 %v5885_v11 }
 0xeca   : > { %5262 = vmatpush3.bf16.msra.mxu0 %v7290_v8 }
 0xecb   : > { %5282 = vmatpush3.bf16.msra.mxu1 %v7290_v8  ;;  %5263 = vmatprep.subr.bf16.mxu0 %v5885_v11 }
 0xecc   : > { %5283 = vmatprep.subr.bf16.mxu1 %v5885_v11 }
 0xece   : > { %5264 = vmatpush3.bf16.msra.mxu0 %v7299_v12 }
 0xecf   : > { %5284 = vmatpush3.bf16.msra.mxu1 %v7299_v12  ;;  %5289 = vmatprep.subr.bf16.mxu0 %v5885_v11 }
 0xed0   : > { %5309 = vmatprep.subr.bf16.mxu1 %v5885_v11 }
 0xf84   : > { %v2247_v2 = vpop.f32.mrb[68].mxu0 }
 0xf85   : > { %v2298_v29 = vadd.f32 %v2296_v62, %v2247_v2  ;;  %v2289_v3 = vpop.f32.mrb[68].mxu1  ;;  %v5227_v5 = vpop.f32.mrb[69].mxu0 }
 0xf86   : > { %v2312_v6 = vadd.f32 %v2310_v1, %v2289_v3  ;;  %v5247_v25 = vpop.f32.mrb[69].mxu1  ;;  %v2250_v30 = vpop.f32.mrb[70].mxu0 }
 0xf87   : > { %v7380_v26 = vadd.f32 %v2298_v29, %v6057_v21  ;;  %v2299_v31 = vadd.f32 %v2297_v9, %v2250_v30  ;;  %v2292_v28 = vpop.f32.mrb[70].mxu1  ;;  %v5228_v32 = vpop.f32.mrb[71].mxu0 }
 0xf88   : > { %v7383_v33 = vadd.f32 %v2312_v6, %v6059_v22  ;;  %v2313_v34 = vadd.f32 %v2311_v24, %v2292_v28  ;;  %v5248_v35 = vpop.f32.mrb[71].mxu1 }
 0xf89   : > { %vm2302_vm14 = vcmp.ge.f32.partialorder %v7380_v26, 1.0  ;;  %v7387_v36 = vadd.f32 %v6053_v19, %v2299_v31 }
 0xf8a   : > { %vm2316_vm15 = vcmp.ge.f32.partialorder %v7383_v33, 1.0  ;;  %v7391_v37 = vadd.f32 %v6055_v20, %v2313_v34  ;;  %v3907_v38 = vsel %vm2302_vm14, 1.0, %v5885_v11 }
 0xf8b   : > { %vm2303_vm0 = vcmp.ge.f32.partialorder %v7387_v36, 1.0  ;;  %v7396_v39 = vadd.f32 %v3907_v38, %v7322_v61  ;;  %v2408_v40 = vsub.f32 %v7380_v26, %v3907_v38  ;;  %v3909_v41 = vsel %vm2316_vm15, 1.0, %v5885_v11 }
 0xf8c   : > { %vm3911_vm2 = vmpackc.low %vm2303_vm0, %vm2302_vm14  ;;  %vm2317_vm3 = vcmp.ge.f32.partialorder %v7391_v37, 1.0  ;;  %v7402_v43 = vadd.f32 %v3909_v41, %v7328_v0  ;;  %v2422_v44 = vsub.f32 %v7383_v33, %v3909_v41  ;;  %v3908_v13 = vsel %vm2303_vm0, 1.0, %v5885_v11 }
 0xf8d   : > { %vm3913_vm4 = vmpackc.low %vm2317_vm3, %vm2316_vm15  ;;  %5266 = vmatmul.mubr.msk.bf16.vlgmr.msra.gmra.mrb[72].mxu0 %vm3911_vm2, %v5887_v23  ;;  %v7408_v14 = vadd.f32 %v3908_v13, %v7334_v7  ;;  %v2409_v15 = vsub.f32 %v7387_v36, %v3908_v13  ;;  %v3910_v16 = vsel %vm2317_vm3, 1.0, %v5885_v11 }
 0xf8e   : > { %5286 = vmatmul.mubr.msk.bf16.vlgmr.msra.gmra.mrb[72].mxu1 %vm3913_vm4, %v5887_v23  ;;  %5290 = vmatpush3.bf16.msra.mxu0 %v7228_v42  ;;  %v7415_v50 = vadd.f32 %v3910_v16, %v7341_v27  ;;  %v2423_v17 = vsub.f32 %v7391_v37, %v3910_v16 }
 0xf8f   : > { %5310 = vmatpush3.bf16.msra.mxu1 %v7228_v42  ;;  %5291 = vmatprep.subr.bf16.mxu0 %v5885_v11 }
 0xf90   : > { %5311 = vmatprep.subr.bf16.mxu1 %v5885_v11  ;;  %5305 = vmatprep.mubr.msk.bf16.mxu0 %vm5886_vm1, %v5885_v11 }
 0xf91   : > { %5325 = vmatprep.mubr.msk.bf16.mxu1 %vm5886_vm1, %v5885_v11 }
 0xf92   : > { %5292 = vmatpush3.bf16.msra.mxu0 %v7245_v45 }
 0xf93   : > { %5312 = vmatpush3.bf16.msra.mxu1 %v7245_v45  ;;  %5293 = vmatprep.subr.bf16.mxu0 %v5885_v11 }
 0xf94   : > { %5313 = vmatprep.subr.bf16.mxu1 %v5885_v11 }
 0xf96   : > { %5294 = vmatpush3.bf16.msra.mxu0 %v7254_v46 }
 0xf97   : > { %5314 = vmatpush3.bf16.msra.mxu1 %v7254_v46  ;;  %5295 = vmatprep.subr.bf16.mxu0 %v5885_v11 }
 0xf98   : > { %5315 = vmatprep.subr.bf16.mxu1 %v5885_v11 }
 0xf9a   : > { %5296 = vmatpush3.bf16.msra.mxu0 %v7263_v47 }
 0xf9b   : > { %5316 = vmatpush3.bf16.msra.mxu1 %v7263_v47  ;;  %5297 = vmatprep.subr.bf16.mxu0 %v5885_v11 }
 0xf9c   : > { %5317 = vmatprep.subr.bf16.mxu1 %v5885_v11 }
 0xf9e   : > { %5298 = vmatpush3.bf16.msra.mxu0 %v7272_v48 }
 0xf9f   : > { %5318 = vmatpush3.bf16.msra.mxu1 %v7272_v48  ;;  %5299 = vmatprep.subr.bf16.mxu0 %v5885_v11 }
 0xfa0   : > { %5319 = vmatprep.subr.bf16.mxu1 %v5885_v11 }
 0xfa2   : > { %5300 = vmatpush3.bf16.msra.mxu0 %v7281_v49 }
 0xfa3   : > { %5320 = vmatpush3.bf16.msra.mxu1 %v7281_v49  ;;  %5301 = vmatprep.subr.bf16.mxu0 %v5885_v11 }
 0xfa4   : > { %5321 = vmatprep.subr.bf16.mxu1 %v5885_v11 }
 0xfa6   : > { %5302 = vmatpush3.bf16.msra.mxu0 %v7290_v8 }
 0xfa7   : > { %5322 = vmatpush3.bf16.msra.mxu1 %v7290_v8  ;;  %5303 = vmatprep.subr.bf16.mxu0 %v5885_v11 }
 0xfa8   : > { %5323 = vmatprep.subr.bf16.mxu1 %v5885_v11 }
 0xfaa   : > { %5304 = vmatpush3.bf16.msra.mxu0 %v7299_v12 }
 0xfab   : > { %5324 = vmatpush3.bf16.msra.mxu1 %v7299_v12  ;;  %5329 = vmatprep.subr.bf16.mxu0 %v5885_v11 }
 0xfac   : > { %5349 = vmatprep.subr.bf16.mxu1 %v5885_v11 }
0x1060   : > { %v2359_v51 = vpop.f32.mrb[72].mxu0 }
0x1061   : > { %v2410_v52 = vadd.f32 %v2408_v40, %v2359_v51  ;;  %v2401_v53 = vpop.f32.mrb[72].mxu1  ;;  %v5267_v54 = vpop.f32.mrb[73].mxu0 }
0x1062   : > { %v2424_v18 = vadd.f32 %v2422_v44, %v2401_v53  ;;  %v5287_v55 = vpop.f32.mrb[73].mxu1  ;;  %v2362_v56 = vpop.f32.mrb[74].mxu0 }
0x1063   : > { %v7454_v57 = vadd.f32 %v2410_v52, %v6057_v21  ;;  %v2411_v58 = vadd.f32 %v2409_v15, %v2362_v56  ;;  %v2404_v59 = vpop.f32.mrb[74].mxu1  ;;  %v5268_v60 = vpop.f32.mrb[75].mxu0 }
0x1064   : > { %v7457_v61 = vadd.f32 %v2424_v18, %v6059_v22  ;;  %v2425_v62 = vadd.f32 %v2423_v17, %v2404_v59  ;;  %v5288_v63 = vpop.f32.mrb[75].mxu1 }
0x1065   : > { %vm2414_vm5 = vcmp.ge.f32.partialorder %v7454_v57, 1.0  ;;  %v7461_v0 = vadd.f32 %v6053_v19, %v2411_v58 }
0x1066   : > { %vm2428_vm6 = vcmp.ge.f32.partialorder %v7457_v61, 1.0  ;;  %v7465_v1 = vadd.f32 %v6055_v20, %v2425_v62  ;;  %v3915_v4 = vsel %vm2414_vm5, 1.0, %v5885_v11 }
0x1067   : > { %vm2415_vm7 = vcmp.ge.f32.partialorder %v7461_v0, 1.0  ;;  %v7470_v7 = vadd.f32 %v3915_v4, %v7396_v39  ;;  %v2520_v9 = vsub.f32 %v7454_v57, %v3915_v4  ;;  %v3917_v10 = vsel %vm2428_vm6, 1.0, %v5885_v11 }
0x1068   : > { %vm3919_vm8 = vmpackc.low %vm2415_vm7, %vm2414_vm5  ;;  %vm2429_vm9 = vcmp.ge.f32.partialorder %v7465_v1, 1.0  ;;  %v7476_v27 = vadd.f32 %v3917_v10, %v7402_v43  ;;  %v2534_v24 = vsub.f32 %v7457_v61, %v3917_v10  ;;  %v3916_v2 = vsel %vm2415_vm7, 1.0, %v5885_v11 }
0x1069   : > { %vm3921_vm10 = vmpackc.low %vm2429_vm9, %vm2428_vm6  ;;  %5306 = vmatmul.mubr.msk.bf16.vlgmr.msra.gmra.mrb[76].mxu0 %vm3919_vm8, %v5887_v23  ;;  %v7482_v29 = vadd.f32 %v3916_v2, %v7408_v14  ;;  %v2521_v3 = vsub.f32 %v7461_v0, %v3916_v2  ;;  %v3918_v5 = vsel %vm2429_vm9, 1.0, %v5885_v11 }
0x106a   : > { %5326 = vmatmul.mubr.msk.bf16.vlgmr.msra.gmra.mrb[76].mxu1 %vm3921_vm10, %v5887_v23  ;;  %5330 = vmatpush3.bf16.msra.mxu0 %v7228_v42  ;;  %v7489_v6 = vadd.f32 %v3918_v5, %v7415_v50  ;;  %v2535_v25 = vsub.f32 %v7465_v1, %v3918_v5 }
0x106b   : > { %5350 = vmatpush3.bf16.msra.mxu1 %v7228_v42  ;;  %5331 = vmatprep.subr.bf16.mxu0 %v5885_v11 }
0x106c   : > { %5351 = vmatprep.subr.bf16.mxu1 %v5885_v11  ;;  %5345 = vmatprep.mubr.msk.bf16.mxu0 %vm5886_vm1, %v5885_v11 }
0x106d   : > { %5365 = vmatprep.mubr.msk.bf16.mxu1 %vm5886_vm1, %v5885_v11 }
0x106e   : > { %5332 = vmatpush3.bf16.msra.mxu0 %v7245_v45 }
0x106f   : > { %5352 = vmatpush3.bf16.msra.mxu1 %v7245_v45  ;;  %5333 = vmatprep.subr.bf16.mxu0 %v5885_v11 }
0x1070   : > { %5353 = vmatprep.subr.bf16.mxu1 %v5885_v11 }
0x1072   : > { %5334 = vmatpush3.bf16.msra.mxu0 %v7254_v46 }
0x1073   : > { %5354 = vmatpush3.bf16.msra.mxu1 %v7254_v46  ;;  %5335 = vmatprep.subr.bf16.mxu0 %v5885_v11 }
0x1074   : > { %5355 = vmatprep.subr.bf16.mxu1 %v5885_v11 }
0x1076   : > { %5336 = vmatpush3.bf16.msra.mxu0 %v7263_v47 }
0x1077   : > { %5356 = vmatpush3.bf16.msra.mxu1 %v7263_v47  ;;  %5337 = vmatprep.subr.bf16.mxu0 %v5885_v11 }
0x1078   : > { %5357 = vmatprep.subr.bf16.mxu1 %v5885_v11 }
0x107a   : > { %5338 = vmatpush3.bf16.msra.mxu0 %v7272_v48 }
0x107b   : > { %5358 = vmatpush3.bf16.msra.mxu1 %v7272_v48  ;;  %5339 = vmatprep.subr.bf16.mxu0 %v5885_v11 }
0x107c   : > { %5359 = vmatprep.subr.bf16.mxu1 %v5885_v11 }
0x107e   : > { %5340 = vmatpush3.bf16.msra.mxu0 %v7281_v49 }
0x107f   : > { %5360 = vmatpush3.bf16.msra.mxu1 %v7281_v49  ;;  %5341 = vmatprep.subr.bf16.mxu0 %v5885_v11 }
0x1080   : > { %5361 = vmatprep.subr.bf16.mxu1 %v5885_v11 }
0x1082   : > { %5342 = vmatpush3.bf16.msra.mxu0 %v7290_v8 }
0x1083   : > { %5362 = vmatpush3.bf16.msra.mxu1 %v7290_v8  ;;  %5343 = vmatprep.subr.bf16.mxu0 %v5885_v11 }
0x1084   : > { %5363 = vmatprep.subr.bf16.mxu1 %v5885_v11 }
0x1086   : > { %5344 = vmatpush3.bf16.msra.mxu0 %v7299_v12 }
0x1087   : > { %5364 = vmatpush3.bf16.msra.mxu1 %v7299_v12  ;;  %5369 = vmatprep.subr.bf16.mxu0 %v5885_v11 }
0x1088   : > { %5389 = vmatprep.subr.bf16.mxu1 %v5885_v11 }
0x113c   : > { %v2471_v30 = vpop.f32.mrb[76].mxu0 }
0x113d   : > { %v2522_v26 = vadd.f32 %v2520_v9, %v2471_v30  ;;  %v2513_v31 = vpop.f32.mrb[76].mxu1  ;;  %v5307_v28 = vpop.f32.mrb[77].mxu0 }
0x113e   : > { %v2536_v32 = vadd.f32 %v2534_v24, %v2513_v31  ;;  %v5327_v33 = vpop.f32.mrb[77].mxu1  ;;  %v2474_v34 = vpop.f32.mrb[78].mxu0 }
0x113f   : > { %v7528_v35 = vadd.f32 %v2522_v26, %v6057_v21  ;;  %v2523_v36 = vadd.f32 %v2521_v3, %v2474_v34  ;;  %v2516_v37 = vpop.f32.mrb[78].mxu1  ;;  %v5308_v38 = vpop.f32.mrb[79].mxu0 }
0x1140   : > { %v7531_v39 = vadd.f32 %v2536_v32, %v6059_v22  ;;  %v2537_v40 = vadd.f32 %v2535_v25, %v2516_v37  ;;  %v5328_v41 = vpop.f32.mrb[79].mxu1 }
0x1141   : > { %vm2526_vm11 = vcmp.ge.f32.partialorder %v7528_v35, 1.0  ;;  %v7535_v43 = vadd.f32 %v6053_v19, %v2523_v36 }
0x1142   : > { %vm2540_vm12 = vcmp.ge.f32.partialorder %v7531_v39, 1.0  ;;  %v7539_v44 = vadd.f32 %v6055_v20, %v2537_v40  ;;  %v3923_v13 = vsel %vm2526_vm11, 1.0, %v5885_v11 }
0x1143   : > { %vm2527_vm13 = vcmp.ge.f32.partialorder %v7535_v43, 1.0  ;;  %v7544_v14 = vadd.f32 %v3923_v13, %v7470_v7  ;;  %v2632_v15 = vsub.f32 %v7528_v35, %v3923_v13  ;;  %v3925_v16 = vsel %vm2540_vm12, 1.0, %v5885_v11 }
0x1144   : > { %vm3927_vm14 = vmpackc.low %vm2527_vm13, %vm2526_vm11  ;;  %vm2541_vm15 = vcmp.ge.f32.partialorder %v7539_v44, 1.0  ;;  %v7550_v50 = vadd.f32 %v3925_v16, %v7476_v27  ;;  %v2646_v17 = vsub.f32 %v7531_v39, %v3925_v16  ;;  %v3924_v51 = vsel %vm2527_vm13, 1.0, %v5885_v11 }
0x1145   : > { %vm3929_vm0 = vmpackc.low %vm2541_vm15, %vm2540_vm12  ;;  %5346 = vmatmul.mubr.msk.bf16.vlgmr.msra.gmra.mrb[80].mxu0 %vm3927_vm14, %v5887_v23  ;;  %v7556_v52 = vadd.f32 %v3924_v51, %v7482_v29  ;;  %v2633_v53 = vsub.f32 %v7535_v43, %v3924_v51  ;;  %v3926_v54 = vsel %vm2541_vm15, 1.0, %v5885_v11 }
0x1146   : > { %5366 = vmatmul.mubr.msk.bf16.vlgmr.msra.gmra.mrb[80].mxu1 %vm3929_vm0, %v5887_v23  ;;  %5370 = vmatpush3.bf16.msra.mxu0 %v7228_v42  ;;  %v7563_v18 = vadd.f32 %v3926_v54, %v7489_v6  ;;  %v2647_v55 = vsub.f32 %v7539_v44, %v3926_v54 }
0x1147   : > { %5390 = vmatpush3.bf16.msra.mxu1 %v7228_v42  ;;  %5371 = vmatprep.subr.bf16.mxu0 %v5885_v11 }
0x1148   : > { %5391 = vmatprep.subr.bf16.mxu1 %v5885_v11  ;;  %5385 = vmatprep.mubr.msk.bf16.mxu0 %vm5886_vm1, %v5885_v11 }
0x1149   : > { %5405 = vmatprep.mubr.msk.bf16.mxu1 %vm5886_vm1, %v5885_v11 }
0x114a   : > { %5372 = vmatpush3.bf16.msra.mxu0 %v7245_v45 }
0x114b   : > { %5392 = vmatpush3.bf16.msra.mxu1 %v7245_v45  ;;  %5373 = vmatprep.subr.bf16.mxu0 %v5885_v11 }
0x114c   : > { %5393 = vmatprep.subr.bf16.mxu1 %v5885_v11 }
0x114e   : > { %5374 = vmatpush3.bf16.msra.mxu0 %v7254_v46 }
0x114f   : > { %5394 = vmatpush3.bf16.msra.mxu1 %v7254_v46  ;;  %5375 = vmatprep.subr.bf16.mxu0 %v5885_v11 }
0x1150   : > { %5395 = vmatprep.subr.bf16.mxu1 %v5885_v11 }
0x1152   : > { %5376 = vmatpush3.bf16.msra.mxu0 %v7263_v47 }
0x1153   : > { %5396 = vmatpush3.bf16.msra.mxu1 %v7263_v47  ;;  %5377 = vmatprep.subr.bf16.mxu0 %v5885_v11 }
0x1154   : > { %5397 = vmatprep.subr.bf16.mxu1 %v5885_v11 }
0x1156   : > { %5378 = vmatpush3.bf16.msra.mxu0 %v7272_v48 }
0x1157   : > { %5398 = vmatpush3.bf16.msra.mxu1 %v7272_v48  ;;  %5379 = vmatprep.subr.bf16.mxu0 %v5885_v11 }
0x1158   : > { %5399 = vmatprep.subr.bf16.mxu1 %v5885_v11 }
0x115a   : > { %5380 = vmatpush3.bf16.msra.mxu0 %v7281_v49 }
0x115b   : > { %5400 = vmatpush3.bf16.msra.mxu1 %v7281_v49  ;;  %5381 = vmatprep.subr.bf16.mxu0 %v5885_v11 }
0x115c   : > { %5401 = vmatprep.subr.bf16.mxu1 %v5885_v11 }
0x115e   : > { %5382 = vmatpush3.bf16.msra.mxu0 %v7290_v8 }
0x115f   : > { %5402 = vmatpush3.bf16.msra.mxu1 %v7290_v8  ;;  %5383 = vmatprep.subr.bf16.mxu0 %v5885_v11 }
0x1160   : > { %5403 = vmatprep.subr.bf16.mxu1 %v5885_v11 }
0x1162   : > { %5384 = vmatpush3.bf16.msra.mxu0 %v7299_v12 }
0x1163   : > { %5404 = vmatpush3.bf16.msra.mxu1 %v7299_v12  ;;  %5409 = vmatprep.subr.bf16.mxu0 %v5885_v11 }
0x1164   : > { %5429 = vmatprep.subr.bf16.mxu1 %v5885_v11 }
0x1218   : > { %v2583_v56 = vpop.f32.mrb[80].mxu0 }
0x1219   : > { %v2634_v57 = vadd.f32 %v2632_v15, %v2583_v56  ;;  %v2625_v58 = vpop.f32.mrb[80].mxu1  ;;  %v5347_v59 = vpop.f32.mrb[81].mxu0 }
0x121a   : > { %v2648_v60 = vadd.f32 %v2646_v17, %v2625_v58  ;;  %v5367_v61 = vpop.f32.mrb[81].mxu1  ;;  %v2586_v62 = vpop.f32.mrb[82].mxu0 }
0x121b   : > { %v7602_v63 = vadd.f32 %v2634_v57, %v6057_v21  ;;  %v2635_v0 = vadd.f32 %v2633_v53, %v2586_v62  ;;  %v2628_v1 = vpop.f32.mrb[82].mxu1  ;;  %v5348_v4 = vpop.f32.mrb[83].mxu0 }
0x121c   : > { %v7605_v7 = vadd.f32 %v2648_v60, %v6059_v22  ;;  %v2649_v9 = vadd.f32 %v2647_v55, %v2628_v1  ;;  %v5368_v10 = vpop.f32.mrb[83].mxu1 }
0x121d   : > { %vm2638_vm2 = vcmp.ge.f32.partialorder %v7602_v63, 1.0  ;;  %v7609_v27 = vadd.f32 %v6053_v19, %v2635_v0 }
0x121e   : > { %vm2652_vm3 = vcmp.ge.f32.partialorder %v7605_v7, 1.0  ;;  %v7613_v24 = vadd.f32 %v6055_v20, %v2649_v9  ;;  %v3931_v2 = vsel %vm2638_vm2, 1.0, %v5885_v11 }
0x121f   : > { %vm2639_vm4 = vcmp.ge.f32.partialorder %v7609_v27, 1.0  ;;  %v7618_v29 = vadd.f32 %v3931_v2, %v7544_v14  ;;  %v2744_v3 = vsub.f32 %v7602_v63, %v3931_v2  ;;  %v3933_v5 = vsel %vm2652_vm3, 1.0, %v5885_v11 }
0x1220   : > { %vm3935_vm5 = vmpackc.low %vm2639_vm4, %vm2638_vm2  ;;  %vm2653_vm6 = vcmp.ge.f32.partialorder %v7613_v24, 1.0  ;;  %v7624_v6 = vadd.f32 %v3933_v5, %v7550_v50  ;;  %v2758_v25 = vsub.f32 %v7605_v7, %v3933_v5  ;;  %v3932_v30 = vsel %vm2639_vm4, 1.0, %v5885_v11 }
0x1221   : > { %vm3937_vm7 = vmpackc.low %vm2653_vm6, %vm2652_vm3  ;;  %5386 = vmatmul.mubr.msk.bf16.vlgmr.msra.gmra.mrb[84].mxu0 %vm3935_vm5, %v5887_v23  ;;  %v7630_v26 = vadd.f32 %v3932_v30, %v7556_v52  ;;  %v2745_v31 = vsub.f32 %v7609_v27, %v3932_v30  ;;  %v3934_v28 = vsel %vm2653_vm6, 1.0, %v5885_v11 }
0x1222   : > { %5406 = vmatmul.mubr.msk.bf16.vlgmr.msra.gmra.mrb[84].mxu1 %vm3937_vm7, %v5887_v23  ;;  %5410 = vmatpush3.bf16.msra.mxu0 %v7228_v42  ;;  %v7637_v32 = vadd.f32 %v3934_v28, %v7563_v18  ;;  %v2759_v33 = vsub.f32 %v7613_v24, %v3934_v28 }
0x1223   : > { %5430 = vmatpush3.bf16.msra.mxu1 %v7228_v42  ;;  %5411 = vmatprep.subr.bf16.mxu0 %v5885_v11 }
0x1224   : > { %5431 = vmatprep.subr.bf16.mxu1 %v5885_v11  ;;  %5425 = vmatprep.mubr.msk.bf16.mxu0 %vm5886_vm1, %v5885_v11 }
0x1225   : > { %5445 = vmatprep.mubr.msk.bf16.mxu1 %vm5886_vm1, %v5885_v11 }
0x1226   : > { %5412 = vmatpush3.bf16.msra.mxu0 %v7245_v45 }
0x1227   : > { %5432 = vmatpush3.bf16.msra.mxu1 %v7245_v45  ;;  %5413 = vmatprep.subr.bf16.mxu0 %v5885_v11 }
0x1228   : > { %5433 = vmatprep.subr.bf16.mxu1 %v5885_v11 }
0x122a   : > { %5414 = vmatpush3.bf16.msra.mxu0 %v7254_v46 }
0x122b   : > { %5434 = vmatpush3.bf16.msra.mxu1 %v7254_v46  ;;  %5415 = vmatprep.subr.bf16.mxu0 %v5885_v11 }
0x122c   : > { %5435 = vmatprep.subr.bf16.mxu1 %v5885_v11 }
0x122e   : > { %5416 = vmatpush3.bf16.msra.mxu0 %v7263_v47 }
0x122f   : > { %5436 = vmatpush3.bf16.msra.mxu1 %v7263_v47  ;;  %5417 = vmatprep.subr.bf16.mxu0 %v5885_v11 }
0x1230   : > { %5437 = vmatprep.subr.bf16.mxu1 %v5885_v11 }
0x1232   : > { %5418 = vmatpush3.bf16.msra.mxu0 %v7272_v48 }
0x1233   : > { %5438 = vmatpush3.bf16.msra.mxu1 %v7272_v48  ;;  %5419 = vmatprep.subr.bf16.mxu0 %v5885_v11 }
0x1234   : > { %5439 = vmatprep.subr.bf16.mxu1 %v5885_v11 }
0x1236   : > { %5420 = vmatpush3.bf16.msra.mxu0 %v7281_v49 }
0x1237   : > { %5440 = vmatpush3.bf16.msra.mxu1 %v7281_v49  ;;  %5421 = vmatprep.subr.bf16.mxu0 %v5885_v11 }
0x1238   : > { %5441 = vmatprep.subr.bf16.mxu1 %v5885_v11 }
0x123a   : > { %5422 = vmatpush3.bf16.msra.mxu0 %v7290_v8 }
0x123b   : > { %5442 = vmatpush3.bf16.msra.mxu1 %v7290_v8  ;;  %5423 = vmatprep.subr.bf16.mxu0 %v5885_v11 }
0x123c   : > { %5443 = vmatprep.subr.bf16.mxu1 %v5885_v11 }
0x123e   : > { %5424 = vmatpush3.bf16.msra.mxu0 %v7299_v12 }
0x123f   : > { %5444 = vmatpush3.bf16.msra.mxu1 %v7299_v12  ;;  %5449 = vmatprep.subr.bf16.mxu0 %v5885_v11 }
0x1240   : > { %5469 = vmatprep.subr.bf16.mxu1 %v5885_v11 }
0x12f4   : > { %v2695_v34 = vpop.f32.mrb[84].mxu0 }
0x12f5   : > { %v2746_v35 = vadd.f32 %v2744_v3, %v2695_v34  ;;  %v2737_v36 = vpop.f32.mrb[84].mxu1  ;;  %v5387_v37 = vpop.f32.mrb[85].mxu0 }
0x12f6   : > { %v2760_v38 = vadd.f32 %v2758_v25, %v2737_v36  ;;  %v5407_v39 = vpop.f32.mrb[85].mxu1  ;;  %v2698_v40 = vpop.f32.mrb[86].mxu0 }
0x12f7   : > { %v7676_v41 = vadd.f32 %v2746_v35, %v6057_v21  ;;  %v2747_v43 = vadd.f32 %v2745_v31, %v2698_v40  ;;  %v2740_v44 = vpop.f32.mrb[86].mxu1  ;;  %v5388_v13 = vpop.f32.mrb[87].mxu0 }
0x12f8   : > { %v7679_v14 = vadd.f32 %v2760_v38, %v6059_v22  ;;  %v2761_v15 = vadd.f32 %v2759_v33, %v2740_v44  ;;  %v5408_v16 = vpop.f32.mrb[87].mxu1 }
0x12f9   : > { %vm2750_vm8 = vcmp.ge.f32.partialorder %v7676_v41, 1.0  ;;  %v7683_v50 = vadd.f32 %v6053_v19, %v2747_v43 }
0x12fa   : > { %vm2764_vm9 = vcmp.ge.f32.partialorder %v7679_v14, 1.0  ;;  %v7687_v17 = vadd.f32 %v6055_v20, %v2761_v15  ;;  %v3939_v51 = vsel %vm2750_vm8, 1.0, %v5885_v11 }
0x12fb   : > { %vm2751_vm10 = vcmp.ge.f32.partialorder %v7683_v50, 1.0  ;;  %v7692_v52 = vadd.f32 %v3939_v51, %v7618_v29  ;;  %v2856_v53 = vsub.f32 %v7676_v41, %v3939_v51  ;;  %v3941_v54 = vsel %vm2764_vm9, 1.0, %v5885_v11 }
0x12fc   : > { %vm3943_vm11 = vmpackc.low %vm2751_vm10, %vm2750_vm8  ;;  %vm2765_vm12 = vcmp.ge.f32.partialorder %v7687_v17, 1.0  ;;  %v7698_v18 = vadd.f32 %v3941_v54, %v7624_v6  ;;  %v2870_v55 = vsub.f32 %v7679_v14, %v3941_v54  ;;  %v3940_v56 = vsel %vm2751_vm10, 1.0, %v5885_v11 }
0x12fd   : > { %vm3945_vm13 = vmpackc.low %vm2765_vm12, %vm2764_vm9  ;;  %5426 = vmatmul.mubr.msk.bf16.vlgmr.msra.gmra.mrb[88].mxu0 %vm3943_vm11, %v5887_v23  ;;  %v7704_v57 = vadd.f32 %v3940_v56, %v7630_v26  ;;  %v2857_v58 = vsub.f32 %v7683_v50, %v3940_v56  ;;  %v3942_v59 = vsel %vm2765_vm12, 1.0, %v5885_v11 }
0x12fe   : > { %5446 = vmatmul.mubr.msk.bf16.vlgmr.msra.gmra.mrb[88].mxu1 %vm3945_vm13, %v5887_v23  ;;  %5450 = vmatpush3.bf16.msra.mxu0 %v7228_v42  ;;  %v7711_v60 = vadd.f32 %v3942_v59, %v7637_v32  ;;  %v2871_v61 = vsub.f32 %v7687_v17, %v3942_v59 }
0x12ff   : > { %5470 = vmatpush3.bf16.msra.mxu1 %v7228_v42  ;;  %5451 = vmatprep.subr.bf16.mxu0 %v5885_v11 }
0x1300   : > { %5471 = vmatprep.subr.bf16.mxu1 %v5885_v11  ;;  %5465 = vmatprep.mubr.msk.bf16.mxu0 %vm5886_vm1, %v5885_v11 }
0x1301   : > { %5485 = vmatprep.mubr.msk.bf16.mxu1 %vm5886_vm1, %v5885_v11 }
0x1302   : > { %5452 = vmatpush3.bf16.msra.mxu0 %v7245_v45 }
0x1303   : > { %5472 = vmatpush3.bf16.msra.mxu1 %v7245_v45  ;;  %5453 = vmatprep.subr.bf16.mxu0 %v5885_v11 }
0x1304   : > { %5473 = vmatprep.subr.bf16.mxu1 %v5885_v11 }
0x1306   : > { %5454 = vmatpush3.bf16.msra.mxu0 %v7254_v46 }
0x1307   : > { %5474 = vmatpush3.bf16.msra.mxu1 %v7254_v46  ;;  %5455 = vmatprep.subr.bf16.mxu0 %v5885_v11 }
0x1308   : > { %5475 = vmatprep.subr.bf16.mxu1 %v5885_v11 }
0x130a   : > { %5456 = vmatpush3.bf16.msra.mxu0 %v7263_v47 }
0x130b   : > { %5476 = vmatpush3.bf16.msra.mxu1 %v7263_v47  ;;  %5457 = vmatprep.subr.bf16.mxu0 %v5885_v11 }
0x130c   : > { %5477 = vmatprep.subr.bf16.mxu1 %v5885_v11 }
0x130e   : > { %5458 = vmatpush3.bf16.msra.mxu0 %v7272_v48 }
0x130f   : > { %5478 = vmatpush3.bf16.msra.mxu1 %v7272_v48  ;;  %5459 = vmatprep.subr.bf16.mxu0 %v5885_v11 }
0x1310   : > { %5479 = vmatprep.subr.bf16.mxu1 %v5885_v11 }
0x1312   : > { %5460 = vmatpush3.bf16.msra.mxu0 %v7281_v49 }
0x1313   : > { %5480 = vmatpush3.bf16.msra.mxu1 %v7281_v49  ;;  %5461 = vmatprep.subr.bf16.mxu0 %v5885_v11 }
0x1314   : > { %5481 = vmatprep.subr.bf16.mxu1 %v5885_v11 }
0x1316   : > { %5462 = vmatpush3.bf16.msra.mxu0 %v7290_v8 }
0x1317   : > { %5482 = vmatpush3.bf16.msra.mxu1 %v7290_v8  ;;  %5463 = vmatprep.subr.bf16.mxu0 %v5885_v11 }
0x1318   : > { %5483 = vmatprep.subr.bf16.mxu1 %v5885_v11 }
0x131a   : > { %5464 = vmatpush3.bf16.msra.mxu0 %v7299_v12 }
0x131b   : > { %5484 = vmatpush3.bf16.msra.mxu1 %v7299_v12  ;;  %5489 = vmatprep.subr.bf16.mxu0 %v5885_v11 }
0x131c   : > { %5509 = vmatprep.subr.bf16.mxu1 %v5885_v11 }
0x13d0   : > { %v2807_v62 = vpop.f32.mrb[88].mxu0 }
0x13d1   : > { %v2858_v63 = vadd.f32 %v2856_v53, %v2807_v62  ;;  %v2849_v0 = vpop.f32.mrb[88].mxu1  ;;  %v5427_v1 = vpop.f32.mrb[89].mxu0  ;;  %v7886_v62 = vld [vmem:[%s8301_s2 + $0x10] sm:$0xff]  }
0x13d2   : > { %v2872_v4 = vadd.f32 %v2870_v55, %v2849_v0  ;;  %v5447_v7 = vpop.f32.mrb[89].mxu1  ;;  %v2810_v9 = vpop.f32.mrb[90].mxu0  ;;  %v7904_v0 = vld [vmem:[%s8301_s2 + $0x20] sm:$0xff]   ;;  %v7913_v1 = vld [vmem:[%s8301_s2 + $0x28] sm:$0xff]  }
0x13d3   : > { %v7750_v10 = vadd.f32 %v2858_v63, %v6057_v21  ;;  %v2859_v27 = vadd.f32 %v2857_v58, %v2810_v9  ;;  %v2852_v24 = vpop.f32.mrb[90].mxu1  ;;  %v5428_v2 = vpop.f32.mrb[91].mxu0  ;;  %v7860_v58 = vld [vmem:[%s8301_s2] sm:$0xff]   ;;  %v7895_v63 = vld [vmem:[%s8301_s2 + $0x18] sm:$0xff]  }
0x13d4   : > { %v7753_v29 = vadd.f32 %v2872_v4, %v6059_v22  ;;  %v2873_v3 = vadd.f32 %v2871_v61, %v2852_v24  ;;  %v5448_v5 = vpop.f32.mrb[91].mxu1  ;;  %v7877_v61 = vld [vmem:[%s8301_s2 + $0x8] sm:$0xff]   ;;  %v7922_v4 = vld [vmem:[%s8301_s2 + $0x30] sm:$0xff]   ;;  %v7931_v7 = vld [vmem:[%s8301_s2 + $0x38] sm:$0xff]  }
0x13d5   : > { %vm2862_vm14 = vcmp.ge.f32.partialorder %v7750_v10, 1.0  ;;  %v7757_v6 = vadd.f32 %v6053_v19, %v2859_v27 }
0x13d6   : > { %vm2876_vm15 = vcmp.ge.f32.partialorder %v7753_v29, 1.0  ;;  %v7761_v25 = vadd.f32 %v6055_v20, %v2873_v3  ;;  %v3947_v30 = vsel %vm2862_vm14, 1.0, %v5885_v11 }
0x13d7   : > { %vm2863_vm0 = vcmp.ge.f32.partialorder %v7757_v6, 1.0  ;;  %v7766_v26 = vadd.f32 %v3947_v30, %v7692_v52  ;;  %v2968_v31 = vsub.f32 %v7750_v10, %v3947_v30  ;;  %v3949_v28 = vsel %vm2876_vm15, 1.0, %v5885_v11 }
0x13d8   : > { %vm3951_vm2 = vmpackc.low %vm2863_vm0, %vm2862_vm14  ;;  %vm2877_vm3 = vcmp.ge.f32.partialorder %v7761_v25, 1.0  ;;  %v7772_v32 = vadd.f32 %v3949_v28, %v7698_v18  ;;  %v2982_v33 = vsub.f32 %v7753_v29, %v3949_v28  ;;  %v3948_v34 = vsel %vm2863_vm0, 1.0, %v5885_v11 }
0x13d9   : > { %vm3953_vm4 = vmpackc.low %vm2877_vm3, %vm2876_vm15  ;;  %5466 = vmatmul.mubr.msk.bf16.vlgmr.msra.gmra.mrb[92].mxu0 %vm3951_vm2, %v5887_v23  ;;  %v7778_v35 = vadd.f32 %v3948_v34, %v7704_v57  ;;  %v2969_v36 = vsub.f32 %v7757_v6, %v3948_v34  ;;  %v3950_v37 = vsel %vm2877_vm3, 1.0, %v5885_v11 }
0x13da   : > { %5486 = vmatmul.mubr.msk.bf16.vlgmr.msra.gmra.mrb[92].mxu1 %vm3953_vm4, %v5887_v23  ;;  %5490 = vmatpush3.bf16.msra.mxu0 %v7228_v42  ;;  %v7785_v38 = vadd.f32 %v3950_v37, %v7711_v60  ;;  %v2983_v39 = vsub.f32 %v7761_v25, %v3950_v37 }
0x13db   : > { %5510 = vmatpush3.bf16.msra.mxu1 %v7228_v42  ;;  %5491 = vmatprep.subr.bf16.mxu0 %v5885_v11 }
0x13dc   : > { %5511 = vmatprep.subr.bf16.mxu1 %v5885_v11  ;;  %5505 = vmatprep.mubr.msk.bf16.mxu0 %vm5886_vm1, %v5885_v11 }
0x13dd   : > { %5525 = vmatprep.mubr.msk.bf16.mxu1 %vm5886_vm1, %v5885_v11 }
0x13de   : > { %5492 = vmatpush3.bf16.msra.mxu0 %v7245_v45 }
0x13df   : > { %5512 = vmatpush3.bf16.msra.mxu1 %v7245_v45  ;;  %5493 = vmatprep.subr.bf16.mxu0 %v5885_v11 }
0x13e0   : > { %5513 = vmatprep.subr.bf16.mxu1 %v5885_v11 }
0x13e2   : > { %5494 = vmatpush3.bf16.msra.mxu0 %v7254_v46 }
0x13e3   : > { %5514 = vmatpush3.bf16.msra.mxu1 %v7254_v46  ;;  %5495 = vmatprep.subr.bf16.mxu0 %v5885_v11 }
0x13e4   : > { %5515 = vmatprep.subr.bf16.mxu1 %v5885_v11 }
0x13e6   : > { %5496 = vmatpush3.bf16.msra.mxu0 %v7263_v47 }
0x13e7   : > { %5516 = vmatpush3.bf16.msra.mxu1 %v7263_v47  ;;  %5497 = vmatprep.subr.bf16.mxu0 %v5885_v11 }
0x13e8   : > { %5517 = vmatprep.subr.bf16.mxu1 %v5885_v11 }
0x13ea   : > { %5498 = vmatpush3.bf16.msra.mxu0 %v7272_v48 }
0x13eb   : > { %5518 = vmatpush3.bf16.msra.mxu1 %v7272_v48  ;;  %5499 = vmatprep.subr.bf16.mxu0 %v5885_v11 }
0x13ec   : > { %5519 = vmatprep.subr.bf16.mxu1 %v5885_v11 }
0x13ee   : > { %5500 = vmatpush3.bf16.msra.mxu0 %v7281_v49 }
0x13ef   : > { %5520 = vmatpush3.bf16.msra.mxu1 %v7281_v49  ;;  %5501 = vmatprep.subr.bf16.mxu0 %v5885_v11 }
0x13f0   : > { %5521 = vmatprep.subr.bf16.mxu1 %v5885_v11 }
0x13f2   : > { %5502 = vmatpush3.bf16.msra.mxu0 %v7290_v8 }
0x13f3   : > { %5522 = vmatpush3.bf16.msra.mxu1 %v7290_v8  ;;  %5503 = vmatprep.subr.bf16.mxu0 %v5885_v11 }
0x13f4   : > { %5523 = vmatprep.subr.bf16.mxu1 %v5885_v11 }
0x13f6   : > { %5504 = vmatpush3.bf16.msra.mxu0 %v7299_v12 }
0x13f7   : > { %5524 = vmatpush3.bf16.msra.mxu1 %v7299_v12  ;;  %5529 = vmatprep.subr.bf16.mxu0 %v5885_v11 }
0x13f8   : > { %5549 = vmatprep.subr.bf16.mxu1 %v5885_v11 }
0x14ac   : > { %v2919_v42 = vpop.f32.mrb[92].mxu0 }
0x14ad   : > { %v2970_v45 = vadd.f32 %v2968_v31, %v2919_v42  ;;  %v2961_v46 = vpop.f32.mrb[92].mxu1  ;;  %v5467_v47 = vpop.f32.mrb[93].mxu0 }
0x14ae   : > { %v2984_v48 = vadd.f32 %v2982_v33, %v2961_v46  ;;  %v5487_v49 = vpop.f32.mrb[93].mxu1  ;;  %v2922_v40 = vpop.f32.mrb[94].mxu0 }
0x14af   : > { %v7824_v8 = vadd.f32 %v2970_v45, %v6057_v21  ;;  %v2971_v41 = vadd.f32 %v2969_v36, %v2922_v40  ;;  %v2964_v43 = vpop.f32.mrb[94].mxu1  ;;  %v5468_v44 = vpop.f32.mrb[95].mxu0 }
0x14b0   : > { %v7827_v13 = vadd.f32 %v2984_v48, %v6059_v22  ;;  %v2985_v12 = vadd.f32 %v2983_v39, %v2964_v43  ;;  %v5488_v14 = vpop.f32.mrb[95].mxu1 }
0x14b1   : > { %vm2974_vm5 = vcmp.ge.f32.partialorder %v7824_v8, 1.0  ;;  %v7831_v15 = vadd.f32 %v6053_v19, %v2971_v41 }
0x14b2   : > { %vm2988_vm6 = vcmp.ge.f32.partialorder %v7827_v13, 1.0  ;;  %v7835_v16 = vadd.f32 %v6055_v20, %v2985_v12  ;;  %v3955_v50 = vsel %vm2974_vm5, 1.0, %v5885_v11 }
0x14b3   : > { %vm2975_vm7 = vcmp.ge.f32.partialorder %v7831_v15, 1.0  ;;  %v7840_v17 = vadd.f32 %v3955_v50, %v7766_v26  ;;  %v3080_v51 = vsub.f32 %v7824_v8, %v3955_v50  ;;  %v3957_v52 = vsel %vm2988_vm6, 1.0, %v5885_v11 }
0x14b4   : > { %vm3959_vm8 = vmpackc.low %vm2975_vm7, %vm2974_vm5  ;;  %vm2989_vm9 = vcmp.ge.f32.partialorder %v7835_v16, 1.0  ;;  %v7846_v53 = vadd.f32 %v3957_v52, %v7772_v32  ;;  %v3094_v54 = vsub.f32 %v7827_v13, %v3957_v52  ;;  %v3956_v18 = vsel %vm2975_vm7, 1.0, %v5885_v11 }
0x14b5   : > { %vm3961_vm10 = vmpackc.low %vm2989_vm9, %vm2988_vm6  ;;  %5506 = vmatmul.mubr.msk.bf16.vlgmr.msra.gmra.mrb[96].mxu0 %vm3959_vm8, %v5887_v23  ;;  %v7852_v55 = vadd.f32 %v3956_v18, %v7778_v35  ;;  %v3081_v56 = vsub.f32 %v7831_v15, %v3956_v18  ;;  %v3958_v57 = vsel %vm2989_vm9, 1.0, %v5885_v11 }
0x14b6   : > { %5526 = vmatmul.mubr.msk.bf16.vlgmr.msra.gmra.mrb[96].mxu1 %vm3961_vm10, %v5887_v23  ;;  %5530 = vmatpush3.bf16.msra.mxu0 %v7860_v58  ;;  %v7864_v59 = vadd.f32 %v3958_v57, %v7785_v38  ;;  %v3095_v60 = vsub.f32 %v7835_v16, %v3958_v57 }
0x14b7   : > { %5550 = vmatpush3.bf16.msra.mxu1 %v7860_v58  ;;  %5531 = vmatprep.subr.bf16.mxu0 %v5885_v11 }
0x14b8   : > { %5551 = vmatprep.subr.bf16.mxu1 %v5885_v11  ;;  %5545 = vmatprep.mubr.msk.bf16.mxu0 %vm5886_vm1, %v5885_v11 }
0x14b9   : > { %5565 = vmatprep.mubr.msk.bf16.mxu1 %vm5886_vm1, %v5885_v11 }
0x14ba   : > { %5532 = vmatpush3.bf16.msra.mxu0 %v7877_v61 }
0x14bb   : > { %5552 = vmatpush3.bf16.msra.mxu1 %v7877_v61  ;;  %5533 = vmatprep.subr.bf16.mxu0 %v5885_v11 }
0x14bc   : > { %5553 = vmatprep.subr.bf16.mxu1 %v5885_v11 }
0x14be   : > { %5534 = vmatpush3.bf16.msra.mxu0 %v7886_v62 }
0x14bf   : > { %5554 = vmatpush3.bf16.msra.mxu1 %v7886_v62  ;;  %5535 = vmatprep.subr.bf16.mxu0 %v5885_v11 }
0x14c0   : > { %5555 = vmatprep.subr.bf16.mxu1 %v5885_v11 }
0x14c2   : > { %5536 = vmatpush3.bf16.msra.mxu0 %v7895_v63 }
0x14c3   : > { %5556 = vmatpush3.bf16.msra.mxu1 %v7895_v63  ;;  %5537 = vmatprep.subr.bf16.mxu0 %v5885_v11 }
0x14c4   : > { %5557 = vmatprep.subr.bf16.mxu1 %v5885_v11 }
0x14c6   : > { %5538 = vmatpush3.bf16.msra.mxu0 %v7904_v0 }
0x14c7   : > { %5558 = vmatpush3.bf16.msra.mxu1 %v7904_v0  ;;  %5539 = vmatprep.subr.bf16.mxu0 %v5885_v11 }
0x14c8   : > { %5559 = vmatprep.subr.bf16.mxu1 %v5885_v11 }
0x14ca   : > { %5540 = vmatpush3.bf16.msra.mxu0 %v7913_v1 }
0x14cb   : > { %5560 = vmatpush3.bf16.msra.mxu1 %v7913_v1  ;;  %5541 = vmatprep.subr.bf16.mxu0 %v5885_v11 }
0x14cc   : > { %5561 = vmatprep.subr.bf16.mxu1 %v5885_v11 }
0x14ce   : > { %5542 = vmatpush3.bf16.msra.mxu0 %v7922_v4 }
0x14cf   : > { %5562 = vmatpush3.bf16.msra.mxu1 %v7922_v4  ;;  %5543 = vmatprep.subr.bf16.mxu0 %v5885_v11 }
0x14d0   : > { %5563 = vmatprep.subr.bf16.mxu1 %v5885_v11 }
0x14d2   : > { %5544 = vmatpush3.bf16.msra.mxu0 %v7931_v7 }
0x14d3   : > { %5564 = vmatpush3.bf16.msra.mxu1 %v7931_v7  ;;  %5569 = vmatprep.subr.bf16.mxu0 %v5885_v11 }
0x14d4   : > { %5589 = vmatprep.subr.bf16.mxu1 %v5885_v11 }
0x1588   : > { %v3031_v9 = vpop.f32.mrb[96].mxu0 }
0x1589   : > { %v3082_v10 = vadd.f32 %v3080_v51, %v3031_v9  ;;  %v3073_v27 = vpop.f32.mrb[96].mxu1  ;;  %v5507_v24 = vpop.f32.mrb[97].mxu0 }
0x158a   : > { %v3096_v2 = vadd.f32 %v3094_v54, %v3073_v27  ;;  %v5527_v29 = vpop.f32.mrb[97].mxu1  ;;  %v3034_v3 = vpop.f32.mrb[98].mxu0 }
0x158b   : > { %v7938_v5 = vadd.f32 %v3082_v10, %v6057_v21  ;;  %v3083_v6 = vadd.f32 %v3081_v56, %v3034_v3  ;;  %v3076_v25 = vpop.f32.mrb[98].mxu1  ;;  %v5508_v30 = vpop.f32.mrb[99].mxu0 }
0x158c   : > { %v7941_v26 = vadd.f32 %v3096_v2, %v6059_v22  ;;  %v3097_v31 = vadd.f32 %v3095_v60, %v3076_v25  ;;  %v5528_v28 = vpop.f32.mrb[99].mxu1 }
0x158d   : > { %vm3086_vm11 = vcmp.ge.f32.partialorder %v7938_v5, 1.0  ;;  %v7945_v32 = vadd.f32 %v6053_v19, %v3083_v6 }
0x158e   : > { %vm3100_vm12 = vcmp.ge.f32.partialorder %v7941_v26, 1.0  ;;  %v7949_v33 = vadd.f32 %v6055_v20, %v3097_v31  ;;  %v3963_v34 = vsel %vm3086_vm11, 1.0, %v5885_v11 }
0x158f   : > { %vm3087_vm13 = vcmp.ge.f32.partialorder %v7945_v32, 1.0  ;;  %v7954_v35 = vadd.f32 %v3963_v34, %v7840_v17  ;;  %v3192_v36 = vsub.f32 %v7938_v5, %v3963_v34  ;;  %v3965_v37 = vsel %vm3100_vm12, 1.0, %v5885_v11 }
0x1590   : > { %vm3967_vm14 = vmpackc.low %vm3087_vm13, %vm3086_vm11  ;;  %vm3101_vm15 = vcmp.ge.f32.partialorder %v7949_v33, 1.0  ;;  %v7960_v38 = vadd.f32 %v3965_v37, %v7846_v53  ;;  %v3206_v39 = vsub.f32 %v7941_v26, %v3965_v37  ;;  %v3964_v42 = vsel %vm3087_vm13, 1.0, %v5885_v11 }
0x1591   : > { %vm3969_vm0 = vmpackc.low %vm3101_vm15, %vm3100_vm12  ;;  %5546 = vmatmul.mubr.msk.bf16.vlgmr.msra.gmra.mrb[100].mxu0 %vm3967_vm14, %v5887_v23  ;;  %v7966_v45 = vadd.f32 %v3964_v42, %v7852_v55  ;;  %v3193_v46 = vsub.f32 %v7945_v32, %v3964_v42  ;;  %v3966_v47 = vsel %vm3101_vm15, 1.0, %v5885_v11 }
0x1592   : > { %5566 = vmatmul.mubr.msk.bf16.vlgmr.msra.gmra.mrb[100].mxu1 %vm3969_vm0, %v5887_v23  ;;  %5570 = vmatpush3.bf16.msra.mxu0 %v7860_v58  ;;  %v7973_v48 = vadd.f32 %v3966_v47, %v7864_v59  ;;  %v3207_v49 = vsub.f32 %v7949_v33, %v3966_v47 }
0x1593   : > { %5590 = vmatpush3.bf16.msra.mxu1 %v7860_v58  ;;  %5571 = vmatprep.subr.bf16.mxu0 %v5885_v11 }
0x1594   : > { %5591 = vmatprep.subr.bf16.mxu1 %v5885_v11  ;;  %5585 = vmatprep.mubr.msk.bf16.mxu0 %vm5886_vm1, %v5885_v11 }
0x1595   : > { %5605 = vmatprep.mubr.msk.bf16.mxu1 %vm5886_vm1, %v5885_v11 }
0x1596   : > { %5572 = vmatpush3.bf16.msra.mxu0 %v7877_v61 }
0x1597   : > { %5592 = vmatpush3.bf16.msra.mxu1 %v7877_v61  ;;  %5573 = vmatprep.subr.bf16.mxu0 %v5885_v11 }
0x1598   : > { %5593 = vmatprep.subr.bf16.mxu1 %v5885_v11 }
0x159a   : > { %5574 = vmatpush3.bf16.msra.mxu0 %v7886_v62 }
0x159b   : > { %5594 = vmatpush3.bf16.msra.mxu1 %v7886_v62  ;;  %5575 = vmatprep.subr.bf16.mxu0 %v5885_v11 }
0x159c   : > { %5595 = vmatprep.subr.bf16.mxu1 %v5885_v11 }
0x159e   : > { %5576 = vmatpush3.bf16.msra.mxu0 %v7895_v63 }
0x159f   : > { %5596 = vmatpush3.bf16.msra.mxu1 %v7895_v63  ;;  %5577 = vmatprep.subr.bf16.mxu0 %v5885_v11 }
0x15a0   : > { %5597 = vmatprep.subr.bf16.mxu1 %v5885_v11 }
0x15a2   : > { %5578 = vmatpush3.bf16.msra.mxu0 %v7904_v0 }
0x15a3   : > { %5598 = vmatpush3.bf16.msra.mxu1 %v7904_v0  ;;  %5579 = vmatprep.subr.bf16.mxu0 %v5885_v11 }
0x15a4   : > { %5599 = vmatprep.subr.bf16.mxu1 %v5885_v11 }
0x15a6   : > { %5580 = vmatpush3.bf16.msra.mxu0 %v7913_v1 }
0x15a7   : > { %5600 = vmatpush3.bf16.msra.mxu1 %v7913_v1  ;;  %5581 = vmatprep.subr.bf16.mxu0 %v5885_v11 }
0x15a8   : > { %5601 = vmatprep.subr.bf16.mxu1 %v5885_v11 }
0x15aa   : > { %5582 = vmatpush3.bf16.msra.mxu0 %v7922_v4 }
0x15ab   : > { %5602 = vmatpush3.bf16.msra.mxu1 %v7922_v4  ;;  %5583 = vmatprep.subr.bf16.mxu0 %v5885_v11 }
0x15ac   : > { %5603 = vmatprep.subr.bf16.mxu1 %v5885_v11 }
0x15ae   : > { %5584 = vmatpush3.bf16.msra.mxu0 %v7931_v7 }
0x15af   : > { %5604 = vmatpush3.bf16.msra.mxu1 %v7931_v7  ;;  %5609 = vmatprep.subr.bf16.mxu0 %v5885_v11 }
0x15b0   : > { %5629 = vmatprep.subr.bf16.mxu1 %v5885_v11 }
0x1664   : > { %v3143_v40 = vpop.f32.mrb[100].mxu0 }
0x1665   : > { %v3194_v8 = vadd.f32 %v3192_v36, %v3143_v40  ;;  %v3185_v41 = vpop.f32.mrb[100].mxu1  ;;  %v5547_v43 = vpop.f32.mrb[101].mxu0 }
0x1666   : > { %v3208_v44 = vadd.f32 %v3206_v39, %v3185_v41  ;;  %v5567_v13 = vpop.f32.mrb[101].mxu1  ;;  %v3146_v12 = vpop.f32.mrb[102].mxu0 }
0x1667   : > { %v8012_v14 = vadd.f32 %v3194_v8, %v6057_v21  ;;  %v3195_v15 = vadd.f32 %v3193_v46, %v3146_v12  ;;  %v3188_v16 = vpop.f32.mrb[102].mxu1  ;;  %v5548_v50 = vpop.f32.mrb[103].mxu0 }
0x1668   : > { %v8015_v17 = vadd.f32 %v3208_v44, %v6059_v22  ;;  %v3209_v51 = vadd.f32 %v3207_v49, %v3188_v16  ;;  %v5568_v52 = vpop.f32.mrb[103].mxu1 }
0x1669   : > { %vm3198_vm2 = vcmp.ge.f32.partialorder %v8012_v14, 1.0  ;;  %v8019_v53 = vadd.f32 %v6053_v19, %v3195_v15 }
0x166a   : > { %vm3212_vm3 = vcmp.ge.f32.partialorder %v8015_v17, 1.0  ;;  %v8023_v54 = vadd.f32 %v6055_v20, %v3209_v51  ;;  %v3971_v18 = vsel %vm3198_vm2, 1.0, %v5885_v11 }
0x166b   : > { %vm3199_vm4 = vcmp.ge.f32.partialorder %v8019_v53, 1.0  ;;  %v8028_v55 = vadd.f32 %v3971_v18, %v7954_v35  ;;  %v3304_v56 = vsub.f32 %v8012_v14, %v3971_v18  ;;  %v3973_v57 = vsel %vm3212_vm3, 1.0, %v5885_v11 }
0x166c   : > { %vm3975_vm5 = vmpackc.low %vm3199_vm4, %vm3198_vm2  ;;  %vm3213_vm6 = vcmp.ge.f32.partialorder %v8023_v54, 1.0  ;;  %v8034_v59 = vadd.f32 %v3973_v57, %v7960_v38  ;;  %v3318_v60 = vsub.f32 %v8015_v17, %v3973_v57  ;;  %v3972_v9 = vsel %vm3199_vm4, 1.0, %v5885_v11 }
0x166d   : > { %vm3977_vm7 = vmpackc.low %vm3213_vm6, %vm3212_vm3  ;;  %5586 = vmatmul.mubr.msk.bf16.vlgmr.msra.gmra.mrb[104].mxu0 %vm3975_vm5, %v5887_v23  ;;  %v8040_v10 = vadd.f32 %v3972_v9, %v7966_v45  ;;  %v3305_v27 = vsub.f32 %v8019_v53, %v3972_v9  ;;  %v3974_v24 = vsel %vm3213_vm6, 1.0, %v5885_v11 }
0x166e   : > { %5606 = vmatmul.mubr.msk.bf16.vlgmr.msra.gmra.mrb[104].mxu1 %vm3977_vm7, %v5887_v23  ;;  %5610 = vmatpush3.bf16.msra.mxu0 %v7860_v58  ;;  %v8047_v2 = vadd.f32 %v3974_v24, %v7973_v48  ;;  %v3319_v29 = vsub.f32 %v8023_v54, %v3974_v24 }
0x166f   : > { %5630 = vmatpush3.bf16.msra.mxu1 %v7860_v58  ;;  %5611 = vmatprep.subr.bf16.mxu0 %v5885_v11 }
0x1670   : > { %5631 = vmatprep.subr.bf16.mxu1 %v5885_v11  ;;  %5625 = vmatprep.mubr.msk.bf16.mxu0 %vm5886_vm1, %v5885_v11 }
0x1671   : > { %5645 = vmatprep.mubr.msk.bf16.mxu1 %vm5886_vm1, %v5885_v11 }
0x1672   : > { %5612 = vmatpush3.bf16.msra.mxu0 %v7877_v61 }
0x1673   : > { %5632 = vmatpush3.bf16.msra.mxu1 %v7877_v61  ;;  %5613 = vmatprep.subr.bf16.mxu0 %v5885_v11 }
0x1674   : > { %5633 = vmatprep.subr.bf16.mxu1 %v5885_v11 }
0x1676   : > { %5614 = vmatpush3.bf16.msra.mxu0 %v7886_v62 }
0x1677   : > { %5634 = vmatpush3.bf16.msra.mxu1 %v7886_v62  ;;  %5615 = vmatprep.subr.bf16.mxu0 %v5885_v11 }
0x1678   : > { %5635 = vmatprep.subr.bf16.mxu1 %v5885_v11 }
0x167a   : > { %5616 = vmatpush3.bf16.msra.mxu0 %v7895_v63 }
0x167b   : > { %5636 = vmatpush3.bf16.msra.mxu1 %v7895_v63  ;;  %5617 = vmatprep.subr.bf16.mxu0 %v5885_v11 }
0x167c   : > { %5637 = vmatprep.subr.bf16.mxu1 %v5885_v11 }
0x167e   : > { %5618 = vmatpush3.bf16.msra.mxu0 %v7904_v0 }
0x167f   : > { %5638 = vmatpush3.bf16.msra.mxu1 %v7904_v0  ;;  %5619 = vmatprep.subr.bf16.mxu0 %v5885_v11 }
0x1680   : > { %5639 = vmatprep.subr.bf16.mxu1 %v5885_v11 }
0x1682   : > { %5620 = vmatpush3.bf16.msra.mxu0 %v7913_v1 }
0x1683   : > { %5640 = vmatpush3.bf16.msra.mxu1 %v7913_v1  ;;  %5621 = vmatprep.subr.bf16.mxu0 %v5885_v11 }
0x1684   : > { %5641 = vmatprep.subr.bf16.mxu1 %v5885_v11 }
0x1686   : > { %5622 = vmatpush3.bf16.msra.mxu0 %v7922_v4 }
0x1687   : > { %5642 = vmatpush3.bf16.msra.mxu1 %v7922_v4  ;;  %5623 = vmatprep.subr.bf16.mxu0 %v5885_v11 }
0x1688   : > { %5643 = vmatprep.subr.bf16.mxu1 %v5885_v11 }
0x168a   : > { %5624 = vmatpush3.bf16.msra.mxu0 %v7931_v7 }
0x168b   : > { %5644 = vmatpush3.bf16.msra.mxu1 %v7931_v7  ;;  %5649 = vmatprep.subr.bf16.mxu0 %v5885_v11 }
0x168c   : > { %5669 = vmatprep.subr.bf16.mxu1 %v5885_v11 }
0x1740   : > { %v3255_v3 = vpop.f32.mrb[104].mxu0 }
0x1741   : > { %v3306_v5 = vadd.f32 %v3304_v56, %v3255_v3  ;;  %v3297_v6 = vpop.f32.mrb[104].mxu1  ;;  %v5587_v25 = vpop.f32.mrb[105].mxu0 }
0x1742   : > { %v3320_v30 = vadd.f32 %v3318_v60, %v3297_v6  ;;  %v5607_v26 = vpop.f32.mrb[105].mxu1  ;;  %v3258_v31 = vpop.f32.mrb[106].mxu0 }
0x1743   : > { %v8086_v28 = vadd.f32 %v3306_v5, %v6057_v21  ;;  %v3307_v32 = vadd.f32 %v3305_v27, %v3258_v31  ;;  %v3300_v33 = vpop.f32.mrb[106].mxu1  ;;  %v5588_v34 = vpop.f32.mrb[107].mxu0 }
0x1744   : > { %v8089_v35 = vadd.f32 %v3320_v30, %v6059_v22  ;;  %v3321_v36 = vadd.f32 %v3319_v29, %v3300_v33  ;;  %v5608_v37 = vpop.f32.mrb[107].mxu1 }
0x1745   : > { %vm3310_vm8 = vcmp.ge.f32.partialorder %v8086_v28, 1.0  ;;  %v8093_v38 = vadd.f32 %v6053_v19, %v3307_v32 }
0x1746   : > { %vm3324_vm9 = vcmp.ge.f32.partialorder %v8089_v35, 1.0  ;;  %v8097_v39 = vadd.f32 %v6055_v20, %v3321_v36  ;;  %v3979_v42 = vsel %vm3310_vm8, 1.0, %v5885_v11 }
0x1747   : > { %vm3311_vm10 = vcmp.ge.f32.partialorder %v8093_v38, 1.0  ;;  %v8102_v45 = vadd.f32 %v3979_v42, %v8028_v55  ;;  %v3416_v46 = vsub.f32 %v8086_v28, %v3979_v42  ;;  %v3981_v47 = vsel %vm3324_vm9, 1.0, %v5885_v11 }
0x1748   : > { %vm3983_vm11 = vmpackc.low %vm3311_vm10, %vm3310_vm8  ;;  %vm3325_vm12 = vcmp.ge.f32.partialorder %v8097_v39, 1.0  ;;  %v8108_v48 = vadd.f32 %v3981_v47, %v8034_v59  ;;  %v3430_v49 = vsub.f32 %v8089_v35, %v3981_v47  ;;  %v3980_v40 = vsel %vm3311_vm10, 1.0, %v5885_v11 }
0x1749   : > { %vm3985_vm13 = vmpackc.low %vm3325_vm12, %vm3324_vm9  ;;  %5626 = vmatmul.mubr.msk.bf16.vlgmr.msra.gmra.mrb[108].mxu0 %vm3983_vm11, %v5887_v23  ;;  %v8114_v8 = vadd.f32 %v3980_v40, %v8040_v10  ;;  %v3417_v41 = vsub.f32 %v8093_v38, %v3980_v40  ;;  %v3982_v43 = vsel %vm3325_vm12, 1.0, %v5885_v11 }
0x174a   : > { %5646 = vmatmul.mubr.msk.bf16.vlgmr.msra.gmra.mrb[108].mxu1 %vm3985_vm13, %v5887_v23  ;;  %5650 = vmatpush3.bf16.msra.mxu0 %v7860_v58  ;;  %v8121_v44 = vadd.f32 %v3982_v43, %v8047_v2  ;;  %v3431_v13 = vsub.f32 %v8097_v39, %v3982_v43 }
0x174b   : > { %5670 = vmatpush3.bf16.msra.mxu1 %v7860_v58  ;;  %5651 = vmatprep.subr.bf16.mxu0 %v5885_v11 }
0x174c   : > { %5671 = vmatprep.subr.bf16.mxu1 %v5885_v11  ;;  %5665 = vmatprep.mubr.msk.bf16.mxu0 %vm5886_vm1, %v5885_v11 }
0x174d   : > { %5685 = vmatprep.mubr.msk.bf16.mxu1 %vm5886_vm1, %v5885_v11 }
0x174e   : > { %5652 = vmatpush3.bf16.msra.mxu0 %v7877_v61 }
0x174f   : > { %5672 = vmatpush3.bf16.msra.mxu1 %v7877_v61  ;;  %5653 = vmatprep.subr.bf16.mxu0 %v5885_v11 }
0x1750   : > { %5673 = vmatprep.subr.bf16.mxu1 %v5885_v11 }
0x1752   : > { %5654 = vmatpush3.bf16.msra.mxu0 %v7886_v62 }
0x1753   : > { %5674 = vmatpush3.bf16.msra.mxu1 %v7886_v62  ;;  %5655 = vmatprep.subr.bf16.mxu0 %v5885_v11 }
0x1754   : > { %5675 = vmatprep.subr.bf16.mxu1 %v5885_v11 }
0x1756   : > { %5656 = vmatpush3.bf16.msra.mxu0 %v7895_v63 }
0x1757   : > { %5676 = vmatpush3.bf16.msra.mxu1 %v7895_v63  ;;  %5657 = vmatprep.subr.bf16.mxu0 %v5885_v11 }
0x1758   : > { %5677 = vmatprep.subr.bf16.mxu1 %v5885_v11 }
0x175a   : > { %5658 = vmatpush3.bf16.msra.mxu0 %v7904_v0 }
0x175b   : > { %5678 = vmatpush3.bf16.msra.mxu1 %v7904_v0  ;;  %5659 = vmatprep.subr.bf16.mxu0 %v5885_v11 }
0x175c   : > { %5679 = vmatprep.subr.bf16.mxu1 %v5885_v11 }
0x175e   : > { %5660 = vmatpush3.bf16.msra.mxu0 %v7913_v1 }
0x175f   : > { %5680 = vmatpush3.bf16.msra.mxu1 %v7913_v1  ;;  %5661 = vmatprep.subr.bf16.mxu0 %v5885_v11 }
0x1760   : > { %5681 = vmatprep.subr.bf16.mxu1 %v5885_v11 }
0x1762   : > { %5662 = vmatpush3.bf16.msra.mxu0 %v7922_v4 }
0x1763   : > { %5682 = vmatpush3.bf16.msra.mxu1 %v7922_v4  ;;  %5663 = vmatprep.subr.bf16.mxu0 %v5885_v11 }
0x1764   : > { %5683 = vmatprep.subr.bf16.mxu1 %v5885_v11 }
0x1766   : > { %5664 = vmatpush3.bf16.msra.mxu0 %v7931_v7 }
0x1767   : > { %5684 = vmatpush3.bf16.msra.mxu1 %v7931_v7  ;;  %5689 = vmatprep.subr.bf16.mxu0 %v5885_v11 }
0x1768   : > { %5709 = vmatprep.subr.bf16.mxu1 %v5885_v11 }
0x181c   : > { %v3367_v12 = vpop.f32.mrb[108].mxu0 }
0x181d   : > { %v3418_v14 = vadd.f32 %v3416_v46, %v3367_v12  ;;  %v3409_v15 = vpop.f32.mrb[108].mxu1  ;;  %v5627_v16 = vpop.f32.mrb[109].mxu0 }
0x181e   : > { %v3432_v50 = vadd.f32 %v3430_v49, %v3409_v15  ;;  %v5647_v17 = vpop.f32.mrb[109].mxu1  ;;  %v3370_v51 = vpop.f32.mrb[110].mxu0 }
0x181f   : > { %v8160_v52 = vadd.f32 %v3418_v14, %v6057_v21  ;;  %v3419_v53 = vadd.f32 %v3417_v41, %v3370_v51  ;;  %v3412_v54 = vpop.f32.mrb[110].mxu1  ;;  %v5628_v18 = vpop.f32.mrb[111].mxu0 }
0x1820   : > { %v3434_v55 = vadd.f32 %v3432_v50, %v6059_v22  ;;  %v3433_v56 = vadd.f32 %v3431_v13, %v3412_v54  ;;  %v5648_v57 = vpop.f32.mrb[111].mxu1 }
0x1821   : > { %vm3422_vm14 = vcmp.ge.f32.partialorder %v8160_v52, 1.0  ;;  %v3421_v59 = vadd.f32 %v6053_v19, %v3419_v53 }
0x1822   : > { %vm3436_vm15 = vcmp.ge.f32.partialorder %v3434_v55, 1.0  ;;  %v8166_v60 = vadd.f32 %v6055_v20, %v3433_v56  ;;  %v3987_v9 = vsel %vm3422_vm14, 1.0, %v5885_v11 }
0x1823   : > { %vm3423_vm0 = vcmp.ge.f32.partialorder %v3421_v59, 1.0  ;;  %v8170_v10 = vadd.f32 %v3987_v9, %v8102_v45  ;;  %v3528_v27 = vsub.f32 %v8160_v52, %v3987_v9  ;;  %v3989_v24 = vsel %vm3436_vm15, 1.0, %v5885_v11 }
0x1824   : > { %vm3991_vm2 = vmpackc.low %vm3423_vm0, %vm3422_vm14  ;;  %vm3437_vm3 = vcmp.ge.f32.partialorder %v8166_v60, 1.0  ;;  %v8176_v2 = vadd.f32 %v3989_v24, %v8108_v48  ;;  %v3542_v29 = vsub.f32 %v3434_v55, %v3989_v24  ;;  %v3988_v3 = vsel %vm3423_vm0, 1.0, %v5885_v11 }
0x1825   : > { %vm3993_vm4 = vmpackc.low %vm3437_vm3, %vm3436_vm15  ;;  %5666 = vmatmul.mubr.msk.bf16.vlgmr.msra.gmra.mrb[112].mxu0 %vm3991_vm2, %v5887_v23  ;;  %v8181_v5 = vadd.f32 %v3988_v3, %v8114_v8  ;;  %v3529_v6 = vsub.f32 %v3421_v59, %v3988_v3  ;;  %v3990_v25 = vsel %vm3437_vm3, 1.0, %v5885_v11 }
0x1826   : > { %5686 = vmatmul.mubr.msk.bf16.vlgmr.msra.gmra.mrb[112].mxu1 %vm3993_vm4, %v5887_v23  ;;  %5690 = vmatpush3.bf16.msra.mxu0 %v7860_v58  ;;  %v8187_v30 = vadd.f32 %v3990_v25, %v8121_v44  ;;  %v3543_v26 = vsub.f32 %v8166_v60, %v3990_v25 }
0x1827   : > { %5710 = vmatpush3.bf16.msra.mxu1 %v7860_v58  ;;  %5691 = vmatprep.subr.bf16.mxu0 %v5885_v11 }
0x1828   : > { %5711 = vmatprep.subr.bf16.mxu1 %v5885_v11  ;;  %5705 = vmatprep.mubr.msk.bf16.mxu0 %vm5886_vm1, %v5885_v11 }
0x1829   : > { %5725 = vmatprep.mubr.msk.bf16.mxu1 %vm5886_vm1, %v5885_v11 }
0x182a   : > { %5692 = vmatpush3.bf16.msra.mxu0 %v7877_v61 }
0x182b   : > { %5712 = vmatpush3.bf16.msra.mxu1 %v7877_v61  ;;  %5693 = vmatprep.subr.bf16.mxu0 %v5885_v11 }
0x182c   : > { %5713 = vmatprep.subr.bf16.mxu1 %v5885_v11 }
0x182e   : > { %5694 = vmatpush3.bf16.msra.mxu0 %v7886_v62 }
0x182f   : > { %5714 = vmatpush3.bf16.msra.mxu1 %v7886_v62  ;;  %5695 = vmatprep.subr.bf16.mxu0 %v5885_v11 }
0x1830   : > { %5715 = vmatprep.subr.bf16.mxu1 %v5885_v11 }
0x1832   : > { %5696 = vmatpush3.bf16.msra.mxu0 %v7895_v63 }
0x1833   : > { %5716 = vmatpush3.bf16.msra.mxu1 %v7895_v63  ;;  %5697 = vmatprep.subr.bf16.mxu0 %v5885_v11 }
0x1834   : > { %5717 = vmatprep.subr.bf16.mxu1 %v5885_v11 }
0x1836   : > { %5698 = vmatpush3.bf16.msra.mxu0 %v7904_v0 }
0x1837   : > { %5718 = vmatpush3.bf16.msra.mxu1 %v7904_v0  ;;  %5699 = vmatprep.subr.bf16.mxu0 %v5885_v11 }
0x1838   : > { %5719 = vmatprep.subr.bf16.mxu1 %v5885_v11 }
0x183a   : > { %5700 = vmatpush3.bf16.msra.mxu0 %v7913_v1 }
0x183b   : > { %5720 = vmatpush3.bf16.msra.mxu1 %v7913_v1  ;;  %5701 = vmatprep.subr.bf16.mxu0 %v5885_v11 }
0x183c   : > { %5721 = vmatprep.subr.bf16.mxu1 %v5885_v11 }
0x183e   : > { %5702 = vmatpush3.bf16.msra.mxu0 %v7922_v4 }
0x183f   : > { %5722 = vmatpush3.bf16.msra.mxu1 %v7922_v4  ;;  %5703 = vmatprep.subr.bf16.mxu0 %v5885_v11 }
0x1840   : > { %5723 = vmatprep.subr.bf16.mxu1 %v5885_v11 }
0x1842   : > { %5704 = vmatpush3.bf16.msra.mxu0 %v7931_v7 }
0x1843   : > { %5724 = vmatpush3.bf16.msra.mxu1 %v7931_v7 }
0x18f8   : > { %v3479_v58 = vpop.f32.mrb[112].mxu0 }
0x18f9   : > { %v3530_v61 = vadd.f32 %v3528_v27, %v3479_v58  ;;  %v3521_v62 = vpop.f32.mrb[112].mxu1  ;;  %v5667_v63 = vpop.f32.mrb[113].mxu0 }
0x18fa   : > { %v3544_v0 = vadd.f32 %v3542_v29, %v3521_v62  ;;  %v5687_v1 = vpop.f32.mrb[113].mxu1  ;;  %v3482_v31 = vpop.f32.mrb[114].mxu0 }
0x18fb   : > { %v3532_v28 = vadd.f32 %v3530_v61, %v6057_v21  ;;  %v3531_v32 = vadd.f32 %v3529_v6, %v3482_v31  ;;  %v3524_v33 = vpop.f32.mrb[114].mxu1  ;;  %v5668_v4 = vpop.f32.mrb[115].mxu0 }
0x18fc   : > { %v3546_v34 = vadd.f32 %v3544_v0, %v6059_v22  ;;  %v3545_v35 = vadd.f32 %v3543_v26, %v3524_v33  ;;  %v5688_v36 = vpop.f32.mrb[115].mxu1 }
0x18fd   : > { %vm3534_vm1 = vcmp.ge.f32.partialorder %v3532_v28, 1.0  ;;  %v3533_v37 = vadd.f32 %v6053_v19, %v3531_v32 }
0x18fe   : > { %vm3548_vm5 = vcmp.ge.f32.partialorder %v3546_v34, 1.0  ;;  %v3547_v7 = vadd.f32 %v6055_v20, %v3545_v35  ;;  %v3995_v38 = vsel %vm3534_vm1, 1.0, %v5885_v11 }
0x18ff   : > { %vm3535_vm6 = vcmp.ge.f32.partialorder %v3533_v37, 1.0  ;;  %v3540_v39 = vadd.f32 %v3995_v38, %v8170_v10  ;;  %v3640_v42 = vsub.f32 %v3532_v28, %v3995_v38  ;;  %v3997_v45 = vsel %vm3548_vm5, 1.0, %v5885_v11 }
0x1900   : > { %vm3999_vm7 = vmpackc.low %vm3535_vm6, %vm3534_vm1  ;;  %vm3549_vm8 = vcmp.ge.f32.partialorder %v3547_v7, 1.0  ;;  %v3554_v46 = vadd.f32 %v3997_v45, %v8176_v2  ;;  %v3654_v47 = vsub.f32 %v3546_v34, %v3997_v45  ;;  %v3996_v48 = vsel %vm3535_vm6, 1.0, %v5885_v11 }
0x1901   : > { %vm4001_vm9 = vmpackc.low %vm3549_vm8, %vm3548_vm5  ;;  %5706 = vmatmul.mubr.msk.bf16.vlgmr.msra.gmra.mrb[116].mxu0 %vm3999_vm7, %v5887_v23  ;;  %v3541_v49 = vadd.f32 %v3996_v48, %v8181_v5  ;;  %v3641_v40 = vsub.f32 %v3533_v37, %v3996_v48  ;;  %v3998_v8 = vsel %vm3549_vm8, 1.0, %v5885_v11 }
0x1902   : > { %5726 = vmatmul.mubr.msk.bf16.vlgmr.msra.gmra.mrb[116].mxu1 %vm4001_vm9, %v5887_v23  ;;  %v3555_v41 = vadd.f32 %v3998_v8, %v8187_v30  ;;  %v3655_v43 = vsub.f32 %v3547_v7, %v3998_v8 }
0x19d4   : > { %v3591_v44 = vpop.f32.mrb[116].mxu0 }
0x19d5   : > { %v3642_v13 = vadd.f32 %v3640_v42, %v3591_v44  ;;  %v3633_v12 = vpop.f32.mrb[116].mxu1  ;;  %v5707_v14 = vpop.f32.mrb[117].mxu0 }
0x19d6   : > { %v3656_v15 = vadd.f32 %v3654_v47, %v3633_v12  ;;  %v5727_v16 = vpop.f32.mrb[117].mxu1  ;;  %v3594_v50 = vpop.f32.mrb[118].mxu0 }
0x19d7   : > { %v3644_v17 = vadd.f32 %v3642_v13, %v6057_v21  ;;  %v3643_v51 = vadd.f32 %v3641_v40, %v3594_v50  ;;  %v3636_v52 = vpop.f32.mrb[118].mxu1  ;;  %v5708_v53 = vpop.f32.mrb[119].mxu0 }
0x19d8   : > { %v3658_v23 = vadd.f32 %v3656_v15, %v6059_v22  ;;  %v3657_v54 = vadd.f32 %v3655_v43, %v3636_v52  ;;  %v5728_v18 = vpop.f32.mrb[119].mxu1 }
0x19d9   : > { %vm3646_vm10 = vcmp.ge.f32.partialorder %v3644_v17, 1.0  ;;  %v3645_v55 = vadd.f32 %v6053_v19, %v3643_v51 }
0x19da   : > { %v4003_v56 = vsel %vm3646_vm10, 1.0, %v5885_v11  ;;  %vm3660_vm11 = vcmp.ge.f32.partialorder %v3658_v23, 1.0  ;;  %v3659_v57 = vadd.f32 %v6055_v20, %v3657_v54 }
0x19db   : > { %v3652_v59 = vadd.f32 %v4003_v56, %v3540_v39  ;;  %v4005_v60 = vsel %vm3660_vm11, 1.0, %v5885_v11  ;;  %vm3647_vm12 = vcmp.ge.f32.partialorder %v3645_v55, 1.0 }
0x19dc   : > { %v3666_v21 = vadd.f32 %v4005_v60, %v3554_v46  ;;  %v4004_v9 = vsel %vm3647_vm12, 1.0, %v5885_v11  ;;  %vm3661_vm13 = vcmp.ge.f32.partialorder %v3659_v57, 1.0 }
0x19dd   : > { %v3668_v22 = vmul.f32 0.033333335, %v3652_v59  ;;  %v3653_v19 = vadd.f32 %v4004_v9, %v3541_v49  ;;  %v4006_v10 = vsel %vm3661_vm13, 1.0, %v5885_v11 }
0x19de   : > { %v3672_v27 = vmul.f32 0.033333335, %v3666_v21  ;;  %v3667_v24 = vadd.f32 %v4006_v10, %v3555_v41 }
0x19df   : > { %3670 = vst [vmem:[%s164_s5] sm:$0xff] %v3668_v22  ;;  %v3669_v20 = vmul.f32 0.033333335, %v3653_v19 }
0x19e0   : > { %3674 = vst [vmem:[%s164_s5 + $0x10] sm:$0xff] %v3672_v27  ;;  %v3673_v2 = vmul.f32 0.033333335, %v3667_v24 }
0x19e1   : > { %3671 = vst [vmem:[%s164_s5 + $0x8] sm:$0xff] %v3669_v20 }
0x19e2   : > { %3675 = vst [vmem:[%s164_s5 + $0x18] sm:$0xff] %v3673_v2 }
0x19e3   : > { %5834 = shalt.err (!%p5831_p3)
}
0x19e4   : > { %s5835_s20 = scalar_lea.hbm %s8252_s9, 512  ;;  %s5839_s26 = scalar_lea.hbm %s8302_s3, 1024 }
0x19e5   : > { %p5836_p4 = scmp.ne.s32.totalorder %s8252_s9, %s5835_s20  ;;  %p5840_p9 = scmp.lt.u32.totalorder %s8252_s9, %s8302_s3 }
0x19e6   : > { %p5841_p10 = scmp.lt.u32.totalorder %s5839_s26, %s5835_s20  ;;  %p5843_p12 = scmp.lt.u32.totalorder %s5835_s20, %s8252_s9 }
0x19e7   : > { %p5837_p7 = pnand %p5836_p4, %p5949_p5 }
0x19e8   : > { %p5842_p11 = por %p5841_p10, %p5840_p9 }
0x19e9   : > { %p5838_p8 = pneg %p5837_p7 }
0x19ea   : > { %p5844_p13 = por %p5843_p12, %p5842_p11 }
0x19ec   : > { %p5845_p0 = pnand %p5844_p13, %p5838_p8 }
0x19ee   : > { %5848 = shalt.err (!%p5845_p0)
}
0x19ef   : > { %s5889_s29 = smov 128   ;;  %s5890_s30 = smov 8  }
0x19f0   : > { %5745 = dma.vmem_to_hbm [thread:$0]  (%p5949_p5), %s8254_s6, 512, %s8252_s9, %s8258_s16, %s5889_s29, %s5889_s29, %s5890_s30  }
0x19f1 PF: > { %p5751_p1 = scmp.ge.s32.totalorder %s5883_s15, 2  ;;  %s3705_s4 = sand.u32 1, %s5871_s12  }
0x19f2   : > { %s3706_s5 = scalar_lea.sflag [#allocation3], %s3705_s4 }
0x19f3   : > { %p5748_p2 = pnand %p5751_p1, %p5953_p6 }
0x19f5   : > { %5866 = dma.done.wait (!%p5748_p2), %s3706_s5, 512  }
0x19f6   : > { %5868 = vsyncadd (!%p5748_p2), %s3706_s5, 4294966784  ;;  %p13_p3 = scmp.ge.s32.totalorder %s5936_s18, 4   ;;  %s8305_s12 = smov %s5875_s13 }
0x19f7   : > { %s8306_s13 = smov %s5879_s14  ;;  %s8307_s14 = smov %s5947_s21 }
0x19f8   : > { %s8308_s15 = smov %s5936_s18  ;;  %15 = sbr.rel (!%p13_p3) target bundleno = 3 (0x3), region = 67 }
0x19ff   :  { %3711 = vsyncpa [#allocation3], 1 }
0x1a00   :  { %3713 = vsyncpa [#allocation3 + $0x1], 1 }

</bundles_post_ra>
